<compile_context>
chip_gen: v5e
topology: v5e:2x2
jax: 0.10.0
libtpu: 0.0.40
codegen_flags: <defaults>
</compile_context>

<pallas_src>
import jax
import jax.numpy as jnp
from jax import lax
from jax.experimental import pallas as pl
from jax.experimental.pallas import tpu as pltpu

EPS = 1e-5
K = 15  # kernel_size of every conv / deconv in the module

ENC_SPECS = [(1, 16), (16, 32), (32, 64)]   # Conv1d(Cin, Cout, k=15, s=2, p=7)
DEC_SPECS = [(64, 32), (32, 16), (16, 1)]   # ConvTranspose1d(..., s=2, p=7, output_padding=1)


# ---------------------------------------------------------------------------
# In-kernel helpers (pure value math; everything lives in vregs / VMEM)
# ---------------------------------------------------------------------------

def _affine_time_select(h, a, b, m):
    """g[n, q, :] = h[n, a*q + b, :]   (zero where a*q + b is out of range).

    Implemented as a per-batch 0/1 selection matmul built from 2-D iotas, so zero
    padding and stride-2 deinterleaving never touch HBM and need no strided loads.
    """
    n_batch, t_len, _ = h.shape
    q = lax.broadcasted_iota(jnp.int32, (m, t_len), 0)
    t = lax.broadcasted_iota(jnp.int32, (m, t_len), 1)
    sel = (t == a * q + b).astype(h.dtype)                       # (m, t_len)
    return jnp.stack(
        [jnp.dot(sel, h[n], preferred_element_type=jnp.float32)
         for n in range(n_batch)])                               # (N, m, C)


def _interleave_time(ye, yo):
    """out[n, 2u, :] = ye[n, u, :],  out[n, 2u+1, :] = yo[n, u, :]."""
    n_batch, u_len, _ = ye.shape
    p = lax.broadcasted_iota(jnp.int32, (2 * u_len, u_len), 0)
    u = lax.broadcasted_iota(jnp.int32, (2 * u_len, u_len), 1)
    pe = (p == 2 * u).astype(ye.dtype)
    po = (p == 2 * u + 1).astype(ye.dtype)
    return jnp.stack(
        [jnp.dot(pe, ye[n], preferred_element_type=jnp.float32)
         + jnp.dot(po, yo[n], preferred_element_type=jnp.float32)
         for n in range(n_batch)])                               # (N, 2u, C)


def _bn_scale_shift(rows, gamma, beta):
    """nn.BatchNorm1d training-mode stats over all (N*L) rows -> per-channel FMA."""
    mean = jnp.mean(rows, axis=0, keepdims=True)
    var = jnp.mean((rows - mean) ** 2, axis=0, keepdims=True)    # biased, like torch
    scale = gamma * lax.rsqrt(var + EPS)
    shift = beta - mean * scale
    return scale, shift


def _encoder_layer(h, w_flat, b, gamma, beta):
    """Conv1d(k=15, s=2, p=7) + BN(train stats) + ReLU.  h: (N, L_in, Cin)."""
    n_batch, l_in, c_in = h.shape
    c_out = w_flat.shape[1]
    l_out = l_in // 2
    m = l_out + (K - 1) // 2                       # = l_out + 7
    # even / odd phases of the (virtually zero-padded) input: x[2q-7], x[2q-6]
    he = _affine_time_select(h, 2, -7, m)
    ho = _affine_time_select(h, 2, -6, m)
    # im2col with K folded into the contraction (k-major, ci-minor column order)
    cols = []
    for k in range(K):
        src = he if k % 2 == 0 else ho
        a = k // 2
        cols.append(src[:, a:a + l_out, :])
    x_cols = jnp.concatenate(cols, axis=-1)        # (N, l_out, K*Cin)
    rows = x_cols.reshape(n_batch * l_out, K * c_in)
    y = jnp.dot(rows, w_flat, preferred_element_type=jnp.float32) + b
    scale, shift = _bn_scale_shift(y, gamma, beta)
    y = jnp.maximum(y * scale + shift, 0.0)
    return y.reshape(n_batch, l_out, c_out)


def _decoder_layer(h, w_e, w_o, b, gamma, beta):
    """Polyphase ConvTranspose1d(k=15, s=2, p=7, output_padding=1) + BN + ReLU."""
    n_batch, l_in, c_in = h.shape
    c_out = w_e.shape[1]
    # hp[q] = h[q - 3] with zero padding (3 front / 4 back), via one selection matmul
    hp = _affine_time_select(h, 1, -3, l_in + 7)
    cols_e = jnp.concatenate([hp[:, j:j + l_in, :] for j in range(7)], axis=-1)
    cols_o = jnp.concatenate([hp[:, j:j + l_in, :] for j in range(8)], axis=-1)
    rows_e = cols_e.reshape(n_batch * l_in, 7 * c_in)
    rows_o = cols_o.reshape(n_batch * l_in, 8 * c_in)
    ye = jnp.dot(rows_e, w_e, preferred_element_type=jnp.float32) + b
    yo = jnp.dot(rows_o, w_o, preferred_element_type=jnp.float32) + b
    # BN statistics are over the FULL output (both phases together)
    scale, shift = _bn_scale_shift(jnp.concatenate([ye, yo], axis=0), gamma, beta)
    ye = jnp.maximum(ye * scale + shift, 0.0).reshape(n_batch, l_in, c_out)
    yo = jnp.maximum(yo * scale + shift, 0.0).reshape(n_batch, l_in, c_out)
    return _interleave_time(ye, yo)                # (N, 2*l_in, Cout)


def _decoder_last(h, w_e_row, w_o_row, b):
    """Final ConvTranspose1d (Cout=1) + Tanh via VPU multiply + lane reduce."""
    n_batch, l_in, c_in = h.shape
    hp = _affine_time_select(h, 1, -3, l_in + 7)
    cols_e = jnp.concatenate([hp[:, j:j + l_in, :] for j in range(7)], axis=-1)
    cols_o = jnp.concatenate([hp[:, j:j + l_in, :] for j in range(8)], axis=-1)
    ye = jnp.tanh(jnp.sum(cols_e * w_e_row, axis=-1) + b)        # (N, l_in)
    yo = jnp.tanh(jnp.sum(cols_o * w_o_row, axis=-1) + b)        # (N, l_in)
    # interleave the two phases along lanes: out[n, 2u] = ye[n, u]; out[n, 2u+1] = yo[n, u]
    u = lax.broadcasted_iota(jnp.int32, (l_in, 2 * l_in), 0)
    p = lax.broadcasted_iota(jnp.int32, (l_in, 2 * l_in), 1)
    ae = (p == 2 * u).astype(ye.dtype)
    ao = (p == 2 * u + 1).astype(ye.dtype)
    return (jnp.dot(ye, ae, preferred_element_type=jnp.float32)
            + jnp.dot(yo, ao, preferred_element_type=jnp.float32))   # (N, 2*l_in)


def _ppg_kernel(*refs):
    x_ref = refs[0]
    enc_refs = refs[1:13]        # 3 layers x (w_flat, b, gamma, beta)
    dec_refs = refs[13:23]       # 2 layers x (w_e, w_o, b, gamma, beta)
    last_refs = refs[23:26]      # (w_e_row, w_o_row, b)
    out_ref = refs[26]

    h = x_ref[...]                                   # (N, L, 1)
    for l in range(3):
        w, b, g, be = enc_refs[4 * l:4 * l + 4]
        h = _encoder_layer(h, w[...], b[...], g[...], be[...])
    for l in range(2):
        we, wo, b, g, be = dec_refs[5 * l:5 * l + 5]
        h = _decoder_layer(h, we[...], wo[...], b[...], g[...], be[...])
    we, wo, b = last_refs
    out_ref[...] = _decoder_last(h, we[...], wo[...], b[...])


# ---------------------------------------------------------------------------
# Host-side wrapper + one-time parameter preparation
# ---------------------------------------------------------------------------

def prepare_params(params):
    """One-time weight repack (hoisted out of the forward pass):
       * encoder: (Cout,Cin,K) -> (K*Cin, Cout) with k-major/ci-minor rows,
       * decoder: polyphase even/odd sub-kernels with taps pre-flipped,
       * last layer: row-vector weights for the VPU (Cout == 1) path."""
    prep = []
    for w, b, g, be in params["encoder"]:
        c_out, c_in, _ = w.shape
        w_flat = jnp.transpose(w, (2, 1, 0)).reshape(K * c_in, c_out)
        prep += [w_flat, b.reshape(1, c_out), g.reshape(1, c_out), be.reshape(1, c_out)]
    n_dec = len(params["decoder"])
    for idx, (w, b, g, be) in enumerate(params["decoder"]):
        c_in, c_out, _ = w.shape
        # even outputs use taps 13,11,...,1 ; odd outputs use taps 14,12,...,0
        w_e = jnp.transpose(w[:, :, 13:0:-2], (2, 0, 1)).reshape(7 * c_in, c_out)
        w_o = jnp.transpose(w[:, :, 14::-2], (2, 0, 1)).reshape(8 * c_in, c_out)
        if idx < n_dec - 1:
            prep += [w_e, w_o, b.reshape(1, c_out),
                     g.reshape(1, c_out), be.reshape(1, c_out)]
        else:
            prep += [w_e.reshape(1, 7 * c_in), w_o.reshape(1, 8 * c_in),
                     b.reshape(1, 1)]
    return tuple(prep)


@jax.jit
def ppg_generator_forward(x_ncl, prepared):
    """Forward pass of PPGGenerator.  Input/output: (N, 1, L) like PyTorch."""
    n, _, l = x_ncl.shape
    x3d = jnp.transpose(x_ncl, (0, 2, 1)).astype(jnp.float32)    # (N, L, 1) channels-last
    inputs = (x3d,) + tuple(prepared)
    vmem = pl.BlockSpec(memory_space=pltpu.MemorySpace.VMEM)
    out2d = pl.pallas_call(
        _ppg_kernel,
        out_shape=jax.ShapeDtypeStruct((n, l), jnp.float32),
        in_specs=[vmem] * len(inputs),
        out_specs=vmem,
    )(*inputs)
    return out2d[:, None, :]                                     # back to (N, 1, L)


# ---------------------------------------------------------------------------
# Synthetic params, pure-JAX reference, and the runnable check
# ---------------------------------------------------------------------------

def init_params(key):
    """Deterministic synthetic init (uniform +/- 1/sqrt(fan_in), BN gamma=1/beta=0)."""
    params = {"encoder": [], "decoder": []}
    for cin, cout in ENC_SPECS:
        key, kw, kb = jax.random.split(key, 3)
        bound = 1.0 / (cin * K) ** 0.5
        w = jax.random.uniform(kw, (cout, cin, K), jnp.float32, -bound, bound)
        b = jax.random.uniform(kb, (cout,), jnp.float32, -bound, bound)
        params["encoder"].append(
            (w, b, jnp.ones((cout,), jnp.float32), jnp.zeros((cout,), jnp.float32)))
    for cin, cout in DEC_SPECS:
        key, kw, kb = jax.random.split(key, 3)
        bound = 1.0 / (cin * K) ** 0.5
        w = jax.random.uniform(kw, (cin, cout, K), jnp.float32, -bound, bound)
        b = jax.random.uniform(kb, (cout,), jnp.float32, -bound, bound)
        params["decoder"].append(
            (w, b, jnp.ones((cout,), jnp.float32), jnp.zeros((cout,), jnp.float32)))
    return params


def ref_forward(x, params):
    """Pure-JAX reference mirroring PyTorch semantics (for correctness check)."""
    def bn(h, g, be):
        mean = h.mean(axis=(0, 2), keepdims=True)
        var = ((h - mean) ** 2).mean(axis=(0, 2), keepdims=True)
        return (h - mean) / jnp.sqrt(var + EPS) * g[None, :, None] + be[None, :, None]

    h = x.astype(jnp.float32)
    for w, b, g, be in params["encoder"]:
        h = jax.lax.conv_general_dilated(
            h, w, (2,), [(7, 7)], dimension_numbers=("NCH", "OIH", "NCH"),
            precision=jax.lax.Precision.HIGHEST) + b[None, :, None]
        h = jnp.maximum(bn(h, g, be), 0.0)
    n_dec = len(params["decoder"])
    for idx, (w, b, g, be) in enumerate(params["decoder"]):
        w_conv = jnp.flip(jnp.transpose(w, (1, 0, 2)), axis=2)   # (Cout,Cin,K) flipped
        h = jax.lax.conv_general_dilated(
            h, w_conv, (1,), [(7, 8)], lhs_dilation=(2,),
            dimension_numbers=("NCH", "OIH", "NCH"),
            precision=jax.lax.Precision.HIGHEST) + b[None, :, None]
        if idx < n_dec - 1:
            h = jnp.maximum(bn(h, g, be), 0.0)
        else:
            h = jnp.tanh(h)
    return h


if __name__ == "__main__":
    key = jax.random.PRNGKey(0)
    pkey, xkey = jax.random.split(key)
    params = init_params(pkey)
    prepared = prepare_params(params)        # one-time weight repack (not per forward)

    # Small shape consistent with the module: batch=2, 1 channel, length 64
    x = jax.random.normal(xkey, (2, 1, 64), jnp.float32)

    out = jax.block_until_ready(ppg_generator_forward(x, prepared))
    ref = jax.block_until_ready(ref_forward(x, params))

    assert out.shape == (2, 1, 64), out.shape
    err = float(jnp.max(jnp.abs(out - ref)))
    # Tolerance leaves headroom for default-precision (possibly bf16-rounded) MXU
    # operands inside the kernel vs. the HIGHEST-precision f32 reference; structural
    # / indexing bugs produce O(0.1-1) errors and are still caught.
    assert err < 2e-2, f"max abs err {err}"
    print("KERNEL_OK")
</pallas_src>

<mosaic_0001>
module attributes {stable_mosaic.version = 11 : i64} {
  func.func @_ppg_kernel(%arg0: memref<2x64x1xf32, #tpu.memory_space<vmem>>, %arg1: memref<15x16xf32, #tpu.memory_space<vmem>>, %arg2: memref<1x16xf32, #tpu.memory_space<vmem>>, %arg3: memref<1x16xf32, #tpu.memory_space<vmem>>, %arg4: memref<1x16xf32, #tpu.memory_space<vmem>>, %arg5: memref<240x32xf32, #tpu.memory_space<vmem>>, %arg6: memref<1x32xf32, #tpu.memory_space<vmem>>, %arg7: memref<1x32xf32, #tpu.memory_space<vmem>>, %arg8: memref<1x32xf32, #tpu.memory_space<vmem>>, %arg9: memref<480x64xf32, #tpu.memory_space<vmem>>, %arg10: memref<1x64xf32, #tpu.memory_space<vmem>>, %arg11: memref<1x64xf32, #tpu.memory_space<vmem>>, %arg12: memref<1x64xf32, #tpu.memory_space<vmem>>, %arg13: memref<448x32xf32, #tpu.memory_space<vmem>>, %arg14: memref<512x32xf32, #tpu.memory_space<vmem>>, %arg15: memref<1x32xf32, #tpu.memory_space<vmem>>, %arg16: memref<1x32xf32, #tpu.memory_space<vmem>>, %arg17: memref<1x32xf32, #tpu.memory_space<vmem>>, %arg18: memref<224x16xf32, #tpu.memory_space<vmem>>, %arg19: memref<256x16xf32, #tpu.memory_space<vmem>>, %arg20: memref<1x16xf32, #tpu.memory_space<vmem>>, %arg21: memref<1x16xf32, #tpu.memory_space<vmem>>, %arg22: memref<1x16xf32, #tpu.memory_space<vmem>>, %arg23: memref<1x112xf32, #tpu.memory_space<vmem>>, %arg24: memref<1x128xf32, #tpu.memory_space<vmem>>, %arg25: memref<1x1xf32, #tpu.memory_space<vmem>>, %arg26: memref<2x64xf32, #tpu.memory_space<vmem>>) attributes {dimension_semantics = [], scalar_prefetch = 0 : i64, scratch_operands = 0 : i64, tpu.core_type = #tpu.core_type<tc>} {
    %c0 = arith.constant 0 : index
    %c0_0 = arith.constant 0 : index
    %c0_1 = arith.constant 0 : index
    %0 = vector.load %arg0[%c0, %c0_0, %c0_1] : memref<2x64x1xf32, #tpu.memory_space<vmem>>, vector<2x64x1xf32>
    %c0_2 = arith.constant 0 : index
    %c0_3 = arith.constant 0 : index
    %1 = vector.load %arg1[%c0_2, %c0_3] : memref<15x16xf32, #tpu.memory_space<vmem>>, vector<15x16xf32>
    %c0_4 = arith.constant 0 : index
    %c0_5 = arith.constant 0 : index
    %2 = vector.load %arg2[%c0_4, %c0_5] : memref<1x16xf32, #tpu.memory_space<vmem>>, vector<1x16xf32>
    %c0_6 = arith.constant 0 : index
    %c0_7 = arith.constant 0 : index
    %3 = vector.load %arg3[%c0_6, %c0_7] : memref<1x16xf32, #tpu.memory_space<vmem>>, vector<1x16xf32>
    %c0_8 = arith.constant 0 : index
    %c0_9 = arith.constant 0 : index
    %4 = vector.load %arg4[%c0_8, %c0_9] : memref<1x16xf32, #tpu.memory_space<vmem>>, vector<1x16xf32>
    %5 = tpu.iota {dimensions = array<i32: 0>} : vector<39x64xi32>
    %6 = tpu.iota {dimensions = array<i32: 1>} : vector<39x64xi32>
    %c2_i32 = arith.constant 2 : i32
    %7 = vector.broadcast %c2_i32 : i32 to vector<39x64xi32>
    %8 = arith.muli %7, %5 : vector<39x64xi32>
    %c-7_i32 = arith.constant -7 : i32
    %9 = vector.broadcast %c-7_i32 : i32 to vector<39x64xi32>
    %10 = arith.addi %8, %9 : vector<39x64xi32>
    %11 = arith.cmpi eq, %6, %10 : vector<39x64xi32>
    %12 = arith.extui %11 : vector<39x64xi1> to vector<39x64xi32>
    %13 = arith.sitofp %12 : vector<39x64xi32> to vector<39x64xf32>
    %14 = vector.extract_strided_slice %0 {offsets = [0, 0, 0], sizes = [1, 64, 1], strides = [1, 1, 1]} : vector<2x64x1xf32> to vector<1x64x1xf32>
    %15 = vector.shape_cast %14 : vector<1x64x1xf32> to vector<64x1xf32>
    %cst = arith.constant dense<0.000000e+00> : vector<39x1xf32>
    %16 = tpu.matmul %13, %15, %cst {dimension_numbers = #tpu.dot_dimension_numbers<[1], [0], [0], [1], [0, 0, 1, 1], [], []>} : vector<39x64xf32>, vector<64x1xf32>, vector<39x1xf32> -> vector<39x1xf32>
    %17 = vector.extract_strided_slice %0 {offsets = [1, 0, 0], sizes = [1, 64, 1], strides = [1, 1, 1]} : vector<2x64x1xf32> to vector<1x64x1xf32>
    %18 = vector.shape_cast %17 : vector<1x64x1xf32> to vector<64x1xf32>
    %cst_10 = arith.constant dense<0.000000e+00> : vector<39x1xf32>
    %19 = tpu.matmul %13, %18, %cst_10 {dimension_numbers = #tpu.dot_dimension_numbers<[1], [0], [0], [1], [0, 0, 1, 1], [], []>} : vector<39x64xf32>, vector<64x1xf32>, vector<39x1xf32> -> vector<39x1xf32>
    %20 = vector.shape_cast %16 : vector<39x1xf32> to vector<1x39x1xf32>
    %21 = vector.shape_cast %19 : vector<39x1xf32> to vector<1x39x1xf32>
    %22 = tpu.concatenate %20, %21 in 0 : vector<1x39x1xf32>, vector<1x39x1xf32> -> vector<2x39x1xf32>
    %23 = tpu.iota {dimensions = array<i32: 0>} : vector<39x64xi32>
    %24 = tpu.iota {dimensions = array<i32: 1>} : vector<39x64xi32>
    %c2_i32_11 = arith.constant 2 : i32
    %25 = vector.broadcast %c2_i32_11 : i32 to vector<39x64xi32>
    %26 = arith.muli %25, %23 : vector<39x64xi32>
    %c-6_i32 = arith.constant -6 : i32
    %27 = vector.broadcast %c-6_i32 : i32 to vector<39x64xi32>
    %28 = arith.addi %26, %27 : vector<39x64xi32>
    %29 = arith.cmpi eq, %24, %28 : vector<39x64xi32>
    %30 = arith.extui %29 : vector<39x64xi1> to vector<39x64xi32>
    %31 = arith.sitofp %30 : vector<39x64xi32> to vector<39x64xf32>
    %32 = vector.extract_strided_slice %0 {offsets = [0, 0, 0], sizes = [1, 64, 1], strides = [1, 1, 1]} : vector<2x64x1xf32> to vector<1x64x1xf32>
    %33 = vector.shape_cast %32 : vector<1x64x1xf32> to vector<64x1xf32>
    %cst_12 = arith.constant dense<0.000000e+00> : vector<39x1xf32>
    %34 = tpu.matmul %31, %33, %cst_12 {dimension_numbers = #tpu.dot_dimension_numbers<[1], [0], [0], [1], [0, 0, 1, 1], [], []>} : vector<39x64xf32>, vector<64x1xf32>, vector<39x1xf32> -> vector<39x1xf32>
    %35 = vector.extract_strided_slice %0 {offsets = [1, 0, 0], sizes = [1, 64, 1], strides = [1, 1, 1]} : vector<2x64x1xf32> to vector<1x64x1xf32>
    %36 = vector.shape_cast %35 : vector<1x64x1xf32> to vector<64x1xf32>
    %cst_13 = arith.constant dense<0.000000e+00> : vector<39x1xf32>
    %37 = tpu.matmul %31, %36, %cst_13 {dimension_numbers = #tpu.dot_dimension_numbers<[1], [0], [0], [1], [0, 0, 1, 1], [], []>} : vector<39x64xf32>, vector<64x1xf32>, vector<39x1xf32> -> vector<39x1xf32>
    %38 = vector.shape_cast %34 : vector<39x1xf32> to vector<1x39x1xf32>
    %39 = vector.shape_cast %37 : vector<39x1xf32> to vector<1x39x1xf32>
    %40 = tpu.concatenate %38, %39 in 0 : vector<1x39x1xf32>, vector<1x39x1xf32> -> vector<2x39x1xf32>
    %41 = vector.extract_strided_slice %22 {offsets = [0, 0, 0], sizes = [2, 32, 1], strides = [1, 1, 1]} : vector<2x39x1xf32> to vector<2x32x1xf32>
    %42 = vector.extract_strided_slice %40 {offsets = [0, 0, 0], sizes = [2, 32, 1], strides = [1, 1, 1]} : vector<2x39x1xf32> to vector<2x32x1xf32>
    %43 = vector.extract_strided_slice %22 {offsets = [0, 1, 0], sizes = [2, 32, 1], strides = [1, 1, 1]} : vector<2x39x1xf32> to vector<2x32x1xf32>
    %44 = vector.extract_strided_slice %40 {offsets = [0, 1, 0], sizes = [2, 32, 1], strides = [1, 1, 1]} : vector<2x39x1xf32> to vector<2x32x1xf32>
    %45 = vector.extract_strided_slice %22 {offsets = [0, 2, 0], sizes = [2, 32, 1], strides = [1, 1, 1]} : vector<2x39x1xf32> to vector<2x32x1xf32>
    %46 = vector.extract_strided_slice %40 {offsets = [0, 2, 0], sizes = [2, 32, 1], strides = [1, 1, 1]} : vector<2x39x1xf32> to vector<2x32x1xf32>
    %47 = vector.extract_strided_slice %22 {offsets = [0, 3, 0], sizes = [2, 32, 1], strides = [1, 1, 1]} : vector<2x39x1xf32> to vector<2x32x1xf32>
    %48 = vector.extract_strided_slice %40 {offsets = [0, 3, 0], sizes = [2, 32, 1], strides = [1, 1, 1]} : vector<2x39x1xf32> to vector<2x32x1xf32>
    %49 = vector.extract_strided_slice %22 {offsets = [0, 4, 0], sizes = [2, 32, 1], strides = [1, 1, 1]} : vector<2x39x1xf32> to vector<2x32x1xf32>
    %50 = vector.extract_strided_slice %40 {offsets = [0, 4, 0], sizes = [2, 32, 1], strides = [1, 1, 1]} : vector<2x39x1xf32> to vector<2x32x1xf32>
    %51 = vector.extract_strided_slice %22 {offsets = [0, 5, 0], sizes = [2, 32, 1], strides = [1, 1, 1]} : vector<2x39x1xf32> to vector<2x32x1xf32>
    %52 = vector.extract_strided_slice %40 {offsets = [0, 5, 0], sizes = [2, 32, 1], strides = [1, 1, 1]} : vector<2x39x1xf32> to vector<2x32x1xf32>
    %53 = vector.extract_strided_slice %22 {offsets = [0, 6, 0], sizes = [2, 32, 1], strides = [1, 1, 1]} : vector<2x39x1xf32> to vector<2x32x1xf32>
    %54 = vector.extract_strided_slice %40 {offsets = [0, 6, 0], sizes = [2, 32, 1], strides = [1, 1, 1]} : vector<2x39x1xf32> to vector<2x32x1xf32>
    %55 = vector.extract_strided_slice %22 {offsets = [0, 7, 0], sizes = [2, 32, 1], strides = [1, 1, 1]} : vector<2x39x1xf32> to vector<2x32x1xf32>
    %56 = tpu.concatenate %41, %42, %43, %44, %45, %46, %47, %48, %49, %50, %51, %52, %53, %54, %55 in 2 : vector<2x32x1xf32>, vector<2x32x1xf32>, vector<2x32x1xf32>, vector<2x32x1xf32>, vector<2x32x1xf32>, vector<2x32x1xf32>, vector<2x32x1xf32>, vector<2x32x1xf32>, vector<2x32x1xf32>, vector<2x32x1xf32>, vector<2x32x1xf32>, vector<2x32x1xf32>, vector<2x32x1xf32>, vector<2x32x1xf32>, vector<2x32x1xf32> -> vector<2x32x15xf32>
    %57 = vector.shape_cast %56 : vector<2x32x15xf32> to vector<64x15xf32>
    %cst_14 = arith.constant dense<0.000000e+00> : vector<64x16xf32>
    %58 = tpu.matmul %57, %1, %cst_14 {dimension_numbers = #tpu.dot_dimension_numbers<[1], [0], [0], [1], [0, 0, 1, 1], [], []>} : vector<64x15xf32>, vector<15x16xf32>, vector<64x16xf32> -> vector<64x16xf32>
    %59 = vector.broadcast %2 : vector<1x16xf32> to vector<64x16xf32>
    %60 = arith.addf %58, %59 : vector<64x16xf32>
    %cst_15 = arith.constant dense<0.000000e+00> : vector<16xf32>
    %61 = vector.multi_reduction <add>, %60, %cst_15 [0] : vector<64x16xf32> to vector<16xf32>
    %62 = vector.shape_cast %61 : vector<16xf32> to vector<1x16xf32>
    %cst_16 = arith.constant 6.400000e+01 : f32
    %63 = vector.broadcast %cst_16 : f32 to vector<1x16xf32>
    %64 = arith.divf %62, %63 : vector<1x16xf32>
    %65 = vector.broadcast %64 : vector<1x16xf32> to vector<64x16xf32>
    %66 = arith.subf %60, %65 : vector<64x16xf32>
    %67 = arith.mulf %66, %66 : vector<64x16xf32>
    %cst_17 = arith.constant dense<0.000000e+00> : vector<16xf32>
    %68 = vector.multi_reduction <add>, %67, %cst_17 [0] : vector<64x16xf32> to vector<16xf32>
    %69 = vector.shape_cast %68 : vector<16xf32> to vector<1x16xf32>
    %cst_18 = arith.constant 6.400000e+01 : f32
    %70 = vector.broadcast %cst_18 : f32 to vector<1x16xf32>
    %71 = arith.divf %69, %70 : vector<1x16xf32>
    %cst_19 = arith.constant 9.99999974E-6 : f32
    %72 = vector.broadcast %cst_19 : f32 to vector<1x16xf32>
    %73 = arith.addf %71, %72 : vector<1x16xf32>
    %74 = math.rsqrt %73 : vector<1x16xf32>
    %75 = arith.mulf %3, %74 : vector<1x16xf32>
    %76 = arith.mulf %64, %75 : vector<1x16xf32>
    %77 = arith.subf %4, %76 : vector<1x16xf32>
    %78 = vector.broadcast %75 : vector<1x16xf32> to vector<64x16xf32>
    %79 = arith.mulf %60, %78 : vector<64x16xf32>
    %80 = vector.broadcast %77 : vector<1x16xf32> to vector<64x16xf32>
    %81 = arith.addf %79, %80 : vector<64x16xf32>
    %cst_20 = arith.constant 0.000000e+00 : f32
    %82 = vector.broadcast %cst_20 : f32 to vector<64x16xf32>
    %83 = arith.maximumf %81, %82 : vector<64x16xf32>
    %84 = vector.shape_cast %83 : vector<64x16xf32> to vector<2x32x16xf32>
    %c0_21 = arith.constant 0 : index
    %c0_22 = arith.constant 0 : index
    %85 = vector.load %arg5[%c0_21, %c0_22] : memref<240x32xf32, #tpu.memory_space<vmem>>, vector<240x32xf32>
    %c0_23 = arith.constant 0 : index
    %c0_24 = arith.constant 0 : index
    %86 = vector.load %arg6[%c0_23, %c0_24] : memref<1x32xf32, #tpu.memory_space<vmem>>, vector<1x32xf32>
    %c0_25 = arith.constant 0 : index
    %c0_26 = arith.constant 0 : index
    %87 = vector.load %arg7[%c0_25, %c0_26] : memref<1x32xf32, #tpu.memory_space<vmem>>, vector<1x32xf32>
    %c0_27 = arith.constant 0 : index
    %c0_28 = arith.constant 0 : index
    %88 = vector.load %arg8[%c0_27, %c0_28] : memref<1x32xf32, #tpu.memory_space<vmem>>, vector<1x32xf32>
    %89 = tpu.iota {dimensions = array<i32: 0>} : vector<23x32xi32>
    %90 = tpu.iota {dimensions = array<i32: 1>} : vector<23x32xi32>
    %c2_i32_29 = arith.constant 2 : i32
    %91 = vector.broadcast %c2_i32_29 : i32 to vector<23x32xi32>
    %92 = arith.muli %91, %89 : vector<23x32xi32>
    %c-7_i32_30 = arith.constant -7 : i32
    %93 = vector.broadcast %c-7_i32_30 : i32 to vector<23x32xi32>
    %94 = arith.addi %92, %93 : vector<23x32xi32>
    %95 = arith.cmpi eq, %90, %94 : vector<23x32xi32>
    %96 = arith.extui %95 : vector<23x32xi1> to vector<23x32xi32>
    %97 = arith.sitofp %96 : vector<23x32xi32> to vector<23x32xf32>
    %98 = vector.extract_strided_slice %84 {offsets = [0, 0, 0], sizes = [1, 32, 16], strides = [1, 1, 1]} : vector<2x32x16xf32> to vector<1x32x16xf32>
    %99 = vector.shape_cast %98 : vector<1x32x16xf32> to vector<32x16xf32>
    %cst_31 = arith.constant dense<0.000000e+00> : vector<23x16xf32>
    %100 = tpu.matmul %97, %99, %cst_31 {dimension_numbers = #tpu.dot_dimension_numbers<[1], [0], [0], [1], [0, 0, 1, 1], [], []>} : vector<23x32xf32>, vector<32x16xf32>, vector<23x16xf32> -> vector<23x16xf32>
    %101 = vector.extract_strided_slice %84 {offsets = [1, 0, 0], sizes = [1, 32, 16], strides = [1, 1, 1]} : vector<2x32x16xf32> to vector<1x32x16xf32>
    %102 = vector.shape_cast %101 : vector<1x32x16xf32> to vector<32x16xf32>
    %cst_32 = arith.constant dense<0.000000e+00> : vector<23x16xf32>
    %103 = tpu.matmul %97, %102, %cst_32 {dimension_numbers = #tpu.dot_dimension_numbers<[1], [0], [0], [1], [0, 0, 1, 1], [], []>} : vector<23x32xf32>, vector<32x16xf32>, vector<23x16xf32> -> vector<23x16xf32>
    %104 = vector.shape_cast %100 : vector<23x16xf32> to vector<1x23x16xf32>
    %105 = vector.shape_cast %103 : vector<23x16xf32> to vector<1x23x16xf32>
    %106 = tpu.concatenate %104, %105 in 0 : vector<1x23x16xf32>, vector<1x23x16xf32> -> vector<2x23x16xf32>
    %107 = tpu.iota {dimensions = array<i32: 0>} : vector<23x32xi32>
    %108 = tpu.iota {dimensions = array<i32: 1>} : vector<23x32xi32>
    %c2_i32_33 = arith.constant 2 : i32
    %109 = vector.broadcast %c2_i32_33 : i32 to vector<23x32xi32>
    %110 = arith.muli %109, %107 : vector<23x32xi32>
    %c-6_i32_34 = arith.constant -6 : i32
    %111 = vector.broadcast %c-6_i32_34 : i32 to vector<23x32xi32>
    %112 = arith.addi %110, %111 : vector<23x32xi32>
    %113 = arith.cmpi eq, %108, %112 : vector<23x32xi32>
    %114 = arith.extui %113 : vector<23x32xi1> to vector<23x32xi32>
    %115 = arith.sitofp %114 : vector<23x32xi32> to vector<23x32xf32>
    %116 = vector.extract_strided_slice %84 {offsets = [0, 0, 0], sizes = [1, 32, 16], strides = [1, 1, 1]} : vector<2x32x16xf32> to vector<1x32x16xf32>
    %117 = vector.shape_cast %116 : vector<1x32x16xf32> to vector<32x16xf32>
    %cst_35 = arith.constant dense<0.000000e+00> : vector<23x16xf32>
    %118 = tpu.matmul %115, %117, %cst_35 {dimension_numbers = #tpu.dot_dimension_numbers<[1], [0], [0], [1], [0, 0, 1, 1], [], []>} : vector<23x32xf32>, vector<32x16xf32>, vector<23x16xf32> -> vector<23x16xf32>
    %119 = vector.extract_strided_slice %84 {offsets = [1, 0, 0], sizes = [1, 32, 16], strides = [1, 1, 1]} : vector<2x32x16xf32> to vector<1x32x16xf32>
    %120 = vector.shape_cast %119 : vector<1x32x16xf32> to vector<32x16xf32>
    %cst_36 = arith.constant dense<0.000000e+00> : vector<23x16xf32>
    %121 = tpu.matmul %115, %120, %cst_36 {dimension_numbers = #tpu.dot_dimension_numbers<[1], [0], [0], [1], [0, 0, 1, 1], [], []>} : vector<23x32xf32>, vector<32x16xf32>, vector<23x16xf32> -> vector<23x16xf32>
    %122 = vector.shape_cast %118 : vector<23x16xf32> to vector<1x23x16xf32>
    %123 = vector.shape_cast %121 : vector<23x16xf32> to vector<1x23x16xf32>
    %124 = tpu.concatenate %122, %123 in 0 : vector<1x23x16xf32>, vector<1x23x16xf32> -> vector<2x23x16xf32>
    %125 = vector.extract_strided_slice %106 {offsets = [0, 0, 0], sizes = [2, 16, 16], strides = [1, 1, 1]} : vector<2x23x16xf32> to vector<2x16x16xf32>
    %126 = vector.extract_strided_slice %124 {offsets = [0, 0, 0], sizes = [2, 16, 16], strides = [1, 1, 1]} : vector<2x23x16xf32> to vector<2x16x16xf32>
    %127 = vector.extract_strided_slice %106 {offsets = [0, 1, 0], sizes = [2, 16, 16], strides = [1, 1, 1]} : vector<2x23x16xf32> to vector<2x16x16xf32>
    %128 = vector.extract_strided_slice %124 {offsets = [0, 1, 0], sizes = [2, 16, 16], strides = [1, 1, 1]} : vector<2x23x16xf32> to vector<2x16x16xf32>
    %129 = vector.extract_strided_slice %106 {offsets = [0, 2, 0], sizes = [2, 16, 16], strides = [1, 1, 1]} : vector<2x23x16xf32> to vector<2x16x16xf32>
    %130 = vector.extract_strided_slice %124 {offsets = [0, 2, 0], sizes = [2, 16, 16], strides = [1, 1, 1]} : vector<2x23x16xf32> to vector<2x16x16xf32>
    %131 = vector.extract_strided_slice %106 {offsets = [0, 3, 0], sizes = [2, 16, 16], strides = [1, 1, 1]} : vector<2x23x16xf32> to vector<2x16x16xf32>
    %132 = vector.extract_strided_slice %124 {offsets = [0, 3, 0], sizes = [2, 16, 16], strides = [1, 1, 1]} : vector<2x23x16xf32> to vector<2x16x16xf32>
    %133 = vector.extract_strided_slice %106 {offsets = [0, 4, 0], sizes = [2, 16, 16], strides = [1, 1, 1]} : vector<2x23x16xf32> to vector<2x16x16xf32>
    %134 = vector.extract_strided_slice %124 {offsets = [0, 4, 0], sizes = [2, 16, 16], strides = [1, 1, 1]} : vector<2x23x16xf32> to vector<2x16x16xf32>
    %135 = vector.extract_strided_slice %106 {offsets = [0, 5, 0], sizes = [2, 16, 16], strides = [1, 1, 1]} : vector<2x23x16xf32> to vector<2x16x16xf32>
    %136 = vector.extract_strided_slice %124 {offsets = [0, 5, 0], sizes = [2, 16, 16], strides = [1, 1, 1]} : vector<2x23x16xf32> to vector<2x16x16xf32>
    %137 = vector.extract_strided_slice %106 {offsets = [0, 6, 0], sizes = [2, 16, 16], strides = [1, 1, 1]} : vector<2x23x16xf32> to vector<2x16x16xf32>
    %138 = vector.extract_strided_slice %124 {offsets = [0, 6, 0], sizes = [2, 16, 16], strides = [1, 1, 1]} : vector<2x23x16xf32> to vector<2x16x16xf32>
    %139 = vector.extract_strided_slice %106 {offsets = [0, 7, 0], sizes = [2, 16, 16], strides = [1, 1, 1]} : vector<2x23x16xf32> to vector<2x16x16xf32>
    %140 = tpu.concatenate %125, %126, %127, %128, %129, %130, %131, %132, %133, %134, %135, %136, %137, %138, %139 in 2 : vector<2x16x16xf32>, vector<2x16x16xf32>, vector<2x16x16xf32>, vector<2x16x16xf32>, vector<2x16x16xf32>, vector<2x16x16xf32>, vector<2x16x16xf32>, vector<2x16x16xf32>, vector<2x16x16xf32>, vector<2x16x16xf32>, vector<2x16x16xf32>, vector<2x16x16xf32>, vector<2x16x16xf32>, vector<2x16x16xf32>, vector<2x16x16xf32> -> vector<2x16x240xf32>
    %141 = vector.shape_cast %140 : vector<2x16x240xf32> to vector<32x240xf32>
    %cst_37 = arith.constant dense<0.000000e+00> : vector<32x32xf32>
    %142 = tpu.matmul %141, %85, %cst_37 {dimension_numbers = #tpu.dot_dimension_numbers<[1], [0], [0], [1], [0, 0, 1, 1], [], []>} : vector<32x240xf32>, vector<240x32xf32>, vector<32x32xf32> -> vector<32x32xf32>
    %143 = vector.broadcast %86 : vector<1x32xf32> to vector<32x32xf32>
    %144 = arith.addf %142, %143 : vector<32x32xf32>
    %cst_38 = arith.constant dense<0.000000e+00> : vector<32xf32>
    %145 = vector.multi_reduction <add>, %144, %cst_38 [0] : vector<32x32xf32> to vector<32xf32>
    %146 = vector.shape_cast %145 : vector<32xf32> to vector<1x32xf32>
    %cst_39 = arith.constant 3.200000e+01 : f32
    %147 = vector.broadcast %cst_39 : f32 to vector<1x32xf32>
    %148 = arith.divf %146, %147 : vector<1x32xf32>
    %149 = vector.broadcast %148 : vector<1x32xf32> to vector<32x32xf32>
    %150 = arith.subf %144, %149 : vector<32x32xf32>
    %151 = arith.mulf %150, %150 : vector<32x32xf32>
    %cst_40 = arith.constant dense<0.000000e+00> : vector<32xf32>
    %152 = vector.multi_reduction <add>, %151, %cst_40 [0] : vector<32x32xf32> to vector<32xf32>
    %153 = vector.shape_cast %152 : vector<32xf32> to vector<1x32xf32>
    %cst_41 = arith.constant 3.200000e+01 : f32
    %154 = vector.broadcast %cst_41 : f32 to vector<1x32xf32>
    %155 = arith.divf %153, %154 : vector<1x32xf32>
    %cst_42 = arith.constant 9.99999974E-6 : f32
    %156 = vector.broadcast %cst_42 : f32 to vector<1x32xf32>
    %157 = arith.addf %155, %156 : vector<1x32xf32>
    %158 = math.rsqrt %157 : vector<1x32xf32>
    %159 = arith.mulf %87, %158 : vector<1x32xf32>
    %160 = arith.mulf %148, %159 : vector<1x32xf32>
    %161 = arith.subf %88, %160 : vector<1x32xf32>
    %162 = vector.broadcast %159 : vector<1x32xf32> to vector<32x32xf32>
    %163 = arith.mulf %144, %162 : vector<32x32xf32>
    %164 = vector.broadcast %161 : vector<1x32xf32> to vector<32x32xf32>
    %165 = arith.addf %163, %164 : vector<32x32xf32>
    %cst_43 = arith.constant 0.000000e+00 : f32
    %166 = vector.broadcast %cst_43 : f32 to vector<32x32xf32>
    %167 = arith.maximumf %165, %166 : vector<32x32xf32>
    %168 = vector.shape_cast %167 : vector<32x32xf32> to vector<2x16x32xf32>
    %c0_44 = arith.constant 0 : index
    %c0_45 = arith.constant 0 : index
    %169 = vector.load %arg9[%c0_44, %c0_45] : memref<480x64xf32, #tpu.memory_space<vmem>>, vector<480x64xf32>
    %c0_46 = arith.constant 0 : index
    %c0_47 = arith.constant 0 : index
    %170 = vector.load %arg10[%c0_46, %c0_47] : memref<1x64xf32, #tpu.memory_space<vmem>>, vector<1x64xf32>
    %c0_48 = arith.constant 0 : index
    %c0_49 = arith.constant 0 : index
    %171 = vector.load %arg11[%c0_48, %c0_49] : memref<1x64xf32, #tpu.memory_space<vmem>>, vector<1x64xf32>
    %c0_50 = arith.constant 0 : index
    %c0_51 = arith.constant 0 : index
    %172 = vector.load %arg12[%c0_50, %c0_51] : memref<1x64xf32, #tpu.memory_space<vmem>>, vector<1x64xf32>
    %173 = tpu.iota {dimensions = array<i32: 0>} : vector<15x16xi32>
    %174 = tpu.iota {dimensions = array<i32: 1>} : vector<15x16xi32>
    %c2_i32_52 = arith.constant 2 : i32
    %175 = vector.broadcast %c2_i32_52 : i32 to vector<15x16xi32>
    %176 = arith.muli %175, %173 : vector<15x16xi32>
    %c-7_i32_53 = arith.constant -7 : i32
    %177 = vector.broadcast %c-7_i32_53 : i32 to vector<15x16xi32>
    %178 = arith.addi %176, %177 : vector<15x16xi32>
    %179 = arith.cmpi eq, %174, %178 : vector<15x16xi32>
    %180 = arith.extui %179 : vector<15x16xi1> to vector<15x16xi32>
    %181 = arith.sitofp %180 : vector<15x16xi32> to vector<15x16xf32>
    %182 = vector.extract_strided_slice %168 {offsets = [0, 0, 0], sizes = [1, 16, 32], strides = [1, 1, 1]} : vector<2x16x32xf32> to vector<1x16x32xf32>
    %183 = vector.shape_cast %182 : vector<1x16x32xf32> to vector<16x32xf32>
    %cst_54 = arith.constant dense<0.000000e+00> : vector<15x32xf32>
    %184 = tpu.matmul %181, %183, %cst_54 {dimension_numbers = #tpu.dot_dimension_numbers<[1], [0], [0], [1], [0, 0, 1, 1], [], []>} : vector<15x16xf32>, vector<16x32xf32>, vector<15x32xf32> -> vector<15x32xf32>
    %185 = vector.extract_strided_slice %168 {offsets = [1, 0, 0], sizes = [1, 16, 32], strides = [1, 1, 1]} : vector<2x16x32xf32> to vector<1x16x32xf32>
    %186 = vector.shape_cast %185 : vector<1x16x32xf32> to vector<16x32xf32>
    %cst_55 = arith.constant dense<0.000000e+00> : vector<15x32xf32>
    %187 = tpu.matmul %181, %186, %cst_55 {dimension_numbers = #tpu.dot_dimension_numbers<[1], [0], [0], [1], [0, 0, 1, 1], [], []>} : vector<15x16xf32>, vector<16x32xf32>, vector<15x32xf32> -> vector<15x32xf32>
    %188 = vector.shape_cast %184 : vector<15x32xf32> to vector<1x15x32xf32>
    %189 = vector.shape_cast %187 : vector<15x32xf32> to vector<1x15x32xf32>
    %190 = tpu.concatenate %188, %189 in 0 : vector<1x15x32xf32>, vector<1x15x32xf32> -> vector<2x15x32xf32>
    %191 = tpu.iota {dimensions = array<i32: 0>} : vector<15x16xi32>
    %192 = tpu.iota {dimensions = array<i32: 1>} : vector<15x16xi32>
    %c2_i32_56 = arith.constant 2 : i32
    %193 = vector.broadcast %c2_i32_56 : i32 to vector<15x16xi32>
    %194 = arith.muli %193, %191 : vector<15x16xi32>
    %c-6_i32_57 = arith.constant -6 : i32
    %195 = vector.broadcast %c-6_i32_57 : i32 to vector<15x16xi32>
    %196 = arith.addi %194, %195 : vector<15x16xi32>
    %197 = arith.cmpi eq, %192, %196 : vector<15x16xi32>
    %198 = arith.extui %197 : vector<15x16xi1> to vector<15x16xi32>
    %199 = arith.sitofp %198 : vector<15x16xi32> to vector<15x16xf32>
    %200 = vector.extract_strided_slice %168 {offsets = [0, 0, 0], sizes = [1, 16, 32], strides = [1, 1, 1]} : vector<2x16x32xf32> to vector<1x16x32xf32>
    %201 = vector.shape_cast %200 : vector<1x16x32xf32> to vector<16x32xf32>
    %cst_58 = arith.constant dense<0.000000e+00> : vector<15x32xf32>
    %202 = tpu.matmul %199, %201, %cst_58 {dimension_numbers = #tpu.dot_dimension_numbers<[1], [0], [0], [1], [0, 0, 1, 1], [], []>} : vector<15x16xf32>, vector<16x32xf32>, vector<15x32xf32> -> vector<15x32xf32>
    %203 = vector.extract_strided_slice %168 {offsets = [1, 0, 0], sizes = [1, 16, 32], strides = [1, 1, 1]} : vector<2x16x32xf32> to vector<1x16x32xf32>
    %204 = vector.shape_cast %203 : vector<1x16x32xf32> to vector<16x32xf32>
    %cst_59 = arith.constant dense<0.000000e+00> : vector<15x32xf32>
    %205 = tpu.matmul %199, %204, %cst_59 {dimension_numbers = #tpu.dot_dimension_numbers<[1], [0], [0], [1], [0, 0, 1, 1], [], []>} : vector<15x16xf32>, vector<16x32xf32>, vector<15x32xf32> -> vector<15x32xf32>
    %206 = vector.shape_cast %202 : vector<15x32xf32> to vector<1x15x32xf32>
    %207 = vector.shape_cast %205 : vector<15x32xf32> to vector<1x15x32xf32>
    %208 = tpu.concatenate %206, %207 in 0 : vector<1x15x32xf32>, vector<1x15x32xf32> -> vector<2x15x32xf32>
    %209 = vector.extract_strided_slice %190 {offsets = [0, 0, 0], sizes = [2, 8, 32], strides = [1, 1, 1]} : vector<2x15x32xf32> to vector<2x8x32xf32>
    %210 = vector.extract_strided_slice %208 {offsets = [0, 0, 0], sizes = [2, 8, 32], strides = [1, 1, 1]} : vector<2x15x32xf32> to vector<2x8x32xf32>
    %211 = vector.extract_strided_slice %190 {offsets = [0, 1, 0], sizes = [2, 8, 32], strides = [1, 1, 1]} : vector<2x15x32xf32> to vector<2x8x32xf32>
    %212 = vector.extract_strided_slice %208 {offsets = [0, 1, 0], sizes = [2, 8, 32], strides = [1, 1, 1]} : vector<2x15x32xf32> to vector<2x8x32xf32>
    %213 = vector.extract_strided_slice %190 {offsets = [0, 2, 0], sizes = [2, 8, 32], strides = [1, 1, 1]} : vector<2x15x32xf32> to vector<2x8x32xf32>
    %214 = vector.extract_strided_slice %208 {offsets = [0, 2, 0], sizes = [2, 8, 32], strides = [1, 1, 1]} : vector<2x15x32xf32> to vector<2x8x32xf32>
    %215 = vector.extract_strided_slice %190 {offsets = [0, 3, 0], sizes = [2, 8, 32], strides = [1, 1, 1]} : vector<2x15x32xf32> to vector<2x8x32xf32>
    %216 = vector.extract_strided_slice %208 {offsets = [0, 3, 0], sizes = [2, 8, 32], strides = [1, 1, 1]} : vector<2x15x32xf32> to vector<2x8x32xf32>
    %217 = vector.extract_strided_slice %190 {offsets = [0, 4, 0], sizes = [2, 8, 32], strides = [1, 1, 1]} : vector<2x15x32xf32> to vector<2x8x32xf32>
    %218 = vector.extract_strided_slice %208 {offsets = [0, 4, 0], sizes = [2, 8, 32], strides = [1, 1, 1]} : vector<2x15x32xf32> to vector<2x8x32xf32>
    %219 = vector.extract_strided_slice %190 {offsets = [0, 5, 0], sizes = [2, 8, 32], strides = [1, 1, 1]} : vector<2x15x32xf32> to vector<2x8x32xf32>
    %220 = vector.extract_strided_slice %208 {offsets = [0, 5, 0], sizes = [2, 8, 32], strides = [1, 1, 1]} : vector<2x15x32xf32> to vector<2x8x32xf32>
    %221 = vector.extract_strided_slice %190 {offsets = [0, 6, 0], sizes = [2, 8, 32], strides = [1, 1, 1]} : vector<2x15x32xf32> to vector<2x8x32xf32>
    %222 = vector.extract_strided_slice %208 {offsets = [0, 6, 0], sizes = [2, 8, 32], strides = [1, 1, 1]} : vector<2x15x32xf32> to vector<2x8x32xf32>
    %223 = vector.extract_strided_slice %190 {offsets = [0, 7, 0], sizes = [2, 8, 32], strides = [1, 1, 1]} : vector<2x15x32xf32> to vector<2x8x32xf32>
    %224 = tpu.concatenate %209, %210, %211, %212, %213, %214, %215, %216, %217, %218, %219, %220, %221, %222, %223 in 2 : vector<2x8x32xf32>, vector<2x8x32xf32>, vector<2x8x32xf32>, vector<2x8x32xf32>, vector<2x8x32xf32>, vector<2x8x32xf32>, vector<2x8x32xf32>, vector<2x8x32xf32>, vector<2x8x32xf32>, vector<2x8x32xf32>, vector<2x8x32xf32>, vector<2x8x32xf32>, vector<2x8x32xf32>, vector<2x8x32xf32>, vector<2x8x32xf32> -> vector<2x8x480xf32>
    %225 = vector.shape_cast %224 : vector<2x8x480xf32> to vector<16x480xf32>
    %cst_60 = arith.constant dense<0.000000e+00> : vector<16x64xf32>
    %226 = tpu.matmul %225, %169, %cst_60 {dimension_numbers = #tpu.dot_dimension_numbers<[1], [0], [0], [1], [0, 0, 1, 1], [], []>} : vector<16x480xf32>, vector<480x64xf32>, vector<16x64xf32> -> vector<16x64xf32>
    %227 = vector.broadcast %170 : vector<1x64xf32> to vector<16x64xf32>
    %228 = arith.addf %226, %227 : vector<16x64xf32>
    %cst_61 = arith.constant dense<0.000000e+00> : vector<64xf32>
    %229 = vector.multi_reduction <add>, %228, %cst_61 [0] : vector<16x64xf32> to vector<64xf32>
    %230 = vector.shape_cast %229 : vector<64xf32> to vector<1x64xf32>
    %cst_62 = arith.constant 1.600000e+01 : f32
    %231 = vector.broadcast %cst_62 : f32 to vector<1x64xf32>
    %232 = arith.divf %230, %231 : vector<1x64xf32>
    %233 = vector.broadcast %232 : vector<1x64xf32> to vector<16x64xf32>
    %234 = arith.subf %228, %233 : vector<16x64xf32>
    %235 = arith.mulf %234, %234 : vector<16x64xf32>
    %cst_63 = arith.constant dense<0.000000e+00> : vector<64xf32>
    %236 = vector.multi_reduction <add>, %235, %cst_63 [0] : vector<16x64xf32> to vector<64xf32>
    %237 = vector.shape_cast %236 : vector<64xf32> to vector<1x64xf32>
    %cst_64 = arith.constant 1.600000e+01 : f32
    %238 = vector.broadcast %cst_64 : f32 to vector<1x64xf32>
    %239 = arith.divf %237, %238 : vector<1x64xf32>
    %cst_65 = arith.constant 9.99999974E-6 : f32
    %240 = vector.broadcast %cst_65 : f32 to vector<1x64xf32>
    %241 = arith.addf %239, %240 : vector<1x64xf32>
    %242 = math.rsqrt %241 : vector<1x64xf32>
    %243 = arith.mulf %171, %242 : vector<1x64xf32>
    %244 = arith.mulf %232, %243 : vector<1x64xf32>
    %245 = arith.subf %172, %244 : vector<1x64xf32>
    %246 = vector.broadcast %243 : vector<1x64xf32> to vector<16x64xf32>
    %247 = arith.mulf %228, %246 : vector<16x64xf32>
    %248 = vector.broadcast %245 : vector<1x64xf32> to vector<16x64xf32>
    %249 = arith.addf %247, %248 : vector<16x64xf32>
    %cst_66 = arith.constant 0.000000e+00 : f32
    %250 = vector.broadcast %cst_66 : f32 to vector<16x64xf32>
    %251 = arith.maximumf %249, %250 : vector<16x64xf32>
    %252 = vector.shape_cast %251 : vector<16x64xf32> to vector<2x8x64xf32>
    %c0_67 = arith.constant 0 : index
    %c0_68 = arith.constant 0 : index
    %253 = vector.load %arg13[%c0_67, %c0_68] : memref<448x32xf32, #tpu.memory_space<vmem>>, vector<448x32xf32>
    %c0_69 = arith.constant 0 : index
    %c0_70 = arith.constant 0 : index
    %254 = vector.load %arg14[%c0_69, %c0_70] : memref<512x32xf32, #tpu.memory_space<vmem>>, vector<512x32xf32>
    %c0_71 = arith.constant 0 : index
    %c0_72 = arith.constant 0 : index
    %255 = vector.load %arg15[%c0_71, %c0_72] : memref<1x32xf32, #tpu.memory_space<vmem>>, vector<1x32xf32>
    %c0_73 = arith.constant 0 : index
    %c0_74 = arith.constant 0 : index
    %256 = vector.load %arg16[%c0_73, %c0_74] : memref<1x32xf32, #tpu.memory_space<vmem>>, vector<1x32xf32>
    %c0_75 = arith.constant 0 : index
    %c0_76 = arith.constant 0 : index
    %257 = vector.load %arg17[%c0_75, %c0_76] : memref<1x32xf32, #tpu.memory_space<vmem>>, vector<1x32xf32>
    %258 = tpu.iota {dimensions = array<i32: 0>} : vector<15x8xi32>
    %259 = tpu.iota {dimensions = array<i32: 1>} : vector<15x8xi32>
    %c1_i32 = arith.constant 1 : i32
    %260 = vector.broadcast %c1_i32 : i32 to vector<15x8xi32>
    %261 = arith.muli %260, %258 : vector<15x8xi32>
    %c-3_i32 = arith.constant -3 : i32
    %262 = vector.broadcast %c-3_i32 : i32 to vector<15x8xi32>
    %263 = arith.addi %261, %262 : vector<15x8xi32>
    %264 = arith.cmpi eq, %259, %263 : vector<15x8xi32>
    %265 = arith.extui %264 : vector<15x8xi1> to vector<15x8xi32>
    %266 = arith.sitofp %265 : vector<15x8xi32> to vector<15x8xf32>
    %267 = vector.extract_strided_slice %252 {offsets = [0, 0, 0], sizes = [1, 8, 64], strides = [1, 1, 1]} : vector<2x8x64xf32> to vector<1x8x64xf32>
    %268 = vector.shape_cast %267 : vector<1x8x64xf32> to vector<8x64xf32>
    %cst_77 = arith.constant dense<0.000000e+00> : vector<15x64xf32>
    %269 = tpu.matmul %266, %268, %cst_77 {dimension_numbers = #tpu.dot_dimension_numbers<[1], [0], [0], [1], [0, 0, 1, 1], [], []>} : vector<15x8xf32>, vector<8x64xf32>, vector<15x64xf32> -> vector<15x64xf32>
    %270 = vector.extract_strided_slice %252 {offsets = [1, 0, 0], sizes = [1, 8, 64], strides = [1, 1, 1]} : vector<2x8x64xf32> to vector<1x8x64xf32>
    %271 = vector.shape_cast %270 : vector<1x8x64xf32> to vector<8x64xf32>
    %cst_78 = arith.constant dense<0.000000e+00> : vector<15x64xf32>
    %272 = tpu.matmul %266, %271, %cst_78 {dimension_numbers = #tpu.dot_dimension_numbers<[1], [0], [0], [1], [0, 0, 1, 1], [], []>} : vector<15x8xf32>, vector<8x64xf32>, vector<15x64xf32> -> vector<15x64xf32>
    %273 = vector.shape_cast %269 : vector<15x64xf32> to vector<1x15x64xf32>
    %274 = vector.shape_cast %272 : vector<15x64xf32> to vector<1x15x64xf32>
    %275 = tpu.concatenate %273, %274 in 0 : vector<1x15x64xf32>, vector<1x15x64xf32> -> vector<2x15x64xf32>
    %276 = vector.extract_strided_slice %275 {offsets = [0, 0, 0], sizes = [2, 8, 64], strides = [1, 1, 1]} : vector<2x15x64xf32> to vector<2x8x64xf32>
    %277 = vector.extract_strided_slice %275 {offsets = [0, 1, 0], sizes = [2, 8, 64], strides = [1, 1, 1]} : vector<2x15x64xf32> to vector<2x8x64xf32>
    %278 = vector.extract_strided_slice %275 {offsets = [0, 2, 0], sizes = [2, 8, 64], strides = [1, 1, 1]} : vector<2x15x64xf32> to vector<2x8x64xf32>
    %279 = vector.extract_strided_slice %275 {offsets = [0, 3, 0], sizes = [2, 8, 64], strides = [1, 1, 1]} : vector<2x15x64xf32> to vector<2x8x64xf32>
    %280 = vector.extract_strided_slice %275 {offsets = [0, 4, 0], sizes = [2, 8, 64], strides = [1, 1, 1]} : vector<2x15x64xf32> to vector<2x8x64xf32>
    %281 = vector.extract_strided_slice %275 {offsets = [0, 5, 0], sizes = [2, 8, 64], strides = [1, 1, 1]} : vector<2x15x64xf32> to vector<2x8x64xf32>
    %282 = vector.extract_strided_slice %275 {offsets = [0, 6, 0], sizes = [2, 8, 64], strides = [1, 1, 1]} : vector<2x15x64xf32> to vector<2x8x64xf32>
    %283 = tpu.concatenate %276, %277, %278, %279, %280, %281, %282 in 2 : vector<2x8x64xf32>, vector<2x8x64xf32>, vector<2x8x64xf32>, vector<2x8x64xf32>, vector<2x8x64xf32>, vector<2x8x64xf32>, vector<2x8x64xf32> -> vector<2x8x448xf32>
    %284 = vector.extract_strided_slice %275 {offsets = [0, 0, 0], sizes = [2, 8, 64], strides = [1, 1, 1]} : vector<2x15x64xf32> to vector<2x8x64xf32>
    %285 = vector.extract_strided_slice %275 {offsets = [0, 1, 0], sizes = [2, 8, 64], strides = [1, 1, 1]} : vector<2x15x64xf32> to vector<2x8x64xf32>
    %286 = vector.extract_strided_slice %275 {offsets = [0, 2, 0], sizes = [2, 8, 64], strides = [1, 1, 1]} : vector<2x15x64xf32> to vector<2x8x64xf32>
    %287 = vector.extract_strided_slice %275 {offsets = [0, 3, 0], sizes = [2, 8, 64], strides = [1, 1, 1]} : vector<2x15x64xf32> to vector<2x8x64xf32>
    %288 = vector.extract_strided_slice %275 {offsets = [0, 4, 0], sizes = [2, 8, 64], strides = [1, 1, 1]} : vector<2x15x64xf32> to vector<2x8x64xf32>
    %289 = vector.extract_strided_slice %275 {offsets = [0, 5, 0], sizes = [2, 8, 64], strides = [1, 1, 1]} : vector<2x15x64xf32> to vector<2x8x64xf32>
    %290 = vector.extract_strided_slice %275 {offsets = [0, 6, 0], sizes = [2, 8, 64], strides = [1, 1, 1]} : vector<2x15x64xf32> to vector<2x8x64xf32>
    %291 = vector.extract_strided_slice %275 {offsets = [0, 7, 0], sizes = [2, 8, 64], strides = [1, 1, 1]} : vector<2x15x64xf32> to vector<2x8x64xf32>
    %292 = tpu.concatenate %284, %285, %286, %287, %288, %289, %290, %291 in 2 : vector<2x8x64xf32>, vector<2x8x64xf32>, vector<2x8x64xf32>, vector<2x8x64xf32>, vector<2x8x64xf32>, vector<2x8x64xf32>, vector<2x8x64xf32>, vector<2x8x64xf32> -> vector<2x8x512xf32>
    %293 = vector.shape_cast %283 : vector<2x8x448xf32> to vector<16x448xf32>
    %294 = vector.shape_cast %292 : vector<2x8x512xf32> to vector<16x512xf32>
    %cst_79 = arith.constant dense<0.000000e+00> : vector<16x32xf32>
    %295 = tpu.matmul %293, %253, %cst_79 {dimension_numbers = #tpu.dot_dimension_numbers<[1], [0], [0], [1], [0, 0, 1, 1], [], []>} : vector<16x448xf32>, vector<448x32xf32>, vector<16x32xf32> -> vector<16x32xf32>
    %296 = vector.broadcast %255 : vector<1x32xf32> to vector<16x32xf32>
    %297 = arith.addf %295, %296 : vector<16x32xf32>
    %cst_80 = arith.constant dense<0.000000e+00> : vector<16x32xf32>
    %298 = tpu.matmul %294, %254, %cst_80 {dimension_numbers = #tpu.dot_dimension_numbers<[1], [0], [0], [1], [0, 0, 1, 1], [], []>} : vector<16x512xf32>, vector<512x32xf32>, vector<16x32xf32> -> vector<16x32xf32>
    %299 = vector.broadcast %255 : vector<1x32xf32> to vector<16x32xf32>
    %300 = arith.addf %298, %299 : vector<16x32xf32>
    %301 = tpu.concatenate %297, %300 in 0 : vector<16x32xf32>, vector<16x32xf32> -> vector<32x32xf32>
    %cst_81 = arith.constant dense<0.000000e+00> : vector<32xf32>
    %302 = vector.multi_reduction <add>, %301, %cst_81 [0] : vector<32x32xf32> to vector<32xf32>
    %303 = vector.shape_cast %302 : vector<32xf32> to vector<1x32xf32>
    %cst_82 = arith.constant 3.200000e+01 : f32
    %304 = vector.broadcast %cst_82 : f32 to vector<1x32xf32>
    %305 = arith.divf %303, %304 : vector<1x32xf32>
    %306 = vector.broadcast %305 : vector<1x32xf32> to vector<32x32xf32>
    %307 = arith.subf %301, %306 : vector<32x32xf32>
    %308 = arith.mulf %307, %307 : vector<32x32xf32>
    %cst_83 = arith.constant dense<0.000000e+00> : vector<32xf32>
    %309 = vector.multi_reduction <add>, %308, %cst_83 [0] : vector<32x32xf32> to vector<32xf32>
    %310 = vector.shape_cast %309 : vector<32xf32> to vector<1x32xf32>
    %cst_84 = arith.constant 3.200000e+01 : f32
    %311 = vector.broadcast %cst_84 : f32 to vector<1x32xf32>
    %312 = arith.divf %310, %311 : vector<1x32xf32>
    %cst_85 = arith.constant 9.99999974E-6 : f32
    %313 = vector.broadcast %cst_85 : f32 to vector<1x32xf32>
    %314 = arith.addf %312, %313 : vector<1x32xf32>
    %315 = math.rsqrt %314 : vector<1x32xf32>
    %316 = arith.mulf %256, %315 : vector<1x32xf32>
    %317 = arith.mulf %305, %316 : vector<1x32xf32>
    %318 = arith.subf %257, %317 : vector<1x32xf32>
    %319 = vector.broadcast %316 : vector<1x32xf32> to vector<16x32xf32>
    %320 = arith.mulf %297, %319 : vector<16x32xf32>
    %321 = vector.broadcast %318 : vector<1x32xf32> to vector<16x32xf32>
    %322 = arith.addf %320, %321 : vector<16x32xf32>
    %cst_86 = arith.constant 0.000000e+00 : f32
    %323 = vector.broadcast %cst_86 : f32 to vector<16x32xf32>
    %324 = arith.maximumf %322, %323 : vector<16x32xf32>
    %325 = vector.shape_cast %324 : vector<16x32xf32> to vector<2x8x32xf32>
    %326 = vector.broadcast %316 : vector<1x32xf32> to vector<16x32xf32>
    %327 = arith.mulf %300, %326 : vector<16x32xf32>
    %328 = vector.broadcast %318 : vector<1x32xf32> to vector<16x32xf32>
    %329 = arith.addf %327, %328 : vector<16x32xf32>
    %cst_87 = arith.constant 0.000000e+00 : f32
    %330 = vector.broadcast %cst_87 : f32 to vector<16x32xf32>
    %331 = arith.maximumf %329, %330 : vector<16x32xf32>
    %332 = vector.shape_cast %331 : vector<16x32xf32> to vector<2x8x32xf32>
    %333 = tpu.iota {dimensions = array<i32: 0>} : vector<16x8xi32>
    %334 = tpu.iota {dimensions = array<i32: 1>} : vector<16x8xi32>
    %c2_i32_88 = arith.constant 2 : i32
    %335 = vector.broadcast %c2_i32_88 : i32 to vector<16x8xi32>
    %336 = arith.muli %335, %334 : vector<16x8xi32>
    %337 = arith.cmpi eq, %333, %336 : vector<16x8xi32>
    %338 = arith.extui %337 : vector<16x8xi1> to vector<16x8xi32>
    %339 = arith.sitofp %338 : vector<16x8xi32> to vector<16x8xf32>
    %c2_i32_89 = arith.constant 2 : i32
    %340 = vector.broadcast %c2_i32_89 : i32 to vector<16x8xi32>
    %341 = arith.muli %340, %334 : vector<16x8xi32>
    %c1_i32_90 = arith.constant 1 : i32
    %342 = vector.broadcast %c1_i32_90 : i32 to vector<16x8xi32>
    %343 = arith.addi %341, %342 : vector<16x8xi32>
    %344 = arith.cmpi eq, %333, %343 : vector<16x8xi32>
    %345 = arith.extui %344 : vector<16x8xi1> to vector<16x8xi32>
    %346 = arith.sitofp %345 : vector<16x8xi32> to vector<16x8xf32>
    %347 = vector.extract_strided_slice %325 {offsets = [0, 0, 0], sizes = [1, 8, 32], strides = [1, 1, 1]} : vector<2x8x32xf32> to vector<1x8x32xf32>
    %348 = vector.shape_cast %347 : vector<1x8x32xf32> to vector<8x32xf32>
    %cst_91 = arith.constant dense<0.000000e+00> : vector<16x32xf32>
    %349 = tpu.matmul %339, %348, %cst_91 {dimension_numbers = #tpu.dot_dimension_numbers<[1], [0], [0], [1], [0, 0, 1, 1], [], []>} : vector<16x8xf32>, vector<8x32xf32>, vector<16x32xf32> -> vector<16x32xf32>
    %350 = vector.extract_strided_slice %332 {offsets = [0, 0, 0], sizes = [1, 8, 32], strides = [1, 1, 1]} : vector<2x8x32xf32> to vector<1x8x32xf32>
    %351 = vector.shape_cast %350 : vector<1x8x32xf32> to vector<8x32xf32>
    %cst_92 = arith.constant dense<0.000000e+00> : vector<16x32xf32>
    %352 = tpu.matmul %346, %351, %cst_92 {dimension_numbers = #tpu.dot_dimension_numbers<[1], [0], [0], [1], [0, 0, 1, 1], [], []>} : vector<16x8xf32>, vector<8x32xf32>, vector<16x32xf32> -> vector<16x32xf32>
    %353 = arith.addf %349, %352 : vector<16x32xf32>
    %354 = vector.extract_strided_slice %325 {offsets = [1, 0, 0], sizes = [1, 8, 32], strides = [1, 1, 1]} : vector<2x8x32xf32> to vector<1x8x32xf32>
    %355 = vector.shape_cast %354 : vector<1x8x32xf32> to vector<8x32xf32>
    %cst_93 = arith.constant dense<0.000000e+00> : vector<16x32xf32>
    %356 = tpu.matmul %339, %355, %cst_93 {dimension_numbers = #tpu.dot_dimension_numbers<[1], [0], [0], [1], [0, 0, 1, 1], [], []>} : vector<16x8xf32>, vector<8x32xf32>, vector<16x32xf32> -> vector<16x32xf32>
    %357 = vector.extract_strided_slice %332 {offsets = [1, 0, 0], sizes = [1, 8, 32], strides = [1, 1, 1]} : vector<2x8x32xf32> to vector<1x8x32xf32>
    %358 = vector.shape_cast %357 : vector<1x8x32xf32> to vector<8x32xf32>
    %cst_94 = arith.constant dense<0.000000e+00> : vector<16x32xf32>
    %359 = tpu.matmul %346, %358, %cst_94 {dimension_numbers = #tpu.dot_dimension_numbers<[1], [0], [0], [1], [0, 0, 1, 1], [], []>} : vector<16x8xf32>, vector<8x32xf32>, vector<16x32xf32> -> vector<16x32xf32>
    %360 = arith.addf %356, %359 : vector<16x32xf32>
    %361 = vector.shape_cast %353 : vector<16x32xf32> to vector<1x16x32xf32>
    %362 = vector.shape_cast %360 : vector<16x32xf32> to vector<1x16x32xf32>
    %363 = tpu.concatenate %361, %362 in 0 : vector<1x16x32xf32>, vector<1x16x32xf32> -> vector<2x16x32xf32>
    %c0_95 = arith.constant 0 : index
    %c0_96 = arith.constant 0 : index
    %364 = vector.load %arg18[%c0_95, %c0_96] : memref<224x16xf32, #tpu.memory_space<vmem>>, vector<224x16xf32>
    %c0_97 = arith.constant 0 : index
    %c0_98 = arith.constant 0 : index
    %365 = vector.load %arg19[%c0_97, %c0_98] : memref<256x16xf32, #tpu.memory_space<vmem>>, vector<256x16xf32>
    %c0_99 = arith.constant 0 : index
    %c0_100 = arith.constant 0 : index
    %366 = vector.load %arg20[%c0_99, %c0_100] : memref<1x16xf32, #tpu.memory_space<vmem>>, vector<1x16xf32>
    %c0_101 = arith.constant 0 : index
    %c0_102 = arith.constant 0 : index
    %367 = vector.load %arg21[%c0_101, %c0_102] : memref<1x16xf32, #tpu.memory_space<vmem>>, vector<1x16xf32>
    %c0_103 = arith.constant 0 : index
    %c0_104 = arith.constant 0 : index
    %368 = vector.load %arg22[%c0_103, %c0_104] : memref<1x16xf32, #tpu.memory_space<vmem>>, vector<1x16xf32>
    %369 = tpu.iota {dimensions = array<i32: 0>} : vector<23x16xi32>
    %370 = tpu.iota {dimensions = array<i32: 1>} : vector<23x16xi32>
    %c1_i32_105 = arith.constant 1 : i32
    %371 = vector.broadcast %c1_i32_105 : i32 to vector<23x16xi32>
    %372 = arith.muli %371, %369 : vector<23x16xi32>
    %c-3_i32_106 = arith.constant -3 : i32
    %373 = vector.broadcast %c-3_i32_106 : i32 to vector<23x16xi32>
    %374 = arith.addi %372, %373 : vector<23x16xi32>
    %375 = arith.cmpi eq, %370, %374 : vector<23x16xi32>
    %376 = arith.extui %375 : vector<23x16xi1> to vector<23x16xi32>
    %377 = arith.sitofp %376 : vector<23x16xi32> to vector<23x16xf32>
    %378 = vector.extract_strided_slice %363 {offsets = [0, 0, 0], sizes = [1, 16, 32], strides = [1, 1, 1]} : vector<2x16x32xf32> to vector<1x16x32xf32>
    %379 = vector.shape_cast %378 : vector<1x16x32xf32> to vector<16x32xf32>
    %cst_107 = arith.constant dense<0.000000e+00> : vector<23x32xf32>
    %380 = tpu.matmul %377, %379, %cst_107 {dimension_numbers = #tpu.dot_dimension_numbers<[1], [0], [0], [1], [0, 0, 1, 1], [], []>} : vector<23x16xf32>, vector<16x32xf32>, vector<23x32xf32> -> vector<23x32xf32>
    %381 = vector.extract_strided_slice %363 {offsets = [1, 0, 0], sizes = [1, 16, 32], strides = [1, 1, 1]} : vector<2x16x32xf32> to vector<1x16x32xf32>
    %382 = vector.shape_cast %381 : vector<1x16x32xf32> to vector<16x32xf32>
    %cst_108 = arith.constant dense<0.000000e+00> : vector<23x32xf32>
    %383 = tpu.matmul %377, %382, %cst_108 {dimension_numbers = #tpu.dot_dimension_numbers<[1], [0], [0], [1], [0, 0, 1, 1], [], []>} : vector<23x16xf32>, vector<16x32xf32>, vector<23x32xf32> -> vector<23x32xf32>
    %384 = vector.shape_cast %380 : vector<23x32xf32> to vector<1x23x32xf32>
    %385 = vector.shape_cast %383 : vector<23x32xf32> to vector<1x23x32xf32>
    %386 = tpu.concatenate %384, %385 in 0 : vector<1x23x32xf32>, vector<1x23x32xf32> -> vector<2x23x32xf32>
    %387 = vector.extract_strided_slice %386 {offsets = [0, 0, 0], sizes = [2, 16, 32], strides = [1, 1, 1]} : vector<2x23x32xf32> to vector<2x16x32xf32>
    %388 = vector.extract_strided_slice %386 {offsets = [0, 1, 0], sizes = [2, 16, 32], strides = [1, 1, 1]} : vector<2x23x32xf32> to vector<2x16x32xf32>
    %389 = vector.extract_strided_slice %386 {offsets = [0, 2, 0], sizes = [2, 16, 32], strides = [1, 1, 1]} : vector<2x23x32xf32> to vector<2x16x32xf32>
    %390 = vector.extract_strided_slice %386 {offsets = [0, 3, 0], sizes = [2, 16, 32], strides = [1, 1, 1]} : vector<2x23x32xf32> to vector<2x16x32xf32>
    %391 = vector.extract_strided_slice %386 {offsets = [0, 4, 0], sizes = [2, 16, 32], strides = [1, 1, 1]} : vector<2x23x32xf32> to vector<2x16x32xf32>
    %392 = vector.extract_strided_slice %386 {offsets = [0, 5, 0], sizes = [2, 16, 32], strides = [1, 1, 1]} : vector<2x23x32xf32> to vector<2x16x32xf32>
    %393 = vector.extract_strided_slice %386 {offsets = [0, 6, 0], sizes = [2, 16, 32], strides = [1, 1, 1]} : vector<2x23x32xf32> to vector<2x16x32xf32>
    %394 = tpu.concatenate %387, %388, %389, %390, %391, %392, %393 in 2 : vector<2x16x32xf32>, vector<2x16x32xf32>, vector<2x16x32xf32>, vector<2x16x32xf32>, vector<2x16x32xf32>, vector<2x16x32xf32>, vector<2x16x32xf32> -> vector<2x16x224xf32>
    %395 = vector.extract_strided_slice %386 {offsets = [0, 0, 0], sizes = [2, 16, 32], strides = [1, 1, 1]} : vector<2x23x32xf32> to vector<2x16x32xf32>
    %396 = vector.extract_strided_slice %386 {offsets = [0, 1, 0], sizes = [2, 16, 32], strides = [1, 1, 1]} : vector<2x23x32xf32> to vector<2x16x32xf32>
    %397 = vector.extract_strided_slice %386 {offsets = [0, 2, 0], sizes = [2, 16, 32], strides = [1, 1, 1]} : vector<2x23x32xf32> to vector<2x16x32xf32>
    %398 = vector.extract_strided_slice %386 {offsets = [0, 3, 0], sizes = [2, 16, 32], strides = [1, 1, 1]} : vector<2x23x32xf32> to vector<2x16x32xf32>
    %399 = vector.extract_strided_slice %386 {offsets = [0, 4, 0], sizes = [2, 16, 32], strides = [1, 1, 1]} : vector<2x23x32xf32> to vector<2x16x32xf32>
    %400 = vector.extract_strided_slice %386 {offsets = [0, 5, 0], sizes = [2, 16, 32], strides = [1, 1, 1]} : vector<2x23x32xf32> to vector<2x16x32xf32>
    %401 = vector.extract_strided_slice %386 {offsets = [0, 6, 0], sizes = [2, 16, 32], strides = [1, 1, 1]} : vector<2x23x32xf32> to vector<2x16x32xf32>
    %402 = vector.extract_strided_slice %386 {offsets = [0, 7, 0], sizes = [2, 16, 32], strides = [1, 1, 1]} : vector<2x23x32xf32> to vector<2x16x32xf32>
    %403 = tpu.concatenate %395, %396, %397, %398, %399, %400, %401, %402 in 2 : vector<2x16x32xf32>, vector<2x16x32xf32>, vector<2x16x32xf32>, vector<2x16x32xf32>, vector<2x16x32xf32>, vector<2x16x32xf32>, vector<2x16x32xf32>, vector<2x16x32xf32> -> vector<2x16x256xf32>
    %404 = vector.shape_cast %394 : vector<2x16x224xf32> to vector<32x224xf32>
    %405 = vector.shape_cast %403 : vector<2x16x256xf32> to vector<32x256xf32>
    %cst_109 = arith.constant dense<0.000000e+00> : vector<32x16xf32>
    %406 = tpu.matmul %404, %364, %cst_109 {dimension_numbers = #tpu.dot_dimension_numbers<[1], [0], [0], [1], [0, 0, 1, 1], [], []>} : vector<32x224xf32>, vector<224x16xf32>, vector<32x16xf32> -> vector<32x16xf32>
    %407 = vector.broadcast %366 : vector<1x16xf32> to vector<32x16xf32>
    %408 = arith.addf %406, %407 : vector<32x16xf32>
    %cst_110 = arith.constant dense<0.000000e+00> : vector<32x16xf32>
    %409 = tpu.matmul %405, %365, %cst_110 {dimension_numbers = #tpu.dot_dimension_numbers<[1], [0], [0], [1], [0, 0, 1, 1], [], []>} : vector<32x256xf32>, vector<256x16xf32>, vector<32x16xf32> -> vector<32x16xf32>
    %410 = vector.broadcast %366 : vector<1x16xf32> to vector<32x16xf32>
    %411 = arith.addf %409, %410 : vector<32x16xf32>
    %412 = tpu.concatenate %408, %411 in 0 : vector<32x16xf32>, vector<32x16xf32> -> vector<64x16xf32>
    %cst_111 = arith.constant dense<0.000000e+00> : vector<16xf32>
    %413 = vector.multi_reduction <add>, %412, %cst_111 [0] : vector<64x16xf32> to vector<16xf32>
    %414 = vector.shape_cast %413 : vector<16xf32> to vector<1x16xf32>
    %cst_112 = arith.constant 6.400000e+01 : f32
    %415 = vector.broadcast %cst_112 : f32 to vector<1x16xf32>
    %416 = arith.divf %414, %415 : vector<1x16xf32>
    %417 = vector.broadcast %416 : vector<1x16xf32> to vector<64x16xf32>
    %418 = arith.subf %412, %417 : vector<64x16xf32>
    %419 = arith.mulf %418, %418 : vector<64x16xf32>
    %cst_113 = arith.constant dense<0.000000e+00> : vector<16xf32>
    %420 = vector.multi_reduction <add>, %419, %cst_113 [0] : vector<64x16xf32> to vector<16xf32>
    %421 = vector.shape_cast %420 : vector<16xf32> to vector<1x16xf32>
    %cst_114 = arith.constant 6.400000e+01 : f32
    %422 = vector.broadcast %cst_114 : f32 to vector<1x16xf32>
    %423 = arith.divf %421, %422 : vector<1x16xf32>
    %cst_115 = arith.constant 9.99999974E-6 : f32
    %424 = vector.broadcast %cst_115 : f32 to vector<1x16xf32>
    %425 = arith.addf %423, %424 : vector<1x16xf32>
    %426 = math.rsqrt %425 : vector<1x16xf32>
    %427 = arith.mulf %367, %426 : vector<1x16xf32>
    %428 = arith.mulf %416, %427 : vector<1x16xf32>
    %429 = arith.subf %368, %428 : vector<1x16xf32>
    %430 = vector.broadcast %427 : vector<1x16xf32> to vector<32x16xf32>
    %431 = arith.mulf %408, %430 : vector<32x16xf32>
    %432 = vector.broadcast %429 : vector<1x16xf32> to vector<32x16xf32>
    %433 = arith.addf %431, %432 : vector<32x16xf32>
    %cst_116 = arith.constant 0.000000e+00 : f32
    %434 = vector.broadcast %cst_116 : f32 to vector<32x16xf32>
    %435 = arith.maximumf %433, %434 : vector<32x16xf32>
    %436 = vector.shape_cast %435 : vector<32x16xf32> to vector<2x16x16xf32>
    %437 = vector.broadcast %427 : vector<1x16xf32> to vector<32x16xf32>
    %438 = arith.mulf %411, %437 : vector<32x16xf32>
    %439 = vector.broadcast %429 : vector<1x16xf32> to vector<32x16xf32>
    %440 = arith.addf %438, %439 : vector<32x16xf32>
    %cst_117 = arith.constant 0.000000e+00 : f32
    %441 = vector.broadcast %cst_117 : f32 to vector<32x16xf32>
    %442 = arith.maximumf %440, %441 : vector<32x16xf32>
    %443 = vector.shape_cast %442 : vector<32x16xf32> to vector<2x16x16xf32>
    %444 = tpu.iota {dimensions = array<i32: 0>} : vector<32x16xi32>
    %445 = tpu.iota {dimensions = array<i32: 1>} : vector<32x16xi32>
    %c2_i32_118 = arith.constant 2 : i32
    %446 = vector.broadcast %c2_i32_118 : i32 to vector<32x16xi32>
    %447 = arith.muli %446, %445 : vector<32x16xi32>
    %448 = arith.cmpi eq, %444, %447 : vector<32x16xi32>
    %449 = arith.extui %448 : vector<32x16xi1> to vector<32x16xi32>
    %450 = arith.sitofp %449 : vector<32x16xi32> to vector<32x16xf32>
    %c2_i32_119 = arith.constant 2 : i32
    %451 = vector.broadcast %c2_i32_119 : i32 to vector<32x16xi32>
    %452 = arith.muli %451, %445 : vector<32x16xi32>
    %c1_i32_120 = arith.constant 1 : i32
    %453 = vector.broadcast %c1_i32_120 : i32 to vector<32x16xi32>
    %454 = arith.addi %452, %453 : vector<32x16xi32>
    %455 = arith.cmpi eq, %444, %454 : vector<32x16xi32>
    %456 = arith.extui %455 : vector<32x16xi1> to vector<32x16xi32>
    %457 = arith.sitofp %456 : vector<32x16xi32> to vector<32x16xf32>
    %458 = vector.extract_strided_slice %436 {offsets = [0, 0, 0], sizes = [1, 16, 16], strides = [1, 1, 1]} : vector<2x16x16xf32> to vector<1x16x16xf32>
    %459 = vector.shape_cast %458 : vector<1x16x16xf32> to vector<16x16xf32>
    %cst_121 = arith.constant dense<0.000000e+00> : vector<32x16xf32>
    %460 = tpu.matmul %450, %459, %cst_121 {dimension_numbers = #tpu.dot_dimension_numbers<[1], [0], [0], [1], [0, 0, 1, 1], [], []>} : vector<32x16xf32>, vector<16x16xf32>, vector<32x16xf32> -> vector<32x16xf32>
    %461 = vector.extract_strided_slice %443 {offsets = [0, 0, 0], sizes = [1, 16, 16], strides = [1, 1, 1]} : vector<2x16x16xf32> to vector<1x16x16xf32>
    %462 = vector.shape_cast %461 : vector<1x16x16xf32> to vector<16x16xf32>
    %cst_122 = arith.constant dense<0.000000e+00> : vector<32x16xf32>
    %463 = tpu.matmul %457, %462, %cst_122 {dimension_numbers = #tpu.dot_dimension_numbers<[1], [0], [0], [1], [0, 0, 1, 1], [], []>} : vector<32x16xf32>, vector<16x16xf32>, vector<32x16xf32> -> vector<32x16xf32>
    %464 = arith.addf %460, %463 : vector<32x16xf32>
    %465 = vector.extract_strided_slice %436 {offsets = [1, 0, 0], sizes = [1, 16, 16], strides = [1, 1, 1]} : vector<2x16x16xf32> to vector<1x16x16xf32>
    %466 = vector.shape_cast %465 : vector<1x16x16xf32> to vector<16x16xf32>
    %cst_123 = arith.constant dense<0.000000e+00> : vector<32x16xf32>
    %467 = tpu.matmul %450, %466, %cst_123 {dimension_numbers = #tpu.dot_dimension_numbers<[1], [0], [0], [1], [0, 0, 1, 1], [], []>} : vector<32x16xf32>, vector<16x16xf32>, vector<32x16xf32> -> vector<32x16xf32>
    %468 = vector.extract_strided_slice %443 {offsets = [1, 0, 0], sizes = [1, 16, 16], strides = [1, 1, 1]} : vector<2x16x16xf32> to vector<1x16x16xf32>
    %469 = vector.shape_cast %468 : vector<1x16x16xf32> to vector<16x16xf32>
    %cst_124 = arith.constant dense<0.000000e+00> : vector<32x16xf32>
    %470 = tpu.matmul %457, %469, %cst_124 {dimension_numbers = #tpu.dot_dimension_numbers<[1], [0], [0], [1], [0, 0, 1, 1], [], []>} : vector<32x16xf32>, vector<16x16xf32>, vector<32x16xf32> -> vector<32x16xf32>
    %471 = arith.addf %467, %470 : vector<32x16xf32>
    %472 = vector.shape_cast %464 : vector<32x16xf32> to vector<1x32x16xf32>
    %473 = vector.shape_cast %471 : vector<32x16xf32> to vector<1x32x16xf32>
    %474 = tpu.concatenate %472, %473 in 0 : vector<1x32x16xf32>, vector<1x32x16xf32> -> vector<2x32x16xf32>
    %c0_125 = arith.constant 0 : index
    %c0_126 = arith.constant 0 : index
    %475 = vector.load %arg23[%c0_125, %c0_126] : memref<1x112xf32, #tpu.memory_space<vmem>>, vector<1x112xf32>
    %c0_127 = arith.constant 0 : index
    %c0_128 = arith.constant 0 : index
    %476 = vector.load %arg24[%c0_127, %c0_128] : memref<1x128xf32, #tpu.memory_space<vmem>>, vector<1x128xf32>
    %c0_129 = arith.constant 0 : index
    %c0_130 = arith.constant 0 : index
    %477 = vector.load %arg25[%c0_129, %c0_130] : memref<1x1xf32, #tpu.memory_space<vmem>>, vector<1x1xf32>
    %478 = tpu.iota {dimensions = array<i32: 0>} : vector<39x32xi32>
    %479 = tpu.iota {dimensions = array<i32: 1>} : vector<39x32xi32>
    %c1_i32_131 = arith.constant 1 : i32
    %480 = vector.broadcast %c1_i32_131 : i32 to vector<39x32xi32>
    %481 = arith.muli %480, %478 : vector<39x32xi32>
    %c-3_i32_132 = arith.constant -3 : i32
    %482 = vector.broadcast %c-3_i32_132 : i32 to vector<39x32xi32>
    %483 = arith.addi %481, %482 : vector<39x32xi32>
    %484 = arith.cmpi eq, %479, %483 : vector<39x32xi32>
    %485 = arith.extui %484 : vector<39x32xi1> to vector<39x32xi32>
    %486 = arith.sitofp %485 : vector<39x32xi32> to vector<39x32xf32>
    %487 = vector.extract_strided_slice %474 {offsets = [0, 0, 0], sizes = [1, 32, 16], strides = [1, 1, 1]} : vector<2x32x16xf32> to vector<1x32x16xf32>
    %488 = vector.shape_cast %487 : vector<1x32x16xf32> to vector<32x16xf32>
    %cst_133 = arith.constant dense<0.000000e+00> : vector<39x16xf32>
    %489 = tpu.matmul %486, %488, %cst_133 {dimension_numbers = #tpu.dot_dimension_numbers<[1], [0], [0], [1], [0, 0, 1, 1], [], []>} : vector<39x32xf32>, vector<32x16xf32>, vector<39x16xf32> -> vector<39x16xf32>
    %490 = vector.extract_strided_slice %474 {offsets = [1, 0, 0], sizes = [1, 32, 16], strides = [1, 1, 1]} : vector<2x32x16xf32> to vector<1x32x16xf32>
    %491 = vector.shape_cast %490 : vector<1x32x16xf32> to vector<32x16xf32>
    %cst_134 = arith.constant dense<0.000000e+00> : vector<39x16xf32>
    %492 = tpu.matmul %486, %491, %cst_134 {dimension_numbers = #tpu.dot_dimension_numbers<[1], [0], [0], [1], [0, 0, 1, 1], [], []>} : vector<39x32xf32>, vector<32x16xf32>, vector<39x16xf32> -> vector<39x16xf32>
    %493 = vector.shape_cast %489 : vector<39x16xf32> to vector<1x39x16xf32>
    %494 = vector.shape_cast %492 : vector<39x16xf32> to vector<1x39x16xf32>
    %495 = tpu.concatenate %493, %494 in 0 : vector<1x39x16xf32>, vector<1x39x16xf32> -> vector<2x39x16xf32>
    %496 = vector.extract_strided_slice %495 {offsets = [0, 0, 0], sizes = [2, 32, 16], strides = [1, 1, 1]} : vector<2x39x16xf32> to vector<2x32x16xf32>
    %497 = vector.extract_strided_slice %495 {offsets = [0, 1, 0], sizes = [2, 32, 16], strides = [1, 1, 1]} : vector<2x39x16xf32> to vector<2x32x16xf32>
    %498 = vector.extract_strided_slice %495 {offsets = [0, 2, 0], sizes = [2, 32, 16], strides = [1, 1, 1]} : vector<2x39x16xf32> to vector<2x32x16xf32>
    %499 = vector.extract_strided_slice %495 {offsets = [0, 3, 0], sizes = [2, 32, 16], strides = [1, 1, 1]} : vector<2x39x16xf32> to vector<2x32x16xf32>
    %500 = vector.extract_strided_slice %495 {offsets = [0, 4, 0], sizes = [2, 32, 16], strides = [1, 1, 1]} : vector<2x39x16xf32> to vector<2x32x16xf32>
    %501 = vector.extract_strided_slice %495 {offsets = [0, 5, 0], sizes = [2, 32, 16], strides = [1, 1, 1]} : vector<2x39x16xf32> to vector<2x32x16xf32>
    %502 = vector.extract_strided_slice %495 {offsets = [0, 6, 0], sizes = [2, 32, 16], strides = [1, 1, 1]} : vector<2x39x16xf32> to vector<2x32x16xf32>
    %503 = tpu.concatenate %496, %497, %498, %499, %500, %501, %502 in 2 : vector<2x32x16xf32>, vector<2x32x16xf32>, vector<2x32x16xf32>, vector<2x32x16xf32>, vector<2x32x16xf32>, vector<2x32x16xf32>, vector<2x32x16xf32> -> vector<2x32x112xf32>
    %504 = vector.extract_strided_slice %495 {offsets = [0, 0, 0], sizes = [2, 32, 16], strides = [1, 1, 1]} : vector<2x39x16xf32> to vector<2x32x16xf32>
    %505 = vector.extract_strided_slice %495 {offsets = [0, 1, 0], sizes = [2, 32, 16], strides = [1, 1, 1]} : vector<2x39x16xf32> to vector<2x32x16xf32>
    %506 = vector.extract_strided_slice %495 {offsets = [0, 2, 0], sizes = [2, 32, 16], strides = [1, 1, 1]} : vector<2x39x16xf32> to vector<2x32x16xf32>
    %507 = vector.extract_strided_slice %495 {offsets = [0, 3, 0], sizes = [2, 32, 16], strides = [1, 1, 1]} : vector<2x39x16xf32> to vector<2x32x16xf32>
    %508 = vector.extract_strided_slice %495 {offsets = [0, 4, 0], sizes = [2, 32, 16], strides = [1, 1, 1]} : vector<2x39x16xf32> to vector<2x32x16xf32>
    %509 = vector.extract_strided_slice %495 {offsets = [0, 5, 0], sizes = [2, 32, 16], strides = [1, 1, 1]} : vector<2x39x16xf32> to vector<2x32x16xf32>
    %510 = vector.extract_strided_slice %495 {offsets = [0, 6, 0], sizes = [2, 32, 16], strides = [1, 1, 1]} : vector<2x39x16xf32> to vector<2x32x16xf32>
    %511 = vector.extract_strided_slice %495 {offsets = [0, 7, 0], sizes = [2, 32, 16], strides = [1, 1, 1]} : vector<2x39x16xf32> to vector<2x32x16xf32>
    %512 = tpu.concatenate %504, %505, %506, %507, %508, %509, %510, %511 in 2 : vector<2x32x16xf32>, vector<2x32x16xf32>, vector<2x32x16xf32>, vector<2x32x16xf32>, vector<2x32x16xf32>, vector<2x32x16xf32>, vector<2x32x16xf32>, vector<2x32x16xf32> -> vector<2x32x128xf32>
    %513 = vector.shape_cast %475 : vector<1x112xf32> to vector<1x1x112xf32>
    %514 = vector.broadcast %513 : vector<1x1x112xf32> to vector<2x32x112xf32>
    %515 = arith.mulf %503, %514 : vector<2x32x112xf32>
    %cst_135 = arith.constant dense<0.000000e+00> : vector<2x32xf32>
    %516 = vector.multi_reduction <add>, %515, %cst_135 [2] : vector<2x32x112xf32> to vector<2x32xf32>
    %517 = vector.broadcast %477 : vector<1x1xf32> to vector<2x32xf32>
    %518 = arith.addf %516, %517 : vector<2x32xf32>
    %519 = math.tanh %518 : vector<2x32xf32>
    %520 = vector.shape_cast %476 : vector<1x128xf32> to vector<1x1x128xf32>
    %521 = vector.broadcast %520 : vector<1x1x128xf32> to vector<2x32x128xf32>
    %522 = arith.mulf %512, %521 : vector<2x32x128xf32>
    %cst_136 = arith.constant dense<0.000000e+00> : vector<2x32xf32>
    %523 = vector.multi_reduction <add>, %522, %cst_136 [2] : vector<2x32x128xf32> to vector<2x32xf32>
    %524 = vector.broadcast %477 : vector<1x1xf32> to vector<2x32xf32>
    %525 = arith.addf %523, %524 : vector<2x32xf32>
    %526 = math.tanh %525 : vector<2x32xf32>
    %527 = tpu.iota {dimensions = array<i32: 0>} : vector<32x64xi32>
    %528 = tpu.iota {dimensions = array<i32: 1>} : vector<32x64xi32>
    %c2_i32_137 = arith.constant 2 : i32
    %529 = vector.broadcast %c2_i32_137 : i32 to vector<32x64xi32>
    %530 = arith.muli %529, %527 : vector<32x64xi32>
    %531 = arith.cmpi eq, %528, %530 : vector<32x64xi32>
    %532 = arith.extui %531 : vector<32x64xi1> to vector<32x64xi32>
    %533 = arith.sitofp %532 : vector<32x64xi32> to vector<32x64xf32>
    %c2_i32_138 = arith.constant 2 : i32
    %534 = vector.broadcast %c2_i32_138 : i32 to vector<32x64xi32>
    %535 = arith.muli %534, %527 : vector<32x64xi32>
    %c1_i32_139 = arith.constant 1 : i32
    %536 = vector.broadcast %c1_i32_139 : i32 to vector<32x64xi32>
    %537 = arith.addi %535, %536 : vector<32x64xi32>
    %538 = arith.cmpi eq, %528, %537 : vector<32x64xi32>
    %539 = arith.extui %538 : vector<32x64xi1> to vector<32x64xi32>
    %540 = arith.sitofp %539 : vector<32x64xi32> to vector<32x64xf32>
    %cst_140 = arith.constant dense<0.000000e+00> : vector<2x64xf32>
    %541 = tpu.matmul %519, %533, %cst_140 {dimension_numbers = #tpu.dot_dimension_numbers<[1], [0], [0], [1], [0, 0, 1, 1], [], []>} : vector<2x32xf32>, vector<32x64xf32>, vector<2x64xf32> -> vector<2x64xf32>
    %cst_141 = arith.constant dense<0.000000e+00> : vector<2x64xf32>
    %542 = tpu.matmul %526, %540, %cst_141 {dimension_numbers = #tpu.dot_dimension_numbers<[1], [0], [0], [1], [0, 0, 1, 1], [], []>} : vector<2x32xf32>, vector<32x64xf32>, vector<2x64xf32> -> vector<2x64xf32>
    %543 = arith.addf %541, %542 : vector<2x64xf32>
    %c0_142 = arith.constant 0 : index
    %c0_143 = arith.constant 0 : index
    %544 = vector.load %arg26[%c0_142, %c0_143] : memref<2x64xf32, #tpu.memory_space<vmem>>, vector<2x64xf32>
    tpu.vector_store %arg26[%c0_142, %c0_143], %543 {strides = array<i32>} : memref<2x64xf32, #tpu.memory_space<vmem>>, vector<2x64xf32>,
    return
  }
}

</mosaic_0001>

<bundles_post_ra>
// kernel: ppg_generator_forward.1
= control target key start
LH: loop header
LB: loop body
LE: loop exit
PB: predicated region body
PF: predicated region fallthrough
CT: control target
= control target key end

     0   :  { %s8246_s0 = inlined_call_operand.vmem [shape: f32[2,64,1], index: 0, kind: input, shape index: {}]   ;;  %s8247_s1 = inlined_call_operand.vmem [shape: f32[15,16], index: 1, kind: input, shape index: {}]   ;;  %s8248_s2 = inlined_call_operand.vmem [shape: f32[1,16], index: 2, kind: input, shape index: {}]   ;;  %s8249_s3 = inlined_call_operand.vmem [shape: f32[1,16], index: 3, kind: input, shape index: {}]   ;;  %s8250_s4 = inlined_call_operand.vmem [shape: f32[1,16], index: 4, kind: input, shape index: {}]   ;;  %s8251_s5 = inlined_call_operand.vmem [shape: f32[240,32], index: 5, kind: input, shape index: {}]   ;;  %s8252_s6 = inlined_call_operand.vmem [shape: f32[1,32], index: 6, kind: input, shape index: {}]   ;;  %s8253_s7 = inlined_call_operand.vmem [shape: f32[1,32], index: 7, kind: input, shape index: {}]   ;;  %s8254_s8 = inlined_call_operand.vmem [shape: f32[1,32], index: 8, kind: input, shape index: {}]   ;;  %s8255_s9 = inlined_call_operand.vmem [shape: f32[480,64], index: 9, kind: input, shape index: {}]   ;;  %s8256_s10 = inlined_call_operand.vmem [shape: f32[1,64], index: 10, kind: input, shape index: {}]   ;;  %s8257_s11 = inlined_call_operand.vmem [shape: f32[1,64], index: 11, kind: input, shape index: {}]   ;;  %s8258_s12 = inlined_call_operand.vmem [shape: f32[1,64], index: 12, kind: input, shape index: {}]   ;;  %s8259_s13 = inlined_call_operand.vmem [shape: f32[448,32], index: 13, kind: input, shape index: {}]   ;;  %s8260_s14 = inlined_call_operand.vmem [shape: f32[512,32], index: 14, kind: input, shape index: {}]   ;;  %s8261_s15 = inlined_call_operand.vmem [shape: f32[1,32], index: 15, kind: input, shape index: {}]   ;;  %s8262_s16 = inlined_call_operand.vmem [shape: f32[1,32], index: 16, kind: input, shape index: {}]   ;;  %s8263_s17 = inlined_call_operand.vmem [shape: f32[1,32], index: 17, kind: input, shape index: {}]   ;;  %s8264_s18 = inlined_call_operand.vmem [shape: f32[224,16], index: 18, kind: input, shape index: {}]   ;;  %s8265_s19 = inlined_call_operand.vmem [shape: f32[256,16], index: 19, kind: input, shape index: {}]   ;;  %s8266_s20 = inlined_call_operand.vmem [shape: f32[1,16], index: 20, kind: input, shape index: {}]   ;;  %s8267_s21 = inlined_call_operand.vmem [shape: f32[1,16], index: 21, kind: input, shape index: {}]   ;;  %s8268_s22 = inlined_call_operand.vmem [shape: f32[1,16], index: 22, kind: input, shape index: {}]   ;;  %s8269_s23 = inlined_call_operand.vmem [shape: f32[1,112], index: 23, kind: input, shape index: {}]   ;;  %s8270_s24 = inlined_call_operand.vmem [shape: f32[1,128], index: 24, kind: input, shape index: {}]   ;;  %s8271_s25 = inlined_call_operand.<no memory space> [shape: f32[1,1], index: 25, kind: input, shape index: {}]   ;;  %s8272_s26 = inlined_call_operand.hbm [shape: f32[2,64], index: 26, kind: output, shape index: {}]  }
   0x1   :  { %8331 = sst [smem:[#allocation6_spill]] %s8246_s0  ;;  %v31_v0 = vstv %s8271_s25 }
   0x2   :  { %8332 = sst [smem:[#allocation7_spill]] %s8247_s1  ;;  %32 = vst [vmem:[#allocation2] sm:$0x1] %v31_v0 }
   0x3   :  { %8333 = sst [smem:[#allocation8_spill]] %s8248_s2 }
   0x4   :  { %8334 = sst [smem:[#allocation9_spill]] %s8249_s3 }
   0x5   :  { %8335 = sst [smem:[#allocation10_spill]] %s8250_s4 }
   0x6   :  { %8336 = sst [smem:[#allocation11_spill]] %s8251_s5 }
   0x7   :  { %8337 = sst [smem:[#allocation12_spill]] %s8252_s6 }
   0x8   :  { %8338 = sst [smem:[#allocation13_spill]] %s8253_s7 }
   0x9   :  { %8339 = sst [smem:[#allocation14_spill]] %s8254_s8 }
   0xa   :  { %8340 = sst [smem:[#allocation15_spill]] %s8255_s9 }
   0xb   :  { %8341 = sst [smem:[#allocation16_spill]] %s8256_s10 }
   0xc   :  { %s8342_s8 = sld [smem:[#allocation6_spill]]  ;;  %v107_v4 = vlaneseq }
   0xe   :  { %v4997_v7 = vshrl.u32 %v107_v4, 7  ;;  %v5014_v13 = vand.u32 127, %v107_v4 }
  0x10   :  { %v5006_v10 = vmul.u32 2, %v4997_v7  ;;  %v5018_v15 = vadd.s32 8, %v4997_v7 }
  0x12   :  { %v93_v1 = vld [vmem:[%s8342_s8 + $0x38] sm:$0xff]  ;;  %v92_v3 = vld [vmem:[%s8342_s8 + $0x30] sm:$0xff]  ;;  %v91_v6 = vld [vmem:[%s8342_s8 + $0x28] sm:$0xff]  ;;  %v120_v14 = vadd.s32 4294967289, %v5006_v10  ;;  %v220_v17 = vadd.s32 4294967290, %v5006_v10  ;;  %v5035_v21 = vmul.u32 2, %v5018_v15 }
  0x13   :  { %v101_v2 = vld [vmem:[%s8342_s8 + $0x78] sm:$0xff]  ;;  %164 = vmatpush.msra.mxu0 %v93_v1  ;;  %263 = vmatpush.msra.mxu2 %v93_v1  ;;  %v100_v5 = vld [vmem:[%s8342_s8 + $0x70] sm:$0xff]  ;;  %v99_v8 = vld [vmem:[%s8342_s8 + $0x68] sm:$0xff] }
  0x14   :  { %295 = vmatpush.msra.mxu3 %v101_v2  ;;  %196 = vmatpush.msra.mxu1 %v101_v2  ;;  %v90_v9 = vld [vmem:[%s8342_s8 + $0x20] sm:$0xff]  ;;  %v89_v12 = vld [vmem:[%s8342_s8 + $0x18] sm:$0xff]  ;;  %v88_v18 = vld [vmem:[%s8342_s8 + $0x10] sm:$0xff]  ;;  %vm125_vm0 = vcmp.eq.s32.totalorder %v5014_v13, %v120_v14 }
  0x15   :  { %165 = vmatpush.msra.mxu0 %v92_v3  ;;  %264 = vmatpush.msra.mxu2 %v92_v3  ;;  %v98_v11 = vld [vmem:[%s8342_s8 + $0x60] sm:$0xff]  ;;  %v97_v16 = vld [vmem:[%s8342_s8 + $0x58] sm:$0xff]  ;;  %v96_v19 = vld [vmem:[%s8342_s8 + $0x50] sm:$0xff] }
  0x16   :  { %296 = vmatpush.msra.mxu3 %v100_v5  ;;  %197 = vmatpush.msra.mxu1 %v100_v5  ;;  %v87_v20 = vld [vmem:[%s8342_s8 + $0x8] sm:$0xff] }
  0x17   :  { %166 = vmatpush.msra.mxu0 %v91_v6  ;;  %265 = vmatpush.msra.mxu2 %v91_v6 }
  0x18   :  { %297 = vmatpush.msra.mxu3 %v99_v8  ;;  %198 = vmatpush.msra.mxu1 %v99_v8 }
  0x19   :  { %167 = vmatpush.msra.mxu0 %v90_v9  ;;  %266 = vmatpush.msra.mxu2 %v90_v9 }
  0x1a   :  { %298 = vmatpush.msra.mxu3 %v98_v11  ;;  %199 = vmatpush.msra.mxu1 %v98_v11 }
  0x1b   :  { %168 = vmatpush.msra.mxu0 %v89_v12  ;;  %267 = vmatpush.msra.mxu2 %v89_v12 }
  0x1c   :  { %299 = vmatpush.msra.mxu3 %v97_v16  ;;  %200 = vmatpush.msra.mxu1 %v97_v16 }
  0x1d   :  { %33 = vsyncpa [#allocation4], 0  ;;  %169 = vmatpush.msra.mxu0 %v88_v18  ;;  %268 = vmatpush.msra.mxu2 %v88_v18  ;;  %v95_v22 = vld [vmem:[%s8342_s8 + $0x48] sm:$0xff]  ;;  %vm225_vm1 = vcmp.eq.s32.totalorder %v5014_v13, %v220_v17  ;;  %v86_v23 = vld [vmem:[%s8342_s8] sm:$0xff]  ;;  %v8277_v25 = vmov 0.0   ;;  %vm8298_vm2 = vcmask 523264  }
  0x1e   :  { %300 = vmatpush.msra.mxu3 %v96_v19  ;;  %201 = vmatpush.msra.mxu1 %v96_v19  ;;  %v94_v24 = vld [vmem:[%s8342_s8 + $0x40] sm:$0xff]  ;;  %v5048_v26 = vsel %vm125_vm0, 1.0, %v8277_v25  ;;  %v5051_v27 = vsel %vm225_vm1, 1.0, %v8277_v25  ;;  %v121_v28 = vadd.s32 4294967289, %v5035_v21  ;;  %v5055_v29 = vadd.s32 16, %v4997_v7  ;;  %s8287_s8 = smov 1  }
  0x1f   :  { %170 = vmatpush.msra.mxu0 %v87_v20  ;;  %269 = vmatpush.msra.mxu2 %v87_v20  ;;  %v221_v30 = vadd.s32 4294967290, %v5035_v21  ;;  %v5079_v35 = vadd.s32 24, %v4997_v7  ;;  %v5103_v41 = vadd.s32 32, %v4997_v7  ;;  %vm8323_vm11 = vcmask 1045504   ;;  %s4818_s4 = smov 4   ;;  %s4819_s29 = smov 6  }
  0x20   :  { %301 = vmatpush.msra.mxu3 %v95_v22  ;;  %202 = vmatpush.msra.mxu1 %v95_v22  ;;  %vm126_vm3 = vcmp.eq.s32.totalorder %v5014_v13, %v121_v28  ;;  %v5066_v31 = vmul.u32 2, %v5055_v29  ;;  %vm8322_vm12 = vcmask 1044480   ;;  %vm8320_vm13 = vcmask 1046528   ;;  %s4820_s0 = smov 2   ;;  %s4821_s9 = smov 8  }
  0x21   :  { %171 = vmatpush.msra.mxu0 %v86_v23  ;;  %270 = vmatpush.msra.mxu2 %v86_v23  ;;  %vm226_vm4 = vcmp.eq.s32.totalorder %v5014_v13, %v221_v30  ;;  %v5072_v32 = vsel %vm126_vm3, 1.0, %v8277_v25  ;;  %v5090_v37 = vmul.u32 2, %v5079_v35  ;;  %v119_v43 = vmul.u32 2, %v5103_v41  ;;  %s4822_s30 = smov 10   ;;  %s4823_s2 = smov 12  }
  0x22   :  { %302 = vmatpush.msra.mxu3 %v94_v24  ;;  %4407 = vmatmul.msk.f32.vlgmr.msra.gmra.mxu0 %vm8298_vm2, %v5048_v26  ;;  %v5075_v33 = vsel %vm226_vm4, 1.0, %v8277_v25  ;;  %v122_v34 = vadd.s32 4294967289, %v5066_v31  ;;  %v222_v36 = vadd.s32 4294967290, %v5066_v31  ;;  %vm8324_vm14 = vcmask 1043456   ;;  %s4824_s25 = smov 14   ;;  %s4825_s5 = smov 5  }
  0x23   :  { %4422 = vmatmul.msk.f32.vlgmr.msra.gmra.mxu2 %vm8298_vm2, %v5051_v27  ;;  %4427 = vmatmul.msk.f32.vlgmr.msra.gmra.mxu3 %vm8298_vm2, %v5051_v27  ;;  %v123_v40 = vadd.s32 4294967289, %v5090_v37  ;;  %v223_v42 = vadd.s32 4294967290, %v5090_v37  ;;  %v124_v46 = vadd.s32 4294967289, %v119_v43  ;;  %v224_v48 = vadd.s32 4294967290, %v119_v43  ;;  %s4826_s10 = smov 7   ;;  %s4827_s6 = smov 13  }
  0x24   :  { %203 = vmatpush.msra.mxu1 %v94_v24  ;;  %vm127_vm5 = vcmp.eq.s32.totalorder %v5014_v13, %v122_v34  ;;  %vm227_vm6 = vcmp.eq.s32.totalorder %v5014_v13, %v222_v36  ;;  %vm8325_vm15 = vcmask 1042432   ;;  %vm8326_vm0 = vcmask 1041408   ;;  %s8289_s1 = smov 9   ;;  %s8291_s27 = smov 3  }
  0x25   :  { %4412 = vmatmul.msk.f32.vlgmr.msra.gmra.mxu1 %vm8298_vm2, %v5048_v26  ;;  %v5096_v38 = vsel %vm127_vm5, 1.0, %v8277_v25  ;;  %v5099_v39 = vsel %vm227_vm6, 1.0, %v8277_v25  ;;  %vm128_vm7 = vcmp.eq.s32.totalorder %v5014_v13, %v123_v40  ;;  %vm228_vm8 = vcmp.eq.s32.totalorder %v5014_v13, %v223_v42  ;;  %s4830_s3 = smov 11   ;;  %s4834_s7 = smov 48  }
  0x26   :  { %v4405_v44 = vsel %vm128_vm7, 1.0, %v8277_v25  ;;  %v4420_v45 = vsel %vm228_vm8, 1.0, %v8277_v25  ;;  %vm129_vm9 = vcmp.eq.s32.totalorder %v5014_v13, %v124_v46  ;;  %vm229_vm10 = vcmp.eq.s32.totalorder %v5014_v13, %v224_v48  ;;  %s4835_s28 = smov 16  }
  0x27   :  { %v4406_v47 = vsel %vm129_vm9, 1.0, %v8277_v25  ;;  %v4421_v49 = vsel %vm229_vm10, 1.0, %v8277_v25  ;;  %vm8309_vm1 = vcmask 1040384   ;;  %vm8314_vm3 = vcmask 15360  }
  0x28   :  { %vm8313_vm4 = vcmask 7168   ;;  %vm8302_vm5 = vcmask 23552   ;;  %vm8299_vm6 = vcmask 31744   ;;  %vm8300_vm7 = vcmask 39936  }
  0x29   :  { %vm8301_vm8 = vcmask 48128   ;;  %vm970_vm9 = vcmask 56320   ;;  %vm8303_vm10 = vcmask 64512  }
  0x2a   :  { %4408 = vmatmul.msk.f32.gmra.mxu0 %vm8298_vm2, %v5072_v32 }
  0x2b   :  { %4423 = vmatmul.msk.f32.gmra.mxu2 %vm8298_vm2, %v5075_v33  ;;  %4428 = vmatmul.msk.f32.gmra.mxu3 %vm8298_vm2, %v5075_v33 }
  0x2d   :  { %4413 = vmatmul.msk.f32.gmra.mxu1 %vm8298_vm2, %v5072_v32 }
  0x32   :  { %4409 = vmatmul.msk.f32.gmra.mxu0 %vm8298_vm2, %v5096_v38 }
  0x33   :  { %4424 = vmatmul.msk.f32.gmra.mxu2 %vm8298_vm2, %v5099_v39  ;;  %4429 = vmatmul.msk.f32.gmra.mxu3 %vm8298_vm2, %v5099_v39 }
  0x35   :  { %4414 = vmatmul.msk.f32.gmra.mxu1 %vm8298_vm2, %v5096_v38 }
  0x3a   :  { %4410 = vmatmul.msk.f32.gmra.mxu0 %vm8298_vm2, %v4405_v44 }
  0x3b   :  { %4425 = vmatmul.msk.f32.gmra.mxu2 %vm8298_vm2, %v4420_v45  ;;  %4430 = vmatmul.msk.f32.gmra.mxu3 %vm8298_vm2, %v4420_v45 }
  0x3d   :  { %4415 = vmatmul.msk.f32.gmra.mxu1 %vm8298_vm2, %v4405_v44 }
  0x42   :  { %4411 = vmatmul.msk.f32.gmra.mxu0 %vm8298_vm2, %v4406_v47 }
  0x43   :  { %4426 = vmatmul.msk.f32.gmra.mxu2 %vm8298_vm2, %v4421_v49  ;;  %4431 = vmatmul.msk.f32.gmra.mxu3 %vm8298_vm2, %v4421_v49 }
  0x45   :  { %4416 = vmatmul.msk.f32.gmra.mxu1 %vm8298_vm2, %v4406_v47  ;;  %vm988_vm2 = vcmask 72704  }
  0x9f   :  { %v5131_v50 = vpop.f32.mrf.mxu0 }
  0xa0   :  { %v449_v54 = vrot.slane %v5131_v50, 2  ;;  %v534_v59 = vrot.slane %v5131_v50, 3  ;;  %v362_v60 = vrot.slane %v5131_v50, 1  ;;  %v619_v1 = vrot.slane %v5131_v50, 4 }
  0xa1   :  { %v704_v5 = vrot.slane %v5131_v50, 5  ;;  %v789_v6 = vrot.slane %v5131_v50, 6  ;;  %v874_v14 = vrot.slane %v5131_v50, 7 }
  0xa2   :  { %v5153_v61 = vpop.f32.mrf.mxu1 }
  0xa3   :  { %v458_v16 = vrot.slane %v5153_v61, 2  ;;  %v543_v19 = vrot.slane %v5153_v61, 3  ;;  %v371_v24 = vrot.slane %v5153_v61, 1  ;;  %v628_v34 = vrot.slane %v5153_v61, 4 }
  0xa4   :  { %v713_v43 = vrot.slane %v5153_v61, 5 }
  0xa6   :  { %v5133_v51 = vpop.f32.mrf.mxu2  ;;  %v5135_v52 = vpop.f32.mrf.mxu3 }
  0xa7   :  { %335 = vrot.lane.b32.xlu2 %v5135_v52, %s8287_s8  ;;  %327 = vrot.lane.b32.xlu0 %v5133_v51, %s8287_s8  ;;  %v5141_v53 = vpop.f32.mrf.mxu0  ;;  %v491_v48 = vrot.slane %v5133_v51, 2  ;;  %v576_v49 = vrot.slane %v5133_v51, 3 }
  0xa8   :  { %v450_v55 = vrot.slane %v5141_v53, 2  ;;  %v535_v57 = vrot.slane %v5141_v53, 3  ;;  %v363_v58 = vrot.slane %v5141_v53, 1  ;;  %v620_v0 = vrot.slane %v5141_v53, 4 }
  0xa9   :  { %v705_v3 = vrot.slane %v5141_v53, 5  ;;  %v790_v4 = vrot.slane %v5141_v53, 6  ;;  %v875_v11 = vrot.slane %v5141_v53, 7 }
  0xaa   :  { %v451_v56 = vsel %vm8323_vm11, %v449_v54, %v450_v55  ;;  %v536_v62 = vsel %vm8322_vm12, %v534_v59, %v535_v57  ;;  %v364_v63 = vsel %vm8320_vm13, %v362_v60, %v363_v58  ;;  %v621_v2 = vsel %vm8324_vm14, %v619_v1, %v620_v0  ;;  %v5180_v12 = vpop.f32.mrf.mxu1 }
  0xab   :  { %467 = vrot.lane.b32.xlu1 %v451_v56, %s4818_s4  ;;  %v706_v8 = vsel %vm8325_vm15, %v704_v5, %v705_v3  ;;  %v791_v9 = vsel %vm8326_vm0, %v789_v6, %v790_v4  ;;  %v876_v17 = vsel %vm8309_vm1, %v874_v14, %v875_v11  ;;  %v8293_v18 = vrot.slane %v5180_v12, 2 }
  0xac   :  { %v8285_v20 = vrot.slane %v5180_v12, 3  ;;  %v372_v28 = vrot.slane %v5180_v12, 1  ;;  %v8284_v36 = vrot.slane %v5180_v12, 4  ;;  %v8280_v44 = vrot.slane %v5180_v12, 5 }
  0xad   :  { %v460_v22 = vsel %vm8323_vm11, %v458_v16, %v8293_v18  ;;  %v661_v1 = vrot.slane %v5133_v51, 4 }
  0xae   :  { %v545_v23 = vsel %vm8322_vm12, %v543_v19, %v8285_v20  ;;  %v373_v30 = vsel %vm8320_vm13, %v371_v24, %v372_v28  ;;  %v5209_v40 = vpop.f32.mrf.mxu2  ;;  %v630_v42 = vsel %vm8324_vm14, %v628_v34, %v8284_v36  ;;  %v715_v45 = vsel %vm8325_vm15, %v713_v43, %v8280_v44  ;;  %v5235_v59 = vpop.f32.mrf.mxu3 }
  0xaf   :  { %552 = vrot.lane.b32.xlu2 %v536_v62, %s4819_s29  ;;  %380 = vrot.lane.b32.xlu0 %v364_v63, %s4820_s0  ;;  %v492_v46 = vrot.slane %v5209_v40, 2  ;;  %v577_v47 = vrot.slane %v5209_v40, 3  ;;  %v832_v60 = vrot.slane %v5209_v40, 6  ;;  %v662_v62 = vrot.slane %v5209_v40, 4 }
  0xb0   :  { %v831_v63 = vrot.slane %v5133_v51, 6  ;;  %v407_v6 = vrot.slane %v5209_v40, 1  ;;  %v8283_v16 = vrot.slane %v5235_v59, 3  ;;  %v416_v19 = vrot.slane %v5235_v59, 1 }
  0xb1   :  { %v493_v54 = vsel %vm8323_vm11, %v491_v48, %v492_v46  ;;  %v578_v56 = vsel %vm8322_vm12, %v576_v49, %v577_v47  ;;  %v663_v5 = vsel %vm8324_vm14, %v661_v1, %v662_v62  ;;  %v747_v24 = vrot.slane %v5209_v40, 5 }
  0xb2   :  { %v746_v34 = vrot.slane %v5133_v51, 5  ;;  %v670_v43 = vrot.slane %v5135_v52, 4 }
  0xb3   :  { %637 = vrot.lane.b32.xlu1 %v621_v2, %s4821_s9  ;;  %v833_v2 = vsel %vm8326_vm0, %v831_v63, %v832_v60 }
  0xb7   :  { %722 = vrot.lane.b32.xlu2 %v706_v8, %s4822_s30  ;;  %807 = vrot.lane.b32.xlu0 %v791_v9, %s4823_s2  ;;  %v406_v8 = vrot.slane %v5133_v51, 1  ;;  %v585_v9 = vrot.slane %v5135_v52, 3 }
  0xb9   :  { %v408_v14 = vsel %vm8320_vm13, %v406_v8, %v407_v6 }
  0xbb   :  { %892 = vrot.lane.b32.xlu1 %v876_v17, %s4824_s25  ;;  %v415_v17 = vrot.slane %v5135_v52, 1 }
  0xbf   :  { %475 = vrot.lane.b32.xlu2 %v460_v22, %s4818_s4  ;;  %560 = vrot.lane.b32.xlu0 %v545_v23, %s4819_s29  ;;  %v587_v22 = vsel %vm8322_vm12, %v585_v9, %v8283_v16  ;;  %v417_v23 = vsel %vm8320_vm13, %v415_v17, %v416_v19 }
  0xc3   :  { %388 = vrot.lane.b32.xlu1 %v373_v30, %s4820_s0  ;;  %v5268_v30 = vpop.f32.mrf.mxu0 }
  0xc4   :  { %v537_v48 = vrot.slane %v5268_v30, 3  ;;  %v622_v1 = vrot.slane %v5268_v30, 4  ;;  %v365_v8 = vrot.slane %v5268_v30, 1  ;;  %v792_v17 = vrot.slane %v5268_v30, 6 }
  0xc6   :  { %v538_v51 = vsel %vm8322_vm12, %v535_v57, %v537_v48  ;;  %v623_v57 = vsel %vm8324_vm14, %v620_v0, %v622_v1  ;;  %v366_v9 = vsel %vm8320_vm13, %v363_v58, %v365_v8  ;;  %v793_v0 = vsel %vm8326_vm0, %v790_v4, %v792_v17 }
  0xc7   :  { %329 = vrot.lane.b32.xlu2 %v5209_v40, %s8287_s8  ;;  %645 = vrot.lane.b32.xlu0 %v630_v42, %s4821_s9  ;;  %v748_v42 = vsel %vm8325_vm15, %v746_v34, %v747_v24  ;;  %v707_v58 = vrot.slane %v5268_v30, 5 }
  0xcb   :  { %730 = vrot.lane.b32.xlu1 %v715_v45, %s4822_s30  ;;  %v8281_v45 = vrot.slane %v5235_v59, 4 }
  0xcd   :  { %v672_v49 = vsel %vm8324_vm14, %v670_v43, %v8281_v45 }
  0xcf   :  { %509 = vrot.lane.b32.xlu2 %v493_v54, %s4825_s5  ;;  %594 = vrot.lane.b32.xlu0 %v578_v56, %s4826_s10  ;;  %v500_v54 = vrot.slane %v5135_v52, 2  ;;  %v8286_v56 = vrot.slane %v5235_v59, 2 }
  0xd1   :  { %v502_v63 = vsel %vm8323_vm11, %v500_v54, %v8286_v56 }
  0xd3   :  { %337 = vrot.lane.b32.xlu1 %v5235_v59, %s8287_s8 }
  0xd7   :  { %849 = vrot.lane.b32.xlu2 %v833_v2, %s4827_s6  ;;  %679 = vrot.lane.b32.xlu0 %v663_v5, %s8289_s1  ;;  %v452_v2 = vrot.slane %v5268_v30, 2 }
  0xd9   :  { %v453_v5 = vsel %vm8323_vm11, %v450_v55, %v452_v2 }
  0xdb   :  { %424 = vrot.lane.b32.xlu1 %v408_v14, %s8291_s27  ;;  %v877_v14 = vrot.slane %v5268_v30, 7 }
  0xdd   :  { %v878_v55 = vsel %vm8309_vm1, %v875_v11, %v877_v14  ;;  %v708_v11 = vsel %vm8325_vm15, %v705_v3, %v707_v58 }
  0xdf   :  { %602 = vrot.lane.b32.xlu2 %v587_v22, %s4826_s10  ;;  %432 = vrot.lane.b32.xlu0 %v417_v23, %s8291_s27  ;;  %v5324_v22 = vpop.f32.mrf.mxu1  ;;  %v5326_v23 = vpop.f32.mrf.mxu2 }
  0xe0   :  { %v8282_v34 = vrot.slane %v5324_v22, 1  ;;  %v494_v54 = vrot.slane %v5326_v23, 2 }
  0xe2   :  { %v375_v4 = vsel %vm8320_vm13, %v372_v28, %v8282_v34 }
  0xe3   :  { %764 = vrot.lane.b32.xlu1 %v748_v42, %s4830_s3  ;;  %v579_v42 = vrot.slane %v5326_v23, 3 }
  0xe5   :  { %v580_v43 = vsel %vm8322_vm12, %v577_v47, %v579_v42 }
  0xe7   :  { %687 = vrot.lane.b32.xlu2 %v672_v49, %s8289_s1  ;;  %554 = vrot.lane.b32.xlu0 %v538_v51, %s4819_s29  ;;  %v409_v49 = vrot.slane %v5326_v23, 1  ;;  %v664_v51 = vrot.slane %v5326_v23, 4  ;;  %v5440_v25 = vpop.f32.mrf.mxu2 }
  0xe8   :  { %v8297_v44 = vrot.slane %v5440_v25, 1  ;;  %v8296_v16 = vrot.slane %v5440_v25, 4 }
  0xe9   :  { %v410_v28 = vsel %vm8320_vm13, %v407_v6, %v409_v49  ;;  %v665_v47 = vsel %vm8324_vm14, %v662_v62, %v664_v51  ;;  %v495_v6 = vsel %vm8323_vm11, %v492_v46, %v494_v54 }
  0xea   :  { %v412_v45 = vsel %vm8320_vm13, %v409_v49, %v8297_v44  ;;  %v667_v49 = vsel %vm8324_vm14, %v664_v51, %v8296_v16 }
  0xeb   :  { %517 = vrot.lane.b32.xlu1 %v502_v63, %s4825_s5  ;;  %v5363_v63 = vpop.f32.mrf.mxu3 }
  0xef   :  { %639 = vrot.lane.b32.xlu0 %v623_v57, %s4821_s9  ;;  %469 = vrot.lane.b32.xlu2 %v453_v5, %s4818_s4  ;;  %v749_v5 = vrot.slane %v5326_v23, 5 }
  0xf1   :  { %v750_v62 = vsel %vm8325_vm15, %v747_v24, %v749_v5 }
  0xf3   :  { %382 = vrot.lane.b32.xlu1 %v366_v9, %s4820_s0  ;;  %v8279_v9 = vrot.slane %v5363_v63, 1 }
  0xf7   :  { %894 = vrot.lane.b32.xlu0 %v878_v55, %s4824_s25  ;;  %809 = vrot.lane.b32.xlu2 %v793_v0, %s4823_s2  ;;  %v419_v55 = vsel %vm8320_vm13, %v416_v19, %v8279_v9  ;;  %v834_v0 = vrot.slane %v5326_v23, 6 }
  0xf9   :  { %v835_v24 = vsel %vm8326_vm0, %v832_v60, %v834_v0 }
  0xfb   :  { %724 = vrot.lane.b32.xlu1 %v708_v11, %s4822_s30  ;;  %v5384_v11 = vpop.f32.mrf.mxu0 }
  0xfc   :  { %v454_v40 = vrot.slane %v5384_v11, 2 }
  0xff   :  { %390 = vrot.lane.b32.xlu0 %v375_v4, %s4820_s0  ;;  %596 = vrot.lane.b32.xlu2 %v580_v43, %s4826_s10  ;;  %v539_v4 = vrot.slane %v5384_v11, 3  ;;  %v367_v43 = vrot.slane %v5384_v11, 1 }
 0x101   :  { %v5348_v3 = vpop.permute.xlu2 %335  ;;  %v540_v19 = vsel %vm8322_vm12, %v537_v48, %v539_v4  ;;  %v624_v48 = vrot.slane %v5384_v11, 4 }
 0x103   :  { %331 = vrot.lane.b32.xlu1 %v5326_v23, %s8287_s8  ;;  %v185_v20 = vpop.f32.mrf.mxu0 }
 0x104   :  { %v541_v51 = vrot.slane %v185_v20, 3  ;;  %v369_v18 = vrot.slane %v185_v20, 1  ;;  %v626_v16 = vrot.slane %v185_v20, 4  ;;  %v711_v44 = vrot.slane %v185_v20, 5 }
 0x107   :  { %426 = vrot.lane.b32.xlu0 %v410_v28, %s8291_s27  ;;  %681 = vrot.lane.b32.xlu2 %v665_v47, %s8289_s1  ;;  %v368_v28 = vsel %vm8320_vm13, %v365_v8, %v367_v43 }
 0x109   :  { %v5367_v57 = vpop.permute.xlu2 %552 }
 0x10b   :  { %511 = vrot.lane.b32.xlu1 %v495_v6, %s4825_s5  ;;  %v455_v6 = vsel %vm8323_vm11, %v452_v2, %v454_v40  ;;  %v794_v2 = vrot.slane %v5384_v11, 6 }
 0x10f   :  { %766 = vrot.lane.b32.xlu0 %v750_v62, %s4830_s3  ;;  %434 = vrot.lane.b32.xlu2 %v419_v55, %s8291_s27  ;;  %v709_v62 = vrot.slane %v5384_v11, 5  ;;  %v625_v55 = vsel %vm8324_vm14, %v622_v1, %v624_v48  ;;  %v795_v1 = vsel %vm8326_vm0, %v792_v17, %v794_v2 }
 0x111   :  { %v5388_v46 = vpop.permute.xlu2 %722 }
 0x113   :  { %851 = vrot.lane.b32.xlu1 %v835_v24, %s4827_s6  ;;  %v710_v24 = vsel %vm8325_vm15, %v707_v58, %v709_v62 }
 0x117   :  { %556 = vrot.lane.b32.xlu2 %v540_v19, %s4819_s29  ;;  %384 = vrot.lane.b32.xlu0 %v368_v28, %s4820_s0 }
 0x119   :  { %v5407_v60 = vpop.permute.xlu0 %327  ;;  %v5409_v47 = vpop.permute.xlu2 %475 }
 0x11b   :  { %471 = vrot.lane.b32.xlu1 %v455_v6, %s4818_s4  ;;  %v879_v6 = vrot.slane %v5384_v11, 7 }
 0x11d   :  { %v5417_v8 = vpop.permute.xlu1 %467 }
 0x11f   :  { %641 = vrot.lane.b32.xlu2 %v625_v55, %s4821_s9  ;;  %726 = vrot.lane.b32.xlu0 %v710_v24, %s4822_s30  ;;  %v880_v55 = vsel %vm8309_vm1, %v877_v14, %v879_v6  ;;  %v581_v24 = vrot.slane %v5440_v25, 3  ;;  %v496_v14 = vrot.slane %v5440_v25, 2 }
 0x121   :  { %v5430_v19 = vpop.permute.xlu2 %329  ;;  %v5432_v28 = vpop.permute.xlu0 %380  ;;  %v497_v34 = vsel %vm8323_vm11, %v494_v54, %v496_v14  ;;  %v8295_v54 = vrot.slane %v5440_v25, 6 }
 0x123   :  { %811 = vrot.lane.b32.xlu1 %v795_v1, %s4823_s2  ;;  %v582_v1 = vsel %vm8322_vm12, %v579_v42, %v581_v24  ;;  %v837_v56 = vsel %vm8326_vm0, %v834_v0, %v8295_v54  ;;  %v370_v54 = vsel %vm8320_vm13, %v367_v43, %v369_v18  ;;  %v712_v43 = vsel %vm8325_vm15, %v709_v62, %v711_v44 }
 0x125   :  { %v5443_v58 = vpop.permute.xlu1 %637 }
 0x127   :  { %896 = vrot.lane.b32.xlu2 %v880_v55, %s4824_s25  ;;  %333 = vrot.lane.b32.xlu0 %v5440_v25, %s8287_s8  ;;  %s8343_s8 = sld [smem:[#allocation7_spill]] }
 0x129   :  { %v5454_v17 = vpop.permute.xlu2 %509  ;;  %v5456_v9 = vpop.permute.xlu0 %807 }
 0x12b   :  { %598 = vrot.lane.b32.xlu1 %v582_v1, %s4826_s10  ;;  %v8294_v1 = vrot.slane %v5440_v25, 5 }
 0x12d   :  { %v5466_v55 = vpop.permute.xlu1 %892  ;;  %v102_v0 = vld [vmem:[%s8343_s8] sm:$0xff] }
 0x12f   :  { %428 = vrot.lane.b32.xlu2 %v412_v45, %s8291_s27  ;;  %513 = vrot.lane.b32.xlu0 %v497_v34, %s4825_s5  ;;  %v752_v34 = vsel %vm8325_vm15, %v749_v5, %v8294_v1  ;;  %s8356_s27 = smov 1  }
 0x131   :  { %v5477_v42 = vpop.permute.xlu2 %849  ;;  %v5479_v36 = vpop.permute.xlu0 %560 }
 0x133   :  { %683 = vrot.lane.b32.xlu1 %v667_v49, %s8289_s1  ;;  %v103_v49 = vld [vmem:[%s8343_s8 + $0x8] sm:$0x7f]  ;;  %s8345_s8 = smov 3   ;;  %s8348_s1 = smov 9  }
 0x134   :  { %4432 = vmatpush.msk.msrb.mxu0 %vm8320_vm13, %v103_v49  ;;  %4548 = vmatpush.msk.msrb.mxu1 %vm8320_vm13, %v103_v49 }
 0x135   :  { %v5489_v45 = vpop.permute.xlu1 %388 }
 0x136   :  { %1088 = vmatpush.msrb.mxu0 %v102_v0  ;;  %4549 = vmatpush.msrb.mxu1 %v102_v0  ;;  %v627_v0 = vsel %vm8324_vm14, %v624_v48, %v626_v16 }
 0x137   :  { %768 = vrot.lane.b32.xlu2 %v752_v34, %s4830_s3  ;;  %853 = vrot.lane.b32.xlu0 %v837_v56, %s4827_s6  ;;  %v542_v56 = vsel %vm8322_vm12, %v539_v4, %v541_v51  ;;  %v456_v34 = vrot.slane %v185_v20, 2 }
 0x139   :  { %v5506_v23 = vpop.permute.xlu2 %602  ;;  %v5508_v5 = vpop.permute.xlu0 %645  ;;  %v457_v49 = vsel %vm8323_vm11, %v454_v40, %v456_v34 }
 0x13a   :  { %v284_v34 = vpop.f32.mrf.mxu2 }
 0x13b   :  { %558 = vrot.lane.b32.xlu1 %v542_v56, %s4819_s29  ;;  %v796_v56 = vrot.slane %v185_v20, 6 }
 0x13d   :  { %v5517_v1 = vpop.permute.xlu1 %730  ;;  %v797_v18 = vsel %vm8326_vm0, %v794_v2, %v796_v56  ;;  %v498_v2 = vrot.slane %v284_v34, 2  ;;  %v413_v56 = vrot.slane %v284_v34, 1 }
 0x13f   :  { %473 = vrot.lane.b32.xlu0 %v457_v49, %s4818_s4  ;;  %386 = vrot.lane.b32.xlu2 %v370_v54, %s4820_s0  ;;  %v881_v54 = vrot.slane %v185_v20, 7  ;;  %v917_v20 = vsel %vm8313_vm4, %v5131_v50, %v5407_v60 }
 0x140   :  { %v926_v44 = vsel %vm8314_vm3, %v917_v20, %v5432_v28 }
 0x141   :  { %v5527_v4 = vpop.permute.xlu2 %687  ;;  %v595_v51 = vpop.permute.xlu0 %594  ;;  %v882_v49 = vsel %vm8309_vm1, %v879_v6, %v881_v54 }
 0x143   :  { %643 = vrot.lane.b32.xlu1 %v627_v0, %s4821_s9  ;;  %v583_v0 = vrot.slane %v284_v34, 3 }
 0x145   :  { %v5533_v40 = vpop.permute.xlu1 %337 }
 0x147   :  { %813 = vrot.lane.b32.xlu0 %v797_v18, %s4823_s2  ;;  %728 = vrot.lane.b32.xlu2 %v712_v43, %s4822_s30  ;;  %v584_v18 = vsel %vm8322_vm12, %v581_v24, %v583_v0  ;;  %v499_v43 = vsel %vm8323_vm11, %v496_v14, %v498_v2  ;;  %v668_v14 = vrot.slane %v284_v34, 4  ;;  %v838_v2 = vrot.slane %v284_v34, 6 }
 0x149   :  { %v680_v16 = vpop.permute.xlu0 %679  ;;  %v5543_v48 = vpop.permute.xlu2 %469 }
 0x14b   :  { %898 = vrot.lane.b32.xlu1 %v882_v49, %s4824_s25 }
 0x14d   :  { %v425_v62 = vpop.permute.xlu1 %424 }
 0x14e   :  { %v935_v6 = vsel %vm8302_vm5, %v926_v44, %v425_v62  ;;  %vm1024_vm5 = vcmask 105472   ;;  %v753_v62 = vrot.slane %v284_v34, 5 }
 0x14f   :  { %v944_v50 = vsel %vm8299_vm6, %v935_v6, %v5417_v8  ;;  %600 = vrot.lane.b32.xlu0 %v584_v18, %s4826_s10  ;;  %515 = vrot.lane.b32.xlu2 %v499_v43, %s4825_s5  ;;  %v8344_v8 = vrot.slane %v5440_v25, 1  ;;  %vm8304_vm6 = vcmask 80896   ;;  %v8347_v18 = vrot.slane %v5440_v25, 6 }
 0x150   :  { %v953_v60 = vsel %vm8300_vm7, %v944_v50, %v5454_v17  ;;  %vm1006_vm7 = vcmask 89088  }
 0x151   :  { %v962_v28 = vsel %vm8301_vm8, %v953_v60, %v5367_v57  ;;  %v5569_v24 = vpop.permute.xlu0 %432  ;;  %v5571_v54 = vpop.permute.xlu2 %809  ;;  %v414_v49 = vsel %vm8320_vm13, %v8344_v8, %v413_v56  ;;  %vm1015_vm8 = vcmask 97280   ;;  %v839_v43 = vsel %vm8326_vm0, %v8347_v18, %v838_v2 }
 0x152   :  { %v971_v0 = vsel %vm970_vm9, %v962_v28, %v595_v51  ;;  %v8346_v51 = vrot.slane %v5440_v25, 4  ;;  %v798_v60 = vrot.slane %v5153_v61, 6  ;;  %v756_v8 = vrot.slane %v5235_v59, 5 }
 0x153   :  { %430 = vrot.lane.b32.xlu1 %v414_v49, %s8345_s8  ;;  %v980_v57 = vsel %vm8303_vm10, %v971_v0, %v5443_v58  ;;  %vm1033_vm10 = vcmask 113664   ;;  %v461_v0 = vrot.slane %v5324_v22, 2  ;;  %v8352_v18 = vrot.slane %v5180_v12, 3 }
 0x154   :  { %v989_v17 = vsel %vm988_vm2, %v980_v57, %v680_v16  ;;  %v669_v6 = vsel %vm8324_vm14, %v8346_v51, %v668_v14  ;;  %v755_v14 = vrot.slane %v5135_v52, 5  ;;  %v8351_v51 = vrot.slane %v5235_v59, 2 }
 0x155   :  { %v765_v20 = vpop.permute.xlu1 %764  ;;  %v998_v44 = vsel %vm8304_vm6, %v989_v17, %v5388_v46  ;;  %vm1045_vm6 = vcmask 121856   ;;  %v8350_v17 = vrot.slane %v5180_v12, 2 }
 0x156   :  { %v1007_v56 = vsel %vm1006_vm7, %v998_v44, %v765_v20  ;;  %v8311_v44 = vrot.slane %v5363_v63, 2 }
 0x157   :  { %v1016_v58 = vsel %vm1015_vm8, %v1007_v56, %v5456_v9  ;;  %685 = vrot.lane.b32.xlu0 %v669_v6, %s8348_s1  ;;  %855 = vrot.lane.b32.xlu2 %v839_v43, %s4827_s6  ;;  %v8349_v9 = vrot.slane %v5440_v25, 5  ;;  %v462_v20 = vsel %vm8323_vm11, %v8350_v17, %v461_v0  ;;  %v8353_v17 = vrot.slane %v5180_v12, 4 }
 0x158   :  { %v1025_v46 = vsel %vm1024_vm5, %v1016_v58, %v5477_v42  ;;  %v8312_v42 = vrot.slane %v5180_v12, 6  ;;  %v504_v6 = vsel %vm8323_vm11, %v8351_v51, %v8311_v44  ;;  %v840_v58 = vrot.slane %v5135_v52, 6 }
 0x159   :  { %v5596_v34 = vpop.permute.xlu0 %554  ;;  %v5598_v16 = vpop.permute.xlu2 %596  ;;  %v1034_v50 = vsel %vm1033_vm10, %v1025_v46, %v5466_v55  ;;  %v754_v28 = vsel %vm8325_vm15, %v8349_v9, %v753_v62  ;;  %v757_v55 = vsel %vm8325_vm15, %v755_v14, %v756_v8  ;;  %v8308_v62 = vrot.slane %v5324_v22, 3 }
 0x15a   :  { %4433 = vmatmul.msk.f32.vlgmr.msrb.gmra.mxu0 %vm1045_vm6, %v1034_v50  ;;  %v800_v25 = vsel %vm8326_vm0, %v798_v60, %v8312_v42  ;;  %v8310_v46 = vrot.slane %v5235_v59, 6  ;;  %v8306_v14 = vrot.slane %v5180_v12, 7  ;;  %v8307_v51 = vrot.slane %v5363_v63, 3 }
 0x15b   :  { %770 = vrot.lane.b32.xlu1 %v754_v28, %s4830_s3  ;;  %v547_v43 = vsel %vm8322_vm12, %v8352_v18, %v8308_v62  ;;  %v883_v28 = vrot.slane %v5153_v61, 7  ;;  %v8316_v42 = vrot.slane %v5324_v22, 5 }
 0x15c   :  { %v842_v9 = vsel %vm8326_vm0, %v840_v58, %v8310_v46  ;;  %v8354_v58 = vrot.slane %v5235_v59, 3  ;;  %v8358_v46 = vrot.slane %v5235_v59, 4 }
 0x15d   :  { %v5611_v49 = vpop.permute.xlu1 %517 }
 0x15f   :  { %772 = vrot.lane.b32.xlu0 %v757_v55, %s4830_s3  ;;  %815 = vrot.lane.b32.xlu2 %v800_v25, %s4823_s2  ;;  %v8305_v55 = vrot.slane %v5324_v22, 4  ;;  %v885_v25 = vsel %vm8309_vm1, %v883_v28, %v8306_v14  ;;  %v5683_v14 = vpop.f32.mrf.mxu3  ;;  %vm8357_vm1 = vcmask 23552  }
 0x161   :  { %v640_v2 = vpop.permute.xlu0 %639  ;;  %v682_v57 = vpop.permute.xlu2 %681 }
 0x163   :  { %477 = vrot.lane.b32.xlu1 %v462_v20, %s4818_s4  ;;  %v632_v20 = vsel %vm8324_vm14, %v8353_v17, %v8305_v55  ;;  %v8315_v55 = vrot.slane %v5363_v63, 4 }
 0x165   :  { %v383_v56 = vpop.permute.xlu1 %382  ;;  %v674_v44 = vsel %vm8324_vm14, %v8358_v46, %v8315_v55  ;;  %v8362_v46 = vrot.slane %v5363_v63, 1 }
 0x167   :  { %519 = vrot.lane.b32.xlu0 %v504_v6, %s4825_s5  ;;  %562 = vrot.lane.b32.xlu2 %v547_v43, %s4819_s29  ;;  %v5662_v6 = vpop.f32.mrf.mxu1 }
 0x168   :  { %v376_v28 = vrot.slane %v5662_v6, 1 }
 0x169   :  { %v895_v50 = vpop.permute.xlu0 %894  ;;  %v5644_v60 = vpop.permute.xlu2 %434 }
 0x16b   :  { %857 = vrot.lane.b32.xlu1 %v842_v9, %s4827_s6  ;;  %v589_v9 = vsel %vm8322_vm12, %v8354_v58, %v8307_v51  ;;  %v918_v58 = vsel %vm8313_vm4, %v5141_v53, %v5430_v19  ;;  %vm8359_vm4 = vcmask 31744  }
 0x16d   :  { %v725_v52 = vpop.permute.xlu1 %724 }
 0x16f   :  { %900 = vrot.lane.b32.xlu0 %v885_v25, %s4824_s25  ;;  %647 = vrot.lane.b32.xlu2 %v632_v20, %s4821_s9  ;;  %v8355_v25 = vrot.slane %v5324_v22, 1 }
 0x171   :  { %v5666_v18 = vpop.permute.xlu0 %390  ;;  %v5668_v43 = vpop.permute.xlu2 %556  ;;  %v377_v20 = vsel %vm8320_vm13, %v8355_v25, %v376_v28 }
 0x173   :  { %604 = vrot.lane.b32.xlu1 %v589_v9, %s4826_s10  ;;  %v927_v9 = vsel %vm8314_vm3, %v918_v58, %v383_v56  ;;  %vm8360_vm3 = vcmask 39936  }
 0x175   :  { %v5677_v17 = vpop.permute.xlu1 %331 }
 0x177   :  { %339 = vrot.lane.b32.xlu0 %v5363_v63, %s8356_s27  ;;  %392 = vrot.lane.b32.xlu2 %v377_v20, %s4820_s0  ;;  %v420_v20 = vrot.slane %v5683_v14, 1 }
 0x179   :  { %v427_v51 = vpop.permute.xlu0 %426  ;;  %v5692_v62 = vpop.permute.xlu2 %641 }
 0x17a   :  { %v936_v25 = vsel %vm8357_vm1, %v927_v9, %v427_v51  ;;  %v8361_v51 = vrot.slane %v5180_v12, 5  ;;  %v421_v9 = vsel %vm8320_vm13, %v8362_v46, %v420_v20  ;;  %vm8363_vm1 = vcmask 48128  }
 0x17b   :  { %689 = vrot.lane.b32.xlu1 %v674_v44, %s8348_s1  ;;  %v945_v53 = vsel %vm8359_vm4, %v936_v25, %v5543_v48  ;;  %v463_v46 = vrot.slane %v5662_v6, 2  ;;  %vm8365_vm4 = vcmask 80896  }
 0x17c   :  { %v717_v58 = vsel %vm8325_vm15, %v8361_v51, %v8316_v42  ;;  %v8319_v51 = vrot.slane %v5363_v63, 5  ;;  %v5726_v42 = vpop.f32.mrf.mxu1 }
 0x17d   :  { %v512_v19 = vpop.permute.xlu1 %511 }
 0x17e   :  { %v954_v56 = vsel %vm8360_vm3, %v945_v53, %v512_v19  ;;  %vm8364_vm3 = vcmask 64512  }
 0x17f   :  { %v963_v55 = vsel %vm8363_vm1, %v954_v56, %v5596_v34  ;;  %732 = vrot.lane.b32.xlu0 %v717_v58, %s4822_s30  ;;  %436 = vrot.lane.b32.xlu2 %v421_v9, %s8345_s8  ;;  %v378_v58 = vrot.slane %v5726_v42, 1  ;;  %vm8370_vm1 = vcmask 7168  }
 0x180   :  { %v972_v48 = vsel %vm970_vm9, %v963_v55, %v5598_v16 }
 0x181   :  { %v767_v44 = vpop.permute.xlu0 %766  ;;  %v981_v25 = vsel %vm8364_vm3, %v972_v48, %v640_v2  ;;  %v5721_v53 = vpop.permute.xlu2 %896  ;;  %vm8371_vm3 = vcmask 15360  }
 0x182   :  { %v990_v19 = vsel %vm988_vm2, %v981_v25, %v682_v57  ;;  %v759_v57 = vsel %vm8325_vm15, %v756_v8, %v8319_v51  ;;  %v8318_v8 = vrot.slane %v5324_v22, 6  ;;  %v505_v25 = vrot.slane %v5683_v14, 2 }
 0x183   :  { %v999_v34 = vsel %vm8365_vm4, %v990_v19, %v725_v52  ;;  %341 = vrot.lane.b32.xlu1 %v5683_v14, %s8356_s27  ;;  %v464_v52 = vsel %vm8323_vm11, %v461_v0, %v463_v46  ;;  %v5751_v19 = vpop.f32.mrf.mxu3  ;;  %vm8373_vm4 = vcmask 1040384   ;;  %s8327_s27 = smov 112  }
 0x184   :  { %v1008_v16 = vsel %vm1006_vm7, %v999_v34, %v767_v44  ;;  %v379_v44 = vsel %vm8320_vm13, %v376_v28, %v378_v58  ;;  %v8366_v34 = vrot.slane %v5180_v12, 6  ;;  %v422_v28 = vrot.slane %v5751_v19, 1 }
 0x185   :  { %v1017_v2 = vsel %vm1015_vm8, %v1008_v16, %v5571_v54  ;;  %v852_v55 = vpop.permute.xlu1 %851  ;;  %v8367_v16 = vrot.slane %v5363_v63, 2  ;;  %v548_v58 = vrot.slane %v5662_v6, 3  ;;  %v507_v51 = vrot.slane %v5751_v19, 2 }
 0x186   :  { %v1026_v56 = vsel %vm1024_vm5, %v1017_v2, %v852_v55 }
 0x187   :  { %774 = vrot.lane.b32.xlu0 %v759_v57, %s4830_s3  ;;  %479 = vrot.lane.b32.xlu2 %v464_v52, %s4818_s4  ;;  %v1035_v54 = vsel %vm1033_vm10, %v1026_v56, %v895_v50  ;;  %v802_v50 = vsel %vm8326_vm0, %v8366_v34, %v8318_v8  ;;  %v506_v2 = vsel %vm8323_vm11, %v8367_v16, %v505_v25  ;;  %v8317_v52 = vrot.slane %v5363_v63, 6 }
 0x188   :  { %4434 = vmatmul.msk.f32.gmra.mxu0 %vm1045_vm6, %v1035_v54  ;;  %v423_v57 = vsel %vm8320_vm13, %v420_v20, %v422_v28  ;;  %vm8377_vm13 = vcmask 39936  }
 0x189   :  { %v429_v9 = vpop.permute.xlu2 %428  ;;  %v385_v48 = vpop.permute.xlu0 %384 }
 0x18b   :  { %394 = vrot.lane.b32.xlu1 %v379_v44, %s4820_s0  ;;  %v8368_v44 = vrot.slane %v5235_v59, 6  ;;  %v8321_v59 = vrot.slane %v5324_v22, 7  ;;  %s8425_s0 = sld [smem:[#allocation8_spill]] }
 0x18d   :  { %v472_v0 = vpop.permute.xlu1 %471  ;;  %v844_v34 = vsel %vm8326_vm0, %v8368_v44, %v8317_v52  ;;  %v590_v44 = vrot.slane %v5683_v14, 3 }
 0x18f   :  { %817 = vrot.lane.b32.xlu0 %v802_v50, %s4823_s2  ;;  %521 = vrot.lane.b32.xlu2 %v506_v2, %s4825_s5  ;;  %v8369_v50 = vrot.slane %v5324_v22, 3  ;;  %v465_v2 = vrot.slane %v5726_v42, 2 }
 0x191   :  { %v769_v55 = vpop.permute.xlu2 %768  ;;  %v727_v56 = vpop.permute.xlu0 %726  ;;  %v549_v16 = vsel %vm8322_vm12, %v8369_v50, %v548_v58  ;;  %v919_v50 = vsel %vm8370_vm1, %v5268_v30, %v5677_v17  ;;  %vm8375_vm1 = vcmask 23552  }
 0x193   :  { %438 = vrot.lane.b32.xlu1 %v423_v57, %s8345_s8  ;;  %v466_v57 = vsel %vm8323_vm11, %v463_v46, %v465_v2  ;;  %v8374_v46 = vrot.slane %v5363_v63, 3  ;;  %s4836_s8 = smov 96  }
 0x195   :  { %v812_v54 = vpop.permute.xlu1 %811  ;;  %v591_v2 = vsel %vm8322_vm12, %v8374_v46, %v590_v44  ;;  %v592_v46 = vrot.slane %v5751_v19, 3 }
 0x197   :  { %859 = vrot.lane.b32.xlu0 %v844_v34, %s4827_s6  ;;  %564 = vrot.lane.b32.xlu2 %v549_v16, %s4819_s29  ;;  %v928_v34 = vsel %vm8371_vm3, %v919_v50, %v385_v48  ;;  %v8372_v16 = vrot.slane %v5180_v12, 7  ;;  %vm8376_vm3 = vcmask 31744  }
 0x198   :  { %v937_v30 = vsel %vm8375_vm1, %v928_v34, %v429_v9  ;;  %vm8379_vm1 = vcmask 64512  }
 0x199   :  { %v5780_v20 = vpop.permute.xlu0 %333  ;;  %v5782_v28 = vpop.permute.xlu2 %386  ;;  %v887_v8 = vsel %vm8373_vm4, %v8372_v16, %v8321_v59  ;;  %v946_v17 = vsel %vm8376_vm3, %v937_v30, %v472_v0  ;;  %v508_v16 = vsel %vm8323_vm11, %v505_v25, %v507_v51  ;;  %v550_v59 = vrot.slane %v5726_v42, 3 }
 0x19a   :  { %vm8378_vm4 = vcmask 48128   ;;  %v593_v51 = vsel %vm8322_vm12, %v590_v44, %v592_v46  ;;  %v633_v25 = vrot.slane %v5662_v6, 4  ;;  %v675_v44 = vrot.slane %v5683_v14, 4 }
 0x19b   :  { %481 = vrot.lane.b32.xlu1 %v466_v57, %s4818_s4  ;;  %v551_v30 = vsel %vm8322_vm12, %v548_v58, %v550_v59  ;;  %v8381_v58 = vrot.slane %v5324_v22, 4  ;;  %vm8387_vm3 = vcmask 7168   ;;  %vm8393_vm12 = vcmask 23552  }
 0x19c   :  { %vm8394_vm11 = vcmask 48128  }
 0x19d   :  { %v599_v52 = vpop.permute.xlu1 %598  ;;  %v634_v59 = vsel %vm8324_vm14, %v8381_v58, %v633_v25 }
 0x19f   :  { %902 = vrot.lane.b32.xlu0 %v887_v8, %s4824_s25  ;;  %606 = vrot.lane.b32.xlu2 %v591_v2, %s4826_s10 }
 0x1a1   :  { %v514_v48 = vpop.permute.xlu0 %513  ;;  %v5805_v57 = vpop.permute.xlu2 %728 }
 0x1a2   :  { %v955_v50 = vsel %vm8377_vm13, %v946_v17, %v514_v48  ;;  %vm8380_vm13 = vcmask 80896  }
 0x1a3   :  { %v964_v8 = vsel %vm8378_vm4, %v955_v50, %v5668_v43  ;;  %523 = vrot.lane.b32.xlu1 %v508_v16, %s4825_s5  ;;  %vm8388_vm4 = vcmask 15360  }
 0x1a4   :  { %v973_v9 = vsel %vm970_vm9, %v964_v8, %v599_v52  ;;  %v8383_v8 = vrot.slane %v5324_v22, 5 }
 0x1a5   :  { %v684_v34 = vpop.permute.xlu1 %683  ;;  %v982_v0 = vsel %vm8379_vm1, %v973_v9, %v5692_v62  ;;  %vm8389_vm1 = vcmask 23552  }
 0x1a6   :  { %v991_v2 = vsel %vm988_vm2, %v982_v0, %v684_v34  ;;  %v635_v34 = vrot.slane %v5726_v42, 4 }
 0x1a7   :  { %v1000_v17 = vsel %vm8380_vm13, %v991_v2, %v727_v56  ;;  %566 = vrot.lane.b32.xlu0 %v551_v30, %s4819_s29  ;;  %608 = vrot.lane.b32.xlu2 %v593_v51, %s4826_s10  ;;  %v718_v56 = vrot.slane %v5662_v6, 5  ;;  %v677_v2 = vrot.slane %v5751_v19, 4  ;;  %v720_v30 = vrot.slane %v5726_v42, 5  ;;  %vm8390_vm13 = vmmov %vm8387_vm3  ;;  %s8427_s10 = sld [smem:[#allocation10_spill]] }
 0x1a8   :  { %v1009_v43 = vsel %vm1006_vm7, %v1000_v17, %v769_v55  ;;  %s8487_s29 = sld [smem:[#allocation12_spill]] }
 0x1a9   :  { %v1018_v52 = vsel %vm1015_vm8, %v1009_v43, %v812_v54  ;;  %v854_v48 = vpop.permute.xlu0 %853  ;;  %v516_v50 = vpop.permute.xlu2 %515  ;;  %v8382_v54 = vrot.slane %v5363_v63, 4  ;;  %v719_v9 = vsel %vm8325_vm15, %v8383_v8, %v718_v56  ;;  %v678_v43 = vsel %vm8324_vm14, %v675_v44, %v677_v2 }
 0x1aa   :  { %v1027_v62 = vsel %vm1024_vm5, %v1018_v52, %v854_v48  ;;  %v721_v52 = vsel %vm8325_vm15, %v718_v56, %v720_v30  ;;  %v760_v48 = vrot.slane %v5683_v14, 5  ;;  %v8385_v56 = vrot.slane %v5324_v22, 6 }
 0x1ab   :  { %649 = vrot.lane.b32.xlu1 %v634_v59, %s4821_s9  ;;  %v1036_v16 = vsel %vm1033_vm10, %v1027_v62, %v5721_v53  ;;  %v676_v46 = vsel %vm8324_vm14, %v8382_v54, %v675_v44  ;;  %v636_v53 = vsel %vm8324_vm14, %v633_v25, %v635_v34  ;;  %v8384_v25 = vrot.slane %v5363_v63, 5 }
 0x1ac   :  { %4435 = vmatmul.msk.f32.gmra.mxu0 %vm1045_vm6, %v1036_v16  ;;  %v803_v59 = vrot.slane %v5662_v6, 6  ;;  %v845_v16 = vrot.slane %v5683_v14, 6  ;;  %v8386_v8 = vrot.slane %v5363_v63, 6  ;;  %v762_v34 = vrot.slane %v5751_v19, 5 }
 0x1ad   :  { %v559_v55 = vpop.permute.xlu1 %558  ;;  %v761_v58 = vsel %vm8325_vm15, %v8384_v25, %v760_v48  ;;  %v920_v14 = vsel %vm8387_vm3, %v5384_v11, %v5780_v20  ;;  %v805_v30 = vrot.slane %v5726_v42, 6  ;;  %v888_v11 = vrot.slane %v5662_v6, 7 }
 0x1ae   :  { %v763_v2 = vsel %vm8325_vm15, %v760_v48, %v762_v34  ;;  %v929_v63 = vsel %vm8388_vm4, %v920_v14, %v5782_v28  ;;  %v921_v20 = vsel %vm8390_vm13, %v5153_v61, %v5348_v3  ;;  %vm8391_vm3 = vcmask 31744  }
 0x1af   :  { %691 = vrot.lane.b32.xlu0 %v676_v46, %s8348_s1  ;;  %734 = vrot.lane.b32.xlu2 %v719_v9, %s4822_s30  ;;  %v804_v46 = vsel %vm8326_vm0, %v8385_v56, %v803_v59  ;;  %v846_v9 = vsel %vm8326_vm0, %v8386_v8, %v845_v16  ;;  %v930_v28 = vsel %vm8388_vm4, %v921_v20, %v5489_v45  ;;  %v8395_v3 = vrot.slane %v5324_v22, 7 }
 0x1b0   :  { %vm8396_vm13 = vcmask 1040384   ;;  %vm8398_vm4 = vcmask 31744   ;;  %vm8410_vm14 = vcmask 64512  }
 0x1b1   :  { %v474_v0 = vpop.permute.xlu0 %473  ;;  %v856_v51 = vpop.permute.xlu2 %855 }
 0x1b3   :  { %651 = vrot.lane.b32.xlu1 %v636_v53, %s4821_s9  ;;  %s8524_s9 = sld [smem:[#allocation16_spill]] }
 0x1b5   :  { %v644_v17 = vpop.permute.xlu1 %643 }
 0x1b7   :  { %693 = vrot.lane.b32.xlu0 %v678_v43, %s8348_s1  ;;  %736 = vrot.lane.b32.xlu2 %v721_v52, %s4822_s30  ;;  %v847_v43 = vrot.slane %v5751_v19, 6  ;;  %s8329_s1 = smov 80  }
 0x1b9   :  { %v814_v62 = vpop.permute.xlu0 %813  ;;  %v816_v54 = vpop.permute.xlu2 %815  ;;  %v848_v56 = vsel %vm8326_vm0, %v845_v16, %v847_v43  ;;  %v939_v16 = vsel %vm8393_vm12, %v930_v28, %v5569_v24 }
 0x1ba   :  { %v948_v45 = vsel %vm8398_vm4, %v939_v16, %v5409_v47 }
 0x1bb   :  { %776 = vrot.lane.b32.xlu1 %v761_v58, %s4830_s3  ;;  %v806_v58 = vsel %vm8326_vm0, %v803_v59, %v805_v30 }
 0x1bd   :  { %v899_v44 = vpop.permute.xlu1 %898 }
 0x1bf   :  { %819 = vrot.lane.b32.xlu0 %v804_v46, %s4823_s2  ;;  %861 = vrot.lane.b32.xlu2 %v846_v9, %s4827_s6  ;;  %v890_v9 = vrot.slane %v5726_v42, 7 }
 0x1c1   :  { %v601_v53 = vpop.permute.xlu0 %600  ;;  %v563_v48 = vpop.permute.xlu2 %562 }
 0x1c3   :  { %778 = vrot.lane.b32.xlu1 %v763_v2, %s4830_s3  ;;  %s4833_s3 = smov 32  }
 0x1c5   :  { %v431_v52 = vpop.permute.xlu1 %430 }
 0x1c6   :  { %v938_v25 = vsel %vm8389_vm1, %v929_v63, %v431_v52  ;;  %vm8392_vm1 = vcmask 39936  }
 0x1c7   :  { %v947_v19 = vsel %vm8391_vm3, %v938_v25, %v474_v0  ;;  %821 = vrot.lane.b32.xlu0 %v806_v58, %s4823_s2  ;;  %863 = vrot.lane.b32.xlu2 %v848_v56, %s4827_s6  ;;  %v889_v0 = vsel %vm8396_vm13, %v8395_v3, %v888_v11  ;;  %vm8397_vm3 = vcmask 64512   ;;  %vm8399_vm12 = vmmov %vm8392_vm1  ;;  %s8426_s2 = sld [smem:[#allocation9_spill]]  ;;  %s4832_s6 = smov 64  }
 0x1c8   :  { %v956_v59 = vsel %vm8392_vm1, %v947_v19, %v516_v50  ;;  %v957_v50 = vsel %vm8399_vm12, %v948_v45, %v5611_v49  ;;  %vm8401_vm1 = vmmov %vm8396_vm13  ;;  %vm8402_vm13 = vcmask 48128   ;;  %vm8404_vm12 = vcmask 7168  }
 0x1c9   :  { %v686_v46 = vpop.permute.xlu0 %685  ;;  %v965_v8 = vsel %vm8394_vm11, %v956_v59, %v559_v55  ;;  %vm8400_vm11 = vcmask 80896   ;;  %v891_v42 = vsel %vm8401_vm1, %v888_v11, %v890_v9  ;;  %v966_v47 = vsel %vm8402_vm13, %v957_v50, %v5479_v36  ;;  %v648_v43 = vpop.permute.xlu2 %647 }
 0x1ca   :  { %v974_v61 = vsel %vm970_vm9, %v965_v8, %v601_v53  ;;  %vm8403_vm4 = vmmov %vm8400_vm11  ;;  %vm8406_vm1 = vcmask 23552   ;;  %vm8407_vm13 = vcmask 31744  }
 0x1cb   :  { %v983_v34 = vsel %vm8397_vm3, %v974_v61, %v644_v17  ;;  %904 = vrot.lane.b32.xlu1 %v889_v0, %s4824_s25  ;;  %vm8416_vm15 = vmmov %vm8406_vm1 }
 0x1cc   :  { %v992_v24 = vsel %vm988_vm2, %v983_v34, %v686_v46 }
 0x1cd   :  { %v771_v55 = vpop.permute.xlu1 %770  ;;  %v1001_v53 = vsel %vm8400_vm11, %v992_v24, %v5805_v57  ;;  %v975_v57 = vsel %vm970_vm9, %v966_v47, %v5506_v23  ;;  %vm8405_vm11 = vcmask 15360  }
 0x1ce   :  { %v1010_v14 = vsel %vm1006_vm7, %v1001_v53, %v771_v55 }
 0x1cf   :  { %v1019_v17 = vsel %vm1015_vm8, %v1010_v14, %v814_v62  ;;  %906 = vrot.lane.b32.xlu0 %v891_v42, %s4824_s25  ;;  %v984_v62 = vsel %vm8397_vm3, %v975_v57, %v5508_v5  ;;  %vm8408_vm3 = vcmask 39936  }
 0x1d0   :  { %v1028_v2 = vsel %vm1024_vm5, %v1019_v17, %v856_v51  ;;  %v993_v52 = vsel %vm988_vm2, %v984_v62, %v5527_v4 }
 0x1d1   :  { %v773_v30 = vpop.permute.xlu0 %772  ;;  %v1037_v49 = vsel %vm1033_vm10, %v1028_v2, %v899_v44  ;;  %v1002_v36 = vsel %vm8403_vm4, %v993_v52, %v5517_v1  ;;  %v393_v51 = vpop.permute.xlu2 %392  ;;  %vm8409_vm4 = vcmask 48128  }
 0x1d2   :  { %4436 = vmatmul.msk.f32.gmra.mxu0 %vm1045_vm6, %v1037_v49  ;;  %v1011_v44 = vsel %vm1006_vm7, %v1002_v36, %v773_v30 }
 0x1d3   :  { %v1020_v56 = vsel %vm1015_vm8, %v1011_v44, %v816_v54  ;;  %v922_v54 = vsel %vm8404_vm12, %v5180_v12, %v5533_v40  ;;  %vm8411_vm12 = vcmask 80896  }
 0x1d4   :  { %v931_v3 = vsel %vm8405_vm11, %v922_v54, %v5666_v18 }
 0x1d5   :  { %v478_v63 = vpop.permute.xlu1 %477  ;;  %v940_v9 = vsel %vm8406_vm1, %v931_v3, %v5644_v60 }
 0x1d6   :  { %v949_v34 = vsel %vm8407_vm13, %v940_v9, %v478_v63 }
 0x1d9   :  { %v520_v25 = vpop.permute.xlu0 %519  ;;  %v437_v19 = vpop.permute.xlu2 %436 }
 0x1da   :  { %v958_v24 = vsel %vm8408_vm3, %v949_v34, %v520_v25 }
 0x1db   :  { %v967_v55 = vsel %vm8409_vm4, %v958_v24, %v563_v48  ;;  %vm8414_vm4 = vmmov %vm8405_vm11 }
 0x1dd   :  { %v858_v58 = vpop.permute.xlu1 %857 }
 0x1de   :  { %v1029_v11 = vsel %vm1024_vm5, %v1020_v56, %v858_v58 }
 0x1e1   :  { %v901_v23 = vpop.permute.xlu0 %900  ;;  %v480_v59 = vpop.permute.xlu2 %479 }
 0x1e2   :  { %v1038_v20 = vsel %vm1033_vm10, %v1029_v11, %v901_v23 }
 0x1e3   :  { %4437 = vmatmul.msk.f32.gmra.mxu0 %vm1045_vm6, %v1038_v20 }
 0x1e5   :  { %v605_v5 = vpop.permute.xlu1 %604 }
 0x1e6   :  { %v976_v53 = vsel %vm970_vm9, %v967_v55, %v605_v5 }
 0x1e7   :  { %v985_v12 = vsel %vm8410_vm14, %v976_v53, %v648_v43  ;;  %vm8412_vm14 = vcmask 7168  }
 0x1e8   :  { %vm8413_vm3 = vmmov %vm8412_vm14 }
 0x1e9   :  { %v340_v4 = vpop.permute.xlu0 %339  ;;  %v522_v8 = vpop.permute.xlu2 %521 }
 0x1ea   :  { %v923_v25 = vsel %vm8412_vm14, %v5324_v22, %v340_v4  ;;  %vm8417_vm14 = vcmask 48128  }
 0x1eb   :  { %v932_v44 = vsel %vm8405_vm11, %v923_v25, %v393_v51  ;;  %vm8418_vm11 = vmmov %vm8407_vm13 }
 0x1ec   :  { %v941_v56 = vsel %vm8406_vm1, %v932_v44, %v437_v19  ;;  %vm8420_vm0 = vmmov %vm8417_vm14 }
 0x1ed   :  { %v690_v28 = vpop.permute.xlu1 %689  ;;  %v950_v20 = vsel %vm8407_vm13, %v941_v56, %v480_v59  ;;  %vm8421_vm13 = vcmask 64512  }
 0x1ee   :  { %v994_v40 = vsel %vm988_vm2, %v985_v12, %v690_v28 }
 0x1f1   :  { %v733_v16 = vpop.permute.xlu0 %732  ;;  %v565_v45 = vpop.permute.xlu2 %564 }
 0x1f2   :  { %v1003_v42 = vsel %vm8411_vm12, %v994_v40, %v733_v16  ;;  %vm8415_vm12 = vcmask 39936  }
 0x1f3   :  { %v959_v16 = vsel %vm8415_vm12, %v950_v20, %v522_v8  ;;  %vm8419_vm1 = vmmov %vm8415_vm12  ;;  %v4831_v20 = vmov 64.0  }
 0x1f4   :  { %v968_v4 = vsel %vm8417_vm14, %v959_v16, %v565_v45  ;;  %4742 = vrcp.f32 %v4831_v20  ;;  %vm8431_vm14 = vcmask 1043456  }
 0x1f5   :  { %v342_v1 = vpop.permute.xlu1 %341 }
 0x1f6   :  { %v924_v5 = vsel %vm8413_vm3, %v5662_v6, %v342_v1  ;;  %vm8423_vm3 = vcmask 80896  }
 0x1f9   :  { %v775_v46 = vpop.permute.xlu0 %774  ;;  %v607_v17 = vpop.permute.xlu2 %606 }
 0x1fa   :  { %v1012_v60 = vsel %vm1006_vm7, %v1003_v42, %v775_v46  ;;  %v977_v19 = vsel %vm970_vm9, %v968_v4, %v607_v17 }
 0x1fd   :  { %v395_v61 = vpop.permute.xlu1 %394 }
 0x1fe   :  { %v933_v28 = vsel %vm8414_vm4, %v924_v5, %v395_v61  ;;  %vm8429_vm4 = vcmask 1042432  }
 0x1ff   :  { %vm8430_vm12 = vmmov %vm8429_vm4 }
 0x201   :  { %v818_v0 = vpop.permute.xlu0 %817  ;;  %v609_v57 = vpop.permute.xlu2 %608 }
 0x202   :  { %v1021_v47 = vsel %vm1015_vm8, %v1012_v60, %v818_v0 }
 0x205   :  { %v439_v50 = vpop.permute.xlu1 %438 }
 0x206   :  { %v942_v46 = vsel %vm8416_vm15, %v933_v28, %v439_v50  ;;  %vm8422_vm15 = vmmov %vm8421_vm13 }
 0x209   :  { %v860_v14 = vpop.permute.xlu0 %859  ;;  %v735_v52 = vpop.permute.xlu2 %734 }
 0x20a   :  { %v1030_v2 = vsel %vm1024_vm5, %v1021_v47, %v860_v14 }
 0x20d   :  { %v482_v18 = vpop.permute.xlu1 %481 }
 0x20e   :  { %v951_v51 = vsel %vm8418_vm11, %v942_v46, %v482_v18  ;;  %vm8432_vm11 = vcmask 1040384  }
 0x211   :  { %v903_v30 = vpop.permute.xlu0 %902  ;;  %v737_v11 = vpop.permute.xlu2 %736 }
 0x212   :  { %v1039_v48 = vsel %vm1033_vm10, %v1030_v2, %v903_v30  ;;  %v1090_v2 = vpop.f32.mrf.mxu0 }
 0x213   :  { %4438 = vmatmul.msk.f32.gmra.mxu0 %vm1045_vm6, %v1039_v48 }
 0x215   :  { %v524_v49 = vpop.permute.xlu1 %523 }
 0x216   :  { %v960_v54 = vsel %vm8419_vm1, %v951_v51, %v524_v49  ;;  %v4743_v51 = vpop.eup %4742  ;;  %vm8433_vm1 = vmmov %vm8429_vm4 }
 0x219   :  { %v567_v43 = vpop.permute.xlu0 %566  ;;  %v862_v61 = vpop.permute.xlu2 %861 }
 0x21a   :  { %v969_v59 = vsel %vm8420_vm0, %v960_v54, %v567_v43  ;;  %vm8424_vm0 = vmmov %vm8423_vm3  ;;  %v1093_v30 = vpop.f32.mrf.mxu0  ;;  %v4734_v43 = vld [vmem:[%s8425_s0] ss:$0 sm:$0xff]  ;;  %s8463_s0 = sld [smem:[#allocation11_spill]] }
 0x21b   :  { %v978_v8 = vsel %vm970_vm9, %v969_v59, %v609_v57  ;;  %vm1259_vm9 = vcmask 261120  }
 0x21d   :  { %v650_v63 = vpop.permute.xlu1 %649 }
 0x21e   :  { %v986_v3 = vsel %vm8421_vm13, %v977_v19, %v650_v63  ;;  %v5984_v63 = vadd.f32 %v4734_v43, %v1093_v30 }
 0x221   :  { %v692_v62 = vpop.permute.xlu0 %691  ;;  %v864_v42 = vpop.permute.xlu2 %863 }
 0x222   :  { %v995_v6 = vsel %vm988_vm2, %v986_v3, %v692_v62  ;;  %v5986_v62 = vadd.f32 %v4734_v43, %v1090_v2 }
 0x223   :  { %v1004_v9 = vsel %vm8423_vm3, %v995_v6, %v735_v52 }
 0x225   :  { %v652_v36 = vpop.permute.xlu1 %651 }
 0x226   :  { %v987_v0 = vsel %vm8422_vm15, %v978_v8, %v652_v36  ;;  %vm8435_vm15 = vcmask 1045504  }
 0x227   :  { %vm8436_vm3 = vmmov %vm8435_vm15 }
 0x229   :  { %v694_v58 = vpop.permute.xlu0 %693  ;;  %v1096_v48 = vpop.f32.mrf.mxu0 }
 0x22a   :  { %v996_v34 = vsel %vm988_vm2, %v987_v0, %v694_v58  ;;  %v5988_v52 = vadd.f32 %v4734_v43, %v1096_v48  ;;  %vm1114_vm2 = vcmask 130048  }
 0x22b   :  { %v1005_v55 = vsel %vm8424_vm0, %v996_v34, %v737_v11  ;;  %v1116_v25 = vsel %vm1114_vm2, %v5984_v63, 0.0  ;;  %v1115_v58 = vsel %vm1114_vm2, %v5986_v62, 0.0 }
 0x22c   :  { %v1118_v56 = vsel %vm1114_vm2, %v5988_v52, 0.0 }
 0x22d   :  { %v777_v23 = vpop.permute.xlu1 %776 }
 0x22e   :  { %v1013_v45 = vsel %vm1006_vm7, %v1004_v9, %v777_v23  ;;  %v1117_v23 = vadd.f32 %v1116_v25, %v1115_v58 }
 0x230   :  { %v1119_v16 = vadd.f32 %v1118_v56, %v1117_v23 }
 0x231   :  { %v820_v22 = vpop.permute.xlu0 %819 }
 0x232   :  { %v1022_v50 = vsel %vm1015_vm8, %v1013_v45, %v820_v22 }
 0x233   :  { %v1031_v12 = vsel %vm1024_vm5, %v1022_v50, %v862_v61 }
 0x235   :  { %v779_v1 = vpop.permute.xlu1 %778 }
 0x236   :  { %v1014_v53 = vsel %vm1006_vm7, %v1005_v55, %v779_v1  ;;  %v1137_v1 = vmul.f32 64.0, %v4743_v51 }
 0x238   :  { %v1138_v34 = vsub.f32 1.0, %v1137_v1 }
 0x239   :  { %v822_v24 = vpop.permute.xlu0 %821 }
 0x23a   :  { %v1023_v40 = vsel %vm1015_vm8, %v1014_v53, %v822_v24  ;;  %v1139_v50 = vmul.f32 %v4743_v51, %v1138_v34 }
 0x23b   :  { %v1032_v60 = vsel %vm1024_vm5, %v1023_v40, %v864_v42  ;;  %vm1141_vm5 = vweird.f32 %v4743_v51 }
 0x23d   :  { %v905_v14 = vpop.permute.xlu1 %904 }
 0x23e   :  { %v1040_v18 = vsel %vm1033_vm10, %v1031_v12, %v905_v14  ;;  %v1140_v14 = vadd.f32 %v4743_v51, %v1139_v50 }
 0x23f   :  { %4439 = vmatmul.msk.f32.gmra.mxu0 %vm1045_vm6, %v1040_v18 }
 0x240   :  { %v6016_v18 = vsel %vm1141_vm5, %v4743_v51, %v1140_v14  ;;  %vm8438_vm5 = vmmov %vm8432_vm11 }
 0x241   :  { %v907_v17 = vpop.permute.xlu0 %906 }
 0x242   :  { %v1041_v47 = vsel %vm1033_vm10, %v1032_v60, %v907_v17  ;;  %vm8428_vm10 = vcmask 1041408  }
 0x243   :  { %4440 = vmatmul.msk.f32.vlgmr.msrb.gmra.mxu1 %vm1045_vm6, %v1041_v47  ;;  %vm8434_vm13 = vmmov %vm8428_vm10 }
 0x244   :  { %vm8437_vm0 = vmmov %vm8428_vm10 }
 0x24f   :  { %v1099_v49 = vpop.f32.mrf.mxu0 }
 0x250   :  { %v5992_v36 = vadd.f32 %v4734_v43, %v1099_v49 }
 0x252   :  { %v1120_v5 = vsel %vm1114_vm2, %v5992_v36, 0.0 }
 0x253   :  { %v1121_v22 = vadd.f32 %v1120_v5, %v1119_v16 }
 0x260   :  { %v1102_v57 = vpop.f32.mrf.mxu0 }
 0x261   :  { %v5998_v11 = vadd.f32 %v4734_v43, %v1102_v57 }
 0x263   :  { %v1122_v46 = vsel %vm1114_vm2, %v5998_v11, 0.0 }
 0x264   :  { %v1123_v19 = vadd.f32 %v1122_v46, %v1121_v22 }
 0x290   :  { %v1105_v44 = vpop.f32.mrf.mxu0 }
 0x291   :  { %v6002_v28 = vadd.f32 %v4734_v43, %v1105_v44 }
 0x293   :  { %v1124_v4 = vsel %vm1114_vm2, %v6002_v28, 0.0 }
 0x294   :  { %v1125_v3 = vadd.f32 %v1124_v4, %v1123_v19 }
 0x2bc   :  { %v1108_v54 = vpop.f32.mrf.mxu0 }
 0x2bd   :  { %v6008_v59 = vadd.f32 %v4734_v43, %v1108_v54 }
 0x2bf   :  { %v1126_v6 = vsel %vm1114_vm2, %v6008_v59, 0.0 }
 0x2c0   :  { %v1127_v61 = vadd.f32 %v1126_v6, %v1125_v3  ;;  %v1111_v8 = vpop.f32.mrf.mxu1 }
 0x2c1   :  { %v6012_v0 = vadd.f32 %v4734_v43, %v1111_v8 }
 0x2c3   :  { %v1128_v9 = vsel %vm1114_vm2, %v6012_v0, 0.0 }
 0x2c4   :  { %v1129_v45 = vadd.f32 %v1128_v9, %v1127_v61 }
 0x2c6   :  { %v1130_v24 = vrot.slane %v1129_v45, 4 }
 0x2c8   :  { %v1131_v55 = vadd.f32 %v1130_v24, %v1129_v45 }
 0x2ca   :  { %v1132_v53 = vrot.slane %v1131_v55, 2 }
 0x2cc   :  { %v1133_v12 = vadd.f32 %v1132_v53, %v1131_v55 }
 0x2ce   :  { %v1134_v40 = vrot.slane %v1133_v12, 1 }
 0x2d0   :  { %v1135_v42 = vadd.f32 %v1134_v40, %v1133_v12 }
 0x2d2   :  { %v1143_v17 = vmul.f32 %v6016_v18, %v1135_v42 }
 0x2d4   :  { %v1144_v60 = vsub.f32 %v5986_v62, %v1143_v17  ;;  %v1145_v47 = vsub.f32 %v5984_v63, %v1143_v17  ;;  %v1146_v2 = vsub.f32 %v5988_v52, %v1143_v17  ;;  %v1147_v30 = vsub.f32 %v5992_v36, %v1143_v17 }
 0x2d5   :  { %v1148_v48 = vsub.f32 %v5998_v11, %v1143_v17  ;;  %v1149_v25 = vsub.f32 %v6002_v28, %v1143_v17  ;;  %v1150_v20 = vsub.f32 %v6008_v59, %v1143_v17  ;;  %v1151_v22 = vsub.f32 %v6012_v0, %v1143_v17 }
 0x2d6   :  { %v1152_v49 = vmul.f32 %v1144_v60, %v1144_v60  ;;  %v1153_v57 = vmul.f32 %v1145_v47, %v1145_v47  ;;  %v1154_v43 = vmul.f32 %v1146_v2, %v1146_v2  ;;  %v1155_v44 = vmul.f32 %v1147_v30, %v1147_v30 }
 0x2d7   :  { %v1156_v5 = vmul.f32 %v1148_v48, %v1148_v48  ;;  %v1157_v4 = vmul.f32 %v1149_v25, %v1149_v25  ;;  %v1158_v54 = vmul.f32 %v1150_v20, %v1150_v20  ;;  %v1159_v1 = vmul.f32 %v1151_v22, %v1151_v22 }
 0x2d8   :  { %v1160_v58 = vsel %vm1114_vm2, %v1152_v49, 0.0  ;;  %v1161_v56 = vsel %vm1114_vm2, %v1153_v57, 0.0  ;;  %v1163_v16 = vsel %vm1114_vm2, %v1154_v43, 0.0  ;;  %v1165_v51 = vsel %vm1114_vm2, %v1155_v44, 0.0  ;;  %v105_v57 = vld [vmem:[%s8426_s2] sm:$0x1] }
 0x2d9   :  { %v1162_v23 = vadd.f32 %v1161_v56, %v1160_v58  ;;  %v1167_v3 = vsel %vm1114_vm2, %v1156_v5, 0.0  ;;  %v1169_v61 = vsel %vm1114_vm2, %v1157_v4, 0.0  ;;  %v1171_v9 = vsel %vm1114_vm2, %v1158_v54, 0.0  ;;  %v106_v58 = vld [vmem:[%s8427_s10] sm:$0x1]  ;;  %s8488_s2 = sld [smem:[#allocation13_spill]] }
 0x2da   :  { %v1173_v45 = vsel %vm1114_vm2, %v1159_v1, 0.0  ;;  %s8489_s10 = sld [smem:[#allocation14_spill]] }
 0x2db   :  { %v1164_v46 = vadd.f32 %v1163_v16, %v1162_v23 }
 0x2dd   :  { %v1166_v19 = vadd.f32 %v1165_v51, %v1164_v46 }
 0x2df   :  { %v1168_v6 = vadd.f32 %v1167_v3, %v1166_v19 }
 0x2e1   :  { %v1170_v8 = vadd.f32 %v1169_v61, %v1168_v6 }
 0x2e3   :  { %v1172_v34 = vadd.f32 %v1171_v9, %v1170_v8 }
 0x2e5   :  { %v1174_v24 = vadd.f32 %v1173_v45, %v1172_v34 }
 0x2e7   :  { %v1175_v50 = vrot.slane %v1174_v24, 4 }
 0x2e9   :  { %v1176_v55 = vadd.f32 %v1175_v50, %v1174_v24 }
 0x2eb   :  { %v1177_v53 = vrot.slane %v1176_v55, 2 }
 0x2ed   :  { %v1178_v14 = vadd.f32 %v1177_v53, %v1176_v55 }
 0x2ef   :  { %v1179_v12 = vrot.slane %v1178_v14, 1 }
 0x2f1   :  { %v1180_v40 = vadd.f32 %v1179_v12, %v1178_v14 }
 0x2f3   :  { %v1181_v42 = vmul.f32 %v1180_v40, %v6016_v18 }
 0x2f5   :  { %v1182_v60 = vadd.f32 1e-05, %v1181_v42 }
 0x2f7   :  { %4744 = vrsqrt.f32 %v1182_v60  ;;  %vm1189_vm7 = vweird.f32 %v1182_v60 }
 0x2fd   :  { %v4745_v47 = vpop.eup %4744 }
 0x2fe   :  { %v1184_v2 = vmul.f32 %v4745_v47, %v1182_v60  ;;  %vm1190_vm6 = vweird.f32 %v4745_v47 }
 0x2ff   :  { %vm1191_vm8 = vmor %vm1189_vm7, %vm1190_vm6  ;;  %vm8439_vm6 = vcmask 1044480   ;;  %vm8440_vm7 = vcmask 1046528  }
 0x300   :  { %v1185_v30 = vmul.f32 %v4745_v47, %v1184_v2 }
 0x302   :  { %v1186_v48 = vmul.f32 0.5, %v1185_v30 }
 0x304   :  { %v1187_v49 = vsub.f32 1.5, %v1186_v48 }
 0x306   :  { %v1188_v43 = vmul.f32 %v4745_v47, %v1187_v49 }
 0x308   :  { %v1192_v25 = vsel %vm1191_vm8, %v4745_v47, %v1188_v43  ;;  %vm8441_vm8 = vmmov %vm8439_vm6 }
 0x309   :  { %v1193_v44 = vmul.f32 %v1192_v25, %v105_v57 }
 0x30b   :  { %v1194_v56 = vmul.f32 %v1193_v44, %v1143_v17  ;;  %v1197_v23 = vperm.slane %v1193_v44, 0 }
 0x30d   :  { %v1195_v20 = vsub.f32 %v106_v58, %v1194_v56  ;;  %v1202_v5 = vmul.f32 %v1197_v23, %v5992_v36  ;;  %v1206_v46 = vmul.f32 %v1197_v23, %v6012_v0  ;;  %v1201_v22 = vmul.f32 %v1197_v23, %v5988_v52 }
 0x30e   :  { %v1205_v4 = vmul.f32 %v1197_v23, %v6008_v59  ;;  %v1200_v51 = vmul.f32 %v1197_v23, %v5984_v63  ;;  %v1204_v19 = vmul.f32 %v1197_v23, %v6002_v28  ;;  %v1199_v17 = vmul.f32 %v1197_v23, %v5986_v62 }
 0x30f   :  { %v1208_v16 = vperm.slane %v1195_v20, 0  ;;  %v1203_v61 = vmul.f32 %v1197_v23, %v5998_v11 }
 0x311   :  { %v1213_v54 = vadd.f32 %v1208_v16, %v1202_v5  ;;  %v1217_v3 = vadd.f32 %v1208_v16, %v1206_v46  ;;  %v1212_v6 = vadd.f32 %v1208_v16, %v1201_v22  ;;  %v1216_v1 = vadd.f32 %v1208_v16, %v1205_v4 }
 0x312   :  { %v1211_v9 = vadd.f32 %v1208_v16, %v1200_v51  ;;  %v1215_v0 = vadd.f32 %v1208_v16, %v1204_v19  ;;  %v1210_v34 = vadd.f32 %v1208_v16, %v1199_v17  ;;  %v1214_v63 = vadd.f32 %v1208_v16, %v1203_v61 }
 0x313   :  { %v1221_v36 = vmax.f32 %v1213_v54, 0.0  ;;  %v1225_v8 = vmax.f32 %v1217_v3, 0.0  ;;  %v1220_v52 = vmax.f32 %v1212_v6, 0.0  ;;  %v1224_v59 = vmax.f32 %v1216_v1, 0.0 }
 0x314   :  { %v1219_v28 = vmax.f32 %v1211_v9, 0.0  ;;  %v1223_v45 = vmax.f32 %v1215_v0, 0.0  ;;  %v1218_v62 = vmax.f32 %v1210_v34, 0.0  ;;  %v1222_v11 = vmax.f32 %v1214_v63, 0.0 }
 0x315   :  { %1278 = vmatpush.msra.mxu1 %v1221_v36  ;;  %1304 = vmatpush.msrb.mxu2 %v1225_v8 }
 0x316   :  { %1336 = vmatpush.msrb.mxu3 %v1221_v36 }
 0x317   :  { %1279 = vmatpush.msra.mxu1 %v1220_v52  ;;  %1305 = vmatpush.msrb.mxu2 %v1224_v59 }
 0x318   :  { %1337 = vmatpush.msrb.mxu3 %v1220_v52 }
 0x319   :  { %1280 = vmatpush.msra.mxu1 %v1219_v28  ;;  %1306 = vmatpush.msrb.mxu2 %v1223_v45 }
 0x31a   :  { %1338 = vmatpush.msrb.mxu3 %v1219_v28 }
 0x31b   :  { %1281 = vmatpush.msra.mxu1 %v1218_v62  ;;  %1307 = vmatpush.msrb.mxu2 %v1222_v11 }
 0x31c   :  { %1339 = vmatpush.msrb.mxu3 %v1218_v62  ;;  %4441 = vmatmul.msk.f32.vlgmr.msra.gmra.mxu1 %vm1259_vm9, %v5048_v26 }
 0x31d   :  { %4447 = vmatmul.msk.f32.vlgmr.msrb.gmra.mxu3 %vm1259_vm9, %v5051_v27  ;;  %1362 = vmatpush.msrb.mxu1 %v1225_v8 }
 0x31e   :  { %4444 = vmatmul.msk.f32.vlgmr.msrb.gmra.mxu2 %vm1259_vm9, %v5048_v26 }
 0x31f   :  { %1363 = vmatpush.msrb.mxu1 %v1224_v59 }
 0x321   :  { %1364 = vmatpush.msrb.mxu1 %v1223_v45 }
 0x323   :  { %1365 = vmatpush.msrb.mxu1 %v1222_v11 }
 0x324   :  { %4442 = vmatmul.msk.f32.gmra.mxu1 %vm1259_vm9, %v5072_v32 }
 0x325   :  { %4448 = vmatmul.msk.f32.gmra.mxu3 %vm1259_vm9, %v5075_v33 }
 0x326   :  { %4445 = vmatmul.msk.f32.gmra.mxu2 %vm1259_vm9, %v5072_v32 }
 0x32c   :  { %4443 = vmatmul.msk.f32.gmra.mxu1 %vm1259_vm9, %v5096_v38 }
 0x32d   :  { %4449 = vmatmul.msk.f32.gmra.mxu3 %vm1259_vm9, %v5099_v39 }
 0x32e   :  { %4446 = vmatmul.msk.f32.gmra.mxu2 %vm1259_vm9, %v5096_v38 }
 0x334   :  { %4450 = vmatmul.msk.f32.vlgmr.msrb.gmra.mxu1 %vm1259_vm9, %v5051_v27 }
 0x33c   :  { %4451 = vmatmul.msk.f32.gmra.mxu1 %vm1259_vm9, %v5075_v33 }
 0x344   :  { %4452 = vmatmul.msk.f32.gmra.mxu1 %vm1259_vm9, %v5099_v39 }
 0x399   :  { %v6074_v24 = vpop.f32.mrf.mxu1 }
 0x39a   :  { %v1612_v53 = vrot.slane %v6074_v24, 6  ;;  %v1568_v38 = vrot.slane %v6074_v24, 5  ;;  %v1656_v57 = vrot.slane %v6074_v24, 7  ;;  %v1444_v17 = vrot.slane %v6074_v24, 2 }
 0x3a0   :  { %v6076_v50 = vpop.f32.mrf.mxu3 }
 0x3a1   :  { %v6078_v55 = vpop.f32.mrf.mxu1  ;;  %v6084_v40 = vpop.f32.mrf.mxu2  ;;  %v1590_v2 = vrot.slane %v6076_v50, 5  ;;  %v1546_v49 = vrot.slane %v6076_v50, 4  ;;  %v1634_v16 = vrot.slane %v6076_v50, 6  ;;  %v1510_v62 = vrot.slane %v6076_v50, 3 }
 0x3a2   :  { %v1613_v14 = vrot.slane %v6078_v55, 6  ;;  %v1569_v12 = vrot.slane %v6078_v55, 5  ;;  %v1657_v47 = vrot.slane %v6078_v55, 7  ;;  %v1573_v56 = vrot.slane %v6084_v40, 5 }
 0x3a3   :  { %v1445_v19 = vrot.slane %v6078_v55, 2  ;;  %v1617_v54 = vrot.slane %v6084_v40, 6  ;;  %v1661_v6 = vrot.slane %v6084_v40, 7  ;;  %v1399_v28 = vrot.slane %v6078_v55, 1 }
 0x3a4   :  { %v1614_v39 = vsel %vm8428_vm10, %v1612_v53, %v1613_v14  ;;  %v1570_v42 = vsel %vm8429_vm4, %v1568_v38, %v1569_v12  ;;  %v1658_v44 = vsel %vm8432_vm11, %v1656_v57, %v1657_v47  ;;  %v1398_v53 = vrot.slane %v6074_v24, 1  ;;  %vm8442_vm10 = vmmov %vm8440_vm7 }
 0x3a5   :  { %1622 = vrot.lane.b32.xlu2 %v1614_v39, %s4832_s6  ;;  %1578 = vrot.lane.b32.xlu1 %v1570_v42, %s4833_s3  ;;  %v1446_v8 = vsel %vm8436_vm3, %v1444_v17, %v1445_v19  ;;  %vm8443_vm4 = vmmov %vm8433_vm1 }
 0x3a6   :  { %v1400_v42 = vsel %vm8442_vm10, %v1398_v53, %v1399_v28  ;;  %vm8446_vm11 = vmmov %vm8440_vm7 }
 0x3a8   :  { %v6094_v60 = vpop.f32.mrf.mxu3 }
 0x3a9   :  { %v1591_v30 = vrot.slane %v6094_v60, 5  ;;  %v1547_v48 = vrot.slane %v6094_v60, 4  ;;  %v6112_v58 = vpop.f32.mrf.mxu2  ;;  %v1635_v20 = vrot.slane %v6094_v60, 6  ;;  %v6119_v5 = vpop.f32.mrf.mxu1  ;;  %v4578_v4 = vpack.i.bf16 %v6094_v60, %v6076_v50 }
 0x3aa   :  { %v1574_v23 = vrot.slane %v6112_v58, 5  ;;  %v1447_v51 = vrot.slane %v6119_v5, 2  ;;  %v1618_v3 = vrot.slane %v6112_v58, 6  ;;  %v1662_v1 = vrot.slane %v6112_v58, 7 }
 0x3ab   :  { %v1592_v43 = vsel %vm8430_vm12, %v1590_v2, %v1591_v30  ;;  %v1548_v25 = vsel %vm8431_vm14, %v1546_v49, %v1547_v48  ;;  %v1636_v22 = vsel %vm8434_vm13, %v1634_v16, %v1635_v20  ;;  %v1401_v34 = vrot.slane %v6119_v5, 1  ;;  %vm8444_vm12 = vmmov %vm8440_vm7 }
 0x3ac   :  { %1600 = vrot.lane.b32.xlu0 %v1592_v43, %s4834_s7  ;;  %v1575_v46 = vsel %vm8433_vm1, %v1573_v56, %v1574_v23  ;;  %v1448_v61 = vsel %vm8435_vm15, %v1445_v19, %v1447_v51  ;;  %v1619_v9 = vsel %vm8437_vm0, %v1617_v54, %v1618_v3  ;;  %v1663_v52 = vsel %vm8438_vm5, %v1661_v6, %v1662_v1  ;;  %vm8445_vm14 = vmmov %vm8439_vm6 }
 0x3ad   :  { %1556 = vrot.lane.b32.xlu2 %v1548_v25, %s4835_s28  ;;  %1666 = vrot.lane.b32.xlu1 %v1658_v44, %s4836_s8  ;;  %v4588_v0 = vpack.i.bf16 %v1448_v61, %v1446_v8  ;;  %v1511_v63 = vrot.slane %v6094_v60, 3  ;;  %v1571_v45 = vrot.slane %v6119_v5, 5  ;;  %v1402_v38 = vsel %vm8440_vm7, %v1399_v28, %v1401_v34  ;;  %vm8447_vm1 = vmmov %vm8439_vm6 }
 0x3ae   :  { %v4583_v57 = vpack.i.bf16 %v1402_v38, %v1400_v42  ;;  %v1491_v25 = vrot.slane %v6119_v5, 3  ;;  %v1423_v44 = vrot.slane %v6094_v60, 1  ;;  %v1489_v56 = vrot.slane %v6078_v55, 3  ;;  %vm8448_vm13 = vmmov %vm8443_vm4 }
 0x3af   :  { %v1512_v39 = vsel %vm8441_vm8, %v1510_v62, %v1511_v63  ;;  %v1572_v2 = vsel %vm8443_vm4, %v1569_v12, %v1571_v45  ;;  %v1422_v16 = vrot.slane %v6076_v50, 1  ;;  %vm8449_vm15 = vmmov %vm8436_vm3  ;;  %v1404_v42 = vrot.slane %v6112_v58, 1 }
 0x3b0   :  { %v6141_v36 = vpop.f32.mrf.mxu3  ;;  %v1492_v51 = vsel %vm8445_vm14, %v1489_v56, %v1491_v25  ;;  %vm8450_vm5 = vmmov %vm8437_vm0 }
 0x3b1   :  { %v1513_v59 = vrot.slane %v6141_v36, 3  ;;  %v1425_v43 = vrot.slane %v6141_v36, 1  ;;  %v1424_v19 = vsel %vm8446_vm11, %v1422_v16, %v1423_v44  ;;  %v1469_v61 = vrot.slane %v6141_v36, 2  ;;  %v6206_v62 = vpop.f32.mrf.mxu2  ;;  %vm8452_vm7 = vmmov %vm8443_vm4 }
 0x3b2   :  { %vm8453_vm8 = vmmov %vm8442_vm10  ;;  %v1549_v25 = vrot.slane %v6141_v36, 4  ;;  %vm8455_vm4 = vcmask 1043456  }
 0x3b3   :  { %v1514_v11 = vsel %vm8439_vm6, %v1511_v63, %v1513_v59  ;;  %v1426_v12 = vsel %vm8444_vm12, %v1423_v44, %v1425_v43  ;;  %v1615_v59 = vrot.slane %v6119_v5, 6  ;;  %vm8451_vm6 = vcmask 1040384   ;;  %vm8454_vm10 = vmmov %vm8453_vm8 }
 0x3b4   :  { %1644 = vrot.lane.b32.xlu0 %v1636_v22, %s8329_s1  ;;  %v4608_v49 = vpack.i.bf16 %v1514_v11, %v1512_v39  ;;  %v1593_v22 = vrot.slane %v6141_v36, 5  ;;  %v4598_v54 = vpack.i.bf16 %v1426_v12, %v1424_v19  ;;  %v1659_v11 = vrot.slane %v6119_v5, 7  ;;  %vm8456_vm12 = vmmov %vm8437_vm0 }
 0x3b5   :  { %1582 = vrot.lane.b32.xlu2 %v1575_v46, %s4833_s3  ;;  %4579 = vrot.lane.b32.xlu1 %v4578_v4, %s4835_s28  ;;  %v6176_v46 = vpop.f32.mrf.mxu1  ;;  %v1488_v4 = vrot.slane %v6074_v24, 3  ;;  %v1616_v45 = vsel %vm8437_vm0, %v1613_v14, %v1615_v59  ;;  %v1403_v14 = vrot.slane %v6084_v40, 1  ;;  %v1493_v12 = vrot.slane %v6084_v40, 3  ;;  %vm8457_vm14 = vmmov %vm8447_vm1 }
 0x3b6   :  { %v1594_v8 = vsel %vm8448_vm13, %v1591_v30, %v1593_v22  ;;  %v1595_v53 = vrot.slane %v6176_v46, 5  ;;  %v1639_v44 = vrot.slane %v6176_v46, 6  ;;  %v1494_v22 = vrot.slane %v6112_v58, 3  ;;  %vm8458_vm11 = vmmov %vm8447_vm1 }
 0x3b7   :  { %v1490_v6 = vsel %vm8447_vm1, %v1488_v4, %v1489_v56  ;;  %v1449_v4 = vrot.slane %v6084_v40, 2  ;;  %v1496_v19 = vrot.slane %v6206_v62, 3  ;;  %vm8459_vm1 = vmmov %vm8436_vm3 }
 0x3b8   :  { %v4593_v17 = vpack.i.bf16 %v1492_v51, %v1490_v6  ;;  %v1550_v51 = vsel %vm8455_vm4, %v1547_v48, %v1549_v25  ;;  %v1495_v48 = vsel %vm8457_vm14, %v1493_v12, %v1494_v22  ;;  %vm8460_vm13 = vmmov %vm8459_vm1  ;;  %vm8472_vm14 = vcmask 1041408  }
 0x3b9   :  { %vm8464_vm0 = vmmov %vm8458_vm11 }
 0x3bc   :  { %1626 = vrot.lane.b32.xlu0 %v1619_v9, %s4832_s6  ;;  %v1467_v9 = vrot.slane %v6094_v60, 2 }
 0x3bd   :  { %1670 = vrot.lane.b32.xlu2 %v1663_v52, %s4836_s8  ;;  %4589 = vrot.lane.b32.xlu1 %v4588_v0, %s4832_s6  ;;  %v1466_v0 = vrot.slane %v6076_v50, 2  ;;  %v6195_v63 = vpop.f32.mrf.mxu1  ;;  %v1637_v50 = vrot.slane %v6141_v36, 6  ;;  %v1450_v36 = vrot.slane %v6112_v58, 2 }
 0x3be   :  { %v1470_v52 = vsel %vm8449_vm15, %v1467_v9, %v1469_v61  ;;  %v4628_v30 = vpack.i.bf16 %v6195_v63, %v6176_v46  ;;  %v1596_v38 = vrot.slane %v6195_v63, 5  ;;  %v1640_v56 = vrot.slane %v6195_v63, 6  ;;  %vm8461_vm15 = vmmov %vm8453_vm8 }
 0x3bf   :  { %v1468_v34 = vsel %vm8436_vm3, %v1466_v0, %v1467_v9  ;;  %v1638_v39 = vsel %vm8450_vm5, %v1635_v20, %v1637_v50  ;;  %v1405_v20 = vsel %vm8453_vm8, %v1403_v14, %v1404_v42  ;;  %v1428_v61 = vrot.slane %v6195_v63, 1  ;;  %vm8462_vm3 = vmmov %vm8453_vm8 }
 0x3c0   :  { %v4603_v28 = vpack.i.bf16 %v1470_v52, %v1468_v34  ;;  %v1641_v6 = vsel %vm8456_vm12, %v1639_v44, %v1640_v56  ;;  %v1451_v9 = vsel %vm8459_vm1, %v1449_v4, %v1450_v36  ;;  %v1255_v34 = vld [vmem:[%s8463_s0 + $0xe8] sm:$0xff]  ;;  %v1471_v14 = vrot.slane %v6176_v46, 2  ;;  %vm8465_vm5 = vmmov %vm8464_vm0 }
 0x3c1   :  { %1780 = vmatpush.msra.mxu3 %v1255_v34  ;;  %vm8468_vm8 = vmmov %vm8455_vm4  ;;  %v1664_v34 = vrot.slane %v6206_v62, 7 }
 0x3c4   :  { %1580 = vrot.lane.b32.xlu0 %v1572_v2, %s4833_s3  ;;  %v1406_v2 = vrot.slane %v6206_v62, 1 }
 0x3c5   :  { %4609 = vrot.lane.b32.xlu1 %v4608_v49, %s8327_s27  ;;  %4584 = vrot.lane.b32.xlu2 %v4583_v57, %s4833_s3  ;;  %v1660_v49 = vsel %vm8451_vm6, %v1657_v47, %v1659_v11  ;;  %v1597_v57 = vsel %vm8452_vm7, %v1595_v53, %v1596_v38  ;;  %v6231_v16 = vpop.f32.mrf.mxu1  ;;  %v1515_v11 = vrot.slane %v6176_v46, 3  ;;  %v1516_v53 = vrot.slane %v6195_v63, 3  ;;  %vm8466_vm6 = vmmov %vm8459_vm1 }
 0x3c6   :  { %v1407_v43 = vsel %vm8454_vm10, %v1404_v42, %v1406_v2  ;;  %v1430_v60 = vrot.slane %v6231_v16, 1  ;;  %v1472_v42 = vrot.slane %v6195_v63, 2  ;;  %v1474_v2 = vrot.slane %v6231_v16, 2  ;;  %vm8467_vm7 = vmmov %vm8459_vm1 }
 0x3c7   :  { %v4613_v47 = vpack.i.bf16 %v1407_v43, %v1405_v20  ;;  %v1253_v20 = vld [vmem:[%s8463_s0 + $0xd8] sm:$0xff]  ;;  %v1252_v43 = vld [vmem:[%s8463_s0 + $0xd0] sm:$0xff]  ;;  %v1517_v25 = vsel %vm8464_vm0, %v1515_v11, %v1516_v53  ;;  %vm8469_vm10 = vmmov %vm8455_vm4  ;;  %vm8470_vm4 = vcmask 1042432   ;;  %vm1700_vm0 = vcmask 785408  }
 0x3c8   :  { %v1431_v59 = vsel %vm8462_vm3, %v1428_v61, %v1430_v60  ;;  %v1475_v12 = vsel %vm8467_vm7, %v1472_v42, %v1474_v2  ;;  %vm8471_vm12 = vmmov %vm8470_vm4  ;;  %v1242_v11 = vld [vmem:[%s8463_s0 + $0x80] sm:$0xff]  ;;  %vm1695_vm3 = vcmask 654336  }
 0x3c9   :  { %vm8474_vm1 = vmmov %vm8472_vm14 }
 0x3ca   :  { %vm8477_vm7 = vmmov %vm8468_vm8 }
 0x3cc   :  { %4599 = vrot.lane.b32.xlu0 %v4598_v54, %s4834_s7  ;;  %v1452_v54 = vrot.slane %v6206_v62, 2 }
 0x3cd   :  { %1602 = vrot.lane.b32.xlu1 %v1594_v8, %s4834_s7  ;;  %4594 = vrot.lane.b32.xlu2 %v4593_v17, %s4836_s8  ;;  %v1427_v17 = vrot.slane %v6176_v46, 1  ;;  %v1497_v8 = vsel %vm8458_vm11, %v1494_v22, %v1496_v19  ;;  %v1250_v19 = vld [vmem:[%s8463_s0 + $0xc0] sm:$0xff]  ;;  %vm8473_vm11 = vcmask 1040384  }
 0x3ce   :  { %v1453_v0 = vsel %vm8460_vm13, %v1450_v36, %v1452_v54  ;;  %v1554_v36 = vrot.slane %v6231_v16, 4  ;;  %v1598_v54 = vrot.slane %v6231_v16, 5  ;;  %vm8475_vm13 = vmmov %vm8468_vm8 }
 0x3cf   :  { %v1429_v52 = vsel %vm8461_vm15, %v1427_v17, %v1428_v61  ;;  %v1249_v17 = vld [vmem:[%s8463_s0 + $0xb8] sm:$0xff]  ;;  %v1248_v61 = vld [vmem:[%s8463_s0 + $0xb0] sm:$0xff]  ;;  %vm1686_vm15 = vcmask 392192  }
 0x3d0   :  { %v4633_v50 = vpack.i.bf16 %v1431_v59, %v1429_v52  ;;  %v1620_v52 = vrot.slane %v6206_v62, 6  ;;  %v1246_v59 = vld [vmem:[%s8463_s0 + $0xa0] sm:$0xff] }
 0x3d4   :  { %4604 = vrot.lane.b32.xlu0 %v4603_v28, %s8329_s1  ;;  %v1254_v28 = vld [vmem:[%s8463_s0 + $0xe0] sm:$0xff] }
 0x3d5   :  { %1624 = vrot.lane.b32.xlu2 %v1616_v45, %s4832_s6  ;;  %4629 = vrot.lane.b32.xlu1 %v4628_v30, %s4835_s28  ;;  %v4623_v30 = vpack.i.bf16 %v1497_v8, %v1495_v48  ;;  %v4618_v45 = vpack.i.bf16 %v1453_v0, %v1451_v9  ;;  %v1247_v48 = vld [vmem:[%s8463_s0 + $0xa8] sm:$0xff]  ;;  %v1599_v8 = vsel %vm8470_vm4, %v1596_v38, %v1598_v54  ;;  %v1642_v38 = vrot.slane %v6231_v16, 6 }
 0x3d6   :  { %1781 = vmatpush.msra.mxu3 %v1254_v28  ;;  %v1244_v28 = vld [vmem:[%s8463_s0 + $0x90] sm:$0xff] }
 0x3d8   :  { %1782 = vmatpush.msra.mxu3 %v1253_v20  ;;  %v1234_v20 = vld [vmem:[%s8463_s0 + $0x40] sm:$0xff] }
 0x3da   :  { %1783 = vmatpush.msra.mxu3 %v1252_v43  ;;  %v1233_v43 = vld [vmem:[%s8463_s0 + $0x38] sm:$0xff] }
 0x3dc   :  { %1646 = vrot.lane.b32.xlu0 %v1638_v39, %s8329_s1  ;;  %v1518_v39 = vrot.slane %v6231_v16, 3  ;;  %v1665_v16 = vsel %vm8473_vm11, %v1662_v1, %v1664_v34  ;;  %v1241_v1 = vld [vmem:[%s8463_s0 + $0x78] sm:$0xff]  ;;  %v1226_v34 = vld [vmem:[%s8463_s0] sm:$0xff] }
 0x3dd   :  { %1668 = vrot.lane.b32.xlu2 %v1660_v49, %s4836_s8  ;;  %1604 = vrot.lane.b32.xlu1 %v1597_v57, %s4834_s7  ;;  %v1551_v49 = vrot.slane %v6176_v46, 4  ;;  %v1552_v57 = vrot.slane %v6195_v63, 4  ;;  %v1251_v46 = vld [vmem:[%s8463_s0 + $0xc8] sm:$0xff]  ;;  %v1240_v63 = vld [vmem:[%s8463_s0 + $0x70] sm:$0xff] }
 0x3de   :  { %v1519_v44 = vsel %vm8465_vm5, %v1516_v53, %v1518_v39  ;;  %1784 = vmatpush.msra.mxu3 %v1251_v46  ;;  %1749 = vmatpush.msra.mxu2 %v1241_v1  ;;  %v1239_v53 = vld [vmem:[%s8463_s0 + $0x68] sm:$0xff]  ;;  %v1238_v39 = vld [vmem:[%s8463_s0 + $0x60] sm:$0xff]  ;;  %vm8476_vm5 = vcmask 523264   ;;  %v1535_v1 = vrot.slane %v6119_v5, 4 }
 0x3df   :  { %v1553_v22 = vsel %vm8468_vm8, %v1551_v49, %v1552_v57  ;;  %v4643_v4 = vpack.i.bf16 %v1519_v44, %v1517_v25  ;;  %v1555_v60 = vsel %vm8469_vm10, %v1552_v57, %v1554_v36  ;;  %v1235_v57 = vld [vmem:[%s8463_s0 + $0x48] sm:$0xff]  ;;  %v1533_v25 = vrot.slane %v6078_v55, 4  ;;  %vm8478_vm8 = vmmov %vm8476_vm5 }
 0x3e0   :  { %1785 = vmatpush.msra.mxu3 %v1250_v19  ;;  %1750 = vmatpush.msra.mxu2 %v1240_v63  ;;  %v1532_v44 = vrot.slane %v6074_v24, 4  ;;  %v1231_v19 = vld [vmem:[%s8463_s0 + $0x28] sm:$0xff]  ;;  %vm8479_vm10 = vmmov %vm8476_vm5 }
 0x3e1   :  { %vm8480_vm4 = vmmov %vm8476_vm5 }
 0x3e2   :  { %1786 = vmatpush.msra.mxu3 %v1249_v17  ;;  %1751 = vmatpush.msra.mxu2 %v1239_v53  ;;  %v1229_v17 = vld [vmem:[%s8463_s0 + $0x18] sm:$0xff]  ;;  %vm8483_vm11 = vmmov %vm8480_vm4 }
 0x3e4   :  { %4614 = vrot.lane.b32.xlu0 %v4613_v47, %s4833_s3  ;;  %v1473_v47 = vsel %vm8466_vm6, %v1471_v14, %v1472_v42  ;;  %1787 = vmatpush.msra.mxu3 %v1248_v61  ;;  %v1237_v14 = vld [vmem:[%s8463_s0 + $0x58] sm:$0xff]  ;;  %v1236_v42 = vld [vmem:[%s8463_s0 + $0x50] sm:$0xff]  ;;  %vm1705_vm6 = vcmask 916480  }
 0x3e5   :  { %1558 = vrot.lane.b32.xlu2 %v1550_v51, %s4835_s28  ;;  %1648 = vrot.lane.b32.xlu1 %v1641_v6, %s8329_s1  ;;  %v4638_v51 = vpack.i.bf16 %v1475_v12, %v1473_v47  ;;  %v1576_v6 = vrot.slane %v6206_v62, 5 }
 0x3e6   :  { %1788 = vmatpush.msra.mxu3 %v1247_v48  ;;  %1752 = vmatpush.msra.mxu2 %v1238_v39 }
 0x3e7   :  { %v1577_v9 = vsel %vm8471_vm12, %v1574_v23, %v1576_v6  ;;  %v1245_v23 = vld [vmem:[%s8463_s0 + $0x98] sm:$0xff]  ;;  %v1230_v6 = vld [vmem:[%s8463_s0 + $0x20] sm:$0xff]  ;;  %vm8481_vm12 = vmmov %vm8477_vm7 }
 0x3e8   :  { %1789 = vmatpush.msra.mxu3 %v1246_v59  ;;  %1753 = vmatpush.msra.mxu2 %v1237_v14  ;;  %v1228_v59 = vld [vmem:[%s8463_s0 + $0x10] sm:$0xff] }
 0x3ea   :  { %1790 = vmatpush.msra.mxu3 %v1245_v23  ;;  %1754 = vmatpush.msra.mxu2 %v1236_v42 }
 0x3ec   :  { %4624 = vrot.lane.b32.xlu0 %v4623_v30, %s4836_s8  ;;  %v1621_v30 = vsel %vm8472_vm14, %v1618_v3, %v1620_v52  ;;  %1791 = vmatpush.msra.mxu3 %v1244_v28  ;;  %vm8482_vm14 = vmmov %vm8480_vm4 }
 0x3ed   :  { %4619 = vrot.lane.b32.xlu2 %v4618_v45, %s4832_s6  ;;  %4634 = vrot.lane.b32.xlu1 %v4633_v50, %s4834_s7  ;;  %v1243_v45 = vld [vmem:[%s8463_s0 + $0x88] sm:$0xff]  ;;  %v1643_v50 = vsel %vm8474_vm1, %v1640_v56, %v1642_v38  ;;  %vm8484_vm1 = vmmov %vm8480_vm4 }
 0x3ee   :  { %1792 = vmatpush.msra.mxu3 %v1243_v45  ;;  %1755 = vmatpush.msra.mxu2 %v1235_v57  ;;  %v1536_v57 = vsel %vm8477_vm7, %v1533_v25, %v1535_v1 }
 0x3f0   :  { %1793 = vmatpush.msra.mxu3 %v1242_v11  ;;  %1756 = vmatpush.msra.mxu2 %v1234_v20 }
 0x3f2   :  { %1757 = vmatpush.msra.mxu2 %v1233_v43 }
 0x3f4   :  { %1560 = vrot.lane.b32.xlu0 %v1553_v22, %s4835_s28  ;;  %v1534_v22 = vsel %vm8475_vm13, %v1532_v44, %v1533_v25  ;;  %vm8485_vm13 = vmmov %vm8477_vm7 }
 0x3f5   :  { %4644 = vrot.lane.b32.xlu2 %v4643_v4, %s8327_s27  ;;  %4639 = vrot.lane.b32.xlu1 %v4638_v51, %s8329_s1  ;;  %v1232_v51 = vld [vmem:[%s8463_s0 + $0x30] sm:$0xff]  ;;  %s8497_s27 = sld [smem:[#allocation15_spill]] }
 0x3f6   :  { %1758 = vmatpush.msra.mxu2 %v1232_v51 }
 0x3f8   :  { %1759 = vmatpush.msra.mxu2 %v1231_v19 }
 0x3fa   :  { %1760 = vmatpush.msra.mxu2 %v1230_v6 }
 0x3fc   :  { %1562 = vrot.lane.b32.xlu0 %v1555_v60, %s4835_s28  ;;  %1761 = vmatpush.msra.mxu2 %v1229_v17 }
 0x3fd   :  { %1606 = vrot.lane.b32.xlu2 %v1599_v8, %s4834_s7  ;;  %1584 = vrot.lane.b32.xlu1 %v1577_v9, %s4833_s3 }
 0x3fe   :  { %1762 = vmatpush.msra.mxu2 %v1228_v59 }
 0x3ff   :  { %v1623_v0 = vpop.permute.xlu2 %1622 }
 0x404   :  { %1628 = vrot.lane.b32.xlu0 %v1621_v30, %s4832_s6 }
 0x405   :  { %1672 = vrot.lane.b32.xlu2 %v1665_v16, %s4836_s8  ;;  %1650 = vrot.lane.b32.xlu1 %v1643_v50, %s8329_s1 }
 0x407   :  { %v1557_v3 = vpop.permute.xlu2 %1556 }
 0x408   :  { %v1710_v4 = vsel %vm1114_vm2, %v1534_v22, %v1557_v3 }
 0x40f   :  { %v6352_v56 = vpop.permute.xlu2 %1582 }
 0x417   :  { %v6366_v2 = vpop.permute.xlu2 %1670  ;;  %v1579_v49 = vpop.permute.xlu1 %1578 }
 0x418   :  { %v1714_v36 = vsel %vm1259_vm9, %v1710_v4, %v1579_v49 }
 0x41e   :  { %v1601_v47 = vpop.permute.xlu0 %1600 }
 0x41f   :  { %v1667_v12 = vpop.permute.xlu1 %1666  ;;  %v4585_v46 = vpop.permute.xlu2 %4584  ;;  %v1718_v54 = vsel %vm1686_vm15, %v1714_v36, %v1601_v47 }
 0x420   :  { %v1722_v60 = vsel %vm8476_vm5, %v1718_v54, %v1623_v0  ;;  %v1227_v0 = vld [vmem:[%s8463_s0 + $0x8] sm:$0xff]  ;;  %v4586_v14 = vunpack.i.l.bf16 %v4585_v46  ;;  %v4587_v5 = vunpack.i.h.bf16 %v4585_v46  ;;  %vm8486_vm5 = vmmov %vm8484_vm1 }
 0x421   :  { %1763 = vmatpush.msra.mxu2 %v1227_v0 }
 0x423   :  { %1764 = vmatpush.msra.mxu2 %v1226_v34 }
 0x426   :  { %v1645_v61 = vpop.permute.xlu0 %1644 }
 0x427   :  { %v1726_v48 = vsel %vm1695_vm3, %v1722_v60, %v1645_v61  ;;  %v4580_v8 = vpop.permute.xlu1 %4579  ;;  %v4595_v9 = vpop.permute.xlu2 %4594 }
 0x428   :  { %v1730_v52 = vsel %vm1700_vm0, %v1726_v48, %v1667_v12  ;;  %v4581_v50 = vunpack.i.l.bf16 %v4580_v8  ;;  %v4582_v63 = vunpack.i.h.bf16 %v4580_v8  ;;  %v4596_v51 = vunpack.i.l.bf16 %v4595_v9 }
 0x429   :  { %4453 = vmatmul.msk.f32.vlgmr.msra.gmra.mxu3 %vm1705_vm6, %v1730_v52  ;;  %v4597_v59 = vunpack.i.h.bf16 %v4595_v9 }
 0x42a   :  { %v1678_v53 = vsel %vm1114_vm2, %v6074_v24, %v4581_v50  ;;  %v1679_v20 = vsel %vm1114_vm2, %v6078_v55, %v4582_v63 }
 0x42b   :  { %v1682_v49 = vsel %vm1259_vm9, %v1678_v53, %v4586_v14  ;;  %v1683_v19 = vsel %vm1259_vm9, %v1679_v20, %v4587_v5 }
 0x42e   :  { %v6408_v38 = vpop.permute.xlu0 %1626 }
 0x42f   :  { %v4590_v23 = vpop.permute.xlu1 %4589  ;;  %v1625_v28 = vpop.permute.xlu2 %1624 }
 0x430   :  { %v4591_v12 = vunpack.i.l.bf16 %v4590_v23  ;;  %v4592_v61 = vunpack.i.h.bf16 %v4590_v23 }
 0x436   :  { %v1581_v30 = vpop.permute.xlu0 %1580 }
 0x437   :  { %v4610_v45 = vpop.permute.xlu1 %4609  ;;  %v1669_v16 = vpop.permute.xlu2 %1668 }
 0x438   :  { %v4611_v54 = vunpack.i.l.bf16 %v4610_v45  ;;  %v4612_v1 = vunpack.i.h.bf16 %v4610_v45 }
 0x43e   :  { %v4600_v3 = vpop.permute.xlu0 %4599 }
 0x43f   :  { %v1603_v11 = vpop.permute.xlu1 %1602  ;;  %v4601_v39 = vunpack.i.l.bf16 %v4600_v3  ;;  %v1559_v42 = vpop.permute.xlu2 %1558  ;;  %v4602_v43 = vunpack.i.h.bf16 %v4600_v3 }
 0x440   :  { %v1711_v47 = vsel %vm1114_vm2, %v1536_v57, %v1559_v42  ;;  %v1537_v57 = vrot.slane %v6084_v40, 4 }
 0x441   :  { %v1687_v44 = vsel %vm1686_vm15, %v1682_v49, %v4601_v39  ;;  %v1715_v36 = vsel %vm1259_vm9, %v1711_v47, %v1581_v30  ;;  %v1688_v55 = vsel %vm1686_vm15, %v1683_v19, %v4602_v43 }
 0x442   :  { %v1691_v25 = vsel %vm8478_vm8, %v1687_v44, %v4591_v12  ;;  %v1719_v48 = vsel %vm1686_vm15, %v1715_v36, %v1603_v11  ;;  %v1692_v8 = vsel %vm8479_vm10, %v1688_v55, %v4592_v61 }
 0x443   :  { %v1723_v34 = vsel %vm8480_vm4, %v1719_v48, %v1625_v28 }
 0x446   :  { %v4605_v22 = vpop.permute.xlu0 %4604 }
 0x447   :  { %v4606_v4 = vunpack.i.l.bf16 %v4605_v22  ;;  %v4630_v24 = vpop.permute.xlu1 %4629  ;;  %v4607_v6 = vunpack.i.h.bf16 %v4605_v22  ;;  %v4620_v39 = vpop.permute.xlu2 %4619 }
 0x448   :  { %v4631_v42 = vunpack.i.l.bf16 %v4630_v24  ;;  %v4632_v20 = vunpack.i.h.bf16 %v4630_v24 }
 0x449   :  { %v1696_v17 = vsel %vm1695_vm3, %v1691_v25, %v4606_v4  ;;  %v1697_v52 = vsel %vm1695_vm3, %v1692_v8, %v4607_v6  ;;  %v4622_v8 = vunpack.i.h.bf16 %v4620_v39 }
 0x44a   :  { %v1701_v46 = vsel %vm1700_vm0, %v1696_v17, %v4596_v51  ;;  %v1702_v3 = vsel %vm1700_vm0, %v1697_v52, %v4597_v59  ;;  %v1680_v45 = vsel %vm1114_vm2, %v6084_v40, %v4631_v42  ;;  %v4621_v51 = vunpack.i.l.bf16 %v4620_v39 }
 0x44b   :  { %v1706_v60 = vsel %vm1705_vm6, %v1701_v46, %v4611_v54  ;;  %v1707_v11 = vsel %vm1705_vm6, %v1702_v3, %v4612_v1  ;;  %v1681_v24 = vsel %vm1114_vm2, %v6112_v58, %v4632_v20 }
 0x44c   :  { %1765 = vmatmul.f32.vlgmr.msra.gmra.mxu2 %v1706_v60 }
 0x44e   :  { %v1647_v0 = vpop.permute.xlu0 %1646 }
 0x44f   :  { %v1727_v30 = vsel %vm1695_vm3, %v1723_v34, %v1647_v0  ;;  %v1605_v50 = vpop.permute.xlu1 %1604  ;;  %v4645_v43 = vpop.permute.xlu2 %4644 }
 0x450   :  { %v1731_v23 = vsel %vm1700_vm0, %v1727_v30, %v1669_v16  ;;  %v1538_v16 = vrot.slane %v6112_v58, 4  ;;  %v4646_v25 = vunpack.i.l.bf16 %v4645_v43 }
 0x451   :  { %4454 = vmatmul.msk.f32.gmra.mxu3 %vm1705_vm6, %v1731_v23 }
 0x452   :  { %v1539_v22 = vsel %vm8481_vm12, %v1537_v57, %v1538_v16  ;;  %vm8490_vm12 = vcmask 1046528  }
 0x454   :  { %1768 = vmatmul.f32.gmra.mxu2 %v1707_v11 }
 0x456   :  { %v4615_v63 = vpop.permute.xlu0 %4614 }
 0x457   :  { %v1649_v53 = vpop.permute.xlu1 %1648  ;;  %v4616_v28 = vunpack.i.l.bf16 %v4615_v63  ;;  %v4617_v44 = vunpack.i.h.bf16 %v4615_v63 }
 0x459   :  { %v1684_v47 = vsel %vm1259_vm9, %v1680_v45, %v4616_v28  ;;  %v1685_v55 = vsel %vm1259_vm9, %v1681_v24, %v4617_v44 }
 0x45e   :  { %v4625_v9 = vpop.permute.xlu0 %4624 }
 0x45f   :  { %v4635_v14 = vpop.permute.xlu1 %4634  ;;  %v4626_v6 = vunpack.i.l.bf16 %v4625_v9  ;;  %v4627_v3 = vunpack.i.h.bf16 %v4625_v9 }
 0x460   :  { %v4636_v49 = vunpack.i.l.bf16 %v4635_v14  ;;  %v4637_v5 = vunpack.i.h.bf16 %v4635_v14 }
 0x462   :  { %v1689_v12 = vsel %vm1686_vm15, %v1684_v47, %v4636_v49  ;;  %v1690_v46 = vsel %vm1686_vm15, %v1685_v55, %v4637_v5  ;;  %v4735_v47 = vld [vmem:[%s8487_s29] ss:$0 sm:$0xff] }
 0x463   :  { %v1693_v61 = vsel %vm8482_vm14, %v1689_v12, %v4621_v51  ;;  %v1694_v30 = vsel %vm8484_vm1, %v1690_v46, %v4622_v8  ;;  %vm8491_vm14 = vcmask 1044480   ;;  %vm8493_vm1 = vmmov %vm8490_vm12 }
 0x466   :  { %v1561_v4 = vpop.permute.xlu0 %1560 }
 0x467   :  { %v1712_v19 = vsel %vm1114_vm2, %v1539_v22, %v1561_v4  ;;  %v4640_v36 = vpop.permute.xlu1 %4639  ;;  %v4839_v22 = vmov 32.0  }
 0x468   :  { %v1716_v40 = vsel %vm1259_vm9, %v1712_v19, %v6352_v56  ;;  %v4641_v54 = vunpack.i.l.bf16 %v4640_v36  ;;  %v4642_v60 = vunpack.i.h.bf16 %v4640_v36  ;;  %v1540_v56 = vrot.slane %v6206_v62, 4 }
 0x469   :  { %v1720_v17 = vsel %vm1686_vm15, %v1716_v40, %v1605_v50  ;;  %4746 = vrcp.f32 %v4839_v22 }
 0x46a   :  { %v1724_v48 = vsel %vm8483_vm11, %v1720_v17, %v6408_v38  ;;  %v1698_v58 = vsel %vm1695_vm3, %v1693_v61, %v4641_v54  ;;  %v1607_v38 = vpop.permute.xlu2 %1606  ;;  %v1699_v23 = vsel %vm1695_vm3, %v1694_v30, %v4642_v60  ;;  %v1541_v1 = vsel %vm8485_vm13, %v1538_v16, %v1540_v56  ;;  %vm8494_vm13 = vmmov %vm8491_vm14 }
 0x46b   :  { %v1728_v52 = vsel %vm1695_vm3, %v1724_v48, %v1649_v53  ;;  %v1703_v59 = vsel %vm1700_vm0, %v1698_v58, %v4626_v6  ;;  %v1704_v63 = vsel %vm1700_vm0, %v1699_v23, %v4627_v3  ;;  %vm8492_vm11 = vcmask 1045504  }
 0x46c   :  { %v1732_v0 = vsel %vm1700_vm0, %v1728_v52, %v6366_v2  ;;  %v1708_v34 = vsel %vm1705_vm6, %v1703_v59, %v4646_v25  ;;  %v4647_v2 = vunpack.i.h.bf16 %v4645_v43 }
 0x46d   :  { %4455 = vmatmul.msk.f32.gmra.mxu3 %vm1705_vm6, %v1732_v0  ;;  %1771 = vmatmul.f32.gmra.mxu2 %v1708_v34 }
 0x46e   :  { %v1563_v50 = vpop.permute.xlu0 %1562  ;;  %v1709_v39 = vsel %vm1705_vm6, %v1704_v63, %v4647_v2 }
 0x46f   :  { %v1585_v62 = vpop.permute.xlu1 %1584  ;;  %v1713_v11 = vsel %vm1114_vm2, %v1541_v1, %v1563_v50  ;;  %v4747_v40 = vpop.eup %4746 }
 0x470   :  { %v1717_v53 = vsel %vm1259_vm9, %v1713_v11, %v1585_v62  ;;  %v1821_v46 = vmul.f32 32.0, %v4747_v40  ;;  %vm1825_vm7 = vweird.f32 %v4747_v40 }
 0x471   :  { %v1721_v42 = vsel %vm1686_vm15, %v1717_v53, %v1607_v38 }
 0x472   :  { %v1673_v9 = vpop.permute.xlu2 %1672  ;;  %v1822_v56 = vsub.f32 1.0, %v1821_v46  ;;  %v1257_v46 = vld [vmem:[%s8488_s2] sm:$0x1] }
 0x474   :  { %v1823_v34 = vmul.f32 %v4747_v40, %v1822_v56 }
 0x475   :  { %1774 = vmatmul.f32.gmra.mxu2 %v1709_v39 }
 0x476   :  { %v1629_v14 = vpop.permute.xlu0 %1628  ;;  %v1824_v50 = vadd.f32 %v4747_v40, %v1823_v34 }
 0x477   :  { %v1725_v28 = vsel %vm8486_vm5, %v1721_v42, %v1629_v14  ;;  %v1651_v49 = vpop.permute.xlu1 %1650  ;;  %vm8495_vm5 = vmmov %vm8493_vm1 }
 0x478   :  { %v1729_v57 = vsel %vm1695_vm3, %v1725_v28, %v1651_v49  ;;  %v6489_v1 = vsel %vm1825_vm7, %v4747_v40, %v1824_v50  ;;  %vm8496_vm7 = vmmov %vm8494_vm13 }
 0x479   :  { %v1733_v16 = vsel %vm1700_vm0, %v1729_v57, %v1673_v9 }
 0x47a   :  { %4456 = vmatmul.msk.f32.gmra.mxu3 %vm1705_vm6, %v1733_v16 }
 0x4ac   :  { %v1795_v45 = vpop.f32.mrf.mxu3 }
 0x4cf   :  { %v1766_v20 = vpop.f32.mrf.mxu2 }
 0x4d0   :  { %v1767_v4 = vadd.f32 %v4735_v47, %v1766_v20 }
 0x4d2   :  { %v6478_v24 = vadd.f32 %v1795_v45, %v1767_v4 }
 0x4d4   :  { %v1798_v44 = vpop.f32.mrf.mxu3  ;;  %v1807_v6 = vsel %vm1259_vm9, %v6478_v24, 0.0 }
 0x4d7   :  { %v1769_v43 = vpop.f32.mrf.mxu2 }
 0x4d8   :  { %v1770_v12 = vadd.f32 %v4735_v47, %v1769_v43 }
 0x4da   :  { %v6476_v36 = vadd.f32 %v1798_v44, %v1770_v12 }
 0x4dc   :  { %v1808_v55 = vsel %vm1259_vm9, %v6476_v36, 0.0 }
 0x4dd   :  { %v1809_v60 = vadd.f32 %v1808_v55, %v1807_v6 }
 0x4f0   :  { %v1772_v5 = vpop.f32.mrf.mxu2  ;;  %v1801_v19 = vpop.f32.mrf.mxu3 }
 0x4f1   :  { %v1773_v51 = vadd.f32 %v4735_v47, %v1772_v5 }
 0x4f3   :  { %v6480_v25 = vadd.f32 %v1801_v19, %v1773_v51 }
 0x4f5   :  { %v1810_v17 = vsel %vm1259_vm9, %v6480_v25, 0.0 }
 0x4f6   :  { %v1811_v8 = vadd.f32 %v1810_v17, %v1809_v60 }
 0x4f8   :  { %v1775_v54 = vpop.f32.mrf.mxu2 }
 0x4f9   :  { %v1776_v61 = vadd.f32 %v4735_v47, %v1775_v54 }
 0x4fd   :  { %v1804_v48 = vpop.f32.mrf.mxu3 }
 0x4fe   :  { %v1805_v58 = vadd.f32 %v1804_v48, %v1776_v61 }
 0x500   :  { %v1812_v52 = vsel %vm1259_vm9, %v1805_v58, 0.0 }
 0x501   :  { %v1813_v59 = vadd.f32 %v1812_v52, %v1811_v8  ;;  %v1258_v52 = vld [vmem:[%s8489_s10] sm:$0x1]  ;;  %s4393_s10 = sshll.u32 %s8272_s26, 4  ;;  %s4394_s10 = int_to_ptr.hbm [resolvable:$true] %s4393_s10 }
 0x503   :  { %v1814_v0 = vrot.slane %v1813_v59, 4 }
 0x505   :  { %v1815_v30 = vadd.f32 %v1814_v0, %v1813_v59 }
 0x507   :  { %v1816_v38 = vrot.slane %v1815_v30, 2 }
 0x509   :  { %v1817_v23 = vadd.f32 %v1816_v38, %v1815_v30 }
 0x50b   :  { %v1818_v3 = vrot.slane %v1817_v23, 1 }
 0x50d   :  { %v1819_v62 = vadd.f32 %v1818_v3, %v1817_v23 }
 0x50f   :  { %v1827_v11 = vmul.f32 %v6489_v1, %v1819_v62 }
 0x511   :  { %v1828_v63 = vsub.f32 %v6478_v24, %v1827_v11  ;;  %v1829_v2 = vsub.f32 %v6476_v36, %v1827_v11  ;;  %v1830_v53 = vsub.f32 %v6480_v25, %v1827_v11  ;;  %v1831_v39 = vsub.f32 %v1805_v58, %v1827_v11 }
 0x513   :  { %v1832_v14 = vmul.f32 %v1828_v63, %v1828_v63  ;;  %v1833_v42 = vmul.f32 %v1829_v2, %v1829_v2  ;;  %v1834_v28 = vmul.f32 %v1830_v53, %v1830_v53  ;;  %v1835_v49 = vmul.f32 %v1831_v39, %v1831_v39 }
 0x515   :  { %v1836_v9 = vsel %vm1259_vm9, %v1832_v14, 0.0  ;;  %v1837_v57 = vsel %vm1259_vm9, %v1833_v42, 0.0  ;;  %v1839_v20 = vsel %vm1259_vm9, %v1834_v28, 0.0  ;;  %v1841_v43 = vsel %vm1259_vm9, %v1835_v49, 0.0 }
 0x516   :  { %v1838_v16 = vadd.f32 %v1837_v57, %v1836_v9 }
 0x518   :  { %v1840_v45 = vadd.f32 %v1839_v20, %v1838_v16 }
 0x51a   :  { %v1842_v44 = vadd.f32 %v1841_v43, %v1840_v45 }
 0x51c   :  { %v1843_v47 = vrot.slane %v1842_v44, 4 }
 0x51e   :  { %v1844_v5 = vadd.f32 %v1843_v47, %v1842_v44 }
 0x520   :  { %v1845_v12 = vrot.slane %v1844_v5, 2 }
 0x522   :  { %v1846_v22 = vadd.f32 %v1845_v12, %v1844_v5 }
 0x524   :  { %v1847_v4 = vrot.slane %v1846_v22, 1 }
 0x526   :  { %v1848_v51 = vadd.f32 %v1847_v4, %v1846_v22 }
 0x528   :  { %v1849_v19 = vmul.f32 %v1848_v51, %v6489_v1 }
 0x52a   :  { %v1850_v40 = vadd.f32 1e-05, %v1849_v19 }
 0x52c   :  { %4748 = vrsqrt.f32 %v1850_v40  ;;  %vm1857_vm10 = vweird.f32 %v1850_v40 }
 0x532   :  { %v4749_v54 = vpop.eup %4748 }
 0x533   :  { %v1852_v55 = vmul.f32 %v4749_v54, %v1850_v40  ;;  %vm1858_vm8 = vweird.f32 %v4749_v54 }
 0x534   :  { %vm1859_vm4 = vmor %vm1857_vm10, %vm1858_vm8  ;;  %vm8498_vm8 = vcmask 1042432  }
 0x535   :  { %v1853_v6 = vmul.f32 %v4749_v54, %v1852_v55  ;;  %vm8499_vm10 = vmmov %vm8498_vm8 }
 0x537   :  { %v1854_v17 = vmul.f32 0.5, %v1853_v6 }
 0x539   :  { %v1855_v61 = vsub.f32 1.5, %v1854_v17 }
 0x53b   :  { %v1856_v60 = vmul.f32 %v4749_v54, %v1855_v61 }
 0x53d   :  { %v1860_v48 = vsel %vm1859_vm4, %v4749_v54, %v1856_v60  ;;  %vm8500_vm4 = vmmov %vm8492_vm11 }
 0x53e   :  { %v1861_v8 = vmul.f32 %v1860_v48, %v1257_v46 }
 0x540   :  { %v1862_v56 = vmul.f32 %v1861_v8, %v1827_v11  ;;  %v1865_v59 = vperm.slane %v1861_v8, 0  ;;  %v1897_v8 = vld [vmem:[%s8497_s27 + $0x78] sm:$0xff] }
 0x541   :  { %2234 = vmatpush.msrb.mxu2 %v1897_v8 }
 0x542   :  { %v1863_v0 = vsub.f32 %v1258_v52, %v1862_v56  ;;  %v1870_v34 = vmul.f32 %v1865_v59, %v1805_v58  ;;  %v1868_v38 = vmul.f32 %v1865_v59, %v6476_v36  ;;  %v1867_v50 = vmul.f32 %v1865_v59, %v6478_v24  ;;  %v1913_v52 = vld [vmem:[%s8497_s27 + $0xf8] sm:$0xff]  ;;  %v1896_v56 = vld [vmem:[%s8497_s27 + $0x70] sm:$0xff] }
 0x543   :  { %v1869_v23 = vmul.f32 %v1865_v59, %v6480_v25  ;;  %2235 = vmatpush.msrb.mxu2 %v1896_v56 }
 0x544   :  { %v1872_v30 = vperm.slane %v1863_v0, 0  ;;  %v1912_v0 = vld [vmem:[%s8497_s27 + $0xf0] sm:$0xff] }
 0x546   :  { %v1877_v3 = vadd.f32 %v1872_v30, %v1870_v34  ;;  %v1875_v62 = vadd.f32 %v1872_v30, %v1868_v38  ;;  %v1874_v63 = vadd.f32 %v1872_v30, %v1867_v50  ;;  %v1876_v2 = vadd.f32 %v1872_v30, %v1869_v23 }
 0x548   :  { %v1879_v53 = vmax.f32 %v1875_v62, 0.0  ;;  %v1881_v39 = vmax.f32 %v1877_v3, 0.0  ;;  %v1878_v14 = vmax.f32 %v1874_v63, 0.0  ;;  %v1880_v11 = vmax.f32 %v1876_v2, 0.0  ;;  %v1895_v3 = vld [vmem:[%s8497_s27 + $0x68] sm:$0xff] }
 0x549   :  { %2236 = vmatpush.msrb.mxu2 %v1895_v3  ;;  %v1889_v3 = vld [vmem:[%s8497_s27 + $0x38] sm:$0xff] }
 0x54a   :  { %1963 = vmatpush.msra.mxu1 %v1879_v53  ;;  %1986 = vmatpush.msrb.mxu3 %v1881_v39 }
 0x54b   :  { %2013 = vmatpush.msra.mxu0 %v1879_v53 }
 0x54c   :  { %1964 = vmatpush.msra.mxu1 %v1878_v14  ;;  %1987 = vmatpush.msrb.mxu3 %v1880_v11 }
 0x54d   :  { %2014 = vmatpush.msra.mxu0 %v1878_v14  ;;  %4457 = vmatmul.msk.f32.vlgmr.msra.gmra.mxu1 %vm1114_vm2, %v5048_v26  ;;  %v1894_v14 = vld [vmem:[%s8497_s27 + $0x60] sm:$0xff] }
 0x54e   :  { %4461 = vmatmul.msk.f32.vlgmr.msra.gmra.mxu0 %vm1114_vm2, %v5051_v27  ;;  %2036 = vmatpush.msrb.mxu1 %v1881_v39  ;;  %v1911_v39 = vld [vmem:[%s8497_s27 + $0xe8] sm:$0xff] }
 0x54f   :  { %4459 = vmatmul.msk.f32.vlgmr.msrb.gmra.mxu3 %vm1114_vm2, %v5048_v26  ;;  %2237 = vmatpush.msrb.mxu2 %v1894_v14  ;;  %v1886_v14 = vld [vmem:[%s8497_s27 + $0x20] sm:$0xff] }
 0x550   :  { %2037 = vmatpush.msrb.mxu1 %v1880_v11  ;;  %2257 = vmatpush.msra.mxu3 %v1913_v52 }
 0x552   :  { %2258 = vmatpush.msra.mxu3 %v1912_v0 }
 0x554   :  { %2259 = vmatpush.msra.mxu3 %v1911_v39  ;;  %v1903_v39 = vld [vmem:[%s8497_s27 + $0xa8] sm:$0xff] }
 0x555   :  { %4458 = vmatmul.msk.f32.gmra.mxu1 %vm1114_vm2, %v5072_v32 }
 0x556   :  { %4462 = vmatmul.msk.f32.gmra.mxu0 %vm1114_vm2, %v5075_v33 }
 0x557   :  { %4460 = vmatmul.msk.f32.gmra.mxu3 %vm1114_vm2, %v5072_v32 }
 0x55d   :  { %4463 = vmatmul.msk.f32.vlgmr.msrb.gmra.mxu1 %vm1114_vm2, %v5051_v27 }
 0x565   :  { %4464 = vmatmul.msk.f32.gmra.mxu1 %vm1114_vm2, %v5075_v33 }
 0x5ca   :  { %v6525_v36 = vpop.f32.mrf.mxu1 }
 0x5cb   :  { %v6527_v24 = vpop.f32.mrf.mxu0  ;;  %v2057_v27 = vrot.slane %v6525_v36, 1  ;;  %v2103_v49 = vrot.slane %v6525_v36, 3  ;;  %v2147_v30 = vrot.slane %v6525_v36, 5 }
 0x5cc   :  { %v2091_v58 = vrot.slane %v6527_v24, 2  ;;  %v2071_v42 = vrot.slane %v6527_v24, 1  ;;  %v2115_v32 = vrot.slane %v6527_v24, 3 }
 0x5d2   :  { %v6529_v26 = vpop.f32.mrf.mxu1  ;;  %v6531_v25 = vpop.f32.mrf.mxu3 }
 0x5d3   :  { %v6536_v28 = vpop.f32.mrf.mxu0  ;;  %v2058_v33 = vrot.slane %v6529_v26, 1  ;;  %v2104_v9 = vrot.slane %v6529_v26, 3  ;;  %v2060_v51 = vrot.slane %v6531_v25, 1  ;;  %v2106_v19 = vrot.slane %v6531_v25, 3 }
 0x5d4   :  { %v2072_v57 = vrot.slane %v6536_v28, 1  ;;  %v2092_v16 = vrot.slane %v6536_v28, 2  ;;  %v2116_v20 = vrot.slane %v6536_v28, 3  ;;  %v2150_v60 = vrot.slane %v6531_v25, 5 }
 0x5d5   :  { %v2059_v45 = vsel %vm8490_vm12, %v2057_v27, %v2058_v33  ;;  %v2105_v43 = vsel %vm8491_vm14, %v2103_v49, %v2104_v9  ;;  %v2148_v59 = vrot.slane %v6529_v26, 5  ;;  %vm8501_vm12 = vmmov %vm8493_vm1  ;;  %v1910_v9 = vld [vmem:[%s8497_s27 + $0xe0] sm:$0xff] }
 0x5d6   :  { %v2093_v44 = vsel %vm8492_vm11, %v2091_v58, %v2092_v16  ;;  %v4653_v47 = vpack.i.bf16 %v2105_v43, %v2059_v45  ;;  %v2073_v5 = vsel %vm8493_vm1, %v2071_v42, %v2072_v57  ;;  %v2117_v12 = vsel %vm8494_vm13, %v2115_v32, %v2116_v20  ;;  %vm8502_vm14 = vmmov %vm8496_vm7  ;;  %v1893_v16 = vld [vmem:[%s8497_s27 + $0x58] sm:$0xff]  ;;  %2260 = vmatpush.msra.mxu3 %v1910_v9  ;;  %v1883_v9 = vld [vmem:[%s8497_s27 + $0x8] sm:$0xff] }
 0x5d7   :  { %v4648_v22 = vpack.i.bf16 %v2093_v44, %v6527_v24  ;;  %v4658_v4 = vpack.i.bf16 %v2117_v12, %v2073_v5  ;;  %v2149_v11 = vsel %vm8499_vm10, %v2147_v30, %v2148_v59  ;;  %v1909_v20 = vld [vmem:[%s8497_s27 + $0xd8] sm:$0xff]  ;;  %v2136_v45 = vrot.slane %v6536_v28, 4  ;;  %2238 = vmatpush.msrb.mxu2 %v1893_v16  ;;  %v1892_v30 = vld [vmem:[%s8497_s27 + $0x50] sm:$0xff]  ;;  %v1927_v16 = vld [vmem:[%s8497_s27 + $0x168] sm:$0xff] }
 0x5d8   :  { %4654 = vrot.lane.b32.xlu1 %v4653_v47, %s4832_s6  ;;  %v2135_v43 = vrot.slane %v6527_v24, 4  ;;  %v2192_v47 = vrot.slane %v6529_v26, 7  ;;  %vm8503_vm11 = vcmask 1043456   ;;  %2261 = vmatpush.msra.mxu3 %v1909_v20  ;;  %v2159_v12 = vrot.slane %v6527_v24, 5  ;;  %v1882_v20 = vld [vmem:[%s8497_s27] sm:$0xff] }
 0x5d9   :  { %4649 = vrot.lane.b32.xlu0 %v4648_v22, %s4833_s3  ;;  %4659 = vrot.lane.b32.xlu2 %v4658_v4, %s4836_s8  ;;  %v2160_v22 = vrot.slane %v6536_v28, 5  ;;  %v2191_v4 = vrot.slane %v6525_v36, 7  ;;  %vm8504_vm1 = vmmov %vm8503_vm11  ;;  %vm8505_vm13 = vcmask 1040384  }
 0x5da   :  { %v6556_v40 = vpop.f32.mrf.mxu3  ;;  %v6558_v54 = vpop.f32.mrf.mxu1  ;;  %2239 = vmatpush.msrb.mxu2 %v1892_v30  ;;  %v1914_v30 = vld [vmem:[%s8497_s27 + $0x100] sm:$0xff] }
 0x5db   :  { %v2061_v55 = vrot.slane %v6556_v40, 1  ;;  %v2107_v6 = vrot.slane %v6556_v40, 3  ;;  %v2151_v48 = vrot.slane %v6556_v40, 5  ;;  %v2094_v38 = vrot.slane %v6558_v54, 2 }
 0x5dc   :  { %v2074_v50 = vrot.slane %v6558_v54, 1  ;;  %v2118_v23 = vrot.slane %v6558_v54, 3  ;;  %v2138_v44 = vrot.slane %v6558_v54, 4  ;;  %v2162_v8 = vrot.slane %v6558_v54, 5 }
 0x5dd   :  { %v2062_v17 = vsel %vm8495_vm5, %v2060_v51, %v2061_v55  ;;  %v2108_v61 = vsel %vm8496_vm7, %v2106_v19, %v2107_v6  ;;  %v2152_v53 = vsel %vm8498_vm8, %v2150_v60, %v2151_v48  ;;  %v2137_v51 = vsel %vm8504_vm1, %v2135_v43, %v2136_v45  ;;  %vm8506_vm5 = vmmov %vm8498_vm8  ;;  %v1898_v45 = vld [vmem:[%s8497_s27 + $0x80] sm:$0xff] }
 0x5de   :  { %v4663_v46 = vpack.i.bf16 %v2108_v61, %v2062_v17  ;;  %v4668_v27 = vpack.i.bf16 %v2152_v53, %v2149_v11  ;;  %v2193_v55 = vsel %vm8505_vm13, %v2191_v4, %v2192_v47  ;;  %v2161_v6 = vsel %vm8506_vm5, %v2159_v12, %v2160_v22  ;;  %vm8507_vm7 = vmmov %vm8505_vm13  ;;  %v1887_v53 = vld [vmem:[%s8497_s27 + $0x28] sm:$0xff]  ;;  %v1902_v11 = vld [vmem:[%s8497_s27 + $0xa0] sm:$0xff] }
 0x5df   :  { %v2194_v17 = vrot.slane %v6531_v25, 7  ;;  %v2195_v61 = vrot.slane %v6556_v40, 7  ;;  %v2180_v60 = vrot.slane %v6536_v28, 6  ;;  %vm8508_vm8 = vcmask 1041408   ;;  %vm8509_vm10 = vmmov %vm8506_vm5  ;;  %v1926_v43 = vld [vmem:[%s8497_s27 + $0x160] sm:$0xff]  ;;  %v1941_v47 = vld [vmem:[%s8497_s27 + $0x1d8] sm:$0xff] }
 0x5e0   :  { %4664 = vrot.lane.b32.xlu1 %v4663_v46, %s4832_s6  ;;  %v2179_v46 = vrot.slane %v6527_v24, 6  ;;  %v2182_v28 = vrot.slane %v6558_v54, 6  ;;  %2307 = vmatpush.msra.mxu1 %v1941_v47  ;;  %v1924_v12 = vld [vmem:[%s8497_s27 + $0x150] sm:$0xff]  ;;  %v1939_v22 = vld [vmem:[%s8497_s27 + $0x1c8] sm:$0xff] }
 0x5e1   :  { %v2196_v52 = vsel %vm8507_vm7, %v2194_v17, %v2195_v61  ;;  %v1923_v4 = vld [vmem:[%s8497_s27 + $0x148] sm:$0xff]  ;;  %v1920_v17 = vld [vmem:[%s8497_s27 + $0x130] sm:$0xff]  ;;  %vm8517_vm7 = vcmask 1043456  }
 0x5e2   :  { %v6580_v34 = vpop.f32.mrf.mxu1  ;;  %v2181_v56 = vsel %vm8508_vm8, %v2179_v46, %v2180_v60  ;;  %v1919_v61 = vld [vmem:[%s8497_s27 + $0x128] sm:$0xff]  ;;  %v1936_v46 = vld [vmem:[%s8497_s27 + $0x1b0] sm:$0xff] }
 0x5e3   :  { %v2075_v62 = vrot.slane %v6580_v34, 1  ;;  %v2095_v63 = vrot.slane %v6580_v34, 2  ;;  %v2119_v2 = vrot.slane %v6580_v34, 3  ;;  %v2139_v57 = vrot.slane %v6580_v34, 4  ;;  %v1935_v60 = vld [vmem:[%s8497_s27 + $0x1a8] sm:$0xff] }
 0x5e4   :  { %v2163_v48 = vrot.slane %v6580_v34, 5  ;;  %v2183_v24 = vrot.slane %v6580_v34, 6  ;;  %v1890_v34 = vld [vmem:[%s8497_s27 + $0x40] sm:$0xff] }
 0x5e5   :  { %v2096_v58 = vsel %vm8500_vm4, %v2094_v38, %v2095_v63  ;;  %v2076_v42 = vsel %vm8501_vm12, %v2074_v50, %v2075_v62  ;;  %v2120_v32 = vsel %vm8502_vm14, %v2118_v23, %v2119_v2  ;;  %v2140_v5 = vsel %vm8503_vm11, %v2138_v44, %v2139_v57  ;;  %vm8510_vm4 = vmmov %vm8508_vm8  ;;  %v1908_v38 = vld [vmem:[%s8497_s27 + $0xd0] sm:$0xff]  ;;  %v1891_v50 = vld [vmem:[%s8497_s27 + $0x48] sm:$0xff] }
 0x5e6   :  { %v4673_v33 = vpack.i.bf16 %v2096_v58, %v6558_v54  ;;  %v4678_v49 = vpack.i.bf16 %v2120_v32, %v2076_v42  ;;  %v4683_v19 = vpack.i.bf16 %v2140_v5, %v2137_v51  ;;  %v2164_v59 = vsel %vm8509_vm10, %v2162_v8, %v2163_v48  ;;  %2262 = vmatpush.msra.mxu3 %v1908_v38  ;;  %v1907_v54 = vld [vmem:[%s8497_s27 + $0xc8] sm:$0xff]  ;;  %v1906_v23 = vld [vmem:[%s8497_s27 + $0xc0] sm:$0xff]  ;;  %v1905_v62 = vld [vmem:[%s8497_s27 + $0xb8] sm:$0xff] }
 0x5e7   :  { %v2184_v0 = vsel %vm8510_vm4, %v2182_v28, %v2183_v24  ;;  %2240 = vmatpush.msrb.mxu2 %v1891_v50  ;;  %v1888_v63 = vld [vmem:[%s8497_s27 + $0x30] sm:$0xff]  ;;  %v1929_v58 = vld [vmem:[%s8497_s27 + $0x178] sm:$0xff]  ;;  %v1899_v57 = vld [vmem:[%s8497_s27 + $0x88] sm:$0xff]  ;;  %vm8511_vm12 = vcmask 1045504   ;;  %vm8512_vm14 = vcmask 523264  }
 0x5e8   :  { %4669 = vrot.lane.b32.xlu1 %v4668_v27, %s4832_s6  ;;  %4674 = vrot.lane.b32.xlu0 %v4673_v33, %s4833_s3  ;;  %v1904_v2 = vld [vmem:[%s8497_s27 + $0xb0] sm:$0xff]  ;;  %v1885_v42 = vld [vmem:[%s8497_s27 + $0x18] sm:$0xff]  ;;  %vm8513_vm11 = vmmov %vm8512_vm14 }
 0x5e9   :  { %4679 = vrot.lane.b32.xlu2 %v4678_v49, %s4836_s8  ;;  %2263 = vmatpush.msra.mxu3 %v1907_v54  ;;  %v1901_v32 = vld [vmem:[%s8497_s27 + $0x98] sm:$0xff]  ;;  %v1884_v27 = vld [vmem:[%s8497_s27 + $0x10] sm:$0xff]  ;;  %v1922_v51 = vld [vmem:[%s8497_s27 + $0x140] sm:$0xff] }
 0x5ea   :  { %2241 = vmatpush.msrb.mxu2 %v1890_v34  ;;  %2280 = vmatpush.msrb.mxu0 %v1929_v58  ;;  %v1900_v33 = vld [vmem:[%s8497_s27 + $0x90] sm:$0xff]  ;;  %v1925_v44 = vld [vmem:[%s8497_s27 + $0x158] sm:$0xff]  ;;  %v1918_v48 = vld [vmem:[%s8497_s27 + $0x120] sm:$0xff] }
 0x5eb   :  { %2264 = vmatpush.msra.mxu3 %v1906_v23  ;;  %v1928_v49 = vld [vmem:[%s8497_s27 + $0x170] sm:$0xff]  ;;  %v1917_v8 = vld [vmem:[%s8497_s27 + $0x118] sm:$0xff]  ;;  %v1915_v24 = vld [vmem:[%s8497_s27 + $0x108] sm:$0xff]  ;;  %v2083_v23 = vrot.slane %v6525_v36, 2 }
 0x5ec   :  { %2242 = vmatpush.msrb.mxu2 %v1889_v3  ;;  %2281 = vmatpush.msrb.mxu0 %v1928_v49  ;;  %v1940_v5 = vld [vmem:[%s8497_s27 + $0x1d0] sm:$0xff]  ;;  %v1931_v38 = vld [vmem:[%s8497_s27 + $0x188] sm:$0xff]  ;;  %vm8514_vm1 = vmmov %vm8511_vm12 }
 0x5ed   :  { %2265 = vmatpush.msra.mxu3 %v1905_v62  ;;  %2308 = vmatpush.msra.mxu1 %v1940_v5  ;;  %v1932_v28 = vld [vmem:[%s8497_s27 + $0x190] sm:$0xff]  ;;  %vm8515_vm13 = vmmov %vm8513_vm11 }
 0x5ee   :  { %2243 = vmatpush.msrb.mxu2 %v1888_v63  ;;  %2282 = vmatpush.msrb.mxu0 %v1927_v16  ;;  %v2087_v16 = vrot.slane %v6556_v40, 2  ;;  %vm8516_vm5 = vmmov %vm8513_vm11 }
 0x5ef   :  { %2266 = vmatpush.msra.mxu3 %v1904_v2  ;;  %2309 = vmatpush.msra.mxu1 %v1939_v22  ;;  %vm8518_vm8 = vmmov %vm8516_vm5 }
 0x5f0   :  { %2197 = vrot.lane.b32.xlu1 %v2193_v55, %s4832_s6  ;;  %4684 = vrot.lane.b32.xlu0 %v4683_v19, %s4833_s3  ;;  %v1921_v19 = vld [vmem:[%s8497_s27 + $0x138] sm:$0xff]  ;;  %v1938_v55 = vld [vmem:[%s8497_s27 + $0x1c0] sm:$0xff]  ;;  %vm8519_vm10 = vmmov %vm8517_vm7 }
 0x5f1   :  { %2165 = vrot.lane.b32.xlu2 %v2161_v6, %s4836_s8  ;;  %2244 = vmatpush.msrb.mxu2 %v1887_v53  ;;  %v1937_v6 = vld [vmem:[%s8497_s27 + $0x1b8] sm:$0xff]  ;;  %v1930_v53 = vld [vmem:[%s8497_s27 + $0x180] sm:$0xff] }
 0x5f2   :  { %2267 = vmatpush.msra.mxu3 %v1903_v39  ;;  %2283 = vmatpush.msrb.mxu0 %v1926_v43 }
 0x5f3   :  { %2245 = vmatpush.msrb.mxu2 %v1886_v14  ;;  %2310 = vmatpush.msra.mxu1 %v1938_v55 }
 0x5f4   :  { %2268 = vmatpush.msra.mxu3 %v1902_v11  ;;  %2284 = vmatpush.msrb.mxu0 %v1925_v44 }
 0x5f5   :  { %2246 = vmatpush.msrb.mxu2 %v1885_v42  ;;  %2311 = vmatpush.msra.mxu1 %v1937_v6 }
 0x5f6   :  { %2269 = vmatpush.msra.mxu3 %v1901_v32  ;;  %2285 = vmatpush.msrb.mxu0 %v1924_v12 }
 0x5f7   :  { %2247 = vmatpush.msrb.mxu2 %v1884_v27  ;;  %2312 = vmatpush.msra.mxu1 %v1936_v46 }
 0x5f8   :  { %2199 = vrot.lane.b32.xlu1 %v2196_v52, %s4832_s6  ;;  %2185 = vrot.lane.b32.xlu0 %v2181_v56, %s4833_s3  ;;  %v1916_v52 = vld [vmem:[%s8497_s27 + $0x110] sm:$0xff]  ;;  %v1934_v56 = vld [vmem:[%s8497_s27 + $0x1a0] sm:$0xff] }
 0x5f9   :  { %2167 = vrot.lane.b32.xlu2 %v2164_v59, %s4836_s8  ;;  %2270 = vmatpush.msra.mxu3 %v1900_v33  ;;  %v1933_v59 = vld [vmem:[%s8497_s27 + $0x198] sm:$0xff] }
 0x5fa   :  { %2248 = vmatpush.msrb.mxu2 %v1883_v9  ;;  %2286 = vmatpush.msrb.mxu0 %v1923_v4 }
 0x5fb   :  { %2271 = vmatpush.msra.mxu3 %v1899_v57  ;;  %2313 = vmatpush.msra.mxu1 %v1935_v60  ;;  %v2086_v57 = vrot.slane %v6531_v25, 2  ;;  %v2128_v60 = vrot.slane %v6529_v26, 4 }
 0x5fc   :  { %2249 = vmatpush.msrb.mxu2 %v1882_v20  ;;  %2287 = vmatpush.msrb.mxu0 %v1922_v51 }
 0x5fd   :  { %2272 = vmatpush.msra.mxu3 %v1898_v45  ;;  %2314 = vmatpush.msra.mxu1 %v1934_v56  ;;  %v2088_v12 = vsel %vm8514_vm1, %v2086_v57, %v2087_v16  ;;  %vm8523_vm1 = vmmov %vm8516_vm5 }
 0x5fe   :  { %2288 = vmatpush.msrb.mxu0 %v1921_v19 }
 0x5ff   :  { %2315 = vmatpush.msra.mxu1 %v1933_v59 }
 0x600   :  { %2187 = vrot.lane.b32.xlu0 %v2184_v0, %s4833_s3  ;;  %2289 = vmatpush.msrb.mxu0 %v1920_v17  ;;  %v2084_v0 = vrot.slane %v6529_v26, 2 }
 0x601   :  { %2316 = vmatpush.msra.mxu1 %v1932_v28  ;;  %v2130_v28 = vrot.slane %v6531_v25, 4 }
 0x602   :  { %2290 = vmatpush.msrb.mxu0 %v1919_v61  ;;  %v2085_v39 = vsel %vm8511_vm12, %v2083_v23, %v2084_v0  ;;  %v2131_v0 = vrot.slane %v6556_v40, 4  ;;  %v2171_v23 = vrot.slane %v6525_v36, 6  ;;  %vm8520_vm12 = vmmov %vm8516_vm5 }
 0x603   :  { %2317 = vmatpush.msra.mxu1 %v1931_v38 }
 0x604   :  { %2291 = vmatpush.msrb.mxu0 %v1918_v48  ;;  %v2127_v48 = vrot.slane %v6525_v36, 4 }
 0x605   :  { %2318 = vmatpush.msra.mxu1 %v1930_v53 }
 0x606   :  { %2292 = vmatpush.msrb.mxu0 %v1917_v8 }
 0x608   :  { %2293 = vmatpush.msrb.mxu0 %v1916_v52 }
 0x60a   :  { %2294 = vmatpush.msrb.mxu0 %v1915_v24  ;;  %v2129_v24 = vsel %vm8517_vm7, %v2127_v48, %v2128_v60 }
 0x60c   :  { %2295 = vmatpush.msrb.mxu0 %v1914_v30 }
 0x633   :  { %v4660_v54 = vpop.permute.xlu2 %4659 }
 0x634   :  { %v4662_v14 = vunpack.i.h.bf16 %v4660_v54  ;;  %v4661_v11 = vunpack.i.l.bf16 %v4660_v54  ;;  %v2172_v54 = vrot.slane %v6529_v26, 6 }
 0x636   :  { %v2173_v53 = vsel %vm8510_vm4, %v2171_v23, %v2172_v54 }
 0x643   :  { %v4680_v20 = vpop.permute.xlu2 %4679 }
 0x644   :  { %v4682_v22 = vunpack.i.h.bf16 %v4680_v20  ;;  %v4681_v4 = vunpack.i.l.bf16 %v4680_v20 }
 0x64a   :  { %v4655_v50 = vpop.permute.xlu1 %4654 }
 0x64b   :  { %v4650_v34 = vpop.permute.xlu0 %4649  ;;  %v4657_v3 = vunpack.i.h.bf16 %v4655_v50  ;;  %v4656_v62 = vunpack.i.l.bf16 %v4655_v50  ;;  %v2166_v56 = vpop.permute.xlu2 %2165 }
 0x64c   :  { %v4652_v63 = vunpack.i.h.bf16 %v4650_v34  ;;  %v4651_v2 = vunpack.i.l.bf16 %v4650_v34 }
 0x64e   :  { %v2203_v58 = vsel %vm1259_vm9, %v6525_v36, %v4651_v2  ;;  %v2209_v42 = vsel %vm1259_vm9, %v2085_v39, %v4652_v63  ;;  %v2174_v36 = vrot.slane %v6531_v25, 6 }
 0x64f   :  { %v2205_v32 = vsel %vm8512_vm14, %v2203_v58, %v4656_v62  ;;  %v2211_v27 = vsel %vm8513_vm11, %v2209_v42, %v4657_v3  ;;  %v2132_v3 = vsel %vm8519_vm10, %v2130_v28, %v2131_v0  ;;  %vm8521_vm14 = vmmov %vm8516_vm5  ;;  %v2175_v42 = vrot.slane %v6556_v40, 6 }
 0x650   :  { %v2207_v33 = vsel %vm1700_vm0, %v2205_v32, %v4661_v11  ;;  %v2213_v49 = vsel %vm1700_vm0, %v2211_v27, %v4662_v14  ;;  %vm8522_vm11 = vmmov %vm8510_vm4 }
 0x651   :  { %2250 = vmatmul.f32.vlgmr.msrb.gmra.mxu2 %v2207_v33  ;;  %2273 = vmatmul.f32.vlgmr.msra.gmra.mxu3 %v2213_v49  ;;  %v2176_v27 = vsel %vm8522_vm11, %v2174_v36, %v2175_v42  ;;  %vm8528_vm10 = vmmov %vm8523_vm1 }
 0x652   :  { %v4665_v9 = vpop.permute.xlu1 %4664 }
 0x653   :  { %v4667_v47 = vunpack.i.h.bf16 %v4665_v9  ;;  %v4666_v5 = vunpack.i.l.bf16 %v4665_v9  ;;  %v2168_v58 = vpop.permute.xlu2 %2167 }
 0x65a   :  { %v4675_v45 = vpop.permute.xlu0 %4674  ;;  %v4670_v17 = vpop.permute.xlu1 %4669 }
 0x65b   :  { %v4677_v43 = vunpack.i.h.bf16 %v4675_v45  ;;  %v4676_v44 = vunpack.i.l.bf16 %v4675_v45  ;;  %v4671_v59 = vunpack.i.l.bf16 %v4670_v17  ;;  %v4672_v2 = vunpack.i.h.bf16 %v4670_v17 }
 0x65d   :  { %v2204_v51 = vsel %vm1259_vm9, %v6531_v25, %v4676_v44  ;;  %v2210_v19 = vsel %vm1259_vm9, %v2088_v12, %v4677_v43  ;;  %v4736_v25 = vld [vmem:[%s8524_s9] ss:$0 sm:$0xff]  ;;  %v4840_v43 = vmov 16.0  }
 0x65e   :  { %v2206_v55 = vsel %vm8515_vm13, %v2204_v51, %v4666_v5  ;;  %v2212_v6 = vsel %vm8516_vm5, %v2210_v19, %v4667_v47  ;;  %4750 = vrcp.f32 %v4840_v43  ;;  %vm8525_vm13 = vmmov %vm8523_vm1 }
 0x65f   :  { %v2208_v61 = vsel %vm1700_vm0, %v2206_v55, %v4681_v4  ;;  %v2214_v46 = vsel %vm1700_vm0, %v2212_v6, %v4682_v22  ;;  %vm8526_vm5 = vmmov %vm8523_vm1 }
 0x660   :  { %2253 = vmatmul.f32.gmra.mxu2 %v2208_v61  ;;  %2276 = vmatmul.f32.gmra.mxu3 %v2214_v46 }
 0x662   :  { %v4685_v8 = vpop.permute.xlu0 %4684  ;;  %v2198_v62 = vpop.permute.xlu1 %2197 }
 0x663   :  { %v4686_v52 = vunpack.i.l.bf16 %v4685_v8  ;;  %v4687_v30 = vunpack.i.h.bf16 %v4685_v8 }
 0x664   :  { %v4751_v22 = vpop.eup %4750 }
 0x665   :  { %v2215_v38 = vsel %vm1259_vm9, %v2129_v24, %v4686_v52  ;;  %v2216_v63 = vsel %vm1259_vm9, %v2132_v3, %v4687_v30  ;;  %v2336_v61 = vmul.f32 16.0, %v4751_v22  ;;  %vm2340_vm7 = vweird.f32 %v4751_v22 }
 0x666   :  { %v2217_v50 = vsel %vm8518_vm8, %v2215_v38, %v4671_v59  ;;  %v2218_v26 = vsel %vm8521_vm14, %v2216_v63, %v4672_v2  ;;  %vm8527_vm8 = vmmov %vm8523_vm1 }
 0x667   :  { %v2219_v34 = vsel %vm1700_vm0, %v2217_v50, %v2166_v56  ;;  %v2220_v32 = vsel %vm1700_vm0, %v2218_v26, %v2168_v58  ;;  %v2337_v52 = vsub.f32 1.0, %v2336_v61 }
 0x668   :  { %2296 = vmatmul.f32.vlgmr.msrb.gmra.mxu0 %v2219_v34 }
 0x669   :  { %v2338_v24 = vmul.f32 %v4751_v22, %v2337_v52  ;;  %v2507_v52 = vadd.s32 4294967293, %v5018_v15 }
 0x66a   :  { %v2186_v39 = vpop.permute.xlu0 %2185  ;;  %v2200_v49 = vpop.permute.xlu1 %2199 }
 0x66b   :  { %v2221_v14 = vsel %vm1259_vm9, %v2173_v53, %v2186_v39  ;;  %v2339_v30 = vadd.f32 %v4751_v22, %v2338_v24  ;;  %v2435_v24 = vld [vmem:[%s8259_s13 + $0x1a0] sm:$0xff] }
 0x66c   :  { %v2223_v11 = vsel %vm8520_vm12, %v2221_v14, %v2198_v62 }
 0x66d   :  { %4465 = vmatmul.msk.f32.vlgmr.msra.gmra.mxu1 %vm1700_vm0, %v2223_v11  ;;  %v2341_v54 = vsel %vm2340_vm7, %v4751_v22, %v2339_v30  ;;  %v2432_v30 = vld [vmem:[%s8259_s13 + $0x188] sm:$0xff] }
 0x670   :  { %2299 = vmatmul.f32.gmra.mxu0 %v2220_v32 }
 0x672   :  { %v2188_v33 = vpop.permute.xlu0 %2187 }
 0x673   :  { %v2222_v9 = vsel %vm1259_vm9, %v2176_v27, %v2188_v33 }
 0x674   :  { %v2224_v57 = vsel %vm8523_vm1, %v2222_v9, %v2200_v49  ;;  %vm8530_vm1 = vcmask 64512  }
 0x675   :  { %4466 = vmatmul.msk.f32.gmra.mxu1 %vm1700_vm0, %v2224_v57  ;;  %vm8532_vm7 = vmmov %vm8530_vm1 }
 0x6d4   :  { %v2251_v16 = vpop.f32.mrf.mxu2  ;;  %v2274_v40 = vpop.f32.mrf.mxu3 }
 0x6d5   :  { %v2252_v44 = vadd.f32 %v4736_v25, %v2251_v16 }
 0x6d7   :  { %v2275_v12 = vadd.f32 %v2274_v40, %v2252_v44  ;;  %v1944_v44 = vld [vmem:[%s8258_s12] sm:$0x1] }
 0x6e3   :  { %v2254_v45 = vpop.f32.mrf.mxu2  ;;  %v2277_v4 = vpop.f32.mrf.mxu3 }
 0x6e4   :  { %v2255_v5 = vadd.f32 %v4736_v25, %v2254_v45 }
 0x6e5   :  { %v2297_v20 = vpop.f32.mrf.mxu0 }
 0x6e6   :  { %v2278_v19 = vadd.f32 %v2277_v4, %v2255_v5  ;;  %v2298_v55 = vadd.f32 %v2297_v20, %v2275_v12  ;;  %v1943_v20 = vld [vmem:[%s8257_s11] sm:$0x1]  ;;  %v2506_v12 = vadd.s32 4294967293, %v4997_v7 }
 0x6e8   :  { %vm2508_vm11 = vcmp.eq.s32.totalorder %v5014_v13, %v2506_v12  ;;  %v2392_v12 = vld [vmem:[%s8259_s13 + $0x48] sm:$0xff] }
 0x6ea   :  { %v2320_v47 = vpop.f32.mrf.mxu1 }
 0x6eb   :  { %v2321_v6 = vadd.f32 %v2320_v47, %v2298_v55 }
 0x6ed   :  { %v2300_v51 = vpop.f32.mrf.mxu0  ;;  %v2326_v48 = vsel %vm8525_vm13, %v2321_v6, 0.0  ;;  %vm2509_vm13 = vcmp.eq.s32.totalorder %v5014_v13, %v2507_v52  ;;  %v2429_v52 = vld [vmem:[%s8259_s13 + $0x170] sm:$0xff] }
 0x6ee   :  { %v2301_v17 = vadd.f32 %v2300_v51, %v2278_v19 }
 0x6f2   :  { %v2323_v46 = vpop.f32.mrf.mxu1 }
 0x6f3   :  { %v2324_v60 = vadd.f32 %v2323_v46, %v2301_v17  ;;  %v8529_v46 = vmov 0.0  }
 0x6f5   :  { %v2327_v8 = vsel %vm8526_vm5, %v2324_v60, 0.0  ;;  %vm8531_vm5 = vmmov %vm8530_vm1 }
 0x6f6   :  { %v2328_v56 = vadd.f32 %v2327_v8, %v2326_v48  ;;  %v6857_v48 = vsel %vm2508_vm11, 1.0, %v8529_v46  ;;  %vm8538_vm11 = vcmask 1042432  }
 0x6f8   :  { %v2329_v59 = vrot.slane %v2328_v56, 4 }
 0x6fa   :  { %v2330_v28 = vadd.f32 %v2329_v59, %v2328_v56  ;;  %v2437_v56 = vld [vmem:[%s8259_s13 + $0x1b0] sm:$0xff]  ;;  %v2436_v59 = vld [vmem:[%s8259_s13 + $0x1a8] sm:$0xff] }
 0x6fc   :  { %v2331_v0 = vrot.slane %v2330_v28, 2 }
 0x6fe   :  { %v2332_v38 = vadd.f32 %v2331_v0, %v2330_v28  ;;  %v2434_v28 = vld [vmem:[%s8259_s13 + $0x198] sm:$0xff]  ;;  %v2433_v0 = vld [vmem:[%s8259_s13 + $0x190] sm:$0xff] }
 0x700   :  { %v2333_v50 = vrot.slane %v2332_v38, 1 }
 0x702   :  { %v2334_v34 = vadd.f32 %v2333_v50, %v2332_v38  ;;  %v2431_v38 = vld [vmem:[%s8259_s13 + $0x180] sm:$0xff] }
 0x704   :  { %v2342_v23 = vmul.f32 %v2341_v54, %v2334_v34  ;;  %v2414_v34 = vld [vmem:[%s8259_s13 + $0xf8] sm:$0xff] }
 0x705   :  { %2680 = vmatpush.msrb.mxu3 %v2414_v34 }
 0x706   :  { %v2343_v3 = vsub.f32 %v2321_v6, %v2342_v23  ;;  %v2344_v62 = vsub.f32 %v2324_v60, %v2342_v23 }
 0x708   :  { %v2345_v63 = vmul.f32 %v2343_v3, %v2343_v3  ;;  %v2346_v2 = vmul.f32 %v2344_v62, %v2344_v62  ;;  %v2397_v3 = vld [vmem:[%s8259_s13 + $0x70] sm:$0xff] }
 0x709   :  { %v2413_v62 = vld [vmem:[%s8259_s13 + $0xf0] sm:$0xff] }
 0x70a   :  { %v2347_v53 = vsel %vm8527_vm8, %v2345_v63, 0.0  ;;  %v2348_v39 = vsel %vm8528_vm10, %v2346_v2, 0.0  ;;  %vm8533_vm8 = vmmov %vm8530_vm1  ;;  %v2453_v63 = vld [vmem:[%s8260_s14 + $0x70] sm:$0xff]  ;;  %2681 = vmatpush.msrb.mxu3 %v2413_v62  ;;  %vm8534_vm10 = vcmask 1046528  }
 0x70b   :  { %v2349_v14 = vadd.f32 %v2348_v39, %v2347_v53 }
 0x70d   :  { %v2350_v11 = vrot.slane %v2349_v14, 4 }
 0x70f   :  { %v2351_v26 = vadd.f32 %v2350_v11, %v2349_v14  ;;  %v2396_v14 = vld [vmem:[%s8259_s13 + $0x68] sm:$0xff] }
 0x711   :  { %v2352_v58 = vrot.slane %v2351_v26, 2 }
 0x713   :  { %v2353_v36 = vadd.f32 %v2352_v58, %v2351_v26 }
 0x715   :  { %v2354_v42 = vrot.slane %v2353_v36, 1 }
 0x717   :  { %v2355_v32 = vadd.f32 %v2354_v42, %v2353_v36  ;;  %v2412_v42 = vld [vmem:[%s8259_s13 + $0xe8] sm:$0xff] }
 0x718   :  { %2682 = vmatpush.msrb.mxu3 %v2412_v42  ;;  %v2404_v42 = vld [vmem:[%s8259_s13 + $0xa8] sm:$0xff] }
 0x719   :  { %v2356_v27 = vmul.f32 %v2355_v32, %v2341_v54  ;;  %v2398_v54 = vld [vmem:[%s8259_s13 + $0x78] sm:$0xff]  ;;  %v2452_v32 = vld [vmem:[%s8260_s14 + $0x68] sm:$0xff] }
 0x71a   :  { %2657 = vmatpush.msrb.mxu1 %v2398_v54 }
 0x71b   :  { %v2357_v33 = vadd.f32 1e-05, %v2356_v27  ;;  %v2395_v27 = vld [vmem:[%s8259_s13 + $0x60] sm:$0xff] }
 0x71c   :  { %2658 = vmatpush.msrb.mxu1 %v2397_v3 }
 0x71d   :  { %4752 = vrsqrt.f32 %v2357_v33  ;;  %vm2364_vm12 = vweird.f32 %v2357_v33 }
 0x71e   :  { %2659 = vmatpush.msrb.mxu1 %v2396_v14  ;;  %v2388_v14 = vld [vmem:[%s8259_s13 + $0x28] sm:$0xff] }
 0x720   :  { %2660 = vmatpush.msrb.mxu1 %v2395_v27  ;;  %v2444_v27 = vld [vmem:[%s8260_s14 + $0x28] sm:$0xff] }
 0x723   :  { %v4753_v49 = vpop.eup %4752 }
 0x724   :  { %v2359_v9 = vmul.f32 %v4753_v49, %v2357_v33  ;;  %vm2365_vm4 = vweird.f32 %v4753_v49 }
 0x725   :  { %vm2366_vm14 = vmor %vm2364_vm12, %vm2365_vm4  ;;  %vm8535_vm4 = vcmask 1044480   ;;  %vm8536_vm12 = vcmask 1041408  }
 0x726   :  { %v2360_v57 = vmul.f32 %v4753_v49, %v2359_v9 }
 0x728   :  { %v2361_v16 = vmul.f32 0.5, %v2360_v57  ;;  %v2411_v57 = vld [vmem:[%s8259_s13 + $0xe0] sm:$0xff] }
 0x729   :  { %2683 = vmatpush.msrb.mxu3 %v2411_v57  ;;  %v2443_v57 = vld [vmem:[%s8260_s14 + $0x20] sm:$0xff] }
 0x72a   :  { %v2362_v25 = vsub.f32 1.5, %v2361_v16 }
 0x72c   :  { %v2363_v40 = vmul.f32 %v4753_v49, %v2362_v25  ;;  %v2451_v25 = vld [vmem:[%s8260_s14 + $0x60] sm:$0xff] }
 0x72e   :  { %v2367_v45 = vsel %vm2366_vm14, %v4753_v49, %v2363_v40  ;;  %vm8537_vm14 = vcmask 523264   ;;  %v2410_v40 = vld [vmem:[%s8259_s13 + $0xd8] sm:$0xff] }
 0x72f   :  { %v2368_v43 = vmul.f32 %v2367_v45, %v1943_v20  ;;  %v2394_v20 = vld [vmem:[%s8259_s13 + $0x58] sm:$0xff]  ;;  %2684 = vmatpush.msrb.mxu3 %v2410_v40 }
 0x730   :  { %v2450_v45 = vld [vmem:[%s8260_s14 + $0x58] sm:$0xff]  ;;  %2661 = vmatpush.msrb.mxu1 %v2394_v20 }
 0x731   :  { %v2369_v47 = vmul.f32 %v2368_v43, %v2342_v23  ;;  %v2372_v5 = vperm.slane %v2368_v43, 0  ;;  %v2454_v23 = vld [vmem:[%s8260_s14 + $0x78] sm:$0xff]  ;;  %v2393_v43 = vld [vmem:[%s8259_s13 + $0x50] sm:$0xff] }
 0x732   :  { %2662 = vmatpush.msrb.mxu1 %v2393_v43  ;;  %v2402_v20 = vld [vmem:[%s8259_s13 + $0x98] sm:$0xff] }
 0x733   :  { %v2370_v22 = vsub.f32 %v1944_v44, %v2369_v47  ;;  %v2374_v4 = vmul.f32 %v2372_v5, %v2321_v6  ;;  %v2375_v51 = vmul.f32 %v2372_v5, %v2324_v60  ;;  %v6864_v6 = vsel %vm2509_vm13, 1.0, %v8529_v46  ;;  %v2438_v60 = vld [vmem:[%s8259_s13 + $0x1b8] sm:$0xff]  ;;  %v2409_v44 = vld [vmem:[%s8259_s13 + $0xd0] sm:$0xff]  ;;  %vm8540_vm13 = vmmov %vm8534_vm10 }
 0x734   :  { %v2449_v5 = vld [vmem:[%s8260_s14 + $0x50] sm:$0xff]  ;;  %2685 = vmatpush.msrb.mxu3 %v2409_v44  ;;  %2663 = vmatpush.msrb.mxu1 %v2392_v12  ;;  %v2442_v40 = vld [vmem:[%s8260_s14 + $0x18] sm:$0xff] }
 0x735   :  { %v2377_v19 = vperm.slane %v2370_v22, 0  ;;  %v2408_v22 = vld [vmem:[%s8259_s13 + $0xc8] sm:$0xff]  ;;  %v2441_v12 = vld [vmem:[%s8260_s14 + $0x10] sm:$0xff] }
 0x736   :  { %2686 = vmatpush.msrb.mxu3 %v2408_v22 }
 0x737   :  { %v2380_v55 = vadd.f32 %v2377_v19, %v2375_v51  ;;  %v2379_v17 = vadd.f32 %v2377_v19, %v2374_v4  ;;  %v2448_v4 = vld [vmem:[%s8260_s14 + $0x48] sm:$0xff]  ;;  %v2391_v51 = vld [vmem:[%s8259_s13 + $0x40] sm:$0xff] }
 0x738   :  { %v2407_v19 = vld [vmem:[%s8259_s13 + $0xc0] sm:$0xff]  ;;  %2664 = vmatpush.msrb.mxu1 %v2391_v51 }
 0x739   :  { %v2381_v61 = vmax.f32 %v2379_v17, 0.0  ;;  %v2382_v8 = vmax.f32 %v2380_v55, 0.0  ;;  %v2430_v55 = vld [vmem:[%s8259_s13 + $0x178] sm:$0xff]  ;;  %v2447_v17 = vld [vmem:[%s8260_s14 + $0x40] sm:$0xff]  ;;  %2687 = vmatpush.msrb.mxu3 %v2407_v19  ;;  %v2384_v19 = vld [vmem:[%s8259_s13 + $0x8] sm:$0xff] }
 0x73a   :  { %2703 = vmatpush.msra.mxu0 %v2430_v55  ;;  %v2400_v55 = vld [vmem:[%s8259_s13 + $0x88] sm:$0xff] }
 0x73b   :  { %2535 = vmatpush.msra.mxu2 %v2381_v61  ;;  %v2390_v61 = vld [vmem:[%s8259_s13 + $0x38] sm:$0xff] }
 0x73c   :  { %4469 = vmatmul.msk.f32.vlgmr.msra.gmra.mxu2 %vm8530_vm1, %v6857_v48  ;;  %2704 = vmatpush.msra.mxu0 %v2429_v52  ;;  %vm8539_vm1 = vmmov %vm8538_vm11  ;;  %v2399_v52 = vld [vmem:[%s8259_s13 + $0x80] sm:$0xff] }
 0x73d   :  { %2558 = vmatpush.msrb.mxu2 %v2382_v8  ;;  %v2406_v8 = vld [vmem:[%s8259_s13 + $0xb8] sm:$0xff]  ;;  %2665 = vmatpush.msrb.mxu1 %v2390_v61  ;;  %v2428_v61 = vld [vmem:[%s8259_s13 + $0x168] sm:$0xff] }
 0x73e   :  { %2688 = vmatpush.msrb.mxu3 %v2406_v8  ;;  %v2383_v8 = vld [vmem:[%s8259_s13] sm:$0xff]  ;;  %2705 = vmatpush.msra.mxu0 %v2428_v61 }
 0x73f   :  { %2734 = vmatpush.msra.mxu2 %v2438_v60 }
 0x741   :  { %2735 = vmatpush.msra.mxu2 %v2437_v56  ;;  %v2446_v56 = vld [vmem:[%s8260_s14 + $0x38] sm:$0xff] }
 0x743   :  { %2736 = vmatpush.msra.mxu2 %v2436_v59  ;;  %v2389_v59 = vld [vmem:[%s8259_s13 + $0x30] sm:$0xff] }
 0x744   :  { %4470 = vmatmul.msk.f32.gmra.mxu2 %vm8531_vm5, %v6864_v6  ;;  %2666 = vmatpush.msrb.mxu1 %v2389_v59  ;;  %vm8541_vm5 = vmmov %vm8535_vm4  ;;  %v2426_v59 = vld [vmem:[%s8259_s13 + $0x158] sm:$0xff] }
 0x745   :  { %2737 = vmatpush.msra.mxu2 %v2435_v24 }
 0x746   :  { %2667 = vmatpush.msrb.mxu1 %v2388_v14  ;;  %v2467_v14 = vld [vmem:[%s8260_s14 + $0xe0] sm:$0xff] }
 0x747   :  { %2738 = vmatpush.msra.mxu2 %v2434_v28  ;;  %v2405_v28 = vld [vmem:[%s8259_s13 + $0xb0] sm:$0xff] }
 0x748   :  { %2689 = vmatpush.msrb.mxu3 %v2405_v28  ;;  %v2424_v28 = vld [vmem:[%s8259_s13 + $0x148] sm:$0xff] }
 0x749   :  { %2739 = vmatpush.msra.mxu2 %v2433_v0 }
 0x74a   :  { %2690 = vmatpush.msrb.mxu3 %v2404_v42  ;;  %v2483_v42 = vld [vmem:[%s8260_s14 + $0x160] sm:$0xff] }
 0x74b   :  { %2740 = vmatpush.msra.mxu2 %v2432_v30 }
 0x74c   :  { %4471 = vmatmul.msk.f32.vlgmr.msrb.gmra.mxu2 %vm8532_vm7, %v6857_v48  ;;  %vm8542_vm7 = vmmov %vm8536_vm12 }
 0x74d   :  { %2741 = vmatpush.msra.mxu2 %v2431_v38 }
 0x74f   :  { %2749 = vmatpush.msrb.mxu2 %v2454_v23  ;;  %v2445_v23 = vld [vmem:[%s8260_s14 + $0x30] sm:$0xff] }
 0x751   :  { %2750 = vmatpush.msrb.mxu2 %v2453_v63 }
 0x753   :  { %2751 = vmatpush.msrb.mxu2 %v2452_v32 }
 0x754   :  { %4472 = vmatmul.msk.f32.gmra.mxu2 %vm8533_vm8, %v6864_v6  ;;  %vm8543_vm8 = vmmov %vm8537_vm14 }
 0x755   :  { %2752 = vmatpush.msrb.mxu2 %v2451_v25 }
 0x757   :  { %2753 = vmatpush.msrb.mxu2 %v2450_v45  ;;  %v2385_v45 = vld [vmem:[%s8259_s13 + $0x10] sm:$0xff] }
 0x759   :  { %2754 = vmatpush.msrb.mxu2 %v2449_v5  ;;  %v2401_v5 = vld [vmem:[%s8259_s13 + $0x90] sm:$0xff] }
 0x75b   :  { %2755 = vmatpush.msrb.mxu2 %v2448_v4 }
 0x75d   :  { %2756 = vmatpush.msrb.mxu2 %v2447_v17  ;;  %v2440_v17 = vld [vmem:[%s8260_s14 + $0x8] sm:$0xff] }
 0x75f   :  { %2757 = vmatpush.msrb.mxu2 %v2446_v56  ;;  %v2427_v56 = vld [vmem:[%s8259_s13 + $0x160] sm:$0xff] }
 0x760   :  { %2706 = vmatpush.msra.mxu0 %v2427_v56 }
 0x761   :  { %2758 = vmatpush.msrb.mxu2 %v2445_v23  ;;  %v2469_v23 = vld [vmem:[%s8260_s14 + $0xf0] sm:$0xff] }
 0x762   :  { %2707 = vmatpush.msra.mxu0 %v2426_v59 }
 0x763   :  { %2759 = vmatpush.msrb.mxu2 %v2444_v27  ;;  %v2465_v27 = vld [vmem:[%s8260_s14 + $0xd0] sm:$0xff] }
 0x765   :  { %2760 = vmatpush.msrb.mxu2 %v2443_v57  ;;  %v2464_v57 = vld [vmem:[%s8260_s14 + $0xc8] sm:$0xff] }
 0x767   :  { %2761 = vmatpush.msrb.mxu2 %v2442_v40  ;;  %v2502_v40 = vld [vmem:[%s8260_s14 + $0x1f8] sm:$0xff] }
 0x769   :  { %2762 = vmatpush.msrb.mxu2 %v2441_v12 }
 0x76b   :  { %2763 = vmatpush.msrb.mxu2 %v2440_v17  ;;  %v2460_v17 = vld [vmem:[%s8260_s14 + $0xa8] sm:$0xff] }
 0x7bf   :  { %v6896_v50 = vpop.f32.mrf.mxu2 }
 0x7c0   :  { %v2570_v53 = vrot.slane %v6896_v50, 1  ;;  %v2590_v39 = vrot.slane %v6896_v50, 3  ;;  %v2622_v58 = vrot.slane %v6896_v50, 6  ;;  %v2610_v24 = vrot.slane %v6896_v50, 5 }
 0x7c1   :  { %v2636_v4 = vrot.slane %v6896_v50, 7 }
 0x7c7   :  { %v6916_v2 = vpop.f32.mrf.mxu2 }
 0x7c8   :  { %v2571_v11 = vrot.slane %v6916_v2, 1  ;;  %v2591_v26 = vrot.slane %v6916_v2, 3  ;;  %v2623_v36 = vrot.slane %v6916_v2, 6  ;;  %v2611_v60 = vrot.slane %v6916_v2, 5 }
 0x7c9   :  { %v2637_v44 = vrot.slane %v6916_v2, 7  ;;  %v2583_v12 = vrot.slane %v6916_v2, 2 }
 0x7ca   :  { %v2572_v33 = vsel %vm8534_vm10, %v2570_v53, %v2571_v11  ;;  %v2592_v49 = vsel %vm8535_vm4, %v2590_v39, %v2591_v26  ;;  %v6939_v9 = vsel %vm8536_vm12, %v2622_v58, %v2623_v36  ;;  %v2612_v39 = vsel %vm8538_vm11, %v2610_v24, %v2611_v60  ;;  %v2439_v60 = vld [vmem:[%s8260_s14] sm:$0xff]  ;;  %v2425_v24 = vld [vmem:[%s8259_s13 + $0x150] sm:$0xff]  ;;  %vm8548_vm11 = vmmov %vm8543_vm8 }
 0x7cb   :  { %v4688_v16 = vpack.i.bf16 %v2572_v33, %v2592_v49  ;;  %4473 = vmatmul.msk.f32.vlgmr.msra.gmra.mxu2 %vm8537_vm14, %v6939_v9  ;;  %v2387_v33 = vld [vmem:[%s8259_s13 + $0x20] sm:$0xff]  ;;  %vm8544_vm10 = vcmask 1040384   ;;  %2708 = vmatpush.msra.mxu0 %v2425_v24  ;;  %vm8546_vm12 = vcmask 1045504   ;;  %vm8547_vm14 = vmmov %vm8543_vm8  ;;  %v2498_v24 = vld [vmem:[%s8260_s14 + $0x1d8] sm:$0xff] }
 0x7cc   :  { %v2403_v49 = vld [vmem:[%s8259_s13 + $0xa0] sm:$0xff]  ;;  %2668 = vmatpush.msrb.mxu1 %v2387_v33  ;;  %vm8545_vm4 = vmmov %vm8544_vm10  ;;  %2764 = vmatpush.msrb.mxu2 %v2439_v60  ;;  %v2482_v33 = vld [vmem:[%s8260_s14 + $0x158] sm:$0xff] }
 0x7cd   :  { %4689 = vrot.lane.b32.xlu2 %v4688_v16, %s4832_s6  ;;  %v2386_v16 = vld [vmem:[%s8259_s13 + $0x18] sm:$0xff]  ;;  %2691 = vmatpush.msrb.mxu3 %v2403_v49  ;;  %v2638_v51 = vsel %vm8545_vm4, %v2636_v4, %v2637_v44  ;;  %v2416_v49 = vld [vmem:[%s8259_s13 + $0x108] sm:$0xff]  ;;  %v2501_v44 = vld [vmem:[%s8260_s14 + $0x1f0] sm:$0xff] }
 0x7ce   :  { %2669 = vmatpush.msrb.mxu1 %v2386_v16  ;;  %2709 = vmatpush.msra.mxu0 %v2424_v28  ;;  %v2481_v16 = vld [vmem:[%s8260_s14 + $0x150] sm:$0xff]  ;;  %v2500_v4 = vld [vmem:[%s8260_s14 + $0x1e8] sm:$0xff]  ;;  %v2499_v60 = vld [vmem:[%s8260_s14 + $0x1e0] sm:$0xff] }
 0x7cf   :  { %v6965_v47 = vpop.f32.mrf.mxu2  ;;  %2692 = vmatpush.msrb.mxu3 %v2402_v20  ;;  %v2463_v20 = vld [vmem:[%s8260_s14 + $0xc0] sm:$0xff] }
 0x7d0   :  { %v2613_v30 = vrot.slane %v6965_v47, 5  ;;  %v2573_v38 = vrot.slane %v6965_v47, 1  ;;  %v2593_v54 = vrot.slane %v6965_v47, 3  ;;  %v2625_v34 = vrot.slane %v6965_v47, 6  ;;  %2670 = vmatpush.msrb.mxu1 %v2385_v45  ;;  %v2480_v45 = vld [vmem:[%s8260_s14 + $0x148] sm:$0xff]  ;;  %v2459_v28 = vld [vmem:[%s8260_s14 + $0xa0] sm:$0xff] }
 0x7d1   :  { %v2639_v43 = vrot.slane %v6965_v47, 7  ;;  %2693 = vmatpush.msrb.mxu3 %v2401_v5  ;;  %v2479_v5 = vld [vmem:[%s8260_s14 + $0x140] sm:$0xff] }
 0x7d2   :  { %2671 = vmatpush.msrb.mxu1 %v2384_v19 }
 0x7d3   :  { %2694 = vmatpush.msrb.mxu3 %v2400_v55  ;;  %v2582_v55 = vrot.slane %v6896_v50, 2 }
 0x7d4   :  { %2672 = vmatpush.msrb.mxu1 %v2383_v8 }
 0x7d5   :  { %2695 = vmatpush.msrb.mxu3 %v2399_v52  ;;  %v2584_v52 = vsel %vm8546_vm12, %v2582_v55, %v2583_v12  ;;  %v2602_v12 = vrot.slane %v6896_v50, 4 }
 0x7d7   :  { %v7011_v0 = vpop.f32.mrf.mxu2 }
 0x7d8   :  { %v2614_v3 = vrot.slane %v7011_v0, 5  ;;  %v2574_v62 = vrot.slane %v7011_v0, 1  ;;  %v2594_v63 = vrot.slane %v7011_v0, 3  ;;  %v2626_v53 = vrot.slane %v7011_v0, 6 }
 0x7d9   :  { %v2640_v25 = vrot.slane %v7011_v0, 7 }
 0x7da   :  { %v2615_v11 = vsel %vm8539_vm1, %v2613_v30, %v2614_v3  ;;  %v2575_v26 = vsel %vm8540_vm13, %v2573_v38, %v2574_v62  ;;  %v2595_v58 = vsel %vm8541_vm5, %v2593_v54, %v2594_v63  ;;  %v7032_v36 = vsel %vm8542_vm7, %v2625_v34, %v2626_v53  ;;  %v2423_v30 = vld [vmem:[%s8259_s13 + $0x140] sm:$0xff]  ;;  %v2422_v38 = vld [vmem:[%s8259_s13 + $0x138] sm:$0xff]  ;;  %v2421_v54 = vld [vmem:[%s8259_s13 + $0x130] sm:$0xff] }
 0x7db   :  { %2618 = vrot.lane.b32.xlu2 %v2615_v11, %s4832_s6  ;;  %2578 = vrot.lane.b32.xlu1 %v2575_v26, %s4832_s6  ;;  %v4693_v32 = vpack.i.bf16 %v2612_v39, %v2595_v58  ;;  %v2641_v22 = vsel %vm8544_vm10, %v2639_v43, %v2640_v25  ;;  %v2470_v34 = vld [vmem:[%s8260_s14 + $0xf8] sm:$0xff]  ;;  %v2420_v3 = vld [vmem:[%s8259_s13 + $0x128] sm:$0xff]  ;;  %vm8549_vm1 = vmmov %vm8543_vm8  ;;  %vm8551_vm5 = vcmask 1043456  }
 0x7dc   :  { %4474 = vmatmul.msk.f32.gmra.mxu2 %vm8543_vm8, %v7032_v36  ;;  %2710 = vmatpush.msra.mxu0 %v2423_v30  ;;  %v2468_v62 = vld [vmem:[%s8260_s14 + $0xe8] sm:$0xff]  ;;  %v2486_v63 = vld [vmem:[%s8260_s14 + $0x178] sm:$0xff]  ;;  %v2485_v53 = vld [vmem:[%s8260_s14 + $0x170] sm:$0xff] }
 0x7dd   :  { %4694 = vrot.lane.b32.xlu0 %v4693_v32, %s4832_s6  ;;  %2772 = vmatpush.msra.mxu1 %v2470_v34  ;;  %v2419_v39 = vld [vmem:[%s8259_s13 + $0x120] sm:$0xff]  ;;  %v2484_v11 = vld [vmem:[%s8260_s14 + $0x168] sm:$0xff]  ;;  %v2418_v26 = vld [vmem:[%s8259_s13 + $0x118] sm:$0xff] }
 0x7de   :  { %2711 = vmatpush.msra.mxu0 %v2422_v38  ;;  %2795 = vmatpush.msra.mxu3 %v2486_v63  ;;  %v2466_v58 = vld [vmem:[%s8260_s14 + $0xd8] sm:$0xff]  ;;  %v2417_v32 = vld [vmem:[%s8259_s13 + $0x110] sm:$0xff]  ;;  %v2415_v25 = vld [vmem:[%s8259_s13 + $0x100] sm:$0xff] }
 0x7df   :  { %2773 = vmatpush.msra.mxu1 %v2469_v23  ;;  %v2462_v43 = vld [vmem:[%s8260_s14 + $0xb8] sm:$0xff]  ;;  %v2477_v30 = vld [vmem:[%s8260_s14 + $0x130] sm:$0xff]  ;;  %v2476_v34 = vld [vmem:[%s8260_s14 + $0x128] sm:$0xff] }
 0x7e0   :  { %2712 = vmatpush.msra.mxu0 %v2421_v54  ;;  %2796 = vmatpush.msra.mxu3 %v2485_v53  ;;  %v2497_v38 = vld [vmem:[%s8260_s14 + $0x1d0] sm:$0xff]  ;;  %v2458_v54 = vld [vmem:[%s8260_s14 + $0x98] sm:$0xff]  ;;  %v2496_v23 = vld [vmem:[%s8260_s14 + $0x1c8] sm:$0xff] }
 0x7e1   :  { %2774 = vmatpush.msra.mxu1 %v2468_v62  ;;  %v2475_v62 = vld [vmem:[%s8260_s14 + $0x120] sm:$0xff]  ;;  %v2456_v53 = vld [vmem:[%s8260_s14 + $0x88] sm:$0xff]  ;;  %vm8550_vm13 = vmmov %vm8546_vm12 }
 0x7e2   :  { %2713 = vmatpush.msra.mxu0 %v2420_v3  ;;  %2797 = vmatpush.msra.mxu3 %v2484_v11  ;;  %v2457_v3 = vld [vmem:[%s8260_s14 + $0x90] sm:$0xff]  ;;  %v2495_v63 = vld [vmem:[%s8260_s14 + $0x1c0] sm:$0xff]  ;;  %vm8552_vm7 = vmmov %vm8549_vm1 }
 0x7e3   :  { %2644 = vrot.lane.b32.xlu1 %v2641_v22, %s4832_s6  ;;  %2775 = vmatpush.msra.mxu1 %v2467_v14  ;;  %v2461_v22 = vld [vmem:[%s8260_s14 + $0xb0] sm:$0xff]  ;;  %v2494_v14 = vld [vmem:[%s8260_s14 + $0x1b8] sm:$0xff]  ;;  %v2455_v11 = vld [vmem:[%s8260_s14 + $0x80] sm:$0xff] }
 0x7e4   :  { %2714 = vmatpush.msra.mxu0 %v2419_v39  ;;  %2798 = vmatpush.msra.mxu3 %v2483_v42  ;;  %v2474_v39 = vld [vmem:[%s8260_s14 + $0x118] sm:$0xff]  ;;  %v2472_v42 = vld [vmem:[%s8260_s14 + $0x108] sm:$0xff]  ;;  %vm8553_vm8 = vmmov %vm8549_vm1 }
 0x7e5   :  { %2642 = vrot.lane.b32.xlu0 %v2638_v51, %s4832_s6  ;;  %2776 = vmatpush.msra.mxu1 %v2466_v58  ;;  %v2478_v51 = vld [vmem:[%s8260_s14 + $0x138] sm:$0xff]  ;;  %v2493_v58 = vld [vmem:[%s8260_s14 + $0x1b0] sm:$0xff]  ;;  %vm8554_vm10 = vmmov %vm8551_vm5 }
 0x7e6   :  { %2715 = vmatpush.msra.mxu0 %v2418_v26  ;;  %2799 = vmatpush.msra.mxu3 %v2482_v33  ;;  %v2473_v26 = vld [vmem:[%s8260_s14 + $0x110] sm:$0xff]  ;;  %v2491_v33 = vld [vmem:[%s8260_s14 + $0x1a0] sm:$0xff]  ;;  %vm8555_vm4 = vmmov %vm8549_vm1 }
 0x7e7   :  { %2777 = vmatpush.msra.mxu1 %v2465_v27  ;;  %v2471_v27 = vld [vmem:[%s8260_s14 + $0x100] sm:$0xff]  ;;  %vm8556_vm12 = vmmov %vm8549_vm1 }
 0x7e8   :  { %2716 = vmatpush.msra.mxu0 %v2417_v32  ;;  %2800 = vmatpush.msra.mxu3 %v2481_v16  ;;  %v2492_v32 = vld [vmem:[%s8260_s14 + $0x1a8] sm:$0xff] }
 0x7e9   :  { %2778 = vmatpush.msra.mxu1 %v2464_v57  ;;  %v2489_v57 = vld [vmem:[%s8260_s14 + $0x190] sm:$0xff]  ;;  %v2488_v16 = vld [vmem:[%s8260_s14 + $0x188] sm:$0xff] }
 0x7ea   :  { %2717 = vmatpush.msra.mxu0 %v2416_v49  ;;  %2801 = vmatpush.msra.mxu3 %v2480_v45  ;;  %v2490_v49 = vld [vmem:[%s8260_s14 + $0x198] sm:$0xff]  ;;  %v2603_v45 = vrot.slane %v6916_v2, 4 }
 0x7eb   :  { %2779 = vmatpush.msra.mxu1 %v2463_v20 }
 0x7ec   :  { %2718 = vmatpush.msra.mxu0 %v2415_v25  ;;  %2802 = vmatpush.msra.mxu3 %v2479_v5  ;;  %v2487_v25 = vld [vmem:[%s8260_s14 + $0x180] sm:$0xff]  ;;  %v2585_v5 = vrot.slane %v6965_v47, 2 }
 0x7ed   :  { %2780 = vmatpush.msra.mxu1 %v2462_v43 }
 0x7ee   :  { %2818 = vmatpush.msrb.mxu0 %v2502_v40  ;;  %2803 = vmatpush.msra.mxu3 %v2478_v51  ;;  %v2586_v40 = vrot.slane %v7011_v0, 2 }
 0x7ef   :  { %2781 = vmatpush.msra.mxu1 %v2461_v22 }
 0x7f0   :  { %2819 = vmatpush.msrb.mxu0 %v2501_v44  ;;  %2804 = vmatpush.msra.mxu3 %v2477_v30  ;;  %v2587_v51 = vsel %vm8550_vm13, %v2585_v5, %v2586_v40 }
 0x7f1   :  { %2782 = vmatpush.msra.mxu1 %v2460_v17  ;;  %v2606_v17 = vrot.slane %v7011_v0, 4 }
 0x7f2   :  { %2820 = vmatpush.msrb.mxu0 %v2500_v4  ;;  %2805 = vmatpush.msra.mxu3 %v2476_v34  ;;  %v4737_v34 = vld [vmem:[%s8261_s15] ss:$0 sm:$0xff] }
 0x7f3   :  { %2783 = vmatpush.msra.mxu1 %v2459_v28 }
 0x7f4   :  { %2821 = vmatpush.msrb.mxu0 %v2499_v60  ;;  %2806 = vmatpush.msra.mxu3 %v2475_v62 }
 0x7f5   :  { %2784 = vmatpush.msra.mxu1 %v2458_v54 }
 0x7f6   :  { %2822 = vmatpush.msrb.mxu0 %v2498_v24  ;;  %2807 = vmatpush.msra.mxu3 %v2474_v39 }
 0x7f7   :  { %2785 = vmatpush.msra.mxu1 %v2457_v3 }
 0x7f8   :  { %2823 = vmatpush.msrb.mxu0 %v2497_v38  ;;  %2808 = vmatpush.msra.mxu3 %v2473_v26 }
 0x7f9   :  { %2786 = vmatpush.msra.mxu1 %v2456_v53 }
 0x7fa   :  { %2824 = vmatpush.msrb.mxu0 %v2496_v23  ;;  %2809 = vmatpush.msra.mxu3 %v2472_v42 }
 0x7fb   :  { %2787 = vmatpush.msra.mxu1 %v2455_v11 }
 0x7fc   :  { %2825 = vmatpush.msrb.mxu0 %v2495_v63  ;;  %2810 = vmatpush.msra.mxu3 %v2471_v27 }
 0x7fe   :  { %2826 = vmatpush.msrb.mxu0 %v2494_v14 }
 0x800   :  { %2827 = vmatpush.msrb.mxu0 %v2493_v58 }
 0x802   :  { %2828 = vmatpush.msrb.mxu0 %v2492_v32 }
 0x804   :  { %2829 = vmatpush.msrb.mxu0 %v2491_v33 }
 0x806   :  { %2830 = vmatpush.msrb.mxu0 %v2490_v49 }
 0x808   :  { %2831 = vmatpush.msrb.mxu0 %v2489_v57 }
 0x80a   :  { %2832 = vmatpush.msrb.mxu0 %v2488_v16 }
 0x80c   :  { %2833 = vmatpush.msrb.mxu0 %v2487_v25 }
 0x827   :  { %v4690_v19 = vpop.permute.xlu2 %4689 }
 0x828   :  { %v4692_v61 = vunpack.i.h.bf16 %v4690_v19  ;;  %v4691_v8 = vunpack.i.l.bf16 %v4690_v19  ;;  %v2604_v19 = vsel %vm8551_vm5, %v2602_v12, %v2603_v45 }
 0x82a   :  { %v2628_v56 = vsel %vm8547_vm14, %v6896_v50, %v4692_v61  ;;  %v7218_v59 = vsel %vm8548_vm11, %v2584_v52, %v4691_v8  ;;  %v2605_v8 = vrot.slane %v6965_v47, 4  ;;  %vm8557_vm14 = vmmov %vm8549_vm1 }
 0x82b   :  { %2673 = vmatmul.f32.vlgmr.msrb.gmra.mxu1 %v2628_v56  ;;  %2696 = vmatmul.f32.vlgmr.msrb.gmra.mxu3 %v7218_v59 }
 0x82c   :  { %2765 = vmatmul.f32.vlgmr.msrb.gmra.mxu2 %v2628_v56  ;;  %v2607_v50 = vsel %vm8554_vm10, %v2605_v8, %v2606_v17 }
 0x835   :  { %v2619_v61 = vpop.permute.xlu2 %2618 }
 0x836   :  { %v2633_v52 = vsel %vm8555_vm4, %v2607_v50, %v2619_v61 }
 0x84d   :  { %v2579_v20 = vpop.permute.xlu1 %2578 }
 0x84e   :  { %v2629_v43 = vsel %vm8549_vm1, %v6965_v47, %v2579_v20  ;;  %v2743_v47 = vpop.f32.mrf.mxu2 }
 0x84f   :  { %v4695_v44 = vpop.permute.xlu0 %4694  ;;  %2676 = vmatmul.f32.gmra.mxu1 %v2629_v43  ;;  %2768 = vmatmul.f32.gmra.mxu2 %v2629_v43 }
 0x850   :  { %v4697_v22 = vunpack.i.h.bf16 %v4695_v44  ;;  %v4696_v4 = vunpack.i.l.bf16 %v4695_v44 }
 0x852   :  { %v2631_v55 = vsel %vm8552_vm7, %v2587_v51, %v4696_v4  ;;  %v2632_v2 = vsel %vm8553_vm8, %v2604_v19, %v4697_v22  ;;  %vm8558_vm8 = vcmask 64512  }
 0x853   :  { %2699 = vmatmul.f32.gmra.mxu3 %v2631_v55  ;;  %2719 = vmatmul.f32.vlgmr.msra.gmra.mxu0 %v2632_v2  ;;  %vm8559_vm10 = vmmov %vm8558_vm8 }
 0x855   :  { %v2645_v24 = vpop.permute.xlu1 %2644 }
 0x856   :  { %v2649_v0 = vsel %vm8557_vm14, %v7032_v36, %v2645_v24 }
 0x857   :  { %2788 = vmatmul.f32.vlgmr.msra.gmra.mxu1 %v7218_v59  ;;  %v2643_v60 = vpop.permute.xlu0 %2642 }
 0x858   :  { %v2648_v56 = vsel %vm8556_vm12, %v6939_v9, %v2643_v60  ;;  %vm8560_vm12 = vmmov %vm8558_vm8 }
 0x85b   :  { %2722 = vmatmul.f32.gmra.mxu0 %v2633_v52  ;;  %2811 = vmatmul.f32.vlgmr.msra.gmra.mxu3 %v2632_v2 }
 0x85f   :  { %2791 = vmatmul.f32.gmra.mxu1 %v2631_v55  ;;  %v2746_v38 = vpop.f32.mrf.mxu2 }
 0x863   :  { %2814 = vmatmul.f32.gmra.mxu3 %v2633_v52  ;;  %2834 = vmatmul.f32.vlgmr.msrb.gmra.mxu0 %v2648_v56 }
 0x86b   :  { %2837 = vmatmul.f32.gmra.mxu0 %v2649_v0 }
 0x8a8   :  { %v2674_v59 = vpop.f32.mrf.mxu1 }
 0x8a9   :  { %v2675_v39 = vadd.f32 %v4737_v34, %v2674_v59 }
 0x8ae   :  { %v2697_v28 = vpop.f32.mrf.mxu3 }
 0x8af   :  { %v2766_v3 = vpop.f32.mrf.mxu2  ;;  %v2698_v36 = vadd.f32 %v2697_v28, %v2675_v39 }
 0x8b0   :  { %v2767_v14 = vadd.f32 %v4737_v34, %v2766_v3 }
 0x8cc   :  { %v2677_v30 = vpop.f32.mrf.mxu1 }
 0x8cd   :  { %v2678_v9 = vadd.f32 %v4737_v34, %v2677_v30 }
 0x8d0   :  { %v2720_v54 = vpop.f32.mrf.mxu0 }
 0x8d1   :  { %v2721_v42 = vadd.f32 %v2720_v54, %v2698_v36 }
 0x8d2   :  { %v2769_v27 = vpop.f32.mrf.mxu2 }
 0x8d3   :  { %v7317_v16 = vadd.f32 %v2743_v47, %v2721_v42  ;;  %v2770_v25 = vadd.f32 %v4737_v34, %v2769_v27 }
 0x8d4   :  { %v2789_v62 = vpop.f32.mrf.mxu1 }
 0x8d5   :  { %v2790_v11 = vadd.f32 %v2789_v62, %v2767_v14  ;;  %v2841_v44 = vsel %vm1259_vm9, %v7317_v16, 0.0 }
 0x8d6   :  { %v2700_v23 = vpop.f32.mrf.mxu3 }
 0x8d7   :  { %v2701_v53 = vadd.f32 %v2700_v23, %v2678_v9 }
 0x8d8   :  { %v2723_v63 = vpop.f32.mrf.mxu0 }
 0x8d9   :  { %v2724_v26 = vadd.f32 %v2723_v63, %v2701_v53 }
 0x8db   :  { %v7315_v49 = vadd.f32 %v2746_v38, %v2724_v26 }
 0x8dc   :  { %v2792_v57 = vpop.f32.mrf.mxu1 }
 0x8dd   :  { %v2842_v40 = vsel %vm1259_vm9, %v7315_v49, 0.0  ;;  %v2793_v45 = vadd.f32 %v2792_v57, %v2770_v25 }
 0x8de   :  { %v2812_v58 = vpop.f32.mrf.mxu3  ;;  %v2843_v22 = vadd.f32 %v2842_v40, %v2841_v44  ;;  %v7341_v44 = vmul.u32 2, %v5014_v13 }
 0x8df   :  { %v2813_v32 = vadd.f32 %v2812_v58, %v2790_v11 }
 0x8e0   :  { %v2835_v33 = vpop.f32.mrf.mxu0  ;;  %vm2910_vm7 = vcmp.eq.s32.totalorder %v4997_v7, %v7341_v44  ;;  %vm2911_vm14 = vcmp.eq.s32.totalorder %v5018_v15, %v7341_v44 }
 0x8e1   :  { %v7319_v20 = vadd.f32 %v2835_v33, %v2813_v32 }
 0x8e3   :  { %v2844_v5 = vsel %vm1259_vm9, %v7319_v20, 0.0 }
 0x8e4   :  { %v2845_v19 = vadd.f32 %v2844_v5, %v2843_v22  ;;  %v7347_v22 = vadd.s32 1, %v7341_v44 }
 0x8e6   :  { %v2815_v43 = vpop.f32.mrf.mxu3  ;;  %vm2917_vm5 = vcmp.eq.s32.totalorder %v4997_v7, %v7347_v22  ;;  %vm2918_vm4 = vcmp.eq.s32.totalorder %v5018_v15, %v7347_v22 }
 0x8e7   :  { %v2816_v12 = vadd.f32 %v2815_v43, %v2793_v45  ;;  %v2504_v45 = vld [vmem:[%s8262_s16] sm:$0x1]  ;;  %v7373_v7 = vsel %vm2918_vm4, 1.0, %v8529_v46  ;;  %vm8567_vm4 = vcmask 1046528  }
 0x8e8   :  { %v2838_v4 = vpop.f32.mrf.mxu0 }
 0x8e9   :  { %v2839_v51 = vadd.f32 %v2838_v4, %v2816_v12  ;;  %v2505_v12 = vld [vmem:[%s8263_s17] sm:$0x1] }
 0x8eb   :  { %v2846_v55 = vsel %vm1259_vm9, %v2839_v51, 0.0 }
 0x8ec   :  { %v2847_v2 = vadd.f32 %v2846_v55, %v2845_v19 }
 0x8ee   :  { %v2848_v17 = vrot.slane %v2847_v2, 4 }
 0x8f0   :  { %v2849_v61 = vadd.f32 %v2848_v17, %v2847_v2 }
 0x8f2   :  { %v2850_v8 = vrot.slane %v2849_v61, 2 }
 0x8f4   :  { %v2851_v50 = vadd.f32 %v2850_v8, %v2849_v61 }
 0x8f6   :  { %v2852_v52 = vrot.slane %v2851_v50, 1 }
 0x8f8   :  { %v2853_v60 = vadd.f32 %v2852_v52, %v2851_v50 }
 0x8fa   :  { %v2854_v56 = vmul.f32 %v2853_v60, %v6489_v1 }
 0x8fc   :  { %v2855_v24 = vsub.f32 %v7317_v16, %v2854_v56  ;;  %v2856_v0 = vsub.f32 %v7315_v49, %v2854_v56  ;;  %v2857_v59 = vsub.f32 %v7319_v20, %v2854_v56  ;;  %v2858_v47 = vsub.f32 %v2839_v51, %v2854_v56 }
 0x8fe   :  { %v2859_v28 = vmul.f32 %v2855_v24, %v2855_v24  ;;  %v2860_v30 = vmul.f32 %v2856_v0, %v2856_v0  ;;  %v2861_v38 = vmul.f32 %v2857_v59, %v2857_v59  ;;  %v2862_v54 = vmul.f32 %v2858_v47, %v2858_v47 }
 0x8ff   :  { %v7357_v0 = vsel %vm2917_vm5, 1.0, %v8529_v46 }
 0x900   :  { %v2863_v34 = vsel %vm1259_vm9, %v2859_v28, 0.0  ;;  %v2864_v23 = vsel %vm1259_vm9, %v2860_v30, 0.0  ;;  %v2866_v9 = vsel %vm1259_vm9, %v2861_v38, 0.0  ;;  %v2868_v63 = vsel %vm1259_vm9, %v2862_v54, 0.0 }
 0x901   :  { %v2865_v3 = vadd.f32 %v2864_v23, %v2863_v34 }
 0x903   :  { %v2867_v62 = vadd.f32 %v2866_v9, %v2865_v3  ;;  %v3090_v9 = vadd.s32 4294967293, %v5055_v29 }
 0x905   :  { %v2869_v53 = vadd.f32 %v2868_v63, %v2867_v62 }
 0x907   :  { %v2870_v39 = vrot.slane %v2869_v53, 4 }
 0x909   :  { %v2871_v14 = vadd.f32 %v2870_v39, %v2869_v53 }
 0x90b   :  { %v2872_v36 = vrot.slane %v2871_v14, 2 }
 0x90d   :  { %v2873_v11 = vadd.f32 %v2872_v36, %v2871_v14 }
 0x90f   :  { %v2874_v26 = vrot.slane %v2873_v11, 1 }
 0x911   :  { %v2875_v58 = vadd.f32 %v2874_v26, %v2873_v11 }
 0x913   :  { %v2876_v42 = vmul.f32 %v2875_v58, %v6489_v1 }
 0x915   :  { %v2877_v32 = vadd.f32 1e-05, %v2876_v42 }
 0x917   :  { %4754 = vrsqrt.f32 %v2877_v32  ;;  %vm2884_vm1 = vweird.f32 %v2877_v32 }
 0x91d   :  { %v4755_v27 = vpop.eup %4754 }
 0x91e   :  { %v2879_v33 = vmul.f32 %v4755_v27, %v2877_v32  ;;  %vm2885_vm11 = vweird.f32 %v4755_v27 }
 0x91f   :  { %vm2886_vm13 = vmor %vm2884_vm1, %vm2885_vm11 }
 0x920   :  { %v2880_v57 = vmul.f32 %v4755_v27, %v2879_v33  ;;  %vm8561_vm11 = vmmov %vm8558_vm8 }
 0x921   :  { %vm8562_vm1 = vmmov %vm8558_vm8 }
 0x922   :  { %v2881_v25 = vmul.f32 0.5, %v2880_v57  ;;  %vm8564_vm5 = vmmov %vm8562_vm1 }
 0x924   :  { %v2882_v40 = vsub.f32 1.5, %v2881_v25 }
 0x926   :  { %v2883_v43 = vmul.f32 %v4755_v27, %v2882_v40 }
 0x928   :  { %v2887_v5 = vsel %vm2886_vm13, %v4755_v27, %v2883_v43  ;;  %vm8563_vm13 = vmmov %vm8562_vm1 }
 0x929   :  { %v2888_v1 = vmul.f32 %v2887_v5, %v2504_v45 }
 0x92b   :  { %v2889_v4 = vmul.f32 %v2888_v1, %v2854_v56  ;;  %v2892_v19 = vperm.slane %v2888_v1, 0 }
 0x92d   :  { %v2890_v55 = vsub.f32 %v2505_v12, %v2889_v4  ;;  %v2904_v2 = vmul.f32 %v2892_v19, %v2839_v51  ;;  %v2903_v61 = vmul.f32 %v2892_v19, %v7319_v20  ;;  %v2894_v8 = vmul.f32 %v2892_v19, %v7317_v16 }
 0x92e   :  { %v2895_v50 = vmul.f32 %v2892_v19, %v7315_v49  ;;  %v7360_v20 = vsel %vm2910_vm7, 1.0, %v8529_v46  ;;  %v7376_v49 = vsel %vm2911_vm14, 1.0, %v8529_v46  ;;  %vm8565_vm7 = vmmov %vm8562_vm1 }
 0x92f   :  { %v2897_v17 = vperm.slane %v2890_v55, 0  ;;  %vm8569_vm14 = vmmov %vm8567_vm4 }
 0x931   :  { %v2906_v52 = vadd.f32 %v2904_v2, %v2897_v17  ;;  %v2905_v60 = vadd.f32 %v2903_v61, %v2897_v17  ;;  %v2899_v24 = vadd.f32 %v2897_v17, %v2894_v8  ;;  %v2900_v56 = vadd.f32 %v2897_v17, %v2895_v50 }
 0x933   :  { %v2907_v51 = vmax.f32 %v2905_v60, 0.0  ;;  %v2901_v59 = vmax.f32 %v2899_v24, 0.0  ;;  %v2902_v47 = vmax.f32 %v2900_v56, 0.0  ;;  %v2908_v28 = vmax.f32 %v2906_v52, 0.0 }
 0x935   :  { %2944 = vmatpush.msra.mxu2 %v2907_v51  ;;  %2973 = vmatpush.msrb.mxu1 %v2901_v59 }
 0x936   :  { %3019 = vmatpush.msra.mxu0 %v2902_v47  ;;  %4479 = vmatmul.msk.f32.vlgmr.msra.gmra.mxu2 %vm8558_vm8, %v7357_v0  ;;  %vm3091_vm8 = vcmp.eq.s32.totalorder %v5014_v13, %v3090_v9 }
 0x937   :  { %2996 = vmatpush.msrb.mxu2 %v2908_v28  ;;  %4481 = vmatmul.msk.f32.vlgmr.msrb.gmra.mxu1 %vm8559_vm10, %v7360_v20  ;;  %v7395_v14 = vsel %vm3091_vm8, 1.0, %v8529_v46  ;;  %vm8566_vm10 = vcmask 1045504   ;;  %vm8575_vm8 = vmmov %vm8567_vm4 }
 0x938   :  { %4485 = vmatmul.msk.f32.vlgmr.msra.gmra.mxu0 %vm8560_vm12, %v7360_v20  ;;  %vm8568_vm12 = vmmov %vm8566_vm10 }
 0x93e   :  { %4480 = vmatmul.msk.f32.gmra.mxu2 %vm8561_vm11, %v7373_v7  ;;  %vm8570_vm11 = vcmask 1044480  }
 0x93f   :  { %4482 = vmatmul.msk.f32.gmra.mxu1 %vm8562_vm1, %v7376_v49  ;;  %vm8571_vm1 = vmmov %vm8570_vm11 }
 0x940   :  { %4486 = vmatmul.msk.f32.gmra.mxu0 %vm8563_vm13, %v7376_v49  ;;  %vm8572_vm13 = vcmask 1041408  }
 0x946   :  { %4483 = vmatmul.msk.f32.vlgmr.msrb.gmra.mxu2 %vm8564_vm5, %v7357_v0  ;;  %vm8573_vm5 = vcmask 1042432  }
 0x94e   :  { %4484 = vmatmul.msk.f32.gmra.mxu2 %vm8565_vm7, %v7373_v7  ;;  %vm8574_vm7 = vmmov %vm8567_vm4 }
 0x9b4   :  { %v2975_v15 = vpop.f32.mrf.mxu1 }
 0x9b5   :  { %v3021_v23 = vpop.f32.mrf.mxu0 }
 0x9b9   :  { %v2946_v16 = vpop.f32.mrf.mxu2 }
 0x9ba   :  { %v2976_v34 = vadd.f32 %v2975_v15, %v2946_v16 }
 0x9bc   :  { %v2978_v30 = vpop.f32.mrf.mxu1 }
 0x9bd   :  { %v3024_v62 = vpop.f32.mrf.mxu0 }
 0x9c1   :  { %v2949_v38 = vpop.f32.mrf.mxu2 }
 0x9c2   :  { %v2979_v54 = vadd.f32 %v2978_v30, %v2949_v38 }
 0x9c4   :  { %3115 = vmatpush.msra.mxu2 %v2979_v54 }
 0x9c6   :  { %3116 = vmatpush.msra.mxu2 %v2976_v34  ;;  %v3042_v34 = vld [vmem:[%s8264_s18 + $0x78] sm:$0xff] }
 0x9c7   :  { %4488 = vmatmul.msk.f32.vlgmr.msra.gmra.mxu2 %vm1114_vm2, %v6857_v48  ;;  %3344 = vmatpush.msrb.mxu3 %v3042_v34 }
 0x9c9   :  { %v2998_v3 = vpop.f32.mrf.mxu2 }
 0x9ca   :  { %v3022_v39 = vadd.f32 %v3021_v23, %v2998_v3  ;;  %v3070_v23 = vld [vmem:[%s8265_s19 + $0x78] sm:$0xff] }
 0x9cb   :  { %3402 = vmatpush.msrb.mxu2 %v3070_v23  ;;  %v3040_v23 = vld [vmem:[%s8264_s18 + $0x68] sm:$0xff] }
 0x9cf   :  { %4489 = vmatmul.msk.f32.gmra.mxu2 %vm1114_vm2, %v6864_v6 }
 0x9d1   :  { %v3001_v63 = vpop.f32.mrf.mxu2 }
 0x9d2   :  { %v3025_v53 = vadd.f32 %v3024_v62, %v3001_v63  ;;  %v3041_v62 = vld [vmem:[%s8264_s18 + $0x70] sm:$0xff] }
 0x9d3   :  { %v3069_v63 = vld [vmem:[%s8265_s19 + $0x70] sm:$0xff]  ;;  %3345 = vmatpush.msrb.mxu3 %v3041_v62  ;;  %v3067_v62 = vld [vmem:[%s8265_s19 + $0x60] sm:$0xff] }
 0x9d4   :  { %3141 = vmatpush.msra.mxu1 %v3025_v53  ;;  %3403 = vmatpush.msrb.mxu2 %v3069_v63  ;;  %v3038_v63 = vld [vmem:[%s8264_s18 + $0x58] sm:$0xff] }
 0x9d5   :  { %3346 = vmatpush.msrb.mxu3 %v3040_v23  ;;  %v3056_v23 = vld [vmem:[%s8265_s19 + $0x8] sm:$0xff] }
 0x9d6   :  { %3142 = vmatpush.msra.mxu1 %v3022_v39 }
 0x9d7   :  { %4490 = vmatmul.msk.f32.gmra.mxu2 %vm1114_vm2, %v7395_v14  ;;  %4491 = vmatmul.msk.f32.vlgmr.msra.gmra.mxu1 %vm1114_vm2, %v6857_v48 }
 0x9df   :  { %4492 = vmatmul.msk.f32.gmra.mxu1 %vm1114_vm2, %v6864_v6 }
 0x9e7   :  { %4493 = vmatmul.msk.f32.gmra.mxu1 %vm1114_vm2, %v7395_v14 }
 0xa4a   :  { %v7405_v36 = vpop.f32.mrf.mxu2 }
 0xa4b   :  { %v3181_v33 = vrot.slane %v7405_v36, 2  ;;  %v3159_v57 = vrot.slane %v7405_v36, 1  ;;  %v3203_v45 = vrot.slane %v7405_v36, 3  ;;  %v3261_v56 = vrot.slane %v7405_v36, 6 }
 0xa4c   :  { %v3239_v51 = vrot.slane %v7405_v36, 5 }
 0xa52   :  { %v7407_v11 = vpop.f32.mrf.mxu2 }
 0xa53   :  { %v3182_v58 = vrot.slane %v7407_v11, 2  ;;  %v3160_v42 = vrot.slane %v7407_v11, 1  ;;  %v3204_v32 = vrot.slane %v7407_v11, 3  ;;  %v3262_v50 = vrot.slane %v7407_v11, 6 }
 0xa54   :  { %v7409_v26 = vpop.f32.mrf.mxu1  ;;  %v3240_v52 = vrot.slane %v7407_v11, 5  ;;  %v3304_v53 = vrot.slane %v7407_v11, 7 }
 0xa55   :  { %v3183_v1 = vsel %vm8566_vm10, %v3181_v33, %v3182_v58  ;;  %v3161_v12 = vsel %vm8567_vm4, %v3159_v57, %v3160_v42  ;;  %v3205_v55 = vsel %vm8570_vm11, %v3203_v45, %v3204_v32  ;;  %v3164_v59 = vrot.slane %v7409_v26, 1  ;;  %vm8576_vm4 = vmmov %vm8566_vm10 }
 0xa56   :  { %v3263_v28 = vsel %vm8572_vm13, %v3261_v56, %v3262_v50  ;;  %v3241_v15 = vsel %vm8573_vm5, %v3239_v51, %v3240_v52  ;;  %vm8579_vm11 = vcmask 1040384   ;;  %vm8580_vm13 = vmmov %vm8573_vm5 }
 0xa5a   :  { %v7414_v27 = vpop.f32.mrf.mxu2 }
 0xa5b   :  { %v3184_v25 = vrot.slane %v7414_v27, 2  ;;  %v3162_v40 = vrot.slane %v7414_v27, 1  ;;  %v3206_v43 = vrot.slane %v7414_v27, 3  ;;  %v3242_v39 = vrot.slane %v7414_v27, 5 }
 0xa5c   :  { %v7422_v5 = vpop.f32.mrf.mxu1 }
 0xa5d   :  { %v3185_v4 = vsel %vm8568_vm12, %v3182_v58, %v3184_v25  ;;  %v3163_v19 = vsel %vm8569_vm14, %v3160_v42, %v3162_v40  ;;  %v3207_v2 = vsel %vm8571_vm1, %v3204_v32, %v3206_v43  ;;  %v3165_v60 = vrot.slane %v7422_v5, 1  ;;  %vm8577_vm12 = vmmov %vm8571_vm1 }
 0xa5e   :  { %v4703_v17 = vpack.i.bf16 %v3185_v4, %v3183_v1  ;;  %v4698_v61 = vpack.i.bf16 %v3163_v19, %v3161_v12  ;;  %v4708_v8 = vpack.i.bf16 %v3207_v2, %v3205_v55  ;;  %v3187_v3 = vrot.slane %v7422_v5, 2  ;;  %vm8578_vm14 = vmmov %vm8573_vm5 }
 0xa5f   :  { %v3166_v16 = vsel %vm8574_vm7, %v3164_v59, %v3165_v60  ;;  %v3209_v9 = vrot.slane %v7422_v5, 3  ;;  %v3186_v58 = vrot.slane %v7409_v26, 2  ;;  %v3208_v32 = vrot.slane %v7409_v26, 3  ;;  %vm8582_vm7 = vmmov %vm8579_vm11 }
 0xa60   :  { %4704 = vrot.lane.b32.xlu0 %v4703_v17, %s4832_s6  ;;  %4699 = vrot.lane.b32.xlu2 %v4698_v61, %s4833_s3  ;;  %v3303_v25 = vrot.slane %v7405_v36, 7  ;;  %v3243_v45 = vsel %vm8578_vm14, %v3240_v52, %v3242_v39  ;;  %v3245_v4 = vrot.slane %v7422_v5, 5  ;;  %v3264_v19 = vrot.slane %v7414_v27, 6  ;;  %vm8587_vm14 = vmmov %vm8582_vm7  ;;  %v3037_v39 = vld [vmem:[%s8264_s18 + $0x50] sm:$0xff] }
 0xa61   :  { %4709 = vrot.lane.b32.xlu1 %v4708_v8, %s4836_s8  ;;  %v3188_v33 = vsel %vm8576_vm4, %v3186_v58, %v3187_v3  ;;  %v3210_v57 = vsel %vm8577_vm12, %v3208_v32, %v3209_v9  ;;  %v3306_v55 = vrot.slane %v7414_v27, 7  ;;  %v3244_v2 = vrot.slane %v7409_v26, 5  ;;  %vm8586_vm12 = vmmov %vm8582_vm7  ;;  %v3065_v58 = vld [vmem:[%s8265_s19 + $0x50] sm:$0xff]  ;;  %v3064_v32 = vld [vmem:[%s8265_s19 + $0x48] sm:$0xff] }
 0xa62   :  { %v3305_v43 = vsel %vm8579_vm11, %v3303_v25, %v3304_v53  ;;  %vm8581_vm5 = vcmask 1041408   ;;  %v3267_v51 = vrot.slane %v7422_v5, 6  ;;  %v3266_v59 = vrot.slane %v7409_v26, 6  ;;  %v3035_v25 = vld [vmem:[%s8264_s18 + $0x40] sm:$0xff] }
 0xa63   :  { %v4718_v1 = vpack.i.bf16 %v3305_v43, %v3210_v57  ;;  %v3246_v61 = vsel %vm8580_vm13, %v3244_v2, %v3245_v4  ;;  %v3265_v8 = vsel %vm8581_vm5, %v3262_v50, %v3264_v19  ;;  %v3307_v52 = vsel %vm8582_vm7, %v3304_v53, %v3306_v55  ;;  %vm8585_vm4 = vmmov %vm8581_vm5  ;;  %v3066_v53 = vld [vmem:[%s8265_s19 + $0x58] sm:$0xff]  ;;  %v3053_v57 = vld [vmem:[%s8264_s18 + $0xd0] sm:$0xff] }
 0xa64   :  { %v7436_v24 = vpop.f32.mrf.mxu1  ;;  %v3086_v43 = vld [vmem:[%s8265_s19 + $0xf8] sm:$0xff]  ;;  %v3061_v19 = vld [vmem:[%s8265_s19 + $0x30] sm:$0xff]  ;;  %v3051_v55 = vld [vmem:[%s8264_s18 + $0xc0] sm:$0xff]  ;;  %vm8588_vm11 = vcmask 523264  }
 0xa65   :  { %v3167_v47 = vrot.slane %v7436_v24, 1  ;;  %v3189_v38 = vrot.slane %v7436_v24, 2  ;;  %v3211_v12 = vrot.slane %v7436_v24, 3  ;;  %v3247_v56 = vrot.slane %v7436_v24, 5  ;;  %3431 = vmatpush.msrb.mxu1 %v3086_v43  ;;  %v3085_v2 = vld [vmem:[%s8265_s19 + $0xf0] sm:$0xff] }
 0xa66   :  { %v3073_v43 = vld [vmem:[%s8265_s19 + $0x90] sm:$0xff] }
 0xa67   :  { %v3168_v30 = vsel %vm8575_vm8, %v3165_v60, %v3167_v47  ;;  %v3190_v42 = vsel %vm8566_vm10, %v3187_v3, %v3189_v38  ;;  %v3212_v17 = vsel %vm8571_vm1, %v3209_v9, %v3211_v12  ;;  %v3269_v47 = vrot.slane %v7436_v24, 6  ;;  %vm8583_vm8 = vmmov %vm8580_vm13  ;;  %v3068_v3 = vld [vmem:[%s8265_s19 + $0x68] sm:$0xff]  ;;  %v3039_v9 = vld [vmem:[%s8264_s18 + $0x60] sm:$0xff]  ;;  %3432 = vmatpush.msrb.mxu1 %v3085_v2 }
 0xa68   :  { %3271 = vrot.lane.b32.xlu0 %v3263_v28, %s4832_s6  ;;  %3249 = vrot.lane.b32.xlu2 %v3241_v15, %s4833_s3  ;;  %v4713_v54 = vpack.i.bf16 %v3168_v30, %v3166_v16  ;;  %v4723_v40 = vpack.i.bf16 %v3190_v42, %v3188_v33  ;;  %v4728_v60 = vpack.i.bf16 %v3307_v52, %v3212_v17  ;;  %vm8584_vm10 = vmmov %vm8581_vm5  ;;  %v3309_v16 = vrot.slane %v7422_v5, 7  ;;  %v3036_v42 = vld [vmem:[%s8264_s18 + $0x48] sm:$0xff]  ;;  %v3054_v33 = vld [vmem:[%s8264_s18 + $0xd8] sm:$0xff] }
 0xa69   :  { %v3248_v28 = vsel %vm8583_vm8, %v3245_v4, %v3247_v56  ;;  %v3268_v50 = vsel %vm8584_vm10, %v3266_v59, %v3267_v51  ;;  %v3270_v15 = vsel %vm8585_vm4, %v3267_v51, %v3269_v47  ;;  %v3311_v30 = vrot.slane %v7436_v24, 7  ;;  %3404 = vmatpush.msrb.mxu2 %v3068_v3  ;;  %3347 = vmatpush.msrb.mxu3 %v3039_v9  ;;  %v3062_v12 = vld [vmem:[%s8265_s19 + $0x38] sm:$0xff]  ;;  %v3033_v4 = vld [vmem:[%s8264_s18 + $0x30] sm:$0xff]  ;;  %v3032_v17 = vld [vmem:[%s8264_s18 + $0x28] sm:$0xff] }
 0xa6a   :  { %4714 = vrot.lane.b32.xlu1 %v4713_v54, %s4833_s3  ;;  %v3308_v38 = vrot.slane %v7409_v26, 7  ;;  %3377 = vmatpush.msrb.mxu0 %v3054_v33  ;;  %v3084_v52 = vld [vmem:[%s8265_s19 + $0xe8] sm:$0xff]  ;;  %v3059_v56 = vld [vmem:[%s8265_s19 + $0x20] sm:$0xff]  ;;  %v3049_v51 = vld [vmem:[%s8264_s18 + $0xb0] sm:$0xff]  ;;  %vm8589_vm1 = vcmask 1043456  }
 0xa6b   :  { %v3312_v54 = vsel %vm8586_vm12, %v3309_v16, %v3311_v30  ;;  %3405 = vmatpush.msrb.mxu2 %v3067_v62  ;;  %3348 = vmatpush.msrb.mxu3 %v3038_v63  ;;  %v3083_v59 = vld [vmem:[%s8265_s19 + $0xe0] sm:$0xff]  ;;  %v3030_v47 = vld [vmem:[%s8264_s18 + $0x18] sm:$0xff]  ;;  %v3057_v30 = vld [vmem:[%s8265_s19 + $0x10] sm:$0xff] }
 0xa6c   :  { %v3310_v34 = vsel %vm8587_vm14, %v3308_v38, %v3309_v16  ;;  %3378 = vmatpush.msrb.mxu0 %v3053_v57  ;;  %3433 = vmatpush.msrb.mxu1 %v3084_v52  ;;  %v3029_v16 = vld [vmem:[%s8264_s18 + $0x10] sm:$0xff]  ;;  %v3047_v38 = vld [vmem:[%s8264_s18 + $0xa0] sm:$0xff]  ;;  %v3046_v3 = vld [vmem:[%s8264_s18 + $0x98] sm:$0xff]  ;;  %v3226_v52 = vrot.slane %v7407_v11, 4 }
 0xa6d   :  { %3406 = vmatpush.msrb.mxu2 %v3066_v53  ;;  %3349 = vmatpush.msrb.mxu3 %v3037_v39  ;;  %v3080_v9 = vld [vmem:[%s8265_s19 + $0xc8] sm:$0xff]  ;;  %v3027_v62 = vld [vmem:[%s8264_s18] sm:$0xff]  ;;  %v3045_v53 = vld [vmem:[%s8264_s18 + $0x90] sm:$0xff] }
 0xa6e   :  { %3434 = vmatpush.msrb.mxu1 %v3083_v59  ;;  %v3055_v63 = vld [vmem:[%s8265_s19] sm:$0xff]  ;;  %v3077_v33 = vld [vmem:[%s8265_s19 + $0xb0] sm:$0xff]  ;;  %v3076_v57 = vld [vmem:[%s8265_s19 + $0xa8] sm:$0xff]  ;;  %v3225_v59 = vrot.slane %v7405_v36, 4 }
 0xa6f   :  { %3407 = vmatpush.msrb.mxu2 %v3065_v58  ;;  %3350 = vmatpush.msrb.mxu3 %v3036_v42  ;;  %v3079_v39 = vld [vmem:[%s8265_s19 + $0xc0] sm:$0xff]  ;;  %v3044_v58 = vld [vmem:[%s8264_s18 + $0x88] sm:$0xff]  ;;  %v3078_v42 = vld [vmem:[%s8265_s19 + $0xb8] sm:$0xff] }
 0xa70   :  { %3251 = vrot.lane.b32.xlu0 %v3243_v45, %s4833_s3  ;;  %4724 = vrot.lane.b32.xlu2 %v4723_v40, %s4832_s6  ;;  %v3063_v40 = vld [vmem:[%s8265_s19 + $0x40] sm:$0xff]  ;;  %v3052_v45 = vld [vmem:[%s8264_s18 + $0xc8] sm:$0xff]  ;;  %vm8590_vm13 = vmmov %vm8588_vm11 }
 0xa71   :  { %3408 = vmatpush.msrb.mxu2 %v3064_v32  ;;  %3351 = vmatpush.msrb.mxu3 %v3035_v25  ;;  %v3043_v32 = vld [vmem:[%s8264_s18 + $0x80] sm:$0xff]  ;;  %vm8591_vm5 = vmmov %vm8588_vm11 }
 0xa72   :  { %4719 = vrot.lane.b32.xlu1 %v4718_v1, %s4836_s8  ;;  %v3034_v1 = vld [vmem:[%s8264_s18 + $0x38] sm:$0xff]  ;;  %3379 = vmatpush.msrb.mxu0 %v3052_v45  ;;  %v3075_v25 = vld [vmem:[%s8265_s19 + $0xa0] sm:$0xff]  ;;  %vm8592_vm7 = vmmov %vm8589_vm1 }
 0xa73   :  { %3409 = vmatpush.msrb.mxu2 %v3063_v40  ;;  %3352 = vmatpush.msrb.mxu3 %v3034_v1  ;;  %v3074_v40 = vld [vmem:[%s8265_s19 + $0x98] sm:$0xff]  ;;  %v3072_v1 = vld [vmem:[%s8265_s19 + $0x88] sm:$0xff]  ;;  %vm8593_vm8 = vmmov %vm8591_vm5 }
 0xa74   :  { %3380 = vmatpush.msrb.mxu0 %v3051_v55  ;;  %vm8594_vm10 = vmmov %vm8591_vm5 }
 0xa75   :  { %3410 = vmatpush.msrb.mxu2 %v3062_v12  ;;  %3353 = vmatpush.msrb.mxu3 %v3033_v4  ;;  %v3071_v12 = vld [vmem:[%s8265_s19 + $0x80] sm:$0xff]  ;;  %vm8595_vm4 = vmmov %vm8589_vm1 }
 0xa76   :  { %vm8596_vm12 = vmmov %vm8591_vm5 }
 0xa77   :  { %3411 = vmatpush.msrb.mxu2 %v3061_v19  ;;  %3354 = vmatpush.msrb.mxu3 %v3032_v17  ;;  %vm8597_vm14 = vmmov %vm8591_vm5 }
 0xa78   :  { %3253 = vrot.lane.b32.xlu0 %v3246_v61, %s4833_s3  ;;  %3273 = vrot.lane.b32.xlu2 %v3265_v8, %s4832_s6  ;;  %v3060_v61 = vld [vmem:[%s8265_s19 + $0x28] sm:$0xff]  ;;  %v3050_v8 = vld [vmem:[%s8264_s18 + $0xb8] sm:$0xff] }
 0xa79   :  { %3412 = vmatpush.msrb.mxu2 %v3060_v61  ;;  %3381 = vmatpush.msrb.mxu0 %v3050_v8 }
 0xa7a   :  { %4729 = vrot.lane.b32.xlu1 %v4728_v60, %s4836_s8  ;;  %v3031_v60 = vld [vmem:[%s8264_s18 + $0x20] sm:$0xff] }
 0xa7b   :  { %3355 = vmatpush.msrb.mxu3 %v3031_v60  ;;  %3413 = vmatpush.msrb.mxu2 %v3059_v56 }
 0xa7c   :  { %3382 = vmatpush.msrb.mxu0 %v3049_v51 }
 0xa7d   :  { %3356 = vmatpush.msrb.mxu3 %v3030_v47 }
 0xa7f   :  { %3357 = vmatpush.msrb.mxu3 %v3029_v16 }
 0xa80   :  { %3255 = vrot.lane.b32.xlu0 %v3248_v28, %s4833_s3  ;;  %3275 = vrot.lane.b32.xlu2 %v3268_v50, %s4832_s6  ;;  %v3058_v28 = vld [vmem:[%s8265_s19 + $0x18] sm:$0xff]  ;;  %v3048_v50 = vld [vmem:[%s8264_s18 + $0xa8] sm:$0xff] }
 0xa81   :  { %3414 = vmatpush.msrb.mxu2 %v3058_v28  ;;  %3383 = vmatpush.msrb.mxu0 %v3048_v50  ;;  %v3227_v50 = vsel %vm8589_vm1, %v3225_v59, %v3226_v52 }
 0xa82   :  { %3277 = vrot.lane.b32.xlu1 %v3270_v15, %s4832_s6  ;;  %v3082_v15 = vld [vmem:[%s8265_s19 + $0xd8] sm:$0xff] }
 0xa83   :  { %3435 = vmatpush.msrb.mxu1 %v3082_v15  ;;  %3415 = vmatpush.msrb.mxu2 %v3057_v30 }
 0xa84   :  { %3384 = vmatpush.msrb.mxu0 %v3047_v38 }
 0xa85   :  { %3416 = vmatpush.msrb.mxu2 %v3056_v23 }
 0xa86   :  { %3385 = vmatpush.msrb.mxu0 %v3046_v3  ;;  %v3228_v3 = vrot.slane %v7414_v27, 4 }
 0xa87   :  { %3417 = vmatpush.msrb.mxu2 %v3055_v63 }
 0xa88   :  { %3319 = vrot.lane.b32.xlu0 %v3312_v54, %s4836_s8  ;;  %3317 = vrot.lane.b32.xlu2 %v3310_v34, %s4836_s8  ;;  %v3081_v54 = vld [vmem:[%s8265_s19 + $0xd0] sm:$0xff]  ;;  %v3028_v34 = vld [vmem:[%s8264_s18 + $0x8] sm:$0xff]  ;;  %v3229_v63 = vsel %vm8592_vm7, %v3226_v52, %v3228_v3 }
 0xa89   :  { %3436 = vmatpush.msrb.mxu1 %v3081_v54  ;;  %3358 = vmatpush.msrb.mxu3 %v3028_v34 }
 0xa8a   :  { %3386 = vmatpush.msrb.mxu0 %v3045_v53 }
 0xa8b   :  { %3437 = vmatpush.msrb.mxu1 %v3080_v9  ;;  %3359 = vmatpush.msrb.mxu3 %v3027_v62 }
 0xa8c   :  { %3387 = vmatpush.msrb.mxu0 %v3044_v58 }
 0xa8d   :  { %3438 = vmatpush.msrb.mxu1 %v3079_v39 }
 0xa8e   :  { %3388 = vmatpush.msrb.mxu0 %v3043_v32 }
 0xa8f   :  { %3439 = vmatpush.msrb.mxu1 %v3078_v42 }
 0xa91   :  { %3440 = vmatpush.msrb.mxu1 %v3077_v33 }
 0xa93   :  { %3441 = vmatpush.msrb.mxu1 %v3076_v57 }
 0xa95   :  { %3442 = vmatpush.msrb.mxu1 %v3075_v25  ;;  %v3231_v25 = vrot.slane %v7422_v5, 4 }
 0xa97   :  { %3443 = vmatpush.msrb.mxu1 %v3074_v40 }
 0xa99   :  { %3444 = vmatpush.msrb.mxu1 %v3073_v43 }
 0xa9b   :  { %3445 = vmatpush.msrb.mxu1 %v3072_v1  ;;  %v3230_v1 = vrot.slane %v7409_v26, 4 }
 0xa9d   :  { %3446 = vmatpush.msrb.mxu1 %v3071_v12  ;;  %v3232_v12 = vsel %vm8595_vm4, %v3230_v1, %v3231_v25  ;;  %vm3565_vm4 = vcmp.eq.s32.totalorder %v5079_v35, %v7341_v44 }
 0xaba   :  { %v4700_v45 = vpop.permute.xlu2 %4699 }
 0xabb   :  { %v4701_v19 = vunpack.i.l.bf16 %v4700_v45  ;;  %v4702_v56 = vunpack.i.h.bf16 %v4700_v45 }
 0xabd   :  { %v3283_v61 = vsel %vm1259_vm9, %v7405_v36, %v4701_v19  ;;  %v3284_v38 = vsel %vm1259_vm9, %v7407_v11, %v4702_v56  ;;  %v3233_v56 = vrot.slane %v7436_v24, 4 }
 0xac2   :  { %v3250_v4 = vpop.permute.xlu2 %3249 }
 0xac3   :  { %v3295_v15 = vsel %vm1259_vm9, %v3227_v50, %v3250_v4 }
 0xaca   :  { %v4725_v47 = vpop.permute.xlu2 %4724 }
 0xacb   :  { %v4726_v58 = vunpack.i.l.bf16 %v4725_v47 }
 0xad2   :  { %v4705_v55 = vpop.permute.xlu0 %4704  ;;  %v3274_v62 = vpop.permute.xlu2 %3273 }
 0xad3   :  { %v4706_v2 = vunpack.i.l.bf16 %v4705_v55  ;;  %v4710_v17 = vpop.permute.xlu1 %4709  ;;  %v4707_v28 = vunpack.i.h.bf16 %v4705_v55 }
 0xad4   :  { %v4711_v8 = vunpack.i.l.bf16 %v4710_v17  ;;  %v4712_v16 = vunpack.i.h.bf16 %v4710_v17  ;;  %v4727_v17 = vunpack.i.h.bf16 %v4725_v47 }
 0xad5   :  { %v3287_v60 = vsel %vm8588_vm11, %v3283_v61, %v4706_v2  ;;  %v3288_v34 = vsel %vm8591_vm5, %v3284_v38, %v4707_v28  ;;  %vm8598_vm11 = vmmov %vm8589_vm1 }
 0xad6   :  { %v3291_v51 = vsel %vm1700_vm0, %v3287_v60, %v4711_v8  ;;  %v3292_v36 = vsel %vm1700_vm0, %v3288_v34, %v4712_v16  ;;  %vm8599_vm1 = vmmov %vm8591_vm5 }
 0xad7   :  { %3360 = vmatmul.f32.vlgmr.msrb.gmra.mxu3 %v3291_v51  ;;  %3418 = vmatmul.f32.vlgmr.msrb.gmra.mxu2 %v3291_v51 }
 0xada   :  { %v3272_v30 = vpop.permute.xlu0 %3271  ;;  %v3276_v19 = vpop.permute.xlu2 %3275 }
 0xadb   :  { %v3299_v54 = vsel %vm8590_vm13, %v3295_v15, %v3272_v30 }
 0xadc   :  { %v4715_v23 = vpop.permute.xlu1 %4714  ;;  %4494 = vmatmul.msk.f32.vlgmr.msrb.gmra.mxu0 %vm1700_vm0, %v3299_v54 }
 0xadd   :  { %v4716_v9 = vunpack.i.l.bf16 %v4715_v23  ;;  %v4717_v40 = vunpack.i.h.bf16 %v4715_v23 }
 0xadf   :  { %3363 = vmatmul.f32.gmra.mxu3 %v3292_v36  ;;  %3421 = vmatmul.f32.gmra.mxu2 %v3292_v36  ;;  %v3285_v39 = vsel %vm1259_vm9, %v7409_v26, %v4716_v9  ;;  %v3286_v2 = vsel %vm1259_vm9, %v7422_v5, %v4717_v40  ;;  %v3234_v5 = vsel %vm8598_vm11, %v3231_v25, %v3233_v56 }
 0xae0   :  { %v3289_v27 = vsel %vm8594_vm10, %v3285_v39, %v4726_v58  ;;  %v3290_v26 = vsel %vm8597_vm14, %v3286_v2, %v4727_v17  ;;  %vm3570_vm10 = vcmp.eq.s32.totalorder %v5055_v29, %v7347_v22 }
 0xae2   :  { %v3252_v53 = vpop.permute.xlu0 %3251  ;;  %v3318_v16 = vpop.permute.xlu2 %3317 }
 0xae3   :  { %v3296_v11 = vsel %vm1259_vm9, %v3229_v63, %v3252_v53  ;;  %v4738_v63 = vld [vmem:[%s8266_s20] ss:$0 sm:$0xff] }
 0xae4   :  { %v4720_v42 = vpop.permute.xlu1 %4719  ;;  %v3300_v32 = vsel %vm8593_vm8, %v3296_v11, %v3274_v62  ;;  %vm3564_vm8 = vcmp.eq.s32.totalorder %v5055_v29, %v7341_v44  ;;  %v4499_v29 = vsel %vm3565_vm4, 1.0, %v8529_v46 }
 0xae5   :  { %v4722_v33 = vunpack.i.h.bf16 %v4720_v42  ;;  %v4721_v57 = vunpack.i.l.bf16 %v4720_v42  ;;  %4495 = vmatmul.msk.f32.gmra.mxu0 %vm1700_vm0, %v3300_v32 }
 0xae7   :  { %v3293_v45 = vsel %vm1700_vm0, %v3289_v27, %v4721_v57  ;;  %v3325_v43 = vsel %vm1700_vm0, %v3299_v54, %v4722_v33 }
 0xae8   :  { %3366 = vmatmul.f32.gmra.mxu3 %v3293_v45  ;;  %3424 = vmatmul.f32.gmra.mxu2 %v3293_v45 }
 0xae9   :  { %3447 = vmatmul.f32.vlgmr.msrb.gmra.mxu1 %v3325_v43 }
 0xaea   :  { %v3254_v4 = vpop.permute.xlu0 %3253 }
 0xaeb   :  { %v3297_v55 = vsel %vm1259_vm9, %v3232_v12, %v3254_v4 }
 0xaec   :  { %v4730_v61 = vpop.permute.xlu1 %4729  ;;  %v3301_v8 = vsel %vm8596_vm12, %v3297_v55, %v3276_v19  ;;  %vm3571_vm12 = vcmp.eq.s32.totalorder %v5079_v35, %v7347_v22 }
 0xaed   :  { %v4732_v52 = vunpack.i.h.bf16 %v4730_v61  ;;  %v4731_v60 = vunpack.i.l.bf16 %v4730_v61  ;;  %4496 = vmatmul.msk.f32.gmra.mxu0 %vm1700_vm0, %v3301_v8  ;;  %v3327_v24 = vsel %vm1700_vm0, %v3301_v8, %v3318_v16 }
 0xaef   :  { %v3294_v51 = vsel %vm1700_vm0, %v3290_v26, %v4731_v60  ;;  %v3326_v59 = vsel %vm1700_vm0, %v3300_v32, %v4732_v52 }
 0xaf0   :  { %3369 = vmatmul.f32.gmra.mxu3 %v3294_v51  ;;  %3427 = vmatmul.f32.gmra.mxu2 %v3294_v51 }
 0xaf1   :  { %3450 = vmatmul.f32.gmra.mxu1 %v3326_v59 }
 0xaf2   :  { %v3256_v47 = vpop.permute.xlu0 %3255 }
 0xaf3   :  { %v3298_v28 = vsel %vm1259_vm9, %v3234_v5, %v3256_v47 }
 0xaf4   :  { %v3278_v50 = vpop.permute.xlu1 %3277 }
 0xaf5   :  { %v3302_v15 = vsel %vm8599_vm1, %v3298_v28, %v3278_v50  ;;  %vm8600_vm1 = vcmask 1044480  }
 0xaf6   :  { %4497 = vmatmul.msk.f32.gmra.mxu0 %vm1700_vm0, %v3302_v15 }
 0xaf9   :  { %3453 = vmatmul.f32.gmra.mxu1 %v3327_v24 }
 0xafa   :  { %v3320_v30 = vpop.permute.xlu0 %3319 }
 0xafb   :  { %v3328_v38 = vsel %vm1700_vm0, %v3302_v15, %v3320_v30 }
 0xb01   :  { %3456 = vmatmul.f32.gmra.mxu1 %v3328_v38 }
 0xb59   :  { %v3390_v54 = vpop.f32.mrf.mxu0 }
 0xb5a   :  { %v3361_v34 = vpop.f32.mrf.mxu3  ;;  %v3419_v23 = vpop.f32.mrf.mxu2 }
 0xb5b   :  { %v3362_v58 = vadd.f32 %v4738_v63, %v3361_v34  ;;  %v3420_v43 = vadd.f32 %v4738_v63, %v3419_v23 }
 0xb5d   :  { %v7721_v57 = vadd.f32 %v3390_v54, %v3362_v58 }
 0xb5f   :  { %v3460_v1 = vsel %vm1114_vm2, %v7721_v57, 0.0 }
 0xb62   :  { %v3364_v36 = vpop.f32.mrf.mxu3  ;;  %v3393_v3 = vpop.f32.mrf.mxu0 }
 0xb63   :  { %v3422_v9 = vpop.f32.mrf.mxu2  ;;  %v3365_v53 = vadd.f32 %v4738_v63, %v3364_v36 }
 0xb64   :  { %v3423_v2 = vadd.f32 %v4738_v63, %v3422_v9 }
 0xb65   :  { %v7719_v32 = vadd.f32 %v3393_v3, %v3365_v53 }
 0xb66   :  { %v3448_v62 = vpop.f32.mrf.mxu1 }
 0xb67   :  { %v3461_v40 = vsel %vm1114_vm2, %v7719_v32, 0.0  ;;  %v7731_v17 = vadd.f32 %v3448_v62, %v3420_v43 }
 0xb68   :  { %v3462_v19 = vadd.f32 %v3461_v40, %v3460_v1 }
 0xb69   :  { %v3467_v59 = vsel %vm1114_vm2, %v7731_v17, 0.0 }
 0xb6a   :  { %v3396_v11 = vpop.f32.mrf.mxu0 }
 0xb6b   :  { %v3367_v39 = vpop.f32.mrf.mxu3  ;;  %v3425_v25 = vpop.f32.mrf.mxu2 }
 0xb6c   :  { %v3368_v42 = vadd.f32 %v4738_v63, %v3367_v39  ;;  %v3426_v60 = vadd.f32 %v4738_v63, %v3425_v25 }
 0xb6e   :  { %v3451_v33 = vpop.f32.mrf.mxu1  ;;  %v7723_v27 = vadd.f32 %v3396_v11, %v3368_v42 }
 0xb6f   :  { %v7735_v26 = vadd.f32 %v3451_v33, %v3423_v2 }
 0xb70   :  { %v3463_v12 = vsel %vm1114_vm2, %v7723_v27, 0.0 }
 0xb71   :  { %v3464_v52 = vadd.f32 %v3463_v12, %v3462_v19  ;;  %v3469_v50 = vsel %vm1114_vm2, %v7735_v26, 0.0 }
 0xb73   :  { %v3370_v45 = vpop.f32.mrf.mxu3  ;;  %v3399_v55 = vpop.f32.mrf.mxu0 }
 0xb74   :  { %v3371_v4 = vadd.f32 %v4738_v63, %v3370_v45  ;;  %v3428_v5 = vpop.f32.mrf.mxu2 }
 0xb75   :  { %v3429_v15 = vadd.f32 %v4738_v63, %v3428_v5 }
 0xb76   :  { %v7733_v61 = vadd.f32 %v3399_v55, %v3371_v4  ;;  %v3454_v8 = vpop.f32.mrf.mxu1 }
 0xb77   :  { %v7741_v47 = vadd.f32 %v3454_v8, %v3426_v60 }
 0xb78   :  { %v3465_v56 = vsel %vm1114_vm2, %v7733_v61, 0.0 }
 0xb79   :  { %v3466_v51 = vadd.f32 %v3465_v56, %v3464_v52  ;;  %v3471_v24 = vsel %vm1114_vm2, %v7741_v47, 0.0 }
 0xb7b   :  { %v3468_v28 = vadd.f32 %v3467_v59, %v3466_v51 }
 0xb7d   :  { %v3470_v16 = vadd.f32 %v3469_v50, %v3468_v28 }
 0xb7e   :  { %v3457_v30 = vpop.f32.mrf.mxu1 }
 0xb7f   :  { %v3472_v38 = vadd.f32 %v3471_v24, %v3470_v16  ;;  %v7747_v54 = vadd.f32 %v3457_v30, %v3429_v15 }
 0xb81   :  { %v3473_v34 = vsel %vm1114_vm2, %v7747_v54, 0.0 }
 0xb82   :  { %v3474_v23 = vadd.f32 %v3473_v34, %v3472_v38 }
 0xb84   :  { %v3475_v36 = vrot.slane %v3474_v23, 4 }
 0xb86   :  { %v3476_v3 = vadd.f32 %v3475_v36, %v3474_v23 }
 0xb88   :  { %v3477_v9 = vrot.slane %v3476_v3, 2 }
 0xb8a   :  { %v3478_v62 = vadd.f32 %v3477_v9, %v3476_v3 }
 0xb8c   :  { %v3479_v53 = vrot.slane %v3478_v62, 1 }
 0xb8e   :  { %v3480_v11 = vadd.f32 %v3479_v53, %v3478_v62 }
 0xb90   :  { %v3481_v63 = vmul.f32 %v3480_v11, %v6016_v18 }
 0xb92   :  { %v3482_v39 = vsub.f32 %v7721_v57, %v3481_v63  ;;  %v3483_v58 = vsub.f32 %v7719_v32, %v3481_v63  ;;  %v3484_v42 = vsub.f32 %v7723_v27, %v3481_v63  ;;  %v3485_v33 = vsub.f32 %v7733_v61, %v3481_v63 }
 0xb93   :  { %v3486_v25 = vsub.f32 %v7731_v17, %v3481_v63  ;;  %v3487_v1 = vsub.f32 %v7735_v26, %v3481_v63  ;;  %v3488_v2 = vsub.f32 %v7741_v47, %v3481_v63  ;;  %v3489_v56 = vsub.f32 %v7747_v54, %v3481_v63 }
 0xb94   :  { %v3490_v40 = vmul.f32 %v3482_v39, %v3482_v39  ;;  %v3491_v45 = vmul.f32 %v3483_v58, %v3483_v58  ;;  %v3492_v43 = vmul.f32 %v3484_v42, %v3484_v42  ;;  %v3493_v12 = vmul.f32 %v3485_v33, %v3485_v33 }
 0xb95   :  { %v3494_v8 = vmul.f32 %v3486_v25, %v3486_v25  ;;  %v3495_v51 = vmul.f32 %v3487_v1, %v3487_v1  ;;  %v3496_v28 = vmul.f32 %v3488_v2, %v3488_v2  ;;  %v3497_v16 = vmul.f32 %v3489_v56, %v3489_v56  ;;  %v3088_v1 = vld [vmem:[%s8267_s21] sm:$0x1]  ;;  %s8606_s21 = smov 80  }
 0xb96   :  { %v3498_v4 = vsel %vm1114_vm2, %v3490_v40, 0.0  ;;  %v3499_v19 = vsel %vm1114_vm2, %v3491_v45, 0.0  ;;  %v3501_v52 = vsel %vm1114_vm2, %v3492_v43, 0.0  ;;  %v3503_v59 = vsel %vm1114_vm2, %v3493_v12, 0.0 }
 0xb97   :  { %v3500_v55 = vadd.f32 %v3499_v19, %v3498_v4  ;;  %v3505_v50 = vsel %vm1114_vm2, %v3494_v8, 0.0  ;;  %v3507_v24 = vsel %vm1114_vm2, %v3495_v51, 0.0  ;;  %v3509_v38 = vsel %vm1114_vm2, %v3496_v28, 0.0 }
 0xb98   :  { %v3511_v23 = vsel %vm1114_vm2, %v3497_v16, 0.0 }
 0xb99   :  { %v3502_v60 = vadd.f32 %v3501_v52, %v3500_v55 }
 0xb9b   :  { %v3504_v5 = vadd.f32 %v3503_v59, %v3502_v60 }
 0xb9d   :  { %v3506_v15 = vadd.f32 %v3505_v50, %v3504_v5 }
 0xb9f   :  { %v3508_v30 = vadd.f32 %v3507_v24, %v3506_v15 }
 0xba1   :  { %v3510_v34 = vadd.f32 %v3509_v38, %v3508_v30 }
 0xba3   :  { %v3512_v36 = vadd.f32 %v3511_v23, %v3510_v34 }
 0xba5   :  { %v3513_v3 = vrot.slane %v3512_v36, 4 }
 0xba7   :  { %v3514_v9 = vadd.f32 %v3513_v3, %v3512_v36 }
 0xba9   :  { %v3515_v62 = vrot.slane %v3514_v9, 2 }
 0xbab   :  { %v3516_v53 = vadd.f32 %v3515_v62, %v3514_v9 }
 0xbad   :  { %v3517_v11 = vrot.slane %v3516_v53, 1 }
 0xbaf   :  { %v3518_v39 = vadd.f32 %v3517_v11, %v3516_v53 }
 0xbb1   :  { %v3519_v58 = vmul.f32 %v3518_v39, %v6016_v18  ;;  %v3089_v18 = vld [vmem:[%s8268_s22] sm:$0x1]  ;;  %s8609_s22 = smov 112  }
 0xbb3   :  { %v3520_v42 = vadd.f32 1e-05, %v3519_v58 }
 0xbb5   :  { %4756 = vrsqrt.f32 %v3520_v42  ;;  %vm3527_vm5 = vweird.f32 %v3520_v42 }
 0xbbb   :  { %v4757_v33 = vpop.eup %4756 }
 0xbbc   :  { %v3522_v25 = vmul.f32 %v4757_v33, %v3520_v42  ;;  %vm3528_vm13 = vweird.f32 %v4757_v33 }
 0xbbd   :  { %vm3529_vm7 = vmor %vm3527_vm5, %vm3528_vm13  ;;  %vm8601_vm13 = vcmask 1045504   ;;  %vm8602_vm5 = vcmask 1046528  }
 0xbbe   :  { %v3523_v40 = vmul.f32 %v4757_v33, %v3522_v25 }
 0xbc0   :  { %v3524_v45 = vmul.f32 0.5, %v3523_v40 }
 0xbc2   :  { %v3525_v43 = vsub.f32 1.5, %v3524_v45 }
 0xbc4   :  { %v3526_v12 = vmul.f32 %v4757_v33, %v3525_v43 }
 0xbc6   :  { %v3530_v4 = vsel %vm3529_vm7, %v4757_v33, %v3526_v12  ;;  %vm8603_vm7 = vcmask 1041408  }
 0xbc7   :  { %v3531_v19 = vmul.f32 %v3530_v4, %v3088_v1 }
 0xbc9   :  { %v3532_v55 = vmul.f32 %v3531_v19, %v3481_v63  ;;  %v3535_v2 = vperm.slane %v3531_v19, 0 }
 0xbcb   :  { %v3533_v8 = vsub.f32 %v3089_v18, %v3532_v55  ;;  %v3555_v52 = vmul.f32 %v3535_v2, %v7747_v54  ;;  %v3553_v56 = vmul.f32 %v3535_v2, %v7735_v26  ;;  %v3538_v51 = vmul.f32 %v3535_v2, %v7719_v32 }
 0xbcc   :  { %v3540_v59 = vmul.f32 %v3535_v2, %v7733_v61  ;;  %v3552_v5 = vmul.f32 %v3535_v2, %v7731_v17  ;;  %v3537_v28 = vmul.f32 %v3535_v2, %v7721_v57  ;;  %v3554_v50 = vmul.f32 %v3535_v2, %v7741_v47 }
 0xbcd   :  { %v3542_v60 = vperm.slane %v3533_v8, 0  ;;  %v3539_v15 = vmul.f32 %v3535_v2, %v7723_v27 }
 0xbcf   :  { %v3559_v63 = vadd.f32 %v3555_v52, %v3542_v60  ;;  %v3557_v16 = vadd.f32 %v3553_v56, %v3542_v60  ;;  %v3545_v24 = vadd.f32 %v3542_v60, %v3538_v51  ;;  %v3547_v30 = vadd.f32 %v3542_v60, %v3540_v59 }
 0xbd0   :  { %v3556_v54 = vadd.f32 %v3552_v5, %v3542_v60  ;;  %v3544_v38 = vadd.f32 %v3542_v60, %v3537_v28  ;;  %v3558_v34 = vadd.f32 %v3554_v50, %v3542_v60  ;;  %v3546_v26 = vadd.f32 %v3542_v60, %v3539_v15 }
 0xbd1   :  { %v3561_v23 = vmax.f32 %v3557_v16, 0.0  ;;  %v3549_v32 = vmax.f32 %v3545_v24, 0.0  ;;  %v3563_v36 = vmax.f32 %v3559_v63, 0.0  ;;  %v3551_v61 = vmax.f32 %v3547_v30, 0.0 }
 0xbd2   :  { %v3560_v17 = vmax.f32 %v3556_v54, 0.0  ;;  %v3548_v57 = vmax.f32 %v3544_v38, 0.0  ;;  %v3562_v47 = vmax.f32 %v3558_v34, 0.0  ;;  %v3550_v27 = vmax.f32 %v3546_v26, 0.0 }
 0xbd3   :  { %3600 = vmatpush.msra.mxu0 %v3561_v23  ;;  %3639 = vmatpush.msra.mxu3 %v3549_v32  ;;  %v3715_v52 = vadd.s32 4294967293, %v5079_v35 }
 0xbd4   :  { %3668 = vmatpush.msra.mxu2 %v3563_v36  ;;  %3697 = vmatpush.msra.mxu1 %v3551_v61 }
 0xbd5   :  { %3601 = vmatpush.msra.mxu0 %v3560_v17  ;;  %3640 = vmatpush.msra.mxu3 %v3548_v57  ;;  %vm3717_vm14 = vcmp.eq.s32.totalorder %v5014_v13, %v3715_v52 }
 0xbd6   :  { %3669 = vmatpush.msra.mxu2 %v3562_v47  ;;  %3698 = vmatpush.msra.mxu1 %v3550_v27  ;;  %v4518_v60 = vsel %vm3717_vm14, 1.0, %v8529_v46  ;;  %vm8610_vm14 = vmmov %vm8601_vm13 }
 0xbd7   :  { %4506 = vmatmul.msk.f32.vlgmr.msra.gmra.mxu3 %vm1114_vm2, %v7360_v20  ;;  %4510 = vmatmul.msk.f32.vlgmr.msra.gmra.mxu2 %vm1114_vm2, %v7357_v0 }
 0xbd8   :  { %4502 = vmatmul.msk.f32.vlgmr.msra.gmra.mxu0 %vm1114_vm2, %v7357_v0  ;;  %4514 = vmatmul.msk.f32.vlgmr.msra.gmra.mxu1 %vm1114_vm2, %v7360_v20  ;;  %v4498_v0 = vsel %vm3564_vm8, 1.0, %v8529_v46  ;;  %v4500_v20 = vsel %vm3570_vm10, 1.0, %v8529_v46  ;;  %vm8604_vm8 = vcmask 1043456   ;;  %vm8605_vm10 = vcmask 1042432  }
 0xbd9   :  { %vm8607_vm4 = vmmov %vm8605_vm10 }
 0xbdf   :  { %4507 = vmatmul.msk.f32.gmra.mxu3 %vm1114_vm2, %v7376_v49  ;;  %4511 = vmatmul.msk.f32.gmra.mxu2 %vm1114_vm2, %v7373_v7 }
 0xbe0   :  { %4503 = vmatmul.msk.f32.gmra.mxu0 %vm1114_vm2, %v7373_v7  ;;  %4515 = vmatmul.msk.f32.gmra.mxu1 %vm1114_vm2, %v7376_v49  ;;  %v4501_v7 = vsel %vm3571_vm12, 1.0, %v8529_v46  ;;  %vm8608_vm12 = vcmask 1040384  }
 0xbe7   :  { %4508 = vmatmul.msk.f32.gmra.mxu3 %vm1114_vm2, %v4498_v0  ;;  %4512 = vmatmul.msk.f32.gmra.mxu2 %vm1114_vm2, %v4500_v20 }
 0xbe8   :  { %4504 = vmatmul.msk.f32.gmra.mxu0 %vm1114_vm2, %v4500_v20  ;;  %4516 = vmatmul.msk.f32.gmra.mxu1 %vm1114_vm2, %v4498_v0 }
 0xbef   :  { %4509 = vmatmul.msk.f32.gmra.mxu3 %vm1114_vm2, %v4499_v29  ;;  %4513 = vmatmul.msk.f32.gmra.mxu2 %vm1114_vm2, %v4501_v7 }
 0xbf0   :  { %4505 = vmatmul.msk.f32.gmra.mxu0 %vm1114_vm2, %v4501_v7  ;;  %4517 = vmatmul.msk.f32.gmra.mxu1 %vm1114_vm2, %v4499_v29 }
 0xc55   :  { %v3603_v49 = vpop.f32.mrf.mxu0  ;;  %v3700_v3 = vpop.f32.mrf.mxu1 }
 0xc5a   :  { %v3642_v9 = vpop.f32.mrf.mxu3  ;;  %v3671_v62 = vpop.f32.mrf.mxu2 }
 0xc5b   :  { %v3643_v2 = vadd.f32 %v3642_v9, %v3603_v49  ;;  %v3701_v8 = vadd.f32 %v3700_v3, %v3671_v62 }
 0xc5d   :  { %v3606_v44 = vpop.f32.mrf.mxu0  ;;  %v3703_v53 = vpop.f32.mrf.mxu1 }
 0xc62   :  { %v3645_v11 = vpop.f32.mrf.mxu3  ;;  %v3674_v22 = vpop.f32.mrf.mxu2 }
 0xc63   :  { %v3646_v18 = vadd.f32 %v3645_v11, %v3606_v44  ;;  %v3704_v55 = vadd.f32 %v3703_v53, %v3674_v22 }
 0xc65   :  { %v3609_v39 = vpop.f32.mrf.mxu0  ;;  %v3706_v58 = vpop.f32.mrf.mxu1 }
 0xc6a   :  { %v3648_v42 = vpop.f32.mrf.mxu3  ;;  %v3677_v33 = vpop.f32.mrf.mxu2 }
 0xc6b   :  { %v3707_v1 = vadd.f32 %v3706_v58, %v3677_v33  ;;  %v3649_v19 = vadd.f32 %v3648_v42, %v3609_v39 }
 0xc6d   :  { %v3612_v25 = vpop.f32.mrf.mxu0  ;;  %v3709_v40 = vpop.f32.mrf.mxu1 }
 0xc72   :  { %v3651_v45 = vpop.f32.mrf.mxu3  ;;  %v3680_v43 = vpop.f32.mrf.mxu2 }
 0xc73   :  { %v3652_v12 = vadd.f32 %v3651_v45, %v3612_v25  ;;  %v3710_v4 = vadd.f32 %v3709_v40, %v3680_v43 }
 0xc75   :  { %3747 = vmatpush.msrb.mxu0 %v3652_v12  ;;  %3779 = vmatpush.msrb.mxu3 %v3710_v4 }
 0xc77   :  { %3748 = vmatpush.msrb.mxu0 %v3649_v19  ;;  %3780 = vmatpush.msrb.mxu3 %v3707_v1 }
 0xc79   :  { %3749 = vmatpush.msrb.mxu0 %v3646_v18  ;;  %3781 = vmatpush.msrb.mxu3 %v3704_v55 }
 0xc7b   :  { %3750 = vmatpush.msrb.mxu0 %v3643_v2  ;;  %3782 = vmatpush.msrb.mxu3 %v3701_v8 }
 0xc7c   :  { %4520 = vmatmul.msk.f32.vlgmr.msrb.gmra.mxu0 %vm1259_vm9, %v6857_v48  ;;  %4525 = vmatmul.msk.f32.vlgmr.msrb.gmra.mxu3 %vm1259_vm9, %v6857_v48  ;;  %v3716_v48 = vadd.s32 4294967293, %v5103_v41 }
 0xc7e   :  { %vm3718_vm11 = vcmp.eq.s32.totalorder %v5014_v13, %v3716_v48 }
 0xc7f   :  { %v4519_v35 = vsel %vm3718_vm11, 1.0, %v8529_v46  ;;  %vm8611_vm11 = vmmov %vm8602_vm5 }
 0xc84   :  { %4521 = vmatmul.msk.f32.gmra.mxu0 %vm1259_vm9, %v6864_v6  ;;  %4526 = vmatmul.msk.f32.gmra.mxu3 %vm1259_vm9, %v6864_v6 }
 0xc8c   :  { %4522 = vmatmul.msk.f32.gmra.mxu0 %vm1259_vm9, %v7395_v14  ;;  %4527 = vmatmul.msk.f32.gmra.mxu3 %vm1259_vm9, %v7395_v14 }
 0xc94   :  { %4523 = vmatmul.msk.f32.gmra.mxu0 %vm1259_vm9, %v4518_v60  ;;  %4528 = vmatmul.msk.f32.gmra.mxu3 %vm1259_vm9, %v4518_v60 }
 0xc9c   :  { %4524 = vmatmul.msk.f32.gmra.mxu0 %vm1259_vm9, %v4519_v35  ;;  %4529 = vmatmul.msk.f32.gmra.mxu3 %vm1259_vm9, %v4519_v35 }
 0xcf9   :  { %v7841_v6 = vpop.f32.mrf.mxu0 }
 0xcfa   :  { %v3893_v56 = vrot.slane %v7841_v6, 3  ;;  %v3851_v41 = vrot.slane %v7841_v6, 2  ;;  %v3809_v5 = vrot.slane %v7841_v6, 1  ;;  %v4019_v54 = vrot.slane %v7841_v6, 6 }
 0xcfb   :  { %v3935_v38 = vrot.slane %v7841_v6, 4  ;;  %v3977_v34 = vrot.slane %v7841_v6, 5  ;;  %v4109_v0 = vrot.slane %v7841_v6, 7 }
 0xcff   :  { %v7851_v28 = vpop.f32.mrf.mxu3 }
 0xd00   :  { %v3986_v61 = vrot.slane %v7851_v28, 5  ;;  %v3860_v47 = vrot.slane %v7851_v28, 2  ;;  %v3818_v3 = vrot.slane %v7851_v28, 1  ;;  %v3944_v44 = vrot.slane %v7851_v28, 4 }
 0xd01   :  { %v7843_v14 = vpop.f32.mrf.mxu0  ;;  %v3902_v58 = vrot.slane %v7851_v28, 3  ;;  %v4118_v25 = vrot.slane %v7851_v28, 7  ;;  %v4028_v12 = vrot.slane %v7851_v28, 6 }
 0xd02   :  { %v3894_v51 = vrot.slane %v7843_v14, 3  ;;  %v3852_v59 = vrot.slane %v7843_v14, 2  ;;  %v3810_v46 = vrot.slane %v7843_v14, 1  ;;  %v4020_v16 = vrot.slane %v7843_v14, 6 }
 0xd03   :  { %v3936_v24 = vrot.slane %v7843_v14, 4  ;;  %v3978_v30 = vrot.slane %v7843_v14, 5  ;;  %v4110_v57 = vrot.slane %v7843_v14, 7 }
 0xd04   :  { %v3895_v50 = vsel %vm8600_vm1, %v3893_v56, %v3894_v51  ;;  %v3853_v15 = vsel %vm8601_vm13, %v3851_v41, %v3852_v59  ;;  %v3811_v63 = vsel %vm8602_vm5, %v3809_v5, %v3810_v46  ;;  %v4021_v26 = vsel %vm8603_vm7, %v4019_v54, %v4020_v16  ;;  %vm8612_vm1 = vmmov %vm8601_vm13 }
 0xd05   :  { %3911 = vrot.lane.b32.xlu0 %v3895_v50, %s4834_s7  ;;  %3869 = vrot.lane.b32.xlu2 %v3853_v15, %s4833_s3  ;;  %v3937_v23 = vsel %vm8604_vm8, %v3935_v38, %v3936_v24  ;;  %v3979_v32 = vsel %vm8605_vm10, %v3977_v34, %v3978_v30  ;;  %v4111_v29 = vsel %vm8608_vm12, %v4109_v0, %v4110_v57  ;;  %vm8613_vm13 = vmmov %vm8604_vm8  ;;  %vm8614_vm5 = vcmask 1044480  }
 0xd06   :  { %3827 = vrot.lane.b32.xlu1 %v3811_v63, %s4835_s28  ;;  %vm8615_vm7 = vmmov %vm8604_vm8  ;;  %vm8617_vm10 = vcmask 1041408  }
 0xd07   :  { %v7878_v36 = vpop.f32.mrf.mxu3  ;;  %vm8616_vm8 = vmmov %vm8608_vm12 }
 0xd08   :  { %v3987_v17 = vrot.slane %v7878_v36, 5  ;;  %v3861_v27 = vrot.slane %v7878_v36, 2  ;;  %v3819_v9 = vrot.slane %v7878_v36, 1  ;;  %v3945_v53 = vrot.slane %v7878_v36, 4  ;;  %vm8619_vm12 = vmmov %vm8614_vm5 }
 0xd09   :  { %v7894_v49 = vpop.f32.mrf.mxu0  ;;  %v3903_v42 = vrot.slane %v7878_v36, 3  ;;  %v4119_v40 = vrot.slane %v7878_v36, 7  ;;  %v4029_v4 = vrot.slane %v7878_v36, 6 }
 0xd0a   :  { %v3988_v20 = vsel %vm8607_vm4, %v3986_v61, %v3987_v17  ;;  %v3862_v7 = vsel %vm8610_vm14, %v3860_v47, %v3861_v27  ;;  %v3854_v62 = vrot.slane %v7894_v49, 2  ;;  %v3820_v11 = vsel %vm8611_vm11, %v3818_v3, %v3819_v9  ;;  %vm8618_vm4 = vmmov %vm8616_vm8 }
 0xd0b   :  { %v3946_v39 = vsel %vm8613_vm13, %v3944_v44, %v3945_v53  ;;  %v3938_v33 = vrot.slane %v7894_v49, 4  ;;  %v3904_v45 = vsel %vm8614_vm5, %v3902_v58, %v3903_v42  ;;  %v4120_v1 = vsel %vm8616_vm8, %v4118_v25, %v4119_v40  ;;  %vm8620_vm14 = vmmov %vm8611_vm11 }
 0xd0c   :  { %v3855_v22 = vsel %vm8612_vm1, %v3852_v59, %v3854_v62  ;;  %v4112_v19 = vrot.slane %v7894_v49, 7  ;;  %v3896_v18 = vrot.slane %v7894_v49, 3  ;;  %v4030_v55 = vsel %vm8617_vm10, %v4028_v12, %v4029_v4  ;;  %vm8621_vm1 = vmmov %vm8617_vm10 }
 0xd0d   :  { %4037 = vrot.lane.b32.xlu0 %v4021_v26, %s4836_s8  ;;  %3953 = vrot.lane.b32.xlu2 %v3937_v23, %s4832_s6  ;;  %v3939_v43 = vsel %vm8615_vm7, %v3936_v24, %v3938_v33  ;;  %v3812_v48 = vrot.slane %v7894_v49, 1  ;;  %v4022_v35 = vrot.slane %v7894_v49, 6  ;;  %v3980_v5 = vrot.slane %v7894_v49, 5  ;;  %vm8622_vm13 = vmmov %vm8614_vm5 }
 0xd0e   :  { %3995 = vrot.lane.b32.xlu1 %v3979_v32, %s8606_s21  ;;  %v4113_v2 = vsel %vm8618_vm4, %v4110_v57, %v4112_v19  ;;  %v3897_v8 = vsel %vm8619_vm12, %v3894_v51, %v3896_v18  ;;  %vm8623_vm5 = vcmask 1042432   ;;  %vm8625_vm8 = vmmov %vm8621_vm1  ;;  %vm8626_vm10 = vcmask 1045504  }
 0xd0f   :  { %v7934_v52 = vpop.f32.mrf.mxu3  ;;  %v3813_v41 = vsel %vm8611_vm11, %v3810_v46, %v3812_v48  ;;  %v4023_v51 = vsel %vm8621_vm1, %v4020_v16, %v4022_v35  ;;  %v3981_v46 = vsel %vm8623_vm5, %v3978_v30, %v3980_v5  ;;  %vm8624_vm7 = vmmov %vm8623_vm5  ;;  %vm8628_vm12 = vcmask 1043456  }
 0xd10   :  { %v3821_v60 = vrot.slane %v7934_v52, 1  ;;  %v3905_v59 = vrot.slane %v7934_v52, 3  ;;  %v3989_v50 = vrot.slane %v7934_v52, 5  ;;  %v4031_v24 = vrot.slane %v7934_v52, 6  ;;  %vm8627_vm4 = vmmov %vm8626_vm10 }
 0xd11   :  { %v7963_v16 = vpop.f32.mrf.mxu0  ;;  %v3863_v54 = vrot.slane %v7934_v52, 2  ;;  %v3947_v23 = vrot.slane %v7934_v52, 4  ;;  %v4121_v0 = vrot.slane %v7934_v52, 7  ;;  %vm8631_vm1 = vcmask 1040384  }
 0xd12   :  { %v3822_v56 = vsel %vm8620_vm14, %v3819_v9, %v3821_v60  ;;  %v3906_v15 = vsel %vm8622_vm13, %v3903_v42, %v3905_v59  ;;  %v3990_v63 = vsel %vm8624_vm7, %v3987_v17, %v3989_v50  ;;  %v3856_v38 = vrot.slane %v7963_v16, 2  ;;  %vm8629_vm14 = vmmov %vm8611_vm11 }
 0xd13   :  { %v4032_v30 = vsel %vm8625_vm8, %v4029_v4, %v4031_v24  ;;  %v3864_v34 = vsel %vm8626_vm10, %v3861_v27, %v3863_v54  ;;  %v3814_v32 = vrot.slane %v7963_v16, 1  ;;  %v3982_v61 = vrot.slane %v7963_v16, 5  ;;  %vm8630_vm11 = vmmov %vm8623_vm5 }
 0xd14   :  { %v3857_v26 = vsel %vm8627_vm4, %v3854_v62, %v3856_v38  ;;  %v3948_v17 = vsel %vm8628_vm12, %v3945_v53, %v3947_v23  ;;  %vm8632_vm5 = vmmov %vm8629_vm14  ;;  %v3940_v62 = vrot.slane %v7963_v16, 4  ;;  %v4024_v44 = vrot.slane %v7963_v16, 6 }
 0xd15   :  { %4003 = vrot.lane.b32.xlu0 %v3988_v20, %s8606_s21  ;;  %4127 = vrot.lane.b32.xlu2 %v4111_v29, %s8609_s22  ;;  %v3815_v57 = vsel %vm8629_vm14, %v3812_v48, %v3814_v32  ;;  %v3983_v47 = vsel %vm8630_vm11, %v3980_v5, %v3982_v61  ;;  %v3898_v20 = vrot.slane %v7963_v16, 3  ;;  %vm8633_vm7 = vmmov %vm8628_vm12  ;;  %v4114_v42 = vrot.slane %v7963_v16, 7 }
 0xd16   :  { %3877 = vrot.lane.b32.xlu1 %v3862_v7, %s4833_s3  ;;  %v4122_v7 = vsel %vm8631_vm1, %v4119_v40, %v4121_v0  ;;  %vm8634_vm10 = vmmov %vm8622_vm13  ;;  %vm8638_vm11 = vcmask 1045504  }
 0xd17   :  { %v7989_v27 = vpop.f32.mrf.mxu3  ;;  %v3899_v3 = vsel %vm8622_vm13, %v3896_v18, %v3898_v20  ;;  %vm8635_vm4 = vmmov %vm8631_vm1 }
 0xd18   :  { %v3823_v29 = vrot.slane %v7989_v27, 1  ;;  %v3907_v53 = vrot.slane %v7989_v27, 3  ;;  %v3949_v25 = vrot.slane %v7989_v27, 4  ;;  %v4033_v40 = vrot.slane %v7989_v27, 6  ;;  %vm8636_vm12 = vmmov %vm8633_vm7 }
 0xd19   :  { %vm8637_vm14 = vmmov %vm8625_vm8  ;;  %v3865_v4 = vrot.slane %v7989_v27, 2  ;;  %v3991_v48 = vrot.slane %v7989_v27, 5 }
 0xd1a   :  { %v3824_v9 = vsel %vm8632_vm5, %v3821_v60, %v3823_v29  ;;  %vm8639_vm13 = vmmov %vm8632_vm5  ;;  %vm8640_vm5 = vcmask 1042432  }
 0xd1d   :  { %3835 = vrot.lane.b32.xlu2 %v3820_v11, %s4835_s28  ;;  %3871 = vrot.lane.b32.xlu0 %v3855_v22, %s4833_s3  ;;  %v3941_v11 = vsel %vm8633_vm7, %v3938_v33, %v3940_v62  ;;  %v4025_v22 = vsel %vm8625_vm8, %v4022_v35, %v4024_v44  ;;  %v4115_v33 = vsel %vm8635_vm4, %v4112_v19, %v4114_v42  ;;  %v4123_v19 = vrot.slane %v7989_v27, 7  ;;  %vm8641_vm7 = vmmov %vm8634_vm10 }
 0xd1e   :  { %3961 = vrot.lane.b32.xlu1 %v3946_v39, %s4832_s6  ;;  %v3908_v39 = vsel %vm8634_vm10, %v3905_v59, %v3907_v53  ;;  %vm8642_vm8 = vmmov %vm8638_vm11 }
 0xd1f   :  { %vm8643_vm10 = vmmov %vm8636_vm12 }
 0xd20   :  { %vm8644_vm4 = vmmov %vm8637_vm14 }
 0xd25   :  { %3919 = vrot.lane.b32.xlu2 %v3904_v45, %s4834_s7  ;;  %3955 = vrot.lane.b32.xlu0 %v3939_v43, %s4832_s6  ;;  %v3950_v45 = vsel %vm8636_vm12, %v3947_v23, %v3949_v25  ;;  %v4034_v43 = vsel %vm8637_vm14, %v4031_v24, %v4033_v40  ;;  %vm8645_vm12 = vcmask 523264   ;;  %vm8646_vm14 = vmmov %vm8640_vm5 }
 0xd26   :  { %4135 = vrot.lane.b32.xlu1 %v4120_v1, %s8609_s22  ;;  %v3764_v1 = vpop.f32.mrf.mxu0 }
 0xd27   :  { %v3816_v18 = vrot.slane %v3764_v1, 1  ;;  %v3900_v35 = vrot.slane %v3764_v1, 3  ;;  %v3942_v24 = vrot.slane %v3764_v1, 4 }
 0xd29   :  { %v3901_v59 = vsel %vm8641_vm7, %v3898_v20, %v3900_v35  ;;  %v3943_v23 = vsel %vm8643_vm10, %v3940_v62, %v3942_v24  ;;  %vm8650_vm7 = vmmov %vm8643_vm10 }
 0xd2d   :  { %4045 = vrot.lane.b32.xlu2 %v4030_v55, %s4836_s8  ;;  %4129 = vrot.lane.b32.xlu0 %v4113_v2, %s8609_s22  ;;  %v3866_v55 = vsel %vm8638_vm11, %v3863_v54, %v3865_v4  ;;  %v4124_v2 = vsel %vm8631_vm1, %v4121_v0, %v4123_v19  ;;  %v4026_v54 = vrot.slane %v3764_v1, 6  ;;  %vm8647_vm11 = vmmov %vm8642_vm8 }
 0xd2e   :  { %3913 = vrot.lane.b32.xlu1 %v3897_v8, %s4834_s7  ;;  %v3817_v8 = vsel %vm8639_vm13, %v3814_v32, %v3816_v18  ;;  %vm8648_vm1 = vmmov %vm8639_vm13  ;;  %vm8649_vm13 = vcmask 1040384   ;;  %v4739_v18 = vld [vmem:[#allocation2] ss:$0 sm:$0xff] }
 0xd2f   :  { %v4027_v32 = vsel %vm8644_vm4, %v4024_v44, %v4026_v54  ;;  %vm8652_vm10 = vmmov %vm8649_vm13 }
 0xd35   :  { %3837 = vrot.lane.b32.xlu0 %v3822_v56, %s4835_s28  ;;  %3829 = vrot.lane.b32.xlu2 %v3813_v41, %s4835_s28  ;;  %v3858_v56 = vrot.slane %v3764_v1, 2  ;;  %v4841_v41 = vmov 0  }
 0xd36   :  { %4039 = vrot.lane.b32.xlu1 %v4023_v51, %s4836_s8  ;;  %4733 = vset.pattern.permute.xlu0 %v4841_v41  ;;  %v3992_v51 = vsel %vm8640_vm5, %v3989_v50, %v3991_v48 }
 0xd37   :  { %v3859_v5 = vsel %vm8642_vm8, %v3856_v38, %v3858_v56  ;;  %vm8651_vm8 = vcmask 1044480  }
 0xd3d   :  { %3921 = vrot.lane.b32.xlu0 %v3906_v15, %s4834_s7  ;;  %3997 = vrot.lane.b32.xlu2 %v3981_v46, %s8606_s21 }
 0xd3e   :  { %4005 = vrot.lane.b32.xlu1 %v3990_v63, %s8606_s21 }
 0xd45   :  { %4047 = vrot.lane.b32.xlu0 %v4032_v30, %s4836_s8  ;;  %3879 = vrot.lane.b32.xlu2 %v3864_v34, %s4833_s3  ;;  %v3984_v30 = vrot.slane %v3764_v1, 5 }
 0xd46   :  { %3873 = vrot.lane.b32.xlu1 %v3857_v26, %s4833_s3 }
 0xd4d   :  { %3963 = vrot.lane.b32.xlu2 %v3948_v17, %s4832_s6  ;;  %3831 = vrot.lane.b32.xlu0 %v3815_v57, %s4835_s28  ;;  %v3985_v17 = vsel %vm8646_vm14, %v3982_v61, %v3984_v30  ;;  %vm8653_vm14 = vmmov %vm8645_vm12 }
 0xd4e   :  { %3999 = vrot.lane.b32.xlu1 %v3983_v47, %s8606_s21 }
 0xd55   :  { %4137 = vrot.lane.b32.xlu2 %v4122_v7, %s8609_s22  ;;  %3915 = vrot.lane.b32.xlu0 %v3899_v3, %s4834_s7  ;;  %v4116_v3 = vrot.slane %v3764_v1, 7 }
 0xd56   :  { %3839 = vrot.lane.b32.xlu1 %v3824_v9, %s4835_s28 }
 0xd57   :  { %v4117_v61 = vsel %vm8649_vm13, %v4114_v42, %v4116_v3 }
 0xd5d   :  { %3957 = vrot.lane.b32.xlu2 %v3941_v11, %s4832_s6  ;;  %4041 = vrot.lane.b32.xlu0 %v4025_v22, %s4836_s8 }
 0xd5e   :  { %3923 = vrot.lane.b32.xlu1 %v3908_v39, %s4834_s7 }
 0xd5f   :  { %v3870_v58 = vpop.permute.xlu2 %3869 }
 0xd65   :  { %4131 = vrot.lane.b32.xlu2 %v4115_v33, %s8609_s22  ;;  %3965 = vrot.lane.b32.xlu0 %v3950_v45, %s4832_s6 }
 0xd66   :  { %4049 = vrot.lane.b32.xlu1 %v4034_v43, %s4836_s8 }
 0xd67   :  { %v3954_v12 = vpop.permute.xlu2 %3953 }
 0xd6d   :  { %3881 = vrot.lane.b32.xlu2 %v3866_v55, %s4833_s3  ;;  %4139 = vrot.lane.b32.xlu0 %v4124_v2, %s8609_s22 }
 0xd6e   :  { %3833 = vrot.lane.b32.xlu1 %v3817_v8, %s4835_s28 }
 0xd6f   :  { %v8040_v60 = vpop.permute.xlu2 %4127 }
 0xd75   :  { %4007 = vrot.lane.b32.xlu2 %v3992_v51, %s8606_s21  ;;  %3917 = vrot.lane.b32.xlu0 %v3901_v59, %s4834_s7 }
 0xd76   :  { %3875 = vrot.lane.b32.xlu1 %v3859_v5, %s4833_s3 }
 0xd77   :  { %v3912_v15 = vpop.permute.xlu0 %3911  ;;  %v3836_v46 = vpop.permute.xlu2 %3835 }
 0xd78   :  { %v3828_v63 = vpop.permute.xlu1 %3827 }
 0xd79   :  { %v4061_v50 = vsel %vm1114_vm2, %v7841_v6, %v3828_v63  ;;  %v3796_v6 = vpop.f32.mrf.mxu3 }
 0xd7a   :  { %v4069_v34 = vsel %vm1259_vm9, %v4061_v50, %v3870_v58  ;;  %v3867_v20 = vrot.slane %v3796_v6, 2  ;;  %v3825_v7 = vrot.slane %v3796_v6, 1  ;;  %v3993_v39 = vrot.slane %v3796_v6, 5 }
 0xd7b   :  { %v4077_v26 = vsel %vm1686_vm15, %v4069_v34, %v3912_v15  ;;  %v3951_v58 = vrot.slane %v3796_v6, 4  ;;  %v3909_v33 = vrot.slane %v3796_v6, 3  ;;  %v4035_v55 = vrot.slane %v3796_v6, 6 }
 0xd7c   :  { %v4085_v38 = vsel %vm8645_vm12, %v4077_v26, %v3954_v12  ;;  %v3868_v9 = vsel %vm8647_vm11, %v3865_v4, %v3867_v20  ;;  %v3826_v62 = vsel %vm8648_vm1, %v3823_v29, %v3825_v7  ;;  %v3994_v45 = vsel %vm8640_vm5, %v3991_v48, %v3993_v39  ;;  %vm8654_vm11 = vmmov %vm8645_vm12 }
 0xd7d   :  { %3959 = vrot.lane.b32.xlu2 %v3943_v23, %s4832_s6  ;;  %4043 = vrot.lane.b32.xlu0 %v4027_v32, %s4836_s8  ;;  %v3952_v29 = vsel %vm8650_vm7, %v3949_v25, %v3951_v58  ;;  %v3910_v42 = vsel %vm8651_vm8, %v3907_v53, %v3909_v33  ;;  %v4125_v4 = vrot.slane %v3796_v6, 7  ;;  %v4036_v2 = vsel %vm8644_vm4, %v4033_v40, %v4035_v55  ;;  %v8107_v32 = vld [vmem:[%s8269_s23] ss:$0 sm:$0xff]  ;;  %vm8655_vm1 = vmmov %vm8654_vm11  ;;  %s4843_s23 = smov [#allocation3]  }
 0xd7e   :  { %4001 = vrot.lane.b32.xlu1 %v3985_v17, %s8606_s21  ;;  %vm8656_vm13 = vmmov %vm8655_vm1  ;;  %vm4260_vm8 = vcmp.eq.s32.totalorder %v5014_v13, %v5035_v21  ;;  %vm4259_vm4 = vcmp.eq.s32.totalorder %v5014_v13, %v5006_v10 }
 0xd7f   :  { %v4038_v57 = vpop.permute.xlu0 %4037  ;;  %v3920_v47 = vpop.permute.xlu2 %3919  ;;  %v4126_v25 = vsel %vm8652_vm10, %v4123_v19, %v4125_v4  ;;  %v4065_v19 = vsel %vm1114_vm2, %v7851_v28, %v3836_v46  ;;  %vm8657_vm5 = vmmov %vm8655_vm1 }
 0xd80   :  { %v3996_v0 = vpop.permute.xlu1 %3995  ;;  %vm8658_vm7 = vmmov %vm8655_vm1 }
 0xd81   :  { %v4093_v34 = vsel %vm1695_vm3, %v4085_v38, %v3996_v0  ;;  %v8113_v38 = vld [vmem:[%s8270_s24] ss:$0 sm:$0xff]  ;;  %s4391_s24 = sshll.u32 %s4843_s23, 4  ;;  %s4392_s24 = int_to_ptr.vmem [resolvable:$true] %s4391_s24 }
 0xd82   :  { %v4101_v28 = vsel %vm1700_vm0, %v4093_v34, %v4038_v57 }
 0xd83   :  { %v4151_v0 = vsel %vm1705_vm6, %v4101_v28, %v8040_v60  ;;  %v4162_v7 = vmul.f32 %v8107_v32, %v4101_v28 }
 0xd85   :  { %3883 = vrot.lane.b32.xlu2 %v3868_v9, %s4833_s3  ;;  %3841 = vrot.lane.b32.xlu0 %v3826_v62, %s4835_s28 }
 0xd86   :  { %4133 = vrot.lane.b32.xlu1 %v4117_v61, %s8609_s22  ;;  %v4219_v61 = vmul.f32 %v8113_v38, %v4151_v0 }
 0xd87   :  { %v4004_v44 = vpop.permute.xlu0 %4003  ;;  %v4046_v11 = vpop.permute.xlu2 %4045 }
 0xd88   :  { %v3878_v22 = vpop.permute.xlu1 %3877 }
 0xd89   :  { %v4073_v15 = vsel %vm1259_vm9, %v4065_v19, %v3878_v22 }
 0xd8a   :  { %v4081_v40 = vsel %vm1686_vm15, %v4073_v15, %v3920_v47 }
 0xd8d   :  { %4009 = vrot.lane.b32.xlu2 %v3994_v45, %s8606_s21  ;;  %3967 = vrot.lane.b32.xlu0 %v3952_v29, %s4832_s6 }
 0xd8e   :  { %3925 = vrot.lane.b32.xlu1 %v3910_v42, %s4834_s7 }
 0xd8f   :  { %v3872_v43 = vpop.permute.xlu0 %3871  ;;  %v3830_v1 = vpop.permute.xlu2 %3829 }
 0xd90   :  { %v3962_v12 = vpop.permute.xlu1 %3961  ;;  %v4062_v50 = vsel %vm1114_vm2, %v7843_v14, %v3830_v1 }
 0xd91   :  { %v4089_v54 = vsel %vm8645_vm12, %v4081_v40, %v3962_v12  ;;  %v4070_v23 = vsel %vm1259_vm9, %v4062_v50, %v3872_v43  ;;  %vm4298_vm12 = vcmask 130112  }
 0xd92   :  { %v4097_v26 = vsel %vm1695_vm3, %v4089_v54, %v4004_v44 }
 0xd93   :  { %v4105_v6 = vsel %vm1700_vm0, %v4097_v26, %v4046_v11 }
 0xd94   :  { %v4166_v45 = vmul.f32 %v8107_v32, %v4105_v6 }
 0xd95   :  { %4141 = vrot.lane.b32.xlu2 %v4126_v25, %s8609_s22  ;;  %4197 = vperm.xlu0 %4733, %v4739_v18  }
 0xd96   :  { %4051 = vrot.lane.b32.xlu1 %v4036_v2, %s4836_s8  ;;  %v4182_v18 = vsel %vm1705_vm6, %v4166_v45, 0.0 }
 0xd97   :  { %v3956_v53 = vpop.permute.xlu0 %3955  ;;  %v3998_v8 = vpop.permute.xlu2 %3997 }
 0xd98   :  { %v4136_v48 = vpop.permute.xlu1 %4135 }
 0xd99   :  { %v4155_v47 = vsel %vm1705_vm6, %v4105_v6, %v4136_v48 }
 0xd9a   :  { %v4223_v3 = vmul.f32 %v8113_v38, %v4155_v47 }
 0xd9f   :  { %v4130_v35 = vpop.permute.xlu0 %4129  ;;  %v3880_v56 = vpop.permute.xlu2 %3879 }
 0xda0   :  { %v3914_v41 = vpop.permute.xlu1 %3913 }
 0xda1   :  { %v4078_v46 = vsel %vm1686_vm15, %v4070_v23, %v3914_v41 }
 0xda2   :  { %v4086_v57 = vsel %vm8653_vm14, %v4078_v46, %v3956_v53  ;;  %vm4302_vm14 = vcmask 195712  }
 0xda3   :  { %v4094_v9 = vsel %vm1695_vm3, %v4086_v57, %v3998_v8 }
 0xda7   :  { %v3838_v51 = vpop.permute.xlu0 %3837  ;;  %v3964_v5 = vpop.permute.xlu2 %3963 }
 0xda8   :  { %v4040_v59 = vpop.permute.xlu1 %4039  ;;  %v4066_v20 = vsel %vm1114_vm2, %v7878_v36, %v3838_v51  ;;  %v4170_v36 = vsel %vm1705_vm6, %v4162_v7, 0.0 }
 0xda9   :  { %v4102_v44 = vsel %vm1700_vm0, %v4094_v9, %v4040_v59  ;;  %v4074_v11 = vsel %vm1259_vm9, %v4066_v20, %v3880_v56 }
 0xdaa   :  { %v4163_v58 = vmul.f32 %v8107_v32, %v4102_v44  ;;  %v4152_v8 = vsel %vm1705_vm6, %v4102_v44, %v4130_v35 }
 0xdab   :  { %v4220_v56 = vmul.f32 %v8113_v38, %v4152_v8 }
 0xdac   :  { %v4173_v43 = vsel %vm1705_vm6, %v4163_v58, 0.0 }
 0xdaf   :  { %v3922_v63 = vpop.permute.xlu0 %3921  ;;  %v4138_v30 = vpop.permute.xlu2 %4137 }
 0xdb0   :  { %v4006_v24 = vpop.permute.xlu1 %4005  ;;  %v4082_v22 = vsel %vm1686_vm15, %v4074_v11, %v3922_v63 }
 0xdb1   :  { %v4090_v33 = vsel %vm8654_vm11, %v4082_v22, %v3964_v5  ;;  %vm4315_vm11 = vcmask 1041409  }
 0xdb2   :  { %v4098_v29 = vsel %vm1695_vm3, %v4090_v33, %v4006_v24 }
 0xdb7   :  { %v4048_v17 = vpop.permute.xlu0 %4047  ;;  %v3958_v62 = vpop.permute.xlu2 %3957 }
 0xdb8   :  { %v3874_v14 = vpop.permute.xlu1 %3873  ;;  %v4106_v1 = vsel %vm1700_vm0, %v4098_v29, %v4048_v17 }
 0xdb9   :  { %v4156_v2 = vsel %vm1705_vm6, %v4106_v1, %v4138_v30  ;;  %v4167_v19 = vmul.f32 %v8107_v32, %v4106_v1 }
 0xdba   :  { %v4224_v48 = vmul.f32 %v8113_v38, %v4156_v2 }
 0xdbb   :  { %v4185_v24 = vsel %vm1705_vm6, %v4167_v19, 0.0 }
 0xdbe   :  { %4235 = vadd.xlane.f32.xlu2 %v4223_v3 }
 0xdbf   :  { %v3832_v60 = vpop.permute.xlu0 %3831  ;;  %4227 = vadd.xlane.f32.xlu0 %v4219_v61  ;;  %v4132_v12 = vpop.permute.xlu2 %4131 }
 0xdc0   :  { %v4000_v39 = vpop.permute.xlu1 %3999  ;;  %4171 = vadd.xlane.f32.xlu1 %v4170_v36  ;;  %v4063_v42 = vsel %vm1114_vm2, %v7894_v49, %v3832_v60 }
 0xdc1   :  { %v4071_v25 = vsel %vm1259_vm9, %v4063_v42, %v3874_v14 }
 0xdc6   :  { %4174 = vadd.xlane.f32.xlu2 %v4173_v43 }
 0xdc7   :  { %v3916_v4 = vpop.permute.xlu0 %3915  ;;  %v3882_v15 = vpop.permute.xlu2 %3881 }
 0xdc8   :  { %v3840_v55 = vpop.permute.xlu1 %3839  ;;  %4183 = vadd.xlane.f32.xlu1 %v4182_v18  ;;  %v4079_v53 = vsel %vm1686_vm15, %v4071_v25, %v3916_v4 }
 0xdc9   :  { %v4087_v49 = vsel %vm8655_vm1, %v4079_v53, %v3958_v62  ;;  %v4067_v35 = vsel %vm1114_vm2, %v7934_v52, %v3840_v55  ;;  %vm4306_vm1 = vcmask 261312  }
 0xdca   :  { %v4095_v41 = vsel %vm1695_vm3, %v4087_v49, %v4000_v39  ;;  %v4075_v54 = vsel %vm1259_vm9, %v4067_v35, %v3882_v15 }
 0xdce   :  { %4237 = vadd.xlane.f32.xlu2 %v4224_v48 }
 0xdcf   :  { %v4042_v51 = vpop.permute.xlu0 %4041  ;;  %v4008_v23 = vpop.permute.xlu2 %4007 }
 0xdd0   :  { %v3924_v59 = vpop.permute.xlu1 %3923  ;;  %v4103_v5 = vsel %vm1700_vm0, %v4095_v41, %v4042_v51  ;;  %4229 = vadd.xlane.f32.xlu1 %v4220_v56 }
 0xdd1   :  { %v4153_v63 = vsel %vm1705_vm6, %v4103_v5, %v4132_v12  ;;  %v4083_v30 = vsel %vm1686_vm15, %v4075_v54, %v3924_v59  ;;  %v4164_v28 = vmul.f32 %v8107_v32, %v4103_v5  ;;  %v4842_v54 = vmov 1.0  }
 0xdd2   :  { %v4221_v40 = vmul.f32 %v8113_v38, %v4153_v63 }
 0xdd3   :  { %v4176_v6 = vsel %vm1705_vm6, %v4164_v28, 0.0 }
 0xdd6   :  { %4186 = vadd.xlane.f32.xlu2 %v4185_v24 }
 0xdd7   :  { %v3966_v50 = vpop.permute.xlu0 %3965  ;;  %v3960_v9 = vpop.permute.xlu2 %3959 }
 0xdd8   :  { %v4050_v34 = vpop.permute.xlu1 %4049  ;;  %4231 = vadd.xlane.f32.xlu1 %v4221_v40  ;;  %v4091_v26 = vsel %vm8656_vm13, %v4083_v30, %v3966_v50  ;;  %vm4384_vm13 = vcmask 517120  }
 0xdd9   :  { %v4099_v46 = vsel %vm1695_vm3, %v4091_v26, %v4008_v23  ;;  %v4272_v26 = vadd.s32 1, %v5035_v21  ;;  %v4271_v23 = vadd.s32 1, %v5006_v10 }
 0xdda   :  { %v4107_v52 = vsel %vm1700_vm0, %v4099_v46, %v4050_v34  ;;  %v4273_v34 = vadd.s32 1, %v5066_v31 }
 0xddb   :  { %v4168_v41 = vmul.f32 %v8107_v32, %v4107_v52  ;;  %vm4275_vm10 = vcmp.eq.s32.totalorder %v5014_v13, %v4271_v23 }
 0xddd   :  { %v4188_v51 = vsel %vm1705_vm6, %v4168_v41, 0.0 }
 0xddf   :  { %v4140_v17 = vpop.permute.xlu0 %4139  ;;  %v3884_v39 = vpop.permute.xlu2 %3883 }
 0xde0   :  { %v4157_v14 = vsel %vm1705_vm6, %v4107_v52, %v4140_v17  ;;  %4177 = vadd.xlane.f32.xlu1 %v4176_v6  ;;  %v3834_v47 = vpop.permute.xlu1 %3833 }
 0xde1   :  { %v4225_v57 = vmul.f32 %v8113_v38, %v4157_v14  ;;  %v4064_v7 = vsel %vm1114_vm2, %v7963_v16, %v3834_v47 }
 0xde3   :  { %4239 = vadd.xlane.f32.xlu2 %v4225_v57 }
 0xde7   :  { %v3918_v0 = vpop.permute.xlu0 %3917  ;;  %v4010_v43 = vpop.permute.xlu2 %4009 }
 0xde8   :  { %v3876_v20 = vpop.permute.xlu1 %3875 }
 0xde9   :  { %v4072_v3 = vsel %vm1259_vm9, %v4064_v7, %v3876_v20 }
 0xdea   :  { %v4080_v62 = vsel %vm1686_vm15, %v4072_v3, %v3918_v0 }
 0xdeb   :  { %v4088_v44 = vsel %vm8657_vm5, %v4080_v62, %v3960_v9 }
 0xdef   :  { %v4044_v61 = vpop.permute.xlu0 %4043  ;;  %v4142_v53 = vpop.permute.xlu2 %4141 }
 0xdf0   :  { %v4002_v11 = vpop.permute.xlu1 %4001 }
 0xdf1   :  { %v4096_v22 = vsel %vm1695_vm3, %v4088_v44, %v4002_v11 }
 0xdf2   :  { %v4104_v60 = vsel %vm1700_vm0, %v4096_v22, %v4044_v61  ;;  %v4296_v22 = vadd.s32 4294967288, %v5014_v13 }
 0xdf3   :  { %v4165_v36 = vmul.f32 %v8107_v32, %v4104_v60 }
 0xdf5   :  { %v4179_v58 = vsel %vm1705_vm6, %v4165_v36, 0.0 }
 0xdf6   :  { %4180 = vadd.xlane.f32.xlu0 %v4179_v58 }
 0xdf7   :  { %v3842_v16 = vpop.permute.xlu0 %3841 }
 0xdf8   :  { %v4134_v33 = vpop.permute.xlu1 %4133  ;;  %v4068_v42 = vsel %vm1114_vm2, %v7989_v27, %v3842_v16 }
 0xdf9   :  { %v4154_v45 = vsel %vm1705_vm6, %v4104_v60, %v4134_v33  ;;  %v4076_v12 = vsel %vm1259_vm9, %v4068_v42, %v3884_v39  ;;  %v4300_v60 = vadd.s32 4294967280, %v5014_v13  ;;  %v4304_v42 = vadd.s32 4294967272, %v5014_v13 }
 0xdfa   :  { %v4222_v29 = vmul.f32 %v8113_v38, %v4154_v45 }
 0xdfc   :  { %4233 = vadd.xlane.f32.xlu1 %v4222_v29 }
 0xdff   :  { %v3968_v4 = vpop.permute.xlu0 %3967 }
 0xe00   :  { %v3926_v1 = vpop.permute.xlu1 %3925 }
 0xe01   :  { %v4084_v18 = vsel %vm1686_vm15, %v4076_v12, %v3926_v1  ;;  %vm4262_vm15 = vcmp.eq.s32.totalorder %v5014_v13, %v5090_v37 }
 0xe02   :  { %v4092_v55 = vsel %vm8658_vm7, %v4084_v18, %v3968_v4  ;;  %4543 = vmatpush.msk.msrb.mxu1 %vm4262_vm15, %v4842_v54 }
 0xe03   :  { %v4100_v25 = vsel %vm1695_vm3, %v4092_v55, %v4010_v43  ;;  %vm4261_vm3 = vcmp.eq.s32.totalorder %v5014_v13, %v5066_v31 }
 0xe04   :  { %4544 = vmatpush.msk.msrb.mxu1 %vm4261_vm3, %v4842_v54 }
 0xe06   :  { %4545 = vmatpush.msk.msrb.mxu1 %vm4260_vm8, %v4842_v54 }
 0xe07   :  { %v8186_v40 = vpop.permute.xlu0 %4197 }
 0xe08   :  { %v4052_v2 = vpop.permute.xlu1 %4051  ;;  %4546 = vmatpush.msk.msrb.mxu1 %vm4259_vm4, %v4842_v54 }
 0xe09   :  { %v4108_v8 = vsel %vm1700_vm0, %v4100_v25, %v4052_v2  ;;  %vm4277_vm0 = vcmp.eq.s32.totalorder %v5014_v13, %v4273_v34 }
 0xe0a   :  { %v4158_v49 = vsel %vm1705_vm6, %v4108_v8, %v4142_v53  ;;  %v4169_v48 = vmul.f32 %v8107_v32, %v4108_v8 }
 0xe0b   :  { %v4226_v27 = vmul.f32 %v8113_v38, %v4158_v49  ;;  %v4274_v38 = vadd.s32 1, %v5090_v37 }
 0xe0c   :  { %v4191_v56 = vsel %vm1705_vm6, %v4169_v48, 0.0  ;;  %vm4276_vm6 = vcmp.eq.s32.totalorder %v5014_v13, %v4272_v26 }
 0xe0d   :  { %4192 = vadd.xlane.f32.xlu1 %v4191_v56  ;;  %4241 = vadd.xlane.f32.xlu2 %v4226_v27  ;;  %vm4278_vm2 = vcmp.eq.s32.totalorder %v5014_v13, %v4274_v38 }
 0xe0e   :  { %4538 = vmatpush.msk.msrb.mxu2 %vm4278_vm2, %v4842_v54 }
 0xe10   :  { %4539 = vmatpush.msk.msrb.mxu2 %vm4277_vm0, %v4842_v54 }
 0xe12   :  { %4540 = vmatpush.msk.msrb.mxu2 %vm4276_vm6, %v4842_v54 }
 0xe14   :  { %4541 = vmatpush.msk.msrb.mxu2 %vm4275_vm10, %v4842_v54 }
 0xe15   :  { %4189 = vadd.xlane.f32.xlu2 %v4188_v51 }
 0xe31   :  { %v4236_v5 = vpop.xlane.xlu2 %4235 }
 0xe32   :  { %v4228_v30 = vpop.xlane.xlu0 %4227  ;;  %v4247_v28 = vadd.f32 %v4236_v5, %v8186_v40 }
 0xe33   :  { %v4172_v59 = vpop.xlane.xlu1 %4171  ;;  %v4243_v46 = vadd.f32 %v4228_v30, %v8186_v40 }
 0xe34   :  { %4758 = vtanh.f32 %v4247_v28  ;;  %v4200_v47 = vadd.f32 %v8186_v40, %v4172_v59 }
 0xe35   :  { %4760 = vtanh.f32 %v4243_v46 }
 0xe39   :  { %v4175_v15 = vpop.xlane.xlu2 %4174 }
 0xe3a   :  { %v4759_v57 = vpop.eup %4758  ;;  %v4201_v20 = vadd.f32 %v8186_v40, %v4175_v15 }
 0xe3b   :  { %v4184_v19 = vpop.xlane.xlu1 %4183  ;;  %v4761_v0 = vpop.eup %4760  ;;  %v4308_v1 = vperm.slane %v4759_v57, %v5014_v13 }
 0xe3c   :  { %v4204_v3 = vadd.f32 %v8186_v40, %v4184_v19  ;;  %v4295_v55 = vperm.slane %v4761_v0, %v5014_v13 }
 0xe41   :  { %v4238_v35 = vpop.xlane.xlu2 %4237 }
 0xe42   :  { %v4248_v52 = vadd.f32 %v4238_v35, %v8186_v40 }
 0xe43   :  { %v4230_v63 = vpop.xlane.xlu1 %4229 }
 0xe44   :  { %v4244_v6 = vadd.f32 %v4230_v63, %v8186_v40  ;;  %4762 = vtanh.f32 %v4248_v52 }
 0xe46   :  { %4764 = vtanh.f32 %v4244_v6 }
 0xe49   :  { %v4187_v50 = vpop.xlane.xlu2 %4186 }
 0xe4a   :  { %v4763_v7 = vpop.eup %4762  ;;  %v4205_v44 = vadd.f32 %v8186_v40, %v4187_v50 }
 0xe4b   :  { %v4232_v24 = vpop.xlane.xlu1 %4231  ;;  %v4309_v45 = vperm.slane %v4763_v7, %v4296_v22 }
 0xe4c   :  { %v4245_v31 = vadd.f32 %v4232_v24, %v8186_v40  ;;  %v4765_v61 = vpop.eup %4764 }
 0xe4d   :  { %v4297_v29 = vperm.slane %v4765_v61, %v4296_v22  ;;  %v4310_v8 = vsel %vm4298_vm12, %v4309_v45, %v4308_v1 }
 0xe4e   :  { %4766 = vtanh.f32 %v4245_v31 }
 0xe4f   :  { %v4299_v27 = vsel %vm4298_vm12, %v4297_v29, %v4295_v55 }
 0xe53   :  { %v4178_v32 = vpop.xlane.xlu1 %4177 }
 0xe54   :  { %v4767_v11 = vpop.eup %4766  ;;  %v4202_v36 = vadd.f32 %v8186_v40, %v4178_v32 }
 0xe55   :  { %v4301_v12 = vperm.slane %v4767_v11, %v4300_v60 }
 0xe56   :  { %v4240_v17 = vpop.xlane.xlu2 %4239 }
 0xe57   :  { %v4249_v14 = vadd.f32 %v4240_v17, %v8186_v40  ;;  %v4303_v51 = vsel %vm4302_vm14, %v4301_v12, %v4299_v27 }
 0xe59   :  { %4768 = vtanh.f32 %v4249_v14 }
 0xe5f   :  { %v4769_v58 = vpop.eup %4768 }
 0xe60   :  { %v4311_v4 = vperm.slane %v4769_v58, %v4300_v60 }
 0xe62   :  { %v4312_v59 = vsel %vm4302_vm14, %v4311_v4, %v4310_v8 }
 0xe69   :  { %v4181_v9 = vpop.xlane.xlu0 %4180 }
 0xe6a   :  { %v4203_v16 = vadd.f32 %v8186_v40, %v4181_v9 }
 0xe6f   :  { %v4234_v37 = vpop.xlane.xlu1 %4233 }
 0xe70   :  { %v4246_v21 = vadd.f32 %v4234_v37, %v8186_v40 }
 0xe72   :  { %4770 = vtanh.f32 %v4246_v21 }
 0xe73   :  { %4772 = vtanh.f32 %v4200_v47 }
 0xe78   :  { %v4771_v33 = vpop.eup %4770 }
 0xe79   :  { %v4773_v18 = vpop.eup %4772  ;;  %v4305_v25 = vperm.slane %v4771_v33, %v4304_v42 }
 0xe7a   :  { %v4347_v30 = vperm.slane %v4773_v18, %v5014_v13 }
 0xe7b   :  { %v4307_v19 = vsel %vm4306_vm1, %v4305_v25, %v4303_v51 }
 0xe80   :  { %v4242_v10 = vpop.xlane.xlu2 %4241  ;;  %v4193_v39 = vpop.xlane.xlu1 %4192 }
 0xe81   :  { %v4250_v62 = vadd.f32 %v4242_v10, %v8186_v40  ;;  %v4207_v43 = vadd.f32 %v8186_v40, %v4193_v39 }
 0xe83   :  { %4774 = vtanh.f32 %v4250_v62 }
 0xe84   :  { %4776 = vtanh.f32 %v4201_v20 }
 0xe85   :  { %4778 = vtanh.f32 %v4204_v3 }
 0xe86   :  { %4780 = vtanh.f32 %v4205_v44 }
 0xe87   :  { %4782 = vtanh.f32 %v4202_v36 }
 0xe88   :  { %4784 = vtanh.f32 %v4203_v16  ;;  %v4190_v2 = vpop.xlane.xlu2 %4189 }
 0xe89   :  { %v4775_v53 = vpop.eup %4774  ;;  %v4206_v49 = vadd.f32 %v8186_v40, %v4190_v2  ;;  %4786 = vtanh.f32 %v4207_v43 }
 0xe8a   :  { %v4777_v48 = vpop.eup %4776  ;;  %v4313_v56 = vperm.slane %v4775_v53, %v4304_v42 }
 0xe8b   :  { %v4779_v41 = vpop.eup %4778  ;;  %4788 = vtanh.f32 %v4206_v49  ;;  %v4348_v40 = vperm.slane %v4777_v48, %v4296_v22 }
 0xe8c   :  { %v4781_v5 = vpop.eup %4780  ;;  %v4314_v15 = vsel %vm4306_vm1, %v4313_v56, %v4312_v59  ;;  %v4354_v34 = vperm.slane %v4779_v41, %v5014_v13 }
 0xe8d   :  { %v4783_v63 = vpop.eup %4782  ;;  %v4316_v35 = vsel %vm4315_vm11, %v4314_v15, %v4307_v19  ;;  %v4355_v38 = vperm.slane %v4781_v5, %v4296_v22  ;;  %v4349_v28 = vsel %vm4298_vm12, %v4348_v40, %v4347_v30 }
 0xe8e   :  { %v4785_v24 = vpop.eup %4784  ;;  %4542 = vmatmul.msk.f32.vlgmr.msrb.gmra.mxu2 %vm1259_vm9, %v4316_v35  ;;  %v4350_v50 = vperm.slane %v4783_v63, %v4300_v60 }
 0xe8f   :  { %v4787_v54 = vpop.eup %4786  ;;  %v4352_v26 = vperm.slane %v4785_v24, %v4304_v42  ;;  %v4356_v46 = vsel %vm4298_vm12, %v4355_v38, %v4354_v34 }
 0xe90   :  { %v4359_v52 = vperm.slane %v4787_v54, %v4304_v42  ;;  %v4351_v17 = vsel %vm4302_vm14, %v4350_v50, %v4349_v28 }
 0xe91   :  { %v4789_v32 = vpop.eup %4788  ;;  %v4353_v37 = vsel %vm4306_vm1, %v4352_v26, %v4351_v17 }
 0xe92   :  { %v4357_v23 = vperm.slane %v4789_v32, %v4300_v60 }
 0xe94   :  { %v4358_v6 = vsel %vm4302_vm14, %v4357_v23, %v4356_v46 }
 0xe95   :  { %v4360_v31 = vsel %vm4306_vm1, %v4359_v52, %v4358_v6 }
 0xe96   :  { %v4361_v14 = vsel %vm4315_vm11, %v4360_v31, %v4353_v37 }
 0xe97   :  { %4547 = vmatmul.msk.f32.vlgmr.msrb.gmra.mxu1 %vm1259_vm9, %v4361_v14 }
 0xf11   :  { %v4336_v13 = vpop.f32.mrf.mxu2 }
 0xf14   :  { %v4381_v21 = vpop.f32.mrf.mxu1 }
 0xf15   :  { %v4382_v47 = vadd.f32 %v4381_v21, %v4336_v13 }
 0xf17   :  { %4385 = vst.msk [vmem:[#allocation3] sm:$0x3] %vm4384_vm13, %v4382_v47 }
 0xf18   :  { %4396 = dma.vmem_to_hbm [thread:$0]  %s4392_s24, 32, %s4394_s10, [#allocation4]  }
 0xf19   :  { %4814 = dma.done.wait [#allocation4], 32  }
 0xf1a   :  { %4815 = vsyncadd [#allocation4], 4294967264 }
 0xf1b   :  { %4401 = vsyncpa [#allocation4], 1 }

</bundles_post_ra>
